<compile_context>
chip_gen: v7x
topology: tpu7x:2x2x1
jax: 0.10.0
libtpu: 0.0.40
codegen_flags: <defaults>
</compile_context>

<pallas_src>
import numpy as np
import jax
import jax.numpy as jnp
from jax.experimental import pallas as pl
from jax.experimental.pallas import tpu as pltpu

# PyTorch LSTM gate order i, f, g, o; the g gate is pre-scaled by 2 so one
# packed sigmoid recovers tanh via tanh(z) = 2*sigmoid(2z) - 1.
_GATE_SCALE = (1.0, 1.0, 2.0, 1.0)

# Offsets into the single packed scalar vector (SMEM, via scalar prefetch).
_WHH_OFF = 0      # gate-scaled w_hh, 4 floats
_BCONV_OFF = 4    # b_conv, 1 float
_WCONV_OFF = 5    # w_conv, T floats


def t2v_lstm_kernel(scal_ref, x_ref, wcat_ref, amix_ref, out_ref, pre_ref):
    # x_ref:    (1, T, B)  one window, time-major, batch on lanes
    # wcat_ref: (2*Tp, T)  rows [0:T]=W_lin, [Tp:Tp+T]=W_per
    # amix_ref: (4*Tp, 2*Tp+8) structured gate-mix matrix (w_ih + bias + scales)
    # out_ref:  (1, 1, B)
    # pre_ref:  (4*Tp, B)  VMEM scratch, rows 4t..4t+3 = gates of step t
    _, T, B = x_ref.shape
    Tp = wcat_ref.shape[0] // 2

    xT = x_ref[0]                                                   # (T, B)

    # (1) Fused Time2Vector: one MXU pass, already time-major.
    y = jnp.dot(wcat_ref[...], xT, preferred_element_type=jnp.float32)   # (2Tp, B)
    t_lin = y[:Tp]                                                  # (Tp, B)
    t_per = jnp.sin(y[Tp:])                                         # (Tp, B)

    # (2) Second small MXU pass emits the four gate pre-activations already
    #     interleaved time-major (row 4t+j = gate j of step t).  The trailing
    #     ones-block multiplies the bias column of the mix matrix.
    y_aug = jnp.concatenate(
        [t_lin, t_per, jnp.ones((8, B), jnp.float32)], axis=0)      # (2Tp+8, B)
    pre_all = jnp.dot(amix_ref[...], y_aug,
                      preferred_element_type=jnp.float32)           # (4Tp, B)
    pre_ref[...] = pre_all              # stage in VMEM; per-step reads are vlds

    # (3) Recurrent weights broadcast once (hoisted out of the recurrence).
    row_ids = jax.lax.broadcasted_iota(jnp.int32, (4, B), 0)
    r0 = scal_ref[_WHH_OFF + 0]
    r1 = scal_ref[_WHH_OFF + 1]
    r2 = scal_ref[_WHH_OFF + 2]
    r3 = scal_ref[_WHH_OFF + 3]
    rmat = jnp.where(row_ids == 0, r0,
           jnp.where(row_ids == 1, r1,
           jnp.where(row_ids == 2, r2, r3)))                        # (4, B)

    h = jnp.zeros((1, B), jnp.float32)
    c = jnp.zeros((1, B), jnp.float32)
    acc = jnp.zeros((1, B), jnp.float32)    # running conv1 dot product

    # (4) Serial LSTM recurrence (hidden_size=1), statically unrolled.
    #     Per step: one (4,B) ref load (off the h-chain), one VPU mul+add,
    #     ONE packed sigmoid, one tanh, a few (1,B) VPU ops.
    for t in range(T):
        pre_t = pre_ref[4 * t:4 * t + 4, :]                         # (4, B)
        g_all = jax.nn.sigmoid(pre_t + jnp.broadcast_to(h, (4, B)) * rmat)
        i_g = g_all[0:1, :]
        f_g = g_all[1:2, :]
        g_g = g_all[2:3, :] * 2.0 - 1.0                             # == tanh(z_g)
        o_g = g_all[3:4, :]
        c = f_g * c + i_g * g_g
        h = o_g * jnp.tanh(c)
        # conv1 head folded into the loop as a scalar FMA (off the h->h chain).
        acc = acc + h * scal_ref[_WCONV_OFF + t]

    out_ref[...] = (acc + scal_ref[_BCONV_OFF]).reshape(1, 1, B)


def _pack_params(params, T, Tp):
    f32 = jnp.float32
    s = jnp.asarray(_GATE_SCALE, f32)                               # (4,)
    w_ih = params["w_ih"].astype(f32)                               # (4, 2)
    w_hh = params["w_hh"].reshape(-1).astype(f32)                   # (4,)
    bias = (params["b_ih"] + params["b_hh"]).astype(f32)            # (4,)

    # Fused + padded Time2Vector weight (halves kept 8-sublane aligned).
    w_cat = jnp.zeros((2 * Tp, T), f32)
    w_cat = w_cat.at[:T].set(params["w_lin"].astype(f32))
    w_cat = w_cat.at[Tp:Tp + T].set(params["w_per"].astype(f32))

    # Structured gate-mix matrix:
    #   pre[4t+j] = s_j*(w_ih[j,0]*t_lin[t] + w_ih[j,1]*t_per[t] + bias[j])
    eye_tp = jnp.eye(Tp, dtype=f32)
    a_lin = jnp.kron(eye_tp, (s * w_ih[:, 0])[:, None])             # (4Tp, Tp)
    a_per = jnp.kron(eye_tp, (s * w_ih[:, 1])[:, None])             # (4Tp, Tp)
    a_bias = jnp.tile((s * bias)[:, None], (Tp, 1))                 # (4Tp, 1)
    a_pad = jnp.zeros((4 * Tp, 7), f32)
    a_mix = jnp.concatenate([a_lin, a_per, a_bias, a_pad], axis=1)  # (4Tp, 2Tp+8)

    # Remaining tiny scalars merged into ONE SMEM vector (single DMA):
    # [0:4) gate-scaled w_hh, [4] b_conv, [5:5+T) w_conv.
    scal = jnp.concatenate([
        w_hh * s,
        params["b_conv"].reshape(-1).astype(f32),
        params["w_conv"].reshape(-1).astype(f32),
    ])
    return scal, w_cat, a_mix


def t2v_lstm_forward(x, params):
    """x: (n_windows, B, T) float32 -> (n_windows, B, 1), one PyTorch forward per window."""
    G, B, T = x.shape
    Tp = ((T + 7) // 8) * 8
    scal, w_cat, a_mix = _pack_params(params, T, Tp)
    xT = jnp.swapaxes(x, 1, 2).astype(jnp.float32)                  # (G, T, B) time-major

    out = pl.pallas_call(
        t2v_lstm_kernel,
        out_shape=jax.ShapeDtypeStruct((G, 1, B), jnp.float32),
        grid_spec=pltpu.PrefetchScalarGridSpec(
            num_scalar_prefetch=1,
            grid=(G,),
            in_specs=[
                pl.BlockSpec((1, T, B), lambda g, s: (g, 0, 0)),          # per-window input
                pl.BlockSpec((2 * Tp, T), lambda g, s: (0, 0)),            # fused T2V weight (resident)
                pl.BlockSpec((4 * Tp, 2 * Tp + 8), lambda g, s: (0, 0)),   # gate-mix matrix (resident)
            ],
            out_specs=pl.BlockSpec((1, 1, B), lambda g, s: (g, 0, 0)),
            scratch_shapes=[pltpu.VMEM((4 * Tp, B), jnp.float32)],
        ),
        compiler_params=pltpu.CompilerParams(
            dimension_semantics=("parallel",)),   # shard windows across TCs on v7x
    )(scal, xT, w_cat, a_mix)
    return jnp.swapaxes(out, 1, 2)                                   # (G, B, 1)


def ref_forward(x, params):
    """Pure-JAX reference mirroring the PyTorch forward for x of shape (B, T)."""
    hp = jax.lax.Precision.HIGHEST
    t_lin = jnp.dot(x, params["w_lin"].T, precision=hp)
    t_per = jnp.sin(jnp.dot(x, params["w_per"].T, precision=hp))
    seq = jnp.stack([t_lin, t_per], axis=-1)                         # (B, T, 2)
    w_ih, w_hh = params["w_ih"], params["w_hh"]
    b = params["b_ih"] + params["b_hh"]
    B = x.shape[0]

    def step(carry, xt):                                             # xt: (B, 2)
        h, c = carry
        gates = xt @ w_ih.T + h @ w_hh.T + b                         # (B, 4) order i,f,g,o
        i = jax.nn.sigmoid(gates[:, 0:1])
        f = jax.nn.sigmoid(gates[:, 1:2])
        g = jnp.tanh(gates[:, 2:3])
        o = jax.nn.sigmoid(gates[:, 3:4])
        c = f * c + i * g
        h = o * jnp.tanh(c)
        return (h, c), h

    init = (jnp.zeros((B, 1), jnp.float32), jnp.zeros((B, 1), jnp.float32))
    _, hs = jax.lax.scan(step, init, jnp.swapaxes(seq, 0, 1))
    h_seq = jnp.swapaxes(hs[..., 0], 0, 1)                           # (B, T)
    return jnp.dot(h_seq, params["w_conv"].T, precision=hp) + params["b_conv"]


def init_params(key, block_size):
    ks = jax.random.split(key, 8)
    u = lambda k, shape, fan: jax.random.uniform(
        k, shape, jnp.float32, -1.0 / np.sqrt(fan), 1.0 / np.sqrt(fan))
    return {
        # Time2Vector (proj / dropout are unused by the reference forward)
        "w_lin":  u(ks[0], (block_size, block_size), block_size),
        "w_per":  u(ks[1], (block_size, block_size), block_size),
        # LSTM (input_size=2, hidden_size=1, num_layers=1), gate order i,f,g,o
        "w_ih":   u(ks[2], (4, 2), 1),
        "w_hh":   u(ks[3], (4, 1), 1),
        "b_ih":   u(ks[4], (4,), 1),
        "b_hh":   u(ks[5], (4,), 1),
        # conv1 = nn.Linear(block_size, 1)
        "w_conv": u(ks[6], (1, block_size), block_size),
        "b_conv": u(ks[7], (1,), block_size),
    }


if __name__ == "__main__":
    # block_size=60 per the module; 4 independent windows batched per call,
    # batch=8 on lanes (kernel supports up to 128 lanes "for free").
    G, B, T = 4, 8, 60
    key = jax.random.PRNGKey(0)
    kx, kp = jax.random.split(key)
    x = jax.random.normal(kx, (G, B, T), jnp.float32)
    params = init_params(kp, T)

    out = jax.block_until_ready(jax.jit(t2v_lstm_forward)(x, params))
    assert out.shape == (G, B, 1)

    expected = jax.jit(ref_forward)(x.reshape(G * B, T), params).reshape(G, B, 1)
    np.testing.assert_allclose(np.asarray(out), np.asarray(expected),
                               rtol=2e-5, atol=2e-5)
    print("KERNEL_OK")
</pallas_src>

<mosaic_0001>
module attributes {stable_mosaic.version = 11 : i64} {
  func.func @t2v_lstm_kernel(%arg0: i32, %arg1: memref<65xf32, #tpu.memory_space<smem>>, %arg2: memref<1x60x8xf32, #tpu.memory_space<vmem>>, %arg3: memref<128x60xf32, #tpu.memory_space<vmem>>, %arg4: memref<256x136xf32, #tpu.memory_space<vmem>>, %arg5: memref<1x1x8xf32, #tpu.memory_space<vmem>>, %arg6: memref<256x8xf32, #tpu.memory_space<vmem>>) attributes {dimension_semantics = [#tpu.dimension_semantics<parallel>], iteration_bounds = array<i64: 4>, scalar_prefetch = 1 : i64, scratch_operands = 1 : i64, tpu.core_type = #tpu.core_type<tc>, window_params = [{transform_indices = @transform_0, window_bounds = array<i64: 1, 60, 8>}, {pipeline_mode = #tpu.pipeline_mode<synchronous>, transform_indices = @transform_1, window_bounds = array<i64: 128, 60>}, {pipeline_mode = #tpu.pipeline_mode<synchronous>, transform_indices = @transform_2, window_bounds = array<i64: 256, 136>}, {transform_indices = @transform_3, window_bounds = array<i64: 1, 1, 8>}]} {
    %c0 = arith.constant 0 : index
    %c0_0 = arith.constant 0 : index
    %c0_1 = arith.constant 0 : index
    %0 = vector.load %arg2[%c0, %c0_0, %c0_1] : memref<1x60x8xf32, #tpu.memory_space<vmem>>, vector<1x60x8xf32>
    %1 = vector.shape_cast %0 : vector<1x60x8xf32> to vector<60x8xf32>
    %c0_2 = arith.constant 0 : index
    %c0_3 = arith.constant 0 : index
    %2 = vector.load %arg3[%c0_2, %c0_3] : memref<128x60xf32, #tpu.memory_space<vmem>>, vector<128x60xf32>
    %cst = arith.constant dense<0.000000e+00> : vector<128x8xf32>
    %3 = tpu.matmul %2, %1, %cst {dimension_numbers = #tpu.dot_dimension_numbers<[1], [0], [0], [1], [0, 0, 1, 1], [], []>} : vector<128x60xf32>, vector<60x8xf32>, vector<128x8xf32> -> vector<128x8xf32>
    %4 = vector.extract_strided_slice %3 {offsets = [0, 0], sizes = [64, 8], strides = [1, 1]} : vector<128x8xf32> to vector<64x8xf32>
    %5 = vector.extract_strided_slice %3 {offsets = [64, 0], sizes = [64, 8], strides = [1, 1]} : vector<128x8xf32> to vector<64x8xf32>
    %6 = math.sin %5 : vector<64x8xf32>
    %cst_4 = arith.constant 1.000000e+00 : f32
    %7 = vector.broadcast %cst_4 : f32 to vector<8x8xf32>
    %8 = tpu.concatenate %4, %6, %7 in 0 : vector<64x8xf32>, vector<64x8xf32>, vector<8x8xf32> -> vector<136x8xf32>
    %c0_5 = arith.constant 0 : index
    %c0_6 = arith.constant 0 : index
    %9 = vector.load %arg4[%c0_5, %c0_6] : memref<256x136xf32, #tpu.memory_space<vmem>>, vector<256x136xf32>
    %cst_7 = arith.constant dense<0.000000e+00> : vector<256x8xf32>
    %10 = tpu.matmul %9, %8, %cst_7 {dimension_numbers = #tpu.dot_dimension_numbers<[1], [0], [0], [1], [0, 0, 1, 1], [], []>} : vector<256x136xf32>, vector<136x8xf32>, vector<256x8xf32> -> vector<256x8xf32>
    %c0_8 = arith.constant 0 : index
    %c0_9 = arith.constant 0 : index
    %11 = vector.load %arg6[%c0_8, %c0_9] : memref<256x8xf32, #tpu.memory_space<vmem>>, vector<256x8xf32>
    tpu.vector_store %arg6[%c0_8, %c0_9], %10 {strides = array<i32>} : memref<256x8xf32, #tpu.memory_space<vmem>>, vector<256x8xf32>,
    %12 = tpu.iota {dimensions = array<i32: 0>} : vector<4x8xi32>
    %c0_10 = arith.constant 0 : index
    %13 = memref.load %arg1[%c0_10] : memref<65xf32, #tpu.memory_space<smem>>
    %c1 = arith.constant 1 : index
    %14 = memref.load %arg1[%c1] : memref<65xf32, #tpu.memory_space<smem>>
    %c2 = arith.constant 2 : index
    %15 = memref.load %arg1[%c2] : memref<65xf32, #tpu.memory_space<smem>>
    %c3 = arith.constant 3 : index
    %16 = memref.load %arg1[%c3] : memref<65xf32, #tpu.memory_space<smem>>
    %c0_i32 = arith.constant 0 : i32
    %17 = vector.broadcast %c0_i32 : i32 to vector<4x8xi32>
    %18 = arith.cmpi eq, %12, %17 : vector<4x8xi32>
    %c1_i32 = arith.constant 1 : i32
    %19 = vector.broadcast %c1_i32 : i32 to vector<4x8xi32>
    %20 = arith.cmpi eq, %12, %19 : vector<4x8xi32>
    %c2_i32 = arith.constant 2 : i32
    %21 = vector.broadcast %c2_i32 : i32 to vector<4x8xi32>
    %22 = arith.cmpi eq, %12, %21 : vector<4x8xi32>
    %23 = vector.broadcast %15 : f32 to vector<4x8xf32>
    %24 = vector.broadcast %16 : f32 to vector<4x8xf32>
    %25 = arith.select %22, %23, %24 : vector<4x8xi1>, vector<4x8xf32>
    %26 = vector.broadcast %14 : f32 to vector<4x8xf32>
    %27 = arith.select %20, %26, %25 : vector<4x8xi1>, vector<4x8xf32>
    %28 = vector.broadcast %13 : f32 to vector<4x8xf32>
    %29 = arith.select %18, %28, %27 : vector<4x8xi1>, vector<4x8xf32>
    %cst_11 = arith.constant 0.000000e+00 : f32
    %30 = vector.broadcast %cst_11 : f32 to vector<1x8xf32>
    %cst_12 = arith.constant 0.000000e+00 : f32
    %31 = vector.broadcast %cst_12 : f32 to vector<1x8xf32>
    %cst_13 = arith.constant 0.000000e+00 : f32
    %32 = vector.broadcast %cst_13 : f32 to vector<1x8xf32>
    %c0_14 = arith.constant 0 : index
    %c0_15 = arith.constant 0 : index
    %33 = vector.load %arg6[%c0_14, %c0_15] : memref<256x8xf32, #tpu.memory_space<vmem>>, vector<4x8xf32>
    %34 = vector.shape_cast %30 : vector<1x8xf32> to vector<1x8xf32>
    %35 = vector.broadcast %34 : vector<1x8xf32> to vector<4x8xf32>
    %36 = arith.mulf %35, %29 : vector<4x8xf32>
    %37 = arith.addf %33, %36 : vector<4x8xf32>
    %38 = arith.negf %37 : vector<4x8xf32>
    %39 = math.exp %38 : vector<4x8xf32>
    %cst_16 = arith.constant 1.000000e+00 : f32
    %40 = vector.broadcast %cst_16 : f32 to vector<4x8xf32>
    %41 = arith.addf %40, %39 : vector<4x8xf32>
    %42 = arith.divf %40, %41 : vector<4x8xf32>
    %43 = vector.extract_strided_slice %42 {offsets = [0, 0], sizes = [1, 8], strides = [1, 1]} : vector<4x8xf32> to vector<1x8xf32>
    %44 = vector.extract_strided_slice %42 {offsets = [1, 0], sizes = [1, 8], strides = [1, 1]} : vector<4x8xf32> to vector<1x8xf32>
    %45 = vector.extract_strided_slice %42 {offsets = [2, 0], sizes = [1, 8], strides = [1, 1]} : vector<4x8xf32> to vector<1x8xf32>
    %cst_17 = arith.constant 2.000000e+00 : f32
    %46 = vector.broadcast %cst_17 : f32 to vector<1x8xf32>
    %47 = arith.mulf %45, %46 : vector<1x8xf32>
    %cst_18 = arith.constant 1.000000e+00 : f32
    %48 = vector.broadcast %cst_18 : f32 to vector<1x8xf32>
    %49 = arith.subf %47, %48 : vector<1x8xf32>
    %50 = vector.extract_strided_slice %42 {offsets = [3, 0], sizes = [1, 8], strides = [1, 1]} : vector<4x8xf32> to vector<1x8xf32>
    %51 = arith.mulf %44, %31 : vector<1x8xf32>
    %52 = arith.mulf %43, %49 : vector<1x8xf32>
    %53 = arith.addf %51, %52 : vector<1x8xf32>
    %54 = math.tanh %53 : vector<1x8xf32>
    %55 = arith.mulf %50, %54 : vector<1x8xf32>
    %c5 = arith.constant 5 : index
    %56 = memref.load %arg1[%c5] : memref<65xf32, #tpu.memory_space<smem>>
    %57 = vector.broadcast %56 : f32 to vector<1x8xf32>
    %58 = arith.mulf %55, %57 : vector<1x8xf32>
    %59 = arith.addf %32, %58 : vector<1x8xf32>
    %c4 = arith.constant 4 : index
    %c0_19 = arith.constant 0 : index
    %60 = vector.load %arg6[%c4, %c0_19] : memref<256x8xf32, #tpu.memory_space<vmem>>, vector<4x8xf32>
    %61 = vector.shape_cast %55 : vector<1x8xf32> to vector<1x8xf32>
    %62 = vector.broadcast %61 : vector<1x8xf32> to vector<4x8xf32>
    %63 = arith.mulf %62, %29 : vector<4x8xf32>
    %64 = arith.addf %60, %63 : vector<4x8xf32>
    %65 = arith.negf %64 : vector<4x8xf32>
    %66 = math.exp %65 : vector<4x8xf32>
    %cst_20 = arith.constant 1.000000e+00 : f32
    %67 = vector.broadcast %cst_20 : f32 to vector<4x8xf32>
    %68 = arith.addf %67, %66 : vector<4x8xf32>
    %69 = arith.divf %67, %68 : vector<4x8xf32>
    %70 = vector.extract_strided_slice %69 {offsets = [0, 0], sizes = [1, 8], strides = [1, 1]} : vector<4x8xf32> to vector<1x8xf32>
    %71 = vector.extract_strided_slice %69 {offsets = [1, 0], sizes = [1, 8], strides = [1, 1]} : vector<4x8xf32> to vector<1x8xf32>
    %72 = vector.extract_strided_slice %69 {offsets = [2, 0], sizes = [1, 8], strides = [1, 1]} : vector<4x8xf32> to vector<1x8xf32>
    %cst_21 = arith.constant 2.000000e+00 : f32
    %73 = vector.broadcast %cst_21 : f32 to vector<1x8xf32>
    %74 = arith.mulf %72, %73 : vector<1x8xf32>
    %cst_22 = arith.constant 1.000000e+00 : f32
    %75 = vector.broadcast %cst_22 : f32 to vector<1x8xf32>
    %76 = arith.subf %74, %75 : vector<1x8xf32>
    %77 = vector.extract_strided_slice %69 {offsets = [3, 0], sizes = [1, 8], strides = [1, 1]} : vector<4x8xf32> to vector<1x8xf32>
    %78 = arith.mulf %71, %53 : vector<1x8xf32>
    %79 = arith.mulf %70, %76 : vector<1x8xf32>
    %80 = arith.addf %78, %79 : vector<1x8xf32>
    %81 = math.tanh %80 : vector<1x8xf32>
    %82 = arith.mulf %77, %81 : vector<1x8xf32>
    %c6 = arith.constant 6 : index
    %83 = memref.load %arg1[%c6] : memref<65xf32, #tpu.memory_space<smem>>
    %84 = vector.broadcast %83 : f32 to vector<1x8xf32>
    %85 = arith.mulf %82, %84 : vector<1x8xf32>
    %86 = arith.addf %59, %85 : vector<1x8xf32>
    %c8 = arith.constant 8 : index
    %c0_23 = arith.constant 0 : index
    %87 = vector.load %arg6[%c8, %c0_23] : memref<256x8xf32, #tpu.memory_space<vmem>>, vector<4x8xf32>
    %88 = vector.shape_cast %82 : vector<1x8xf32> to vector<1x8xf32>
    %89 = vector.broadcast %88 : vector<1x8xf32> to vector<4x8xf32>
    %90 = arith.mulf %89, %29 : vector<4x8xf32>
    %91 = arith.addf %87, %90 : vector<4x8xf32>
    %92 = arith.negf %91 : vector<4x8xf32>
    %93 = math.exp %92 : vector<4x8xf32>
    %cst_24 = arith.constant 1.000000e+00 : f32
    %94 = vector.broadcast %cst_24 : f32 to vector<4x8xf32>
    %95 = arith.addf %94, %93 : vector<4x8xf32>
    %96 = arith.divf %94, %95 : vector<4x8xf32>
    %97 = vector.extract_strided_slice %96 {offsets = [0, 0], sizes = [1, 8], strides = [1, 1]} : vector<4x8xf32> to vector<1x8xf32>
    %98 = vector.extract_strided_slice %96 {offsets = [1, 0], sizes = [1, 8], strides = [1, 1]} : vector<4x8xf32> to vector<1x8xf32>
    %99 = vector.extract_strided_slice %96 {offsets = [2, 0], sizes = [1, 8], strides = [1, 1]} : vector<4x8xf32> to vector<1x8xf32>
    %cst_25 = arith.constant 2.000000e+00 : f32
    %100 = vector.broadcast %cst_25 : f32 to vector<1x8xf32>
    %101 = arith.mulf %99, %100 : vector<1x8xf32>
    %cst_26 = arith.constant 1.000000e+00 : f32
    %102 = vector.broadcast %cst_26 : f32 to vector<1x8xf32>
    %103 = arith.subf %101, %102 : vector<1x8xf32>
    %104 = vector.extract_strided_slice %96 {offsets = [3, 0], sizes = [1, 8], strides = [1, 1]} : vector<4x8xf32> to vector<1x8xf32>
    %105 = arith.mulf %98, %80 : vector<1x8xf32>
    %106 = arith.mulf %97, %103 : vector<1x8xf32>
    %107 = arith.addf %105, %106 : vector<1x8xf32>
    %108 = math.tanh %107 : vector<1x8xf32>
    %109 = arith.mulf %104, %108 : vector<1x8xf32>
    %c7 = arith.constant 7 : index
    %110 = memref.load %arg1[%c7] : memref<65xf32, #tpu.memory_space<smem>>
    %111 = vector.broadcast %110 : f32 to vector<1x8xf32>
    %112 = arith.mulf %109, %111 : vector<1x8xf32>
    %113 = arith.addf %86, %112 : vector<1x8xf32>
    %c12 = arith.constant 12 : index
    %c0_27 = arith.constant 0 : index
    %114 = vector.load %arg6[%c12, %c0_27] : memref<256x8xf32, #tpu.memory_space<vmem>>, vector<4x8xf32>
    %115 = vector.shape_cast %109 : vector<1x8xf32> to vector<1x8xf32>
    %116 = vector.broadcast %115 : vector<1x8xf32> to vector<4x8xf32>
    %117 = arith.mulf %116, %29 : vector<4x8xf32>
    %118 = arith.addf %114, %117 : vector<4x8xf32>
    %119 = arith.negf %118 : vector<4x8xf32>
    %120 = math.exp %119 : vector<4x8xf32>
    %cst_28 = arith.constant 1.000000e+00 : f32
    %121 = vector.broadcast %cst_28 : f32 to vector<4x8xf32>
    %122 = arith.addf %121, %120 : vector<4x8xf32>
    %123 = arith.divf %121, %122 : vector<4x8xf32>
    %124 = vector.extract_strided_slice %123 {offsets = [0, 0], sizes = [1, 8], strides = [1, 1]} : vector<4x8xf32> to vector<1x8xf32>
    %125 = vector.extract_strided_slice %123 {offsets = [1, 0], sizes = [1, 8], strides = [1, 1]} : vector<4x8xf32> to vector<1x8xf32>
    %126 = vector.extract_strided_slice %123 {offsets = [2, 0], sizes = [1, 8], strides = [1, 1]} : vector<4x8xf32> to vector<1x8xf32>
    %cst_29 = arith.constant 2.000000e+00 : f32
    %127 = vector.broadcast %cst_29 : f32 to vector<1x8xf32>
    %128 = arith.mulf %126, %127 : vector<1x8xf32>
    %cst_30 = arith.constant 1.000000e+00 : f32
    %129 = vector.broadcast %cst_30 : f32 to vector<1x8xf32>
    %130 = arith.subf %128, %129 : vector<1x8xf32>
    %131 = vector.extract_strided_slice %123 {offsets = [3, 0], sizes = [1, 8], strides = [1, 1]} : vector<4x8xf32> to vector<1x8xf32>
    %132 = arith.mulf %125, %107 : vector<1x8xf32>
    %133 = arith.mulf %124, %130 : vector<1x8xf32>
    %134 = arith.addf %132, %133 : vector<1x8xf32>
    %135 = math.tanh %134 : vector<1x8xf32>
    %136 = arith.mulf %131, %135 : vector<1x8xf32>
    %c8_31 = arith.constant 8 : index
    %137 = memref.load %arg1[%c8_31] : memref<65xf32, #tpu.memory_space<smem>>
    %138 = vector.broadcast %137 : f32 to vector<1x8xf32>
    %139 = arith.mulf %136, %138 : vector<1x8xf32>
    %140 = arith.addf %113, %139 : vector<1x8xf32>
    %c16 = arith.constant 16 : index
    %c0_32 = arith.constant 0 : index
    %141 = vector.load %arg6[%c16, %c0_32] : memref<256x8xf32, #tpu.memory_space<vmem>>, vector<4x8xf32>
    %142 = vector.shape_cast %136 : vector<1x8xf32> to vector<1x8xf32>
    %143 = vector.broadcast %142 : vector<1x8xf32> to vector<4x8xf32>
    %144 = arith.mulf %143, %29 : vector<4x8xf32>
    %145 = arith.addf %141, %144 : vector<4x8xf32>
    %146 = arith.negf %145 : vector<4x8xf32>
    %147 = math.exp %146 : vector<4x8xf32>
    %cst_33 = arith.constant 1.000000e+00 : f32
    %148 = vector.broadcast %cst_33 : f32 to vector<4x8xf32>
    %149 = arith.addf %148, %147 : vector<4x8xf32>
    %150 = arith.divf %148, %149 : vector<4x8xf32>
    %151 = vector.extract_strided_slice %150 {offsets = [0, 0], sizes = [1, 8], strides = [1, 1]} : vector<4x8xf32> to vector<1x8xf32>
    %152 = vector.extract_strided_slice %150 {offsets = [1, 0], sizes = [1, 8], strides = [1, 1]} : vector<4x8xf32> to vector<1x8xf32>
    %153 = vector.extract_strided_slice %150 {offsets = [2, 0], sizes = [1, 8], strides = [1, 1]} : vector<4x8xf32> to vector<1x8xf32>
    %cst_34 = arith.constant 2.000000e+00 : f32
    %154 = vector.broadcast %cst_34 : f32 to vector<1x8xf32>
    %155 = arith.mulf %153, %154 : vector<1x8xf32>
    %cst_35 = arith.constant 1.000000e+00 : f32
    %156 = vector.broadcast %cst_35 : f32 to vector<1x8xf32>
    %157 = arith.subf %155, %156 : vector<1x8xf32>
    %158 = vector.extract_strided_slice %150 {offsets = [3, 0], sizes = [1, 8], strides = [1, 1]} : vector<4x8xf32> to vector<1x8xf32>
    %159 = arith.mulf %152, %134 : vector<1x8xf32>
    %160 = arith.mulf %151, %157 : vector<1x8xf32>
    %161 = arith.addf %159, %160 : vector<1x8xf32>
    %162 = math.tanh %161 : vector<1x8xf32>
    %163 = arith.mulf %158, %162 : vector<1x8xf32>
    %c9 = arith.constant 9 : index
    %164 = memref.load %arg1[%c9] : memref<65xf32, #tpu.memory_space<smem>>
    %165 = vector.broadcast %164 : f32 to vector<1x8xf32>
    %166 = arith.mulf %163, %165 : vector<1x8xf32>
    %167 = arith.addf %140, %166 : vector<1x8xf32>
    %c20 = arith.constant 20 : index
    %c0_36 = arith.constant 0 : index
    %168 = vector.load %arg6[%c20, %c0_36] : memref<256x8xf32, #tpu.memory_space<vmem>>, vector<4x8xf32>
    %169 = vector.shape_cast %163 : vector<1x8xf32> to vector<1x8xf32>
    %170 = vector.broadcast %169 : vector<1x8xf32> to vector<4x8xf32>
    %171 = arith.mulf %170, %29 : vector<4x8xf32>
    %172 = arith.addf %168, %171 : vector<4x8xf32>
    %173 = arith.negf %172 : vector<4x8xf32>
    %174 = math.exp %173 : vector<4x8xf32>
    %cst_37 = arith.constant 1.000000e+00 : f32
    %175 = vector.broadcast %cst_37 : f32 to vector<4x8xf32>
    %176 = arith.addf %175, %174 : vector<4x8xf32>
    %177 = arith.divf %175, %176 : vector<4x8xf32>
    %178 = vector.extract_strided_slice %177 {offsets = [0, 0], sizes = [1, 8], strides = [1, 1]} : vector<4x8xf32> to vector<1x8xf32>
    %179 = vector.extract_strided_slice %177 {offsets = [1, 0], sizes = [1, 8], strides = [1, 1]} : vector<4x8xf32> to vector<1x8xf32>
    %180 = vector.extract_strided_slice %177 {offsets = [2, 0], sizes = [1, 8], strides = [1, 1]} : vector<4x8xf32> to vector<1x8xf32>
    %cst_38 = arith.constant 2.000000e+00 : f32
    %181 = vector.broadcast %cst_38 : f32 to vector<1x8xf32>
    %182 = arith.mulf %180, %181 : vector<1x8xf32>
    %cst_39 = arith.constant 1.000000e+00 : f32
    %183 = vector.broadcast %cst_39 : f32 to vector<1x8xf32>
    %184 = arith.subf %182, %183 : vector<1x8xf32>
    %185 = vector.extract_strided_slice %177 {offsets = [3, 0], sizes = [1, 8], strides = [1, 1]} : vector<4x8xf32> to vector<1x8xf32>
    %186 = arith.mulf %179, %161 : vector<1x8xf32>
    %187 = arith.mulf %178, %184 : vector<1x8xf32>
    %188 = arith.addf %186, %187 : vector<1x8xf32>
    %189 = math.tanh %188 : vector<1x8xf32>
    %190 = arith.mulf %185, %189 : vector<1x8xf32>
    %c10 = arith.constant 10 : index
    %191 = memref.load %arg1[%c10] : memref<65xf32, #tpu.memory_space<smem>>
    %192 = vector.broadcast %191 : f32 to vector<1x8xf32>
    %193 = arith.mulf %190, %192 : vector<1x8xf32>
    %194 = arith.addf %167, %193 : vector<1x8xf32>
    %c24 = arith.constant 24 : index
    %c0_40 = arith.constant 0 : index
    %195 = vector.load %arg6[%c24, %c0_40] : memref<256x8xf32, #tpu.memory_space<vmem>>, vector<4x8xf32>
    %196 = vector.shape_cast %190 : vector<1x8xf32> to vector<1x8xf32>
    %197 = vector.broadcast %196 : vector<1x8xf32> to vector<4x8xf32>
    %198 = arith.mulf %197, %29 : vector<4x8xf32>
    %199 = arith.addf %195, %198 : vector<4x8xf32>
    %200 = arith.negf %199 : vector<4x8xf32>
    %201 = math.exp %200 : vector<4x8xf32>
    %cst_41 = arith.constant 1.000000e+00 : f32
    %202 = vector.broadcast %cst_41 : f32 to vector<4x8xf32>
    %203 = arith.addf %202, %201 : vector<4x8xf32>
    %204 = arith.divf %202, %203 : vector<4x8xf32>
    %205 = vector.extract_strided_slice %204 {offsets = [0, 0], sizes = [1, 8], strides = [1, 1]} : vector<4x8xf32> to vector<1x8xf32>
    %206 = vector.extract_strided_slice %204 {offsets = [1, 0], sizes = [1, 8], strides = [1, 1]} : vector<4x8xf32> to vector<1x8xf32>
    %207 = vector.extract_strided_slice %204 {offsets = [2, 0], sizes = [1, 8], strides = [1, 1]} : vector<4x8xf32> to vector<1x8xf32>
    %cst_42 = arith.constant 2.000000e+00 : f32
    %208 = vector.broadcast %cst_42 : f32 to vector<1x8xf32>
    %209 = arith.mulf %207, %208 : vector<1x8xf32>
    %cst_43 = arith.constant 1.000000e+00 : f32
    %210 = vector.broadcast %cst_43 : f32 to vector<1x8xf32>
    %211 = arith.subf %209, %210 : vector<1x8xf32>
    %212 = vector.extract_strided_slice %204 {offsets = [3, 0], sizes = [1, 8], strides = [1, 1]} : vector<4x8xf32> to vector<1x8xf32>
    %213 = arith.mulf %206, %188 : vector<1x8xf32>
    %214 = arith.mulf %205, %211 : vector<1x8xf32>
    %215 = arith.addf %213, %214 : vector<1x8xf32>
    %216 = math.tanh %215 : vector<1x8xf32>
    %217 = arith.mulf %212, %216 : vector<1x8xf32>
    %c11 = arith.constant 11 : index
    %218 = memref.load %arg1[%c11] : memref<65xf32, #tpu.memory_space<smem>>
    %219 = vector.broadcast %218 : f32 to vector<1x8xf32>
    %220 = arith.mulf %217, %219 : vector<1x8xf32>
    %221 = arith.addf %194, %220 : vector<1x8xf32>
    %c28 = arith.constant 28 : index
    %c0_44 = arith.constant 0 : index
    %222 = vector.load %arg6[%c28, %c0_44] : memref<256x8xf32, #tpu.memory_space<vmem>>, vector<4x8xf32>
    %223 = vector.shape_cast %217 : vector<1x8xf32> to vector<1x8xf32>
    %224 = vector.broadcast %223 : vector<1x8xf32> to vector<4x8xf32>
    %225 = arith.mulf %224, %29 : vector<4x8xf32>
    %226 = arith.addf %222, %225 : vector<4x8xf32>
    %227 = arith.negf %226 : vector<4x8xf32>
    %228 = math.exp %227 : vector<4x8xf32>
    %cst_45 = arith.constant 1.000000e+00 : f32
    %229 = vector.broadcast %cst_45 : f32 to vector<4x8xf32>
    %230 = arith.addf %229, %228 : vector<4x8xf32>
    %231 = arith.divf %229, %230 : vector<4x8xf32>
    %232 = vector.extract_strided_slice %231 {offsets = [0, 0], sizes = [1, 8], strides = [1, 1]} : vector<4x8xf32> to vector<1x8xf32>
    %233 = vector.extract_strided_slice %231 {offsets = [1, 0], sizes = [1, 8], strides = [1, 1]} : vector<4x8xf32> to vector<1x8xf32>
    %234 = vector.extract_strided_slice %231 {offsets = [2, 0], sizes = [1, 8], strides = [1, 1]} : vector<4x8xf32> to vector<1x8xf32>
    %cst_46 = arith.constant 2.000000e+00 : f32
    %235 = vector.broadcast %cst_46 : f32 to vector<1x8xf32>
    %236 = arith.mulf %234, %235 : vector<1x8xf32>
    %cst_47 = arith.constant 1.000000e+00 : f32
    %237 = vector.broadcast %cst_47 : f32 to vector<1x8xf32>
    %238 = arith.subf %236, %237 : vector<1x8xf32>
    %239 = vector.extract_strided_slice %231 {offsets = [3, 0], sizes = [1, 8], strides = [1, 1]} : vector<4x8xf32> to vector<1x8xf32>
    %240 = arith.mulf %233, %215 : vector<1x8xf32>
    %241 = arith.mulf %232, %238 : vector<1x8xf32>
    %242 = arith.addf %240, %241 : vector<1x8xf32>
    %243 = math.tanh %242 : vector<1x8xf32>
    %244 = arith.mulf %239, %243 : vector<1x8xf32>
    %c12_48 = arith.constant 12 : index
    %245 = memref.load %arg1[%c12_48] : memref<65xf32, #tpu.memory_space<smem>>
    %246 = vector.broadcast %245 : f32 to vector<1x8xf32>
    %247 = arith.mulf %244, %246 : vector<1x8xf32>
    %248 = arith.addf %221, %247 : vector<1x8xf32>
    %c32 = arith.constant 32 : index
    %c0_49 = arith.constant 0 : index
    %249 = vector.load %arg6[%c32, %c0_49] : memref<256x8xf32, #tpu.memory_space<vmem>>, vector<4x8xf32>
    %250 = vector.shape_cast %244 : vector<1x8xf32> to vector<1x8xf32>
    %251 = vector.broadcast %250 : vector<1x8xf32> to vector<4x8xf32>
    %252 = arith.mulf %251, %29 : vector<4x8xf32>
    %253 = arith.addf %249, %252 : vector<4x8xf32>
    %254 = arith.negf %253 : vector<4x8xf32>
    %255 = math.exp %254 : vector<4x8xf32>
    %cst_50 = arith.constant 1.000000e+00 : f32
    %256 = vector.broadcast %cst_50 : f32 to vector<4x8xf32>
    %257 = arith.addf %256, %255 : vector<4x8xf32>
    %258 = arith.divf %256, %257 : vector<4x8xf32>
    %259 = vector.extract_strided_slice %258 {offsets = [0, 0], sizes = [1, 8], strides = [1, 1]} : vector<4x8xf32> to vector<1x8xf32>
    %260 = vector.extract_strided_slice %258 {offsets = [1, 0], sizes = [1, 8], strides = [1, 1]} : vector<4x8xf32> to vector<1x8xf32>
    %261 = vector.extract_strided_slice %258 {offsets = [2, 0], sizes = [1, 8], strides = [1, 1]} : vector<4x8xf32> to vector<1x8xf32>
    %cst_51 = arith.constant 2.000000e+00 : f32
    %262 = vector.broadcast %cst_51 : f32 to vector<1x8xf32>
    %263 = arith.mulf %261, %262 : vector<1x8xf32>
    %cst_52 = arith.constant 1.000000e+00 : f32
    %264 = vector.broadcast %cst_52 : f32 to vector<1x8xf32>
    %265 = arith.subf %263, %264 : vector<1x8xf32>
    %266 = vector.extract_strided_slice %258 {offsets = [3, 0], sizes = [1, 8], strides = [1, 1]} : vector<4x8xf32> to vector<1x8xf32>
    %267 = arith.mulf %260, %242 : vector<1x8xf32>
    %268 = arith.mulf %259, %265 : vector<1x8xf32>
    %269 = arith.addf %267, %268 : vector<1x8xf32>
    %270 = math.tanh %269 : vector<1x8xf32>
    %271 = arith.mulf %266, %270 : vector<1x8xf32>
    %c13 = arith.constant 13 : index
    %272 = memref.load %arg1[%c13] : memref<65xf32, #tpu.memory_space<smem>>
    %273 = vector.broadcast %272 : f32 to vector<1x8xf32>
    %274 = arith.mulf %271, %273 : vector<1x8xf32>
    %275 = arith.addf %248, %274 : vector<1x8xf32>
    %c36 = arith.constant 36 : index
    %c0_53 = arith.constant 0 : index
    %276 = vector.load %arg6[%c36, %c0_53] : memref<256x8xf32, #tpu.memory_space<vmem>>, vector<4x8xf32>
    %277 = vector.shape_cast %271 : vector<1x8xf32> to vector<1x8xf32>
    %278 = vector.broadcast %277 : vector<1x8xf32> to vector<4x8xf32>
    %279 = arith.mulf %278, %29 : vector<4x8xf32>
    %280 = arith.addf %276, %279 : vector<4x8xf32>
    %281 = arith.negf %280 : vector<4x8xf32>
    %282 = math.exp %281 : vector<4x8xf32>
    %cst_54 = arith.constant 1.000000e+00 : f32
    %283 = vector.broadcast %cst_54 : f32 to vector<4x8xf32>
    %284 = arith.addf %283, %282 : vector<4x8xf32>
    %285 = arith.divf %283, %284 : vector<4x8xf32>
    %286 = vector.extract_strided_slice %285 {offsets = [0, 0], sizes = [1, 8], strides = [1, 1]} : vector<4x8xf32> to vector<1x8xf32>
    %287 = vector.extract_strided_slice %285 {offsets = [1, 0], sizes = [1, 8], strides = [1, 1]} : vector<4x8xf32> to vector<1x8xf32>
    %288 = vector.extract_strided_slice %285 {offsets = [2, 0], sizes = [1, 8], strides = [1, 1]} : vector<4x8xf32> to vector<1x8xf32>
    %cst_55 = arith.constant 2.000000e+00 : f32
    %289 = vector.broadcast %cst_55 : f32 to vector<1x8xf32>
    %290 = arith.mulf %288, %289 : vector<1x8xf32>
    %cst_56 = arith.constant 1.000000e+00 : f32
    %291 = vector.broadcast %cst_56 : f32 to vector<1x8xf32>
    %292 = arith.subf %290, %291 : vector<1x8xf32>
    %293 = vector.extract_strided_slice %285 {offsets = [3, 0], sizes = [1, 8], strides = [1, 1]} : vector<4x8xf32> to vector<1x8xf32>
    %294 = arith.mulf %287, %269 : vector<1x8xf32>
    %295 = arith.mulf %286, %292 : vector<1x8xf32>
    %296 = arith.addf %294, %295 : vector<1x8xf32>
    %297 = math.tanh %296 : vector<1x8xf32>
    %298 = arith.mulf %293, %297 : vector<1x8xf32>
    %c14 = arith.constant 14 : index
    %299 = memref.load %arg1[%c14] : memref<65xf32, #tpu.memory_space<smem>>
    %300 = vector.broadcast %299 : f32 to vector<1x8xf32>
    %301 = arith.mulf %298, %300 : vector<1x8xf32>
    %302 = arith.addf %275, %301 : vector<1x8xf32>
    %c40 = arith.constant 40 : index
    %c0_57 = arith.constant 0 : index
    %303 = vector.load %arg6[%c40, %c0_57] : memref<256x8xf32, #tpu.memory_space<vmem>>, vector<4x8xf32>
    %304 = vector.shape_cast %298 : vector<1x8xf32> to vector<1x8xf32>
    %305 = vector.broadcast %304 : vector<1x8xf32> to vector<4x8xf32>
    %306 = arith.mulf %305, %29 : vector<4x8xf32>
    %307 = arith.addf %303, %306 : vector<4x8xf32>
    %308 = arith.negf %307 : vector<4x8xf32>
    %309 = math.exp %308 : vector<4x8xf32>
    %cst_58 = arith.constant 1.000000e+00 : f32
    %310 = vector.broadcast %cst_58 : f32 to vector<4x8xf32>
    %311 = arith.addf %310, %309 : vector<4x8xf32>
    %312 = arith.divf %310, %311 : vector<4x8xf32>
    %313 = vector.extract_strided_slice %312 {offsets = [0, 0], sizes = [1, 8], strides = [1, 1]} : vector<4x8xf32> to vector<1x8xf32>
    %314 = vector.extract_strided_slice %312 {offsets = [1, 0], sizes = [1, 8], strides = [1, 1]} : vector<4x8xf32> to vector<1x8xf32>
    %315 = vector.extract_strided_slice %312 {offsets = [2, 0], sizes = [1, 8], strides = [1, 1]} : vector<4x8xf32> to vector<1x8xf32>
    %cst_59 = arith.constant 2.000000e+00 : f32
    %316 = vector.broadcast %cst_59 : f32 to vector<1x8xf32>
    %317 = arith.mulf %315, %316 : vector<1x8xf32>
    %cst_60 = arith.constant 1.000000e+00 : f32
    %318 = vector.broadcast %cst_60 : f32 to vector<1x8xf32>
    %319 = arith.subf %317, %318 : vector<1x8xf32>
    %320 = vector.extract_strided_slice %312 {offsets = [3, 0], sizes = [1, 8], strides = [1, 1]} : vector<4x8xf32> to vector<1x8xf32>
    %321 = arith.mulf %314, %296 : vector<1x8xf32>
    %322 = arith.mulf %313, %319 : vector<1x8xf32>
    %323 = arith.addf %321, %322 : vector<1x8xf32>
    %324 = math.tanh %323 : vector<1x8xf32>
    %325 = arith.mulf %320, %324 : vector<1x8xf32>
    %c15 = arith.constant 15 : index
    %326 = memref.load %arg1[%c15] : memref<65xf32, #tpu.memory_space<smem>>
    %327 = vector.broadcast %326 : f32 to vector<1x8xf32>
    %328 = arith.mulf %325, %327 : vector<1x8xf32>
    %329 = arith.addf %302, %328 : vector<1x8xf32>
    %c44 = arith.constant 44 : index
    %c0_61 = arith.constant 0 : index
    %330 = vector.load %arg6[%c44, %c0_61] : memref<256x8xf32, #tpu.memory_space<vmem>>, vector<4x8xf32>
    %331 = vector.shape_cast %325 : vector<1x8xf32> to vector<1x8xf32>
    %332 = vector.broadcast %331 : vector<1x8xf32> to vector<4x8xf32>
    %333 = arith.mulf %332, %29 : vector<4x8xf32>
    %334 = arith.addf %330, %333 : vector<4x8xf32>
    %335 = arith.negf %334 : vector<4x8xf32>
    %336 = math.exp %335 : vector<4x8xf32>
    %cst_62 = arith.constant 1.000000e+00 : f32
    %337 = vector.broadcast %cst_62 : f32 to vector<4x8xf32>
    %338 = arith.addf %337, %336 : vector<4x8xf32>
    %339 = arith.divf %337, %338 : vector<4x8xf32>
    %340 = vector.extract_strided_slice %339 {offsets = [0, 0], sizes = [1, 8], strides = [1, 1]} : vector<4x8xf32> to vector<1x8xf32>
    %341 = vector.extract_strided_slice %339 {offsets = [1, 0], sizes = [1, 8], strides = [1, 1]} : vector<4x8xf32> to vector<1x8xf32>
    %342 = vector.extract_strided_slice %339 {offsets = [2, 0], sizes = [1, 8], strides = [1, 1]} : vector<4x8xf32> to vector<1x8xf32>
    %cst_63 = arith.constant 2.000000e+00 : f32
    %343 = vector.broadcast %cst_63 : f32 to vector<1x8xf32>
    %344 = arith.mulf %342, %343 : vector<1x8xf32>
    %cst_64 = arith.constant 1.000000e+00 : f32
    %345 = vector.broadcast %cst_64 : f32 to vector<1x8xf32>
    %346 = arith.subf %344, %345 : vector<1x8xf32>
    %347 = vector.extract_strided_slice %339 {offsets = [3, 0], sizes = [1, 8], strides = [1, 1]} : vector<4x8xf32> to vector<1x8xf32>
    %348 = arith.mulf %341, %323 : vector<1x8xf32>
    %349 = arith.mulf %340, %346 : vector<1x8xf32>
    %350 = arith.addf %348, %349 : vector<1x8xf32>
    %351 = math.tanh %350 : vector<1x8xf32>
    %352 = arith.mulf %347, %351 : vector<1x8xf32>
    %c16_65 = arith.constant 16 : index
    %353 = memref.load %arg1[%c16_65] : memref<65xf32, #tpu.memory_space<smem>>
    %354 = vector.broadcast %353 : f32 to vector<1x8xf32>
    %355 = arith.mulf %352, %354 : vector<1x8xf32>
    %356 = arith.addf %329, %355 : vector<1x8xf32>
    %c48 = arith.constant 48 : index
    %c0_66 = arith.constant 0 : index
    %357 = vector.load %arg6[%c48, %c0_66] : memref<256x8xf32, #tpu.memory_space<vmem>>, vector<4x8xf32>
    %358 = vector.shape_cast %352 : vector<1x8xf32> to vector<1x8xf32>
    %359 = vector.broadcast %358 : vector<1x8xf32> to vector<4x8xf32>
    %360 = arith.mulf %359, %29 : vector<4x8xf32>
    %361 = arith.addf %357, %360 : vector<4x8xf32>
    %362 = arith.negf %361 : vector<4x8xf32>
    %363 = math.exp %362 : vector<4x8xf32>
    %cst_67 = arith.constant 1.000000e+00 : f32
    %364 = vector.broadcast %cst_67 : f32 to vector<4x8xf32>
    %365 = arith.addf %364, %363 : vector<4x8xf32>
    %366 = arith.divf %364, %365 : vector<4x8xf32>
    %367 = vector.extract_strided_slice %366 {offsets = [0, 0], sizes = [1, 8], strides = [1, 1]} : vector<4x8xf32> to vector<1x8xf32>
    %368 = vector.extract_strided_slice %366 {offsets = [1, 0], sizes = [1, 8], strides = [1, 1]} : vector<4x8xf32> to vector<1x8xf32>
    %369 = vector.extract_strided_slice %366 {offsets = [2, 0], sizes = [1, 8], strides = [1, 1]} : vector<4x8xf32> to vector<1x8xf32>
    %cst_68 = arith.constant 2.000000e+00 : f32
    %370 = vector.broadcast %cst_68 : f32 to vector<1x8xf32>
    %371 = arith.mulf %369, %370 : vector<1x8xf32>
    %cst_69 = arith.constant 1.000000e+00 : f32
    %372 = vector.broadcast %cst_69 : f32 to vector<1x8xf32>
    %373 = arith.subf %371, %372 : vector<1x8xf32>
    %374 = vector.extract_strided_slice %366 {offsets = [3, 0], sizes = [1, 8], strides = [1, 1]} : vector<4x8xf32> to vector<1x8xf32>
    %375 = arith.mulf %368, %350 : vector<1x8xf32>
    %376 = arith.mulf %367, %373 : vector<1x8xf32>
    %377 = arith.addf %375, %376 : vector<1x8xf32>
    %378 = math.tanh %377 : vector<1x8xf32>
    %379 = arith.mulf %374, %378 : vector<1x8xf32>
    %c17 = arith.constant 17 : index
    %380 = memref.load %arg1[%c17] : memref<65xf32, #tpu.memory_space<smem>>
    %381 = vector.broadcast %380 : f32 to vector<1x8xf32>
    %382 = arith.mulf %379, %381 : vector<1x8xf32>
    %383 = arith.addf %356, %382 : vector<1x8xf32>
    %c52 = arith.constant 52 : index
    %c0_70 = arith.constant 0 : index
    %384 = vector.load %arg6[%c52, %c0_70] : memref<256x8xf32, #tpu.memory_space<vmem>>, vector<4x8xf32>
    %385 = vector.shape_cast %379 : vector<1x8xf32> to vector<1x8xf32>
    %386 = vector.broadcast %385 : vector<1x8xf32> to vector<4x8xf32>
    %387 = arith.mulf %386, %29 : vector<4x8xf32>
    %388 = arith.addf %384, %387 : vector<4x8xf32>
    %389 = arith.negf %388 : vector<4x8xf32>
    %390 = math.exp %389 : vector<4x8xf32>
    %cst_71 = arith.constant 1.000000e+00 : f32
    %391 = vector.broadcast %cst_71 : f32 to vector<4x8xf32>
    %392 = arith.addf %391, %390 : vector<4x8xf32>
    %393 = arith.divf %391, %392 : vector<4x8xf32>
    %394 = vector.extract_strided_slice %393 {offsets = [0, 0], sizes = [1, 8], strides = [1, 1]} : vector<4x8xf32> to vector<1x8xf32>
    %395 = vector.extract_strided_slice %393 {offsets = [1, 0], sizes = [1, 8], strides = [1, 1]} : vector<4x8xf32> to vector<1x8xf32>
    %396 = vector.extract_strided_slice %393 {offsets = [2, 0], sizes = [1, 8], strides = [1, 1]} : vector<4x8xf32> to vector<1x8xf32>
    %cst_72 = arith.constant 2.000000e+00 : f32
    %397 = vector.broadcast %cst_72 : f32 to vector<1x8xf32>
    %398 = arith.mulf %396, %397 : vector<1x8xf32>
    %cst_73 = arith.constant 1.000000e+00 : f32
    %399 = vector.broadcast %cst_73 : f32 to vector<1x8xf32>
    %400 = arith.subf %398, %399 : vector<1x8xf32>
    %401 = vector.extract_strided_slice %393 {offsets = [3, 0], sizes = [1, 8], strides = [1, 1]} : vector<4x8xf32> to vector<1x8xf32>
    %402 = arith.mulf %395, %377 : vector<1x8xf32>
    %403 = arith.mulf %394, %400 : vector<1x8xf32>
    %404 = arith.addf %402, %403 : vector<1x8xf32>
    %405 = math.tanh %404 : vector<1x8xf32>
    %406 = arith.mulf %401, %405 : vector<1x8xf32>
    %c18 = arith.constant 18 : index
    %407 = memref.load %arg1[%c18] : memref<65xf32, #tpu.memory_space<smem>>
    %408 = vector.broadcast %407 : f32 to vector<1x8xf32>
    %409 = arith.mulf %406, %408 : vector<1x8xf32>
    %410 = arith.addf %383, %409 : vector<1x8xf32>
    %c56 = arith.constant 56 : index
    %c0_74 = arith.constant 0 : index
    %411 = vector.load %arg6[%c56, %c0_74] : memref<256x8xf32, #tpu.memory_space<vmem>>, vector<4x8xf32>
    %412 = vector.shape_cast %406 : vector<1x8xf32> to vector<1x8xf32>
    %413 = vector.broadcast %412 : vector<1x8xf32> to vector<4x8xf32>
    %414 = arith.mulf %413, %29 : vector<4x8xf32>
    %415 = arith.addf %411, %414 : vector<4x8xf32>
    %416 = arith.negf %415 : vector<4x8xf32>
    %417 = math.exp %416 : vector<4x8xf32>
    %cst_75 = arith.constant 1.000000e+00 : f32
    %418 = vector.broadcast %cst_75 : f32 to vector<4x8xf32>
    %419 = arith.addf %418, %417 : vector<4x8xf32>
    %420 = arith.divf %418, %419 : vector<4x8xf32>
    %421 = vector.extract_strided_slice %420 {offsets = [0, 0], sizes = [1, 8], strides = [1, 1]} : vector<4x8xf32> to vector<1x8xf32>
    %422 = vector.extract_strided_slice %420 {offsets = [1, 0], sizes = [1, 8], strides = [1, 1]} : vector<4x8xf32> to vector<1x8xf32>
    %423 = vector.extract_strided_slice %420 {offsets = [2, 0], sizes = [1, 8], strides = [1, 1]} : vector<4x8xf32> to vector<1x8xf32>
    %cst_76 = arith.constant 2.000000e+00 : f32
    %424 = vector.broadcast %cst_76 : f32 to vector<1x8xf32>
    %425 = arith.mulf %423, %424 : vector<1x8xf32>
    %cst_77 = arith.constant 1.000000e+00 : f32
    %426 = vector.broadcast %cst_77 : f32 to vector<1x8xf32>
    %427 = arith.subf %425, %426 : vector<1x8xf32>
    %428 = vector.extract_strided_slice %420 {offsets = [3, 0], sizes = [1, 8], strides = [1, 1]} : vector<4x8xf32> to vector<1x8xf32>
    %429 = arith.mulf %422, %404 : vector<1x8xf32>
    %430 = arith.mulf %421, %427 : vector<1x8xf32>
    %431 = arith.addf %429, %430 : vector<1x8xf32>
    %432 = math.tanh %431 : vector<1x8xf32>
    %433 = arith.mulf %428, %432 : vector<1x8xf32>
    %c19 = arith.constant 19 : index
    %434 = memref.load %arg1[%c19] : memref<65xf32, #tpu.memory_space<smem>>
    %435 = vector.broadcast %434 : f32 to vector<1x8xf32>
    %436 = arith.mulf %433, %435 : vector<1x8xf32>
    %437 = arith.addf %410, %436 : vector<1x8xf32>
    %c60 = arith.constant 60 : index
    %c0_78 = arith.constant 0 : index
    %438 = vector.load %arg6[%c60, %c0_78] : memref<256x8xf32, #tpu.memory_space<vmem>>, vector<4x8xf32>
    %439 = vector.shape_cast %433 : vector<1x8xf32> to vector<1x8xf32>
    %440 = vector.broadcast %439 : vector<1x8xf32> to vector<4x8xf32>
    %441 = arith.mulf %440, %29 : vector<4x8xf32>
    %442 = arith.addf %438, %441 : vector<4x8xf32>
    %443 = arith.negf %442 : vector<4x8xf32>
    %444 = math.exp %443 : vector<4x8xf32>
    %cst_79 = arith.constant 1.000000e+00 : f32
    %445 = vector.broadcast %cst_79 : f32 to vector<4x8xf32>
    %446 = arith.addf %445, %444 : vector<4x8xf32>
    %447 = arith.divf %445, %446 : vector<4x8xf32>
    %448 = vector.extract_strided_slice %447 {offsets = [0, 0], sizes = [1, 8], strides = [1, 1]} : vector<4x8xf32> to vector<1x8xf32>
    %449 = vector.extract_strided_slice %447 {offsets = [1, 0], sizes = [1, 8], strides = [1, 1]} : vector<4x8xf32> to vector<1x8xf32>
    %450 = vector.extract_strided_slice %447 {offsets = [2, 0], sizes = [1, 8], strides = [1, 1]} : vector<4x8xf32> to vector<1x8xf32>
    %cst_80 = arith.constant 2.000000e+00 : f32
    %451 = vector.broadcast %cst_80 : f32 to vector<1x8xf32>
    %452 = arith.mulf %450, %451 : vector<1x8xf32>
    %cst_81 = arith.constant 1.000000e+00 : f32
    %453 = vector.broadcast %cst_81 : f32 to vector<1x8xf32>
    %454 = arith.subf %452, %453 : vector<1x8xf32>
    %455 = vector.extract_strided_slice %447 {offsets = [3, 0], sizes = [1, 8], strides = [1, 1]} : vector<4x8xf32> to vector<1x8xf32>
    %456 = arith.mulf %449, %431 : vector<1x8xf32>
    %457 = arith.mulf %448, %454 : vector<1x8xf32>
    %458 = arith.addf %456, %457 : vector<1x8xf32>
    %459 = math.tanh %458 : vector<1x8xf32>
    %460 = arith.mulf %455, %459 : vector<1x8xf32>
    %c20_82 = arith.constant 20 : index
    %461 = memref.load %arg1[%c20_82] : memref<65xf32, #tpu.memory_space<smem>>
    %462 = vector.broadcast %461 : f32 to vector<1x8xf32>
    %463 = arith.mulf %460, %462 : vector<1x8xf32>
    %464 = arith.addf %437, %463 : vector<1x8xf32>
    %c64 = arith.constant 64 : index
    %c0_83 = arith.constant 0 : index
    %465 = vector.load %arg6[%c64, %c0_83] : memref<256x8xf32, #tpu.memory_space<vmem>>, vector<4x8xf32>
    %466 = vector.shape_cast %460 : vector<1x8xf32> to vector<1x8xf32>
    %467 = vector.broadcast %466 : vector<1x8xf32> to vector<4x8xf32>
    %468 = arith.mulf %467, %29 : vector<4x8xf32>
    %469 = arith.addf %465, %468 : vector<4x8xf32>
    %470 = arith.negf %469 : vector<4x8xf32>
    %471 = math.exp %470 : vector<4x8xf32>
    %cst_84 = arith.constant 1.000000e+00 : f32
    %472 = vector.broadcast %cst_84 : f32 to vector<4x8xf32>
    %473 = arith.addf %472, %471 : vector<4x8xf32>
    %474 = arith.divf %472, %473 : vector<4x8xf32>
    %475 = vector.extract_strided_slice %474 {offsets = [0, 0], sizes = [1, 8], strides = [1, 1]} : vector<4x8xf32> to vector<1x8xf32>
    %476 = vector.extract_strided_slice %474 {offsets = [1, 0], sizes = [1, 8], strides = [1, 1]} : vector<4x8xf32> to vector<1x8xf32>
    %477 = vector.extract_strided_slice %474 {offsets = [2, 0], sizes = [1, 8], strides = [1, 1]} : vector<4x8xf32> to vector<1x8xf32>
    %cst_85 = arith.constant 2.000000e+00 : f32
    %478 = vector.broadcast %cst_85 : f32 to vector<1x8xf32>
    %479 = arith.mulf %477, %478 : vector<1x8xf32>
    %cst_86 = arith.constant 1.000000e+00 : f32
    %480 = vector.broadcast %cst_86 : f32 to vector<1x8xf32>
    %481 = arith.subf %479, %480 : vector<1x8xf32>
    %482 = vector.extract_strided_slice %474 {offsets = [3, 0], sizes = [1, 8], strides = [1, 1]} : vector<4x8xf32> to vector<1x8xf32>
    %483 = arith.mulf %476, %458 : vector<1x8xf32>
    %484 = arith.mulf %475, %481 : vector<1x8xf32>
    %485 = arith.addf %483, %484 : vector<1x8xf32>
    %486 = math.tanh %485 : vector<1x8xf32>
    %487 = arith.mulf %482, %486 : vector<1x8xf32>
    %c21 = arith.constant 21 : index
    %488 = memref.load %arg1[%c21] : memref<65xf32, #tpu.memory_space<smem>>
    %489 = vector.broadcast %488 : f32 to vector<1x8xf32>
    %490 = arith.mulf %487, %489 : vector<1x8xf32>
    %491 = arith.addf %464, %490 : vector<1x8xf32>
    %c68 = arith.constant 68 : index
    %c0_87 = arith.constant 0 : index
    %492 = vector.load %arg6[%c68, %c0_87] : memref<256x8xf32, #tpu.memory_space<vmem>>, vector<4x8xf32>
    %493 = vector.shape_cast %487 : vector<1x8xf32> to vector<1x8xf32>
    %494 = vector.broadcast %493 : vector<1x8xf32> to vector<4x8xf32>
    %495 = arith.mulf %494, %29 : vector<4x8xf32>
    %496 = arith.addf %492, %495 : vector<4x8xf32>
    %497 = arith.negf %496 : vector<4x8xf32>
    %498 = math.exp %497 : vector<4x8xf32>
    %cst_88 = arith.constant 1.000000e+00 : f32
    %499 = vector.broadcast %cst_88 : f32 to vector<4x8xf32>
    %500 = arith.addf %499, %498 : vector<4x8xf32>
    %501 = arith.divf %499, %500 : vector<4x8xf32>
    %502 = vector.extract_strided_slice %501 {offsets = [0, 0], sizes = [1, 8], strides = [1, 1]} : vector<4x8xf32> to vector<1x8xf32>
    %503 = vector.extract_strided_slice %501 {offsets = [1, 0], sizes = [1, 8], strides = [1, 1]} : vector<4x8xf32> to vector<1x8xf32>
    %504 = vector.extract_strided_slice %501 {offsets = [2, 0], sizes = [1, 8], strides = [1, 1]} : vector<4x8xf32> to vector<1x8xf32>
    %cst_89 = arith.constant 2.000000e+00 : f32
    %505 = vector.broadcast %cst_89 : f32 to vector<1x8xf32>
    %506 = arith.mulf %504, %505 : vector<1x8xf32>
    %cst_90 = arith.constant 1.000000e+00 : f32
    %507 = vector.broadcast %cst_90 : f32 to vector<1x8xf32>
    %508 = arith.subf %506, %507 : vector<1x8xf32>
    %509 = vector.extract_strided_slice %501 {offsets = [3, 0], sizes = [1, 8], strides = [1, 1]} : vector<4x8xf32> to vector<1x8xf32>
    %510 = arith.mulf %503, %485 : vector<1x8xf32>
    %511 = arith.mulf %502, %508 : vector<1x8xf32>
    %512 = arith.addf %510, %511 : vector<1x8xf32>
    %513 = math.tanh %512 : vector<1x8xf32>
    %514 = arith.mulf %509, %513 : vector<1x8xf32>
    %c22 = arith.constant 22 : index
    %515 = memref.load %arg1[%c22] : memref<65xf32, #tpu.memory_space<smem>>
    %516 = vector.broadcast %515 : f32 to vector<1x8xf32>
    %517 = arith.mulf %514, %516 : vector<1x8xf32>
    %518 = arith.addf %491, %517 : vector<1x8xf32>
    %c72 = arith.constant 72 : index
    %c0_91 = arith.constant 0 : index
    %519 = vector.load %arg6[%c72, %c0_91] : memref<256x8xf32, #tpu.memory_space<vmem>>, vector<4x8xf32>
    %520 = vector.shape_cast %514 : vector<1x8xf32> to vector<1x8xf32>
    %521 = vector.broadcast %520 : vector<1x8xf32> to vector<4x8xf32>
    %522 = arith.mulf %521, %29 : vector<4x8xf32>
    %523 = arith.addf %519, %522 : vector<4x8xf32>
    %524 = arith.negf %523 : vector<4x8xf32>
    %525 = math.exp %524 : vector<4x8xf32>
    %cst_92 = arith.constant 1.000000e+00 : f32
    %526 = vector.broadcast %cst_92 : f32 to vector<4x8xf32>
    %527 = arith.addf %526, %525 : vector<4x8xf32>
    %528 = arith.divf %526, %527 : vector<4x8xf32>
    %529 = vector.extract_strided_slice %528 {offsets = [0, 0], sizes = [1, 8], strides = [1, 1]} : vector<4x8xf32> to vector<1x8xf32>
    %530 = vector.extract_strided_slice %528 {offsets = [1, 0], sizes = [1, 8], strides = [1, 1]} : vector<4x8xf32> to vector<1x8xf32>
    %531 = vector.extract_strided_slice %528 {offsets = [2, 0], sizes = [1, 8], strides = [1, 1]} : vector<4x8xf32> to vector<1x8xf32>
    %cst_93 = arith.constant 2.000000e+00 : f32
    %532 = vector.broadcast %cst_93 : f32 to vector<1x8xf32>
    %533 = arith.mulf %531, %532 : vector<1x8xf32>
    %cst_94 = arith.constant 1.000000e+00 : f32
    %534 = vector.broadcast %cst_94 : f32 to vector<1x8xf32>
    %535 = arith.subf %533, %534 : vector<1x8xf32>
    %536 = vector.extract_strided_slice %528 {offsets = [3, 0], sizes = [1, 8], strides = [1, 1]} : vector<4x8xf32> to vector<1x8xf32>
    %537 = arith.mulf %530, %512 : vector<1x8xf32>
    %538 = arith.mulf %529, %535 : vector<1x8xf32>
    %539 = arith.addf %537, %538 : vector<1x8xf32>
    %540 = math.tanh %539 : vector<1x8xf32>
    %541 = arith.mulf %536, %540 : vector<1x8xf32>
    %c23 = arith.constant 23 : index
    %542 = memref.load %arg1[%c23] : memref<65xf32, #tpu.memory_space<smem>>
    %543 = vector.broadcast %542 : f32 to vector<1x8xf32>
    %544 = arith.mulf %541, %543 : vector<1x8xf32>
    %545 = arith.addf %518, %544 : vector<1x8xf32>
    %c76 = arith.constant 76 : index
    %c0_95 = arith.constant 0 : index
    %546 = vector.load %arg6[%c76, %c0_95] : memref<256x8xf32, #tpu.memory_space<vmem>>, vector<4x8xf32>
    %547 = vector.shape_cast %541 : vector<1x8xf32> to vector<1x8xf32>
    %548 = vector.broadcast %547 : vector<1x8xf32> to vector<4x8xf32>
    %549 = arith.mulf %548, %29 : vector<4x8xf32>
    %550 = arith.addf %546, %549 : vector<4x8xf32>
    %551 = arith.negf %550 : vector<4x8xf32>
    %552 = math.exp %551 : vector<4x8xf32>
    %cst_96 = arith.constant 1.000000e+00 : f32
    %553 = vector.broadcast %cst_96 : f32 to vector<4x8xf32>
    %554 = arith.addf %553, %552 : vector<4x8xf32>
    %555 = arith.divf %553, %554 : vector<4x8xf32>
    %556 = vector.extract_strided_slice %555 {offsets = [0, 0], sizes = [1, 8], strides = [1, 1]} : vector<4x8xf32> to vector<1x8xf32>
    %557 = vector.extract_strided_slice %555 {offsets = [1, 0], sizes = [1, 8], strides = [1, 1]} : vector<4x8xf32> to vector<1x8xf32>
    %558 = vector.extract_strided_slice %555 {offsets = [2, 0], sizes = [1, 8], strides = [1, 1]} : vector<4x8xf32> to vector<1x8xf32>
    %cst_97 = arith.constant 2.000000e+00 : f32
    %559 = vector.broadcast %cst_97 : f32 to vector<1x8xf32>
    %560 = arith.mulf %558, %559 : vector<1x8xf32>
    %cst_98 = arith.constant 1.000000e+00 : f32
    %561 = vector.broadcast %cst_98 : f32 to vector<1x8xf32>
    %562 = arith.subf %560, %561 : vector<1x8xf32>
    %563 = vector.extract_strided_slice %555 {offsets = [3, 0], sizes = [1, 8], strides = [1, 1]} : vector<4x8xf32> to vector<1x8xf32>
    %564 = arith.mulf %557, %539 : vector<1x8xf32>
    %565 = arith.mulf %556, %562 : vector<1x8xf32>
    %566 = arith.addf %564, %565 : vector<1x8xf32>
    %567 = math.tanh %566 : vector<1x8xf32>
    %568 = arith.mulf %563, %567 : vector<1x8xf32>
    %c24_99 = arith.constant 24 : index
    %569 = memref.load %arg1[%c24_99] : memref<65xf32, #tpu.memory_space<smem>>
    %570 = vector.broadcast %569 : f32 to vector<1x8xf32>
    %571 = arith.mulf %568, %570 : vector<1x8xf32>
    %572 = arith.addf %545, %571 : vector<1x8xf32>
    %c80 = arith.constant 80 : index
    %c0_100 = arith.constant 0 : index
    %573 = vector.load %arg6[%c80, %c0_100] : memref<256x8xf32, #tpu.memory_space<vmem>>, vector<4x8xf32>
    %574 = vector.shape_cast %568 : vector<1x8xf32> to vector<1x8xf32>
    %575 = vector.broadcast %574 : vector<1x8xf32> to vector<4x8xf32>
    %576 = arith.mulf %575, %29 : vector<4x8xf32>
    %577 = arith.addf %573, %576 : vector<4x8xf32>
    %578 = arith.negf %577 : vector<4x8xf32>
    %579 = math.exp %578 : vector<4x8xf32>
    %cst_101 = arith.constant 1.000000e+00 : f32
    %580 = vector.broadcast %cst_101 : f32 to vector<4x8xf32>
    %581 = arith.addf %580, %579 : vector<4x8xf32>
    %582 = arith.divf %580, %581 : vector<4x8xf32>
    %583 = vector.extract_strided_slice %582 {offsets = [0, 0], sizes = [1, 8], strides = [1, 1]} : vector<4x8xf32> to vector<1x8xf32>
    %584 = vector.extract_strided_slice %582 {offsets = [1, 0], sizes = [1, 8], strides = [1, 1]} : vector<4x8xf32> to vector<1x8xf32>
    %585 = vector.extract_strided_slice %582 {offsets = [2, 0], sizes = [1, 8], strides = [1, 1]} : vector<4x8xf32> to vector<1x8xf32>
    %cst_102 = arith.constant 2.000000e+00 : f32
    %586 = vector.broadcast %cst_102 : f32 to vector<1x8xf32>
    %587 = arith.mulf %585, %586 : vector<1x8xf32>
    %cst_103 = arith.constant 1.000000e+00 : f32
    %588 = vector.broadcast %cst_103 : f32 to vector<1x8xf32>
    %589 = arith.subf %587, %588 : vector<1x8xf32>
    %590 = vector.extract_strided_slice %582 {offsets = [3, 0], sizes = [1, 8], strides = [1, 1]} : vector<4x8xf32> to vector<1x8xf32>
    %591 = arith.mulf %584, %566 : vector<1x8xf32>
    %592 = arith.mulf %583, %589 : vector<1x8xf32>
    %593 = arith.addf %591, %592 : vector<1x8xf32>
    %594 = math.tanh %593 : vector<1x8xf32>
    %595 = arith.mulf %590, %594 : vector<1x8xf32>
    %c25 = arith.constant 25 : index
    %596 = memref.load %arg1[%c25] : memref<65xf32, #tpu.memory_space<smem>>
    %597 = vector.broadcast %596 : f32 to vector<1x8xf32>
    %598 = arith.mulf %595, %597 : vector<1x8xf32>
    %599 = arith.addf %572, %598 : vector<1x8xf32>
    %c84 = arith.constant 84 : index
    %c0_104 = arith.constant 0 : index
    %600 = vector.load %arg6[%c84, %c0_104] : memref<256x8xf32, #tpu.memory_space<vmem>>, vector<4x8xf32>
    %601 = vector.shape_cast %595 : vector<1x8xf32> to vector<1x8xf32>
    %602 = vector.broadcast %601 : vector<1x8xf32> to vector<4x8xf32>
    %603 = arith.mulf %602, %29 : vector<4x8xf32>
    %604 = arith.addf %600, %603 : vector<4x8xf32>
    %605 = arith.negf %604 : vector<4x8xf32>
    %606 = math.exp %605 : vector<4x8xf32>
    %cst_105 = arith.constant 1.000000e+00 : f32
    %607 = vector.broadcast %cst_105 : f32 to vector<4x8xf32>
    %608 = arith.addf %607, %606 : vector<4x8xf32>
    %609 = arith.divf %607, %608 : vector<4x8xf32>
    %610 = vector.extract_strided_slice %609 {offsets = [0, 0], sizes = [1, 8], strides = [1, 1]} : vector<4x8xf32> to vector<1x8xf32>
    %611 = vector.extract_strided_slice %609 {offsets = [1, 0], sizes = [1, 8], strides = [1, 1]} : vector<4x8xf32> to vector<1x8xf32>
    %612 = vector.extract_strided_slice %609 {offsets = [2, 0], sizes = [1, 8], strides = [1, 1]} : vector<4x8xf32> to vector<1x8xf32>
    %cst_106 = arith.constant 2.000000e+00 : f32
    %613 = vector.broadcast %cst_106 : f32 to vector<1x8xf32>
    %614 = arith.mulf %612, %613 : vector<1x8xf32>
    %cst_107 = arith.constant 1.000000e+00 : f32
    %615 = vector.broadcast %cst_107 : f32 to vector<1x8xf32>
    %616 = arith.subf %614, %615 : vector<1x8xf32>
    %617 = vector.extract_strided_slice %609 {offsets = [3, 0], sizes = [1, 8], strides = [1, 1]} : vector<4x8xf32> to vector<1x8xf32>
    %618 = arith.mulf %611, %593 : vector<1x8xf32>
    %619 = arith.mulf %610, %616 : vector<1x8xf32>
    %620 = arith.addf %618, %619 : vector<1x8xf32>
    %621 = math.tanh %620 : vector<1x8xf32>
    %622 = arith.mulf %617, %621 : vector<1x8xf32>
    %c26 = arith.constant 26 : index
    %623 = memref.load %arg1[%c26] : memref<65xf32, #tpu.memory_space<smem>>
    %624 = vector.broadcast %623 : f32 to vector<1x8xf32>
    %625 = arith.mulf %622, %624 : vector<1x8xf32>
    %626 = arith.addf %599, %625 : vector<1x8xf32>
    %c88 = arith.constant 88 : index
    %c0_108 = arith.constant 0 : index
    %627 = vector.load %arg6[%c88, %c0_108] : memref<256x8xf32, #tpu.memory_space<vmem>>, vector<4x8xf32>
    %628 = vector.shape_cast %622 : vector<1x8xf32> to vector<1x8xf32>
    %629 = vector.broadcast %628 : vector<1x8xf32> to vector<4x8xf32>
    %630 = arith.mulf %629, %29 : vector<4x8xf32>
    %631 = arith.addf %627, %630 : vector<4x8xf32>
    %632 = arith.negf %631 : vector<4x8xf32>
    %633 = math.exp %632 : vector<4x8xf32>
    %cst_109 = arith.constant 1.000000e+00 : f32
    %634 = vector.broadcast %cst_109 : f32 to vector<4x8xf32>
    %635 = arith.addf %634, %633 : vector<4x8xf32>
    %636 = arith.divf %634, %635 : vector<4x8xf32>
    %637 = vector.extract_strided_slice %636 {offsets = [0, 0], sizes = [1, 8], strides = [1, 1]} : vector<4x8xf32> to vector<1x8xf32>
    %638 = vector.extract_strided_slice %636 {offsets = [1, 0], sizes = [1, 8], strides = [1, 1]} : vector<4x8xf32> to vector<1x8xf32>
    %639 = vector.extract_strided_slice %636 {offsets = [2, 0], sizes = [1, 8], strides = [1, 1]} : vector<4x8xf32> to vector<1x8xf32>
    %cst_110 = arith.constant 2.000000e+00 : f32
    %640 = vector.broadcast %cst_110 : f32 to vector<1x8xf32>
    %641 = arith.mulf %639, %640 : vector<1x8xf32>
    %cst_111 = arith.constant 1.000000e+00 : f32
    %642 = vector.broadcast %cst_111 : f32 to vector<1x8xf32>
    %643 = arith.subf %641, %642 : vector<1x8xf32>
    %644 = vector.extract_strided_slice %636 {offsets = [3, 0], sizes = [1, 8], strides = [1, 1]} : vector<4x8xf32> to vector<1x8xf32>
    %645 = arith.mulf %638, %620 : vector<1x8xf32>
    %646 = arith.mulf %637, %643 : vector<1x8xf32>
    %647 = arith.addf %645, %646 : vector<1x8xf32>
    %648 = math.tanh %647 : vector<1x8xf32>
    %649 = arith.mulf %644, %648 : vector<1x8xf32>
    %c27 = arith.constant 27 : index
    %650 = memref.load %arg1[%c27] : memref<65xf32, #tpu.memory_space<smem>>
    %651 = vector.broadcast %650 : f32 to vector<1x8xf32>
    %652 = arith.mulf %649, %651 : vector<1x8xf32>
    %653 = arith.addf %626, %652 : vector<1x8xf32>
    %c92 = arith.constant 92 : index
    %c0_112 = arith.constant 0 : index
    %654 = vector.load %arg6[%c92, %c0_112] : memref<256x8xf32, #tpu.memory_space<vmem>>, vector<4x8xf32>
    %655 = vector.shape_cast %649 : vector<1x8xf32> to vector<1x8xf32>
    %656 = vector.broadcast %655 : vector<1x8xf32> to vector<4x8xf32>
    %657 = arith.mulf %656, %29 : vector<4x8xf32>
    %658 = arith.addf %654, %657 : vector<4x8xf32>
    %659 = arith.negf %658 : vector<4x8xf32>
    %660 = math.exp %659 : vector<4x8xf32>
    %cst_113 = arith.constant 1.000000e+00 : f32
    %661 = vector.broadcast %cst_113 : f32 to vector<4x8xf32>
    %662 = arith.addf %661, %660 : vector<4x8xf32>
    %663 = arith.divf %661, %662 : vector<4x8xf32>
    %664 = vector.extract_strided_slice %663 {offsets = [0, 0], sizes = [1, 8], strides = [1, 1]} : vector<4x8xf32> to vector<1x8xf32>
    %665 = vector.extract_strided_slice %663 {offsets = [1, 0], sizes = [1, 8], strides = [1, 1]} : vector<4x8xf32> to vector<1x8xf32>
    %666 = vector.extract_strided_slice %663 {offsets = [2, 0], sizes = [1, 8], strides = [1, 1]} : vector<4x8xf32> to vector<1x8xf32>
    %cst_114 = arith.constant 2.000000e+00 : f32
    %667 = vector.broadcast %cst_114 : f32 to vector<1x8xf32>
    %668 = arith.mulf %666, %667 : vector<1x8xf32>
    %cst_115 = arith.constant 1.000000e+00 : f32
    %669 = vector.broadcast %cst_115 : f32 to vector<1x8xf32>
    %670 = arith.subf %668, %669 : vector<1x8xf32>
    %671 = vector.extract_strided_slice %663 {offsets = [3, 0], sizes = [1, 8], strides = [1, 1]} : vector<4x8xf32> to vector<1x8xf32>
    %672 = arith.mulf %665, %647 : vector<1x8xf32>
    %673 = arith.mulf %664, %670 : vector<1x8xf32>
    %674 = arith.addf %672, %673 : vector<1x8xf32>
    %675 = math.tanh %674 : vector<1x8xf32>
    %676 = arith.mulf %671, %675 : vector<1x8xf32>
    %c28_116 = arith.constant 28 : index
    %677 = memref.load %arg1[%c28_116] : memref<65xf32, #tpu.memory_space<smem>>
    %678 = vector.broadcast %677 : f32 to vector<1x8xf32>
    %679 = arith.mulf %676, %678 : vector<1x8xf32>
    %680 = arith.addf %653, %679 : vector<1x8xf32>
    %c96 = arith.constant 96 : index
    %c0_117 = arith.constant 0 : index
    %681 = vector.load %arg6[%c96, %c0_117] : memref<256x8xf32, #tpu.memory_space<vmem>>, vector<4x8xf32>
    %682 = vector.shape_cast %676 : vector<1x8xf32> to vector<1x8xf32>
    %683 = vector.broadcast %682 : vector<1x8xf32> to vector<4x8xf32>
    %684 = arith.mulf %683, %29 : vector<4x8xf32>
    %685 = arith.addf %681, %684 : vector<4x8xf32>
    %686 = arith.negf %685 : vector<4x8xf32>
    %687 = math.exp %686 : vector<4x8xf32>
    %cst_118 = arith.constant 1.000000e+00 : f32
    %688 = vector.broadcast %cst_118 : f32 to vector<4x8xf32>
    %689 = arith.addf %688, %687 : vector<4x8xf32>
    %690 = arith.divf %688, %689 : vector<4x8xf32>
    %691 = vector.extract_strided_slice %690 {offsets = [0, 0], sizes = [1, 8], strides = [1, 1]} : vector<4x8xf32> to vector<1x8xf32>
    %692 = vector.extract_strided_slice %690 {offsets = [1, 0], sizes = [1, 8], strides = [1, 1]} : vector<4x8xf32> to vector<1x8xf32>
    %693 = vector.extract_strided_slice %690 {offsets = [2, 0], sizes = [1, 8], strides = [1, 1]} : vector<4x8xf32> to vector<1x8xf32>
    %cst_119 = arith.constant 2.000000e+00 : f32
    %694 = vector.broadcast %cst_119 : f32 to vector<1x8xf32>
    %695 = arith.mulf %693, %694 : vector<1x8xf32>
    %cst_120 = arith.constant 1.000000e+00 : f32
    %696 = vector.broadcast %cst_120 : f32 to vector<1x8xf32>
    %697 = arith.subf %695, %696 : vector<1x8xf32>
    %698 = vector.extract_strided_slice %690 {offsets = [3, 0], sizes = [1, 8], strides = [1, 1]} : vector<4x8xf32> to vector<1x8xf32>
    %699 = arith.mulf %692, %674 : vector<1x8xf32>
    %700 = arith.mulf %691, %697 : vector<1x8xf32>
    %701 = arith.addf %699, %700 : vector<1x8xf32>
    %702 = math.tanh %701 : vector<1x8xf32>
    %703 = arith.mulf %698, %702 : vector<1x8xf32>
    %c29 = arith.constant 29 : index
    %704 = memref.load %arg1[%c29] : memref<65xf32, #tpu.memory_space<smem>>
    %705 = vector.broadcast %704 : f32 to vector<1x8xf32>
    %706 = arith.mulf %703, %705 : vector<1x8xf32>
    %707 = arith.addf %680, %706 : vector<1x8xf32>
    %c100 = arith.constant 100 : index
    %c0_121 = arith.constant 0 : index
    %708 = vector.load %arg6[%c100, %c0_121] : memref<256x8xf32, #tpu.memory_space<vmem>>, vector<4x8xf32>
    %709 = vector.shape_cast %703 : vector<1x8xf32> to vector<1x8xf32>
    %710 = vector.broadcast %709 : vector<1x8xf32> to vector<4x8xf32>
    %711 = arith.mulf %710, %29 : vector<4x8xf32>
    %712 = arith.addf %708, %711 : vector<4x8xf32>
    %713 = arith.negf %712 : vector<4x8xf32>
    %714 = math.exp %713 : vector<4x8xf32>
    %cst_122 = arith.constant 1.000000e+00 : f32
    %715 = vector.broadcast %cst_122 : f32 to vector<4x8xf32>
    %716 = arith.addf %715, %714 : vector<4x8xf32>
    %717 = arith.divf %715, %716 : vector<4x8xf32>
    %718 = vector.extract_strided_slice %717 {offsets = [0, 0], sizes = [1, 8], strides = [1, 1]} : vector<4x8xf32> to vector<1x8xf32>
    %719 = vector.extract_strided_slice %717 {offsets = [1, 0], sizes = [1, 8], strides = [1, 1]} : vector<4x8xf32> to vector<1x8xf32>
    %720 = vector.extract_strided_slice %717 {offsets = [2, 0], sizes = [1, 8], strides = [1, 1]} : vector<4x8xf32> to vector<1x8xf32>
    %cst_123 = arith.constant 2.000000e+00 : f32
    %721 = vector.broadcast %cst_123 : f32 to vector<1x8xf32>
    %722 = arith.mulf %720, %721 : vector<1x8xf32>
    %cst_124 = arith.constant 1.000000e+00 : f32
    %723 = vector.broadcast %cst_124 : f32 to vector<1x8xf32>
    %724 = arith.subf %722, %723 : vector<1x8xf32>
    %725 = vector.extract_strided_slice %717 {offsets = [3, 0], sizes = [1, 8], strides = [1, 1]} : vector<4x8xf32> to vector<1x8xf32>
    %726 = arith.mulf %719, %701 : vector<1x8xf32>
    %727 = arith.mulf %718, %724 : vector<1x8xf32>
    %728 = arith.addf %726, %727 : vector<1x8xf32>
    %729 = math.tanh %728 : vector<1x8xf32>
    %730 = arith.mulf %725, %729 : vector<1x8xf32>
    %c30 = arith.constant 30 : index
    %731 = memref.load %arg1[%c30] : memref<65xf32, #tpu.memory_space<smem>>
    %732 = vector.broadcast %731 : f32 to vector<1x8xf32>
    %733 = arith.mulf %730, %732 : vector<1x8xf32>
    %734 = arith.addf %707, %733 : vector<1x8xf32>
    %c104 = arith.constant 104 : index
    %c0_125 = arith.constant 0 : index
    %735 = vector.load %arg6[%c104, %c0_125] : memref<256x8xf32, #tpu.memory_space<vmem>>, vector<4x8xf32>
    %736 = vector.shape_cast %730 : vector<1x8xf32> to vector<1x8xf32>
    %737 = vector.broadcast %736 : vector<1x8xf32> to vector<4x8xf32>
    %738 = arith.mulf %737, %29 : vector<4x8xf32>
    %739 = arith.addf %735, %738 : vector<4x8xf32>
    %740 = arith.negf %739 : vector<4x8xf32>
    %741 = math.exp %740 : vector<4x8xf32>
    %cst_126 = arith.constant 1.000000e+00 : f32
    %742 = vector.broadcast %cst_126 : f32 to vector<4x8xf32>
    %743 = arith.addf %742, %741 : vector<4x8xf32>
    %744 = arith.divf %742, %743 : vector<4x8xf32>
    %745 = vector.extract_strided_slice %744 {offsets = [0, 0], sizes = [1, 8], strides = [1, 1]} : vector<4x8xf32> to vector<1x8xf32>
    %746 = vector.extract_strided_slice %744 {offsets = [1, 0], sizes = [1, 8], strides = [1, 1]} : vector<4x8xf32> to vector<1x8xf32>
    %747 = vector.extract_strided_slice %744 {offsets = [2, 0], sizes = [1, 8], strides = [1, 1]} : vector<4x8xf32> to vector<1x8xf32>
    %cst_127 = arith.constant 2.000000e+00 : f32
    %748 = vector.broadcast %cst_127 : f32 to vector<1x8xf32>
    %749 = arith.mulf %747, %748 : vector<1x8xf32>
    %cst_128 = arith.constant 1.000000e+00 : f32
    %750 = vector.broadcast %cst_128 : f32 to vector<1x8xf32>
    %751 = arith.subf %749, %750 : vector<1x8xf32>
    %752 = vector.extract_strided_slice %744 {offsets = [3, 0], sizes = [1, 8], strides = [1, 1]} : vector<4x8xf32> to vector<1x8xf32>
    %753 = arith.mulf %746, %728 : vector<1x8xf32>
    %754 = arith.mulf %745, %751 : vector<1x8xf32>
    %755 = arith.addf %753, %754 : vector<1x8xf32>
    %756 = math.tanh %755 : vector<1x8xf32>
    %757 = arith.mulf %752, %756 : vector<1x8xf32>
    %c31 = arith.constant 31 : index
    %758 = memref.load %arg1[%c31] : memref<65xf32, #tpu.memory_space<smem>>
    %759 = vector.broadcast %758 : f32 to vector<1x8xf32>
    %760 = arith.mulf %757, %759 : vector<1x8xf32>
    %761 = arith.addf %734, %760 : vector<1x8xf32>
    %c108 = arith.constant 108 : index
    %c0_129 = arith.constant 0 : index
    %762 = vector.load %arg6[%c108, %c0_129] : memref<256x8xf32, #tpu.memory_space<vmem>>, vector<4x8xf32>
    %763 = vector.shape_cast %757 : vector<1x8xf32> to vector<1x8xf32>
    %764 = vector.broadcast %763 : vector<1x8xf32> to vector<4x8xf32>
    %765 = arith.mulf %764, %29 : vector<4x8xf32>
    %766 = arith.addf %762, %765 : vector<4x8xf32>
    %767 = arith.negf %766 : vector<4x8xf32>
    %768 = math.exp %767 : vector<4x8xf32>
    %cst_130 = arith.constant 1.000000e+00 : f32
    %769 = vector.broadcast %cst_130 : f32 to vector<4x8xf32>
    %770 = arith.addf %769, %768 : vector<4x8xf32>
    %771 = arith.divf %769, %770 : vector<4x8xf32>
    %772 = vector.extract_strided_slice %771 {offsets = [0, 0], sizes = [1, 8], strides = [1, 1]} : vector<4x8xf32> to vector<1x8xf32>
    %773 = vector.extract_strided_slice %771 {offsets = [1, 0], sizes = [1, 8], strides = [1, 1]} : vector<4x8xf32> to vector<1x8xf32>
    %774 = vector.extract_strided_slice %771 {offsets = [2, 0], sizes = [1, 8], strides = [1, 1]} : vector<4x8xf32> to vector<1x8xf32>
    %cst_131 = arith.constant 2.000000e+00 : f32
    %775 = vector.broadcast %cst_131 : f32 to vector<1x8xf32>
    %776 = arith.mulf %774, %775 : vector<1x8xf32>
    %cst_132 = arith.constant 1.000000e+00 : f32
    %777 = vector.broadcast %cst_132 : f32 to vector<1x8xf32>
    %778 = arith.subf %776, %777 : vector<1x8xf32>
    %779 = vector.extract_strided_slice %771 {offsets = [3, 0], sizes = [1, 8], strides = [1, 1]} : vector<4x8xf32> to vector<1x8xf32>
    %780 = arith.mulf %773, %755 : vector<1x8xf32>
    %781 = arith.mulf %772, %778 : vector<1x8xf32>
    %782 = arith.addf %780, %781 : vector<1x8xf32>
    %783 = math.tanh %782 : vector<1x8xf32>
    %784 = arith.mulf %779, %783 : vector<1x8xf32>
    %c32_133 = arith.constant 32 : index
    %785 = memref.load %arg1[%c32_133] : memref<65xf32, #tpu.memory_space<smem>>
    %786 = vector.broadcast %785 : f32 to vector<1x8xf32>
    %787 = arith.mulf %784, %786 : vector<1x8xf32>
    %788 = arith.addf %761, %787 : vector<1x8xf32>
    %c112 = arith.constant 112 : index
    %c0_134 = arith.constant 0 : index
    %789 = vector.load %arg6[%c112, %c0_134] : memref<256x8xf32, #tpu.memory_space<vmem>>, vector<4x8xf32>
    %790 = vector.shape_cast %784 : vector<1x8xf32> to vector<1x8xf32>
    %791 = vector.broadcast %790 : vector<1x8xf32> to vector<4x8xf32>
    %792 = arith.mulf %791, %29 : vector<4x8xf32>
    %793 = arith.addf %789, %792 : vector<4x8xf32>
    %794 = arith.negf %793 : vector<4x8xf32>
    %795 = math.exp %794 : vector<4x8xf32>
    %cst_135 = arith.constant 1.000000e+00 : f32
    %796 = vector.broadcast %cst_135 : f32 to vector<4x8xf32>
    %797 = arith.addf %796, %795 : vector<4x8xf32>
    %798 = arith.divf %796, %797 : vector<4x8xf32>
    %799 = vector.extract_strided_slice %798 {offsets = [0, 0], sizes = [1, 8], strides = [1, 1]} : vector<4x8xf32> to vector<1x8xf32>
    %800 = vector.extract_strided_slice %798 {offsets = [1, 0], sizes = [1, 8], strides = [1, 1]} : vector<4x8xf32> to vector<1x8xf32>
    %801 = vector.extract_strided_slice %798 {offsets = [2, 0], sizes = [1, 8], strides = [1, 1]} : vector<4x8xf32> to vector<1x8xf32>
    %cst_136 = arith.constant 2.000000e+00 : f32
    %802 = vector.broadcast %cst_136 : f32 to vector<1x8xf32>
    %803 = arith.mulf %801, %802 : vector<1x8xf32>
    %cst_137 = arith.constant 1.000000e+00 : f32
    %804 = vector.broadcast %cst_137 : f32 to vector<1x8xf32>
    %805 = arith.subf %803, %804 : vector<1x8xf32>
    %806 = vector.extract_strided_slice %798 {offsets = [3, 0], sizes = [1, 8], strides = [1, 1]} : vector<4x8xf32> to vector<1x8xf32>
    %807 = arith.mulf %800, %782 : vector<1x8xf32>
    %808 = arith.mulf %799, %805 : vector<1x8xf32>
    %809 = arith.addf %807, %808 : vector<1x8xf32>
    %810 = math.tanh %809 : vector<1x8xf32>
    %811 = arith.mulf %806, %810 : vector<1x8xf32>
    %c33 = arith.constant 33 : index
    %812 = memref.load %arg1[%c33] : memref<65xf32, #tpu.memory_space<smem>>
    %813 = vector.broadcast %812 : f32 to vector<1x8xf32>
    %814 = arith.mulf %811, %813 : vector<1x8xf32>
    %815 = arith.addf %788, %814 : vector<1x8xf32>
    %c116 = arith.constant 116 : index
    %c0_138 = arith.constant 0 : index
    %816 = vector.load %arg6[%c116, %c0_138] : memref<256x8xf32, #tpu.memory_space<vmem>>, vector<4x8xf32>
    %817 = vector.shape_cast %811 : vector<1x8xf32> to vector<1x8xf32>
    %818 = vector.broadcast %817 : vector<1x8xf32> to vector<4x8xf32>
    %819 = arith.mulf %818, %29 : vector<4x8xf32>
    %820 = arith.addf %816, %819 : vector<4x8xf32>
    %821 = arith.negf %820 : vector<4x8xf32>
    %822 = math.exp %821 : vector<4x8xf32>
    %cst_139 = arith.constant 1.000000e+00 : f32
    %823 = vector.broadcast %cst_139 : f32 to vector<4x8xf32>
    %824 = arith.addf %823, %822 : vector<4x8xf32>
    %825 = arith.divf %823, %824 : vector<4x8xf32>
    %826 = vector.extract_strided_slice %825 {offsets = [0, 0], sizes = [1, 8], strides = [1, 1]} : vector<4x8xf32> to vector<1x8xf32>
    %827 = vector.extract_strided_slice %825 {offsets = [1, 0], sizes = [1, 8], strides = [1, 1]} : vector<4x8xf32> to vector<1x8xf32>
    %828 = vector.extract_strided_slice %825 {offsets = [2, 0], sizes = [1, 8], strides = [1, 1]} : vector<4x8xf32> to vector<1x8xf32>
    %cst_140 = arith.constant 2.000000e+00 : f32
    %829 = vector.broadcast %cst_140 : f32 to vector<1x8xf32>
    %830 = arith.mulf %828, %829 : vector<1x8xf32>
    %cst_141 = arith.constant 1.000000e+00 : f32
    %831 = vector.broadcast %cst_141 : f32 to vector<1x8xf32>
    %832 = arith.subf %830, %831 : vector<1x8xf32>
    %833 = vector.extract_strided_slice %825 {offsets = [3, 0], sizes = [1, 8], strides = [1, 1]} : vector<4x8xf32> to vector<1x8xf32>
    %834 = arith.mulf %827, %809 : vector<1x8xf32>
    %835 = arith.mulf %826, %832 : vector<1x8xf32>
    %836 = arith.addf %834, %835 : vector<1x8xf32>
    %837 = math.tanh %836 : vector<1x8xf32>
    %838 = arith.mulf %833, %837 : vector<1x8xf32>
    %c34 = arith.constant 34 : index
    %839 = memref.load %arg1[%c34] : memref<65xf32, #tpu.memory_space<smem>>
    %840 = vector.broadcast %839 : f32 to vector<1x8xf32>
    %841 = arith.mulf %838, %840 : vector<1x8xf32>
    %842 = arith.addf %815, %841 : vector<1x8xf32>
    %c120 = arith.constant 120 : index
    %c0_142 = arith.constant 0 : index
    %843 = vector.load %arg6[%c120, %c0_142] : memref<256x8xf32, #tpu.memory_space<vmem>>, vector<4x8xf32>
    %844 = vector.shape_cast %838 : vector<1x8xf32> to vector<1x8xf32>
    %845 = vector.broadcast %844 : vector<1x8xf32> to vector<4x8xf32>
    %846 = arith.mulf %845, %29 : vector<4x8xf32>
    %847 = arith.addf %843, %846 : vector<4x8xf32>
    %848 = arith.negf %847 : vector<4x8xf32>
    %849 = math.exp %848 : vector<4x8xf32>
    %cst_143 = arith.constant 1.000000e+00 : f32
    %850 = vector.broadcast %cst_143 : f32 to vector<4x8xf32>
    %851 = arith.addf %850, %849 : vector<4x8xf32>
    %852 = arith.divf %850, %851 : vector<4x8xf32>
    %853 = vector.extract_strided_slice %852 {offsets = [0, 0], sizes = [1, 8], strides = [1, 1]} : vector<4x8xf32> to vector<1x8xf32>
    %854 = vector.extract_strided_slice %852 {offsets = [1, 0], sizes = [1, 8], strides = [1, 1]} : vector<4x8xf32> to vector<1x8xf32>
    %855 = vector.extract_strided_slice %852 {offsets = [2, 0], sizes = [1, 8], strides = [1, 1]} : vector<4x8xf32> to vector<1x8xf32>
    %cst_144 = arith.constant 2.000000e+00 : f32
    %856 = vector.broadcast %cst_144 : f32 to vector<1x8xf32>
    %857 = arith.mulf %855, %856 : vector<1x8xf32>
    %cst_145 = arith.constant 1.000000e+00 : f32
    %858 = vector.broadcast %cst_145 : f32 to vector<1x8xf32>
    %859 = arith.subf %857, %858 : vector<1x8xf32>
    %860 = vector.extract_strided_slice %852 {offsets = [3, 0], sizes = [1, 8], strides = [1, 1]} : vector<4x8xf32> to vector<1x8xf32>
    %861 = arith.mulf %854, %836 : vector<1x8xf32>
    %862 = arith.mulf %853, %859 : vector<1x8xf32>
    %863 = arith.addf %861, %862 : vector<1x8xf32>
    %864 = math.tanh %863 : vector<1x8xf32>
    %865 = arith.mulf %860, %864 : vector<1x8xf32>
    %c35 = arith.constant 35 : index
    %866 = memref.load %arg1[%c35] : memref<65xf32, #tpu.memory_space<smem>>
    %867 = vector.broadcast %866 : f32 to vector<1x8xf32>
    %868 = arith.mulf %865, %867 : vector<1x8xf32>
    %869 = arith.addf %842, %868 : vector<1x8xf32>
    %c124 = arith.constant 124 : index
    %c0_146 = arith.constant 0 : index
    %870 = vector.load %arg6[%c124, %c0_146] : memref<256x8xf32, #tpu.memory_space<vmem>>, vector<4x8xf32>
    %871 = vector.shape_cast %865 : vector<1x8xf32> to vector<1x8xf32>
    %872 = vector.broadcast %871 : vector<1x8xf32> to vector<4x8xf32>
    %873 = arith.mulf %872, %29 : vector<4x8xf32>
    %874 = arith.addf %870, %873 : vector<4x8xf32>
    %875 = arith.negf %874 : vector<4x8xf32>
    %876 = math.exp %875 : vector<4x8xf32>
    %cst_147 = arith.constant 1.000000e+00 : f32
    %877 = vector.broadcast %cst_147 : f32 to vector<4x8xf32>
    %878 = arith.addf %877, %876 : vector<4x8xf32>
    %879 = arith.divf %877, %878 : vector<4x8xf32>
    %880 = vector.extract_strided_slice %879 {offsets = [0, 0], sizes = [1, 8], strides = [1, 1]} : vector<4x8xf32> to vector<1x8xf32>
    %881 = vector.extract_strided_slice %879 {offsets = [1, 0], sizes = [1, 8], strides = [1, 1]} : vector<4x8xf32> to vector<1x8xf32>
    %882 = vector.extract_strided_slice %879 {offsets = [2, 0], sizes = [1, 8], strides = [1, 1]} : vector<4x8xf32> to vector<1x8xf32>
    %cst_148 = arith.constant 2.000000e+00 : f32
    %883 = vector.broadcast %cst_148 : f32 to vector<1x8xf32>
    %884 = arith.mulf %882, %883 : vector<1x8xf32>
    %cst_149 = arith.constant 1.000000e+00 : f32
    %885 = vector.broadcast %cst_149 : f32 to vector<1x8xf32>
    %886 = arith.subf %884, %885 : vector<1x8xf32>
    %887 = vector.extract_strided_slice %879 {offsets = [3, 0], sizes = [1, 8], strides = [1, 1]} : vector<4x8xf32> to vector<1x8xf32>
    %888 = arith.mulf %881, %863 : vector<1x8xf32>
    %889 = arith.mulf %880, %886 : vector<1x8xf32>
    %890 = arith.addf %888, %889 : vector<1x8xf32>
    %891 = math.tanh %890 : vector<1x8xf32>
    %892 = arith.mulf %887, %891 : vector<1x8xf32>
    %c36_150 = arith.constant 36 : index
    %893 = memref.load %arg1[%c36_150] : memref<65xf32, #tpu.memory_space<smem>>
    %894 = vector.broadcast %893 : f32 to vector<1x8xf32>
    %895 = arith.mulf %892, %894 : vector<1x8xf32>
    %896 = arith.addf %869, %895 : vector<1x8xf32>
    %c128 = arith.constant 128 : index
    %c0_151 = arith.constant 0 : index
    %897 = vector.load %arg6[%c128, %c0_151] : memref<256x8xf32, #tpu.memory_space<vmem>>, vector<4x8xf32>
    %898 = vector.shape_cast %892 : vector<1x8xf32> to vector<1x8xf32>
    %899 = vector.broadcast %898 : vector<1x8xf32> to vector<4x8xf32>
    %900 = arith.mulf %899, %29 : vector<4x8xf32>
    %901 = arith.addf %897, %900 : vector<4x8xf32>
    %902 = arith.negf %901 : vector<4x8xf32>
    %903 = math.exp %902 : vector<4x8xf32>
    %cst_152 = arith.constant 1.000000e+00 : f32
    %904 = vector.broadcast %cst_152 : f32 to vector<4x8xf32>
    %905 = arith.addf %904, %903 : vector<4x8xf32>
    %906 = arith.divf %904, %905 : vector<4x8xf32>
    %907 = vector.extract_strided_slice %906 {offsets = [0, 0], sizes = [1, 8], strides = [1, 1]} : vector<4x8xf32> to vector<1x8xf32>
    %908 = vector.extract_strided_slice %906 {offsets = [1, 0], sizes = [1, 8], strides = [1, 1]} : vector<4x8xf32> to vector<1x8xf32>
    %909 = vector.extract_strided_slice %906 {offsets = [2, 0], sizes = [1, 8], strides = [1, 1]} : vector<4x8xf32> to vector<1x8xf32>
    %cst_153 = arith.constant 2.000000e+00 : f32
    %910 = vector.broadcast %cst_153 : f32 to vector<1x8xf32>
    %911 = arith.mulf %909, %910 : vector<1x8xf32>
    %cst_154 = arith.constant 1.000000e+00 : f32
    %912 = vector.broadcast %cst_154 : f32 to vector<1x8xf32>
    %913 = arith.subf %911, %912 : vector<1x8xf32>
    %914 = vector.extract_strided_slice %906 {offsets = [3, 0], sizes = [1, 8], strides = [1, 1]} : vector<4x8xf32> to vector<1x8xf32>
    %915 = arith.mulf %908, %890 : vector<1x8xf32>
    %916 = arith.mulf %907, %913 : vector<1x8xf32>
    %917 = arith.addf %915, %916 : vector<1x8xf32>
    %918 = math.tanh %917 : vector<1x8xf32>
    %919 = arith.mulf %914, %918 : vector<1x8xf32>
    %c37 = arith.constant 37 : index
    %920 = memref.load %arg1[%c37] : memref<65xf32, #tpu.memory_space<smem>>
    %921 = vector.broadcast %920 : f32 to vector<1x8xf32>
    %922 = arith.mulf %919, %921 : vector<1x8xf32>
    %923 = arith.addf %896, %922 : vector<1x8xf32>
    %c132 = arith.constant 132 : index
    %c0_155 = arith.constant 0 : index
    %924 = vector.load %arg6[%c132, %c0_155] : memref<256x8xf32, #tpu.memory_space<vmem>>, vector<4x8xf32>
    %925 = vector.shape_cast %919 : vector<1x8xf32> to vector<1x8xf32>
    %926 = vector.broadcast %925 : vector<1x8xf32> to vector<4x8xf32>
    %927 = arith.mulf %926, %29 : vector<4x8xf32>
    %928 = arith.addf %924, %927 : vector<4x8xf32>
    %929 = arith.negf %928 : vector<4x8xf32>
    %930 = math.exp %929 : vector<4x8xf32>
    %cst_156 = arith.constant 1.000000e+00 : f32
    %931 = vector.broadcast %cst_156 : f32 to vector<4x8xf32>
    %932 = arith.addf %931, %930 : vector<4x8xf32>
    %933 = arith.divf %931, %932 : vector<4x8xf32>
    %934 = vector.extract_strided_slice %933 {offsets = [0, 0], sizes = [1, 8], strides = [1, 1]} : vector<4x8xf32> to vector<1x8xf32>
    %935 = vector.extract_strided_slice %933 {offsets = [1, 0], sizes = [1, 8], strides = [1, 1]} : vector<4x8xf32> to vector<1x8xf32>
    %936 = vector.extract_strided_slice %933 {offsets = [2, 0], sizes = [1, 8], strides = [1, 1]} : vector<4x8xf32> to vector<1x8xf32>
    %cst_157 = arith.constant 2.000000e+00 : f32
    %937 = vector.broadcast %cst_157 : f32 to vector<1x8xf32>
    %938 = arith.mulf %936, %937 : vector<1x8xf32>
    %cst_158 = arith.constant 1.000000e+00 : f32
    %939 = vector.broadcast %cst_158 : f32 to vector<1x8xf32>
    %940 = arith.subf %938, %939 : vector<1x8xf32>
    %941 = vector.extract_strided_slice %933 {offsets = [3, 0], sizes = [1, 8], strides = [1, 1]} : vector<4x8xf32> to vector<1x8xf32>
    %942 = arith.mulf %935, %917 : vector<1x8xf32>
    %943 = arith.mulf %934, %940 : vector<1x8xf32>
    %944 = arith.addf %942, %943 : vector<1x8xf32>
    %945 = math.tanh %944 : vector<1x8xf32>
    %946 = arith.mulf %941, %945 : vector<1x8xf32>
    %c38 = arith.constant 38 : index
    %947 = memref.load %arg1[%c38] : memref<65xf32, #tpu.memory_space<smem>>
    %948 = vector.broadcast %947 : f32 to vector<1x8xf32>
    %949 = arith.mulf %946, %948 : vector<1x8xf32>
    %950 = arith.addf %923, %949 : vector<1x8xf32>
    %c136 = arith.constant 136 : index
    %c0_159 = arith.constant 0 : index
    %951 = vector.load %arg6[%c136, %c0_159] : memref<256x8xf32, #tpu.memory_space<vmem>>, vector<4x8xf32>
    %952 = vector.shape_cast %946 : vector<1x8xf32> to vector<1x8xf32>
    %953 = vector.broadcast %952 : vector<1x8xf32> to vector<4x8xf32>
    %954 = arith.mulf %953, %29 : vector<4x8xf32>
    %955 = arith.addf %951, %954 : vector<4x8xf32>
    %956 = arith.negf %955 : vector<4x8xf32>
    %957 = math.exp %956 : vector<4x8xf32>
    %cst_160 = arith.constant 1.000000e+00 : f32
    %958 = vector.broadcast %cst_160 : f32 to vector<4x8xf32>
    %959 = arith.addf %958, %957 : vector<4x8xf32>
    %960 = arith.divf %958, %959 : vector<4x8xf32>
    %961 = vector.extract_strided_slice %960 {offsets = [0, 0], sizes = [1, 8], strides = [1, 1]} : vector<4x8xf32> to vector<1x8xf32>
    %962 = vector.extract_strided_slice %960 {offsets = [1, 0], sizes = [1, 8], strides = [1, 1]} : vector<4x8xf32> to vector<1x8xf32>
    %963 = vector.extract_strided_slice %960 {offsets = [2, 0], sizes = [1, 8], strides = [1, 1]} : vector<4x8xf32> to vector<1x8xf32>
    %cst_161 = arith.constant 2.000000e+00 : f32
    %964 = vector.broadcast %cst_161 : f32 to vector<1x8xf32>
    %965 = arith.mulf %963, %964 : vector<1x8xf32>
    %cst_162 = arith.constant 1.000000e+00 : f32
    %966 = vector.broadcast %cst_162 : f32 to vector<1x8xf32>
    %967 = arith.subf %965, %966 : vector<1x8xf32>
    %968 = vector.extract_strided_slice %960 {offsets = [3, 0], sizes = [1, 8], strides = [1, 1]} : vector<4x8xf32> to vector<1x8xf32>
    %969 = arith.mulf %962, %944 : vector<1x8xf32>
    %970 = arith.mulf %961, %967 : vector<1x8xf32>
    %971 = arith.addf %969, %970 : vector<1x8xf32>
    %972 = math.tanh %971 : vector<1x8xf32>
    %973 = arith.mulf %968, %972 : vector<1x8xf32>
    %c39 = arith.constant 39 : index
    %974 = memref.load %arg1[%c39] : memref<65xf32, #tpu.memory_space<smem>>
    %975 = vector.broadcast %974 : f32 to vector<1x8xf32>
    %976 = arith.mulf %973, %975 : vector<1x8xf32>
    %977 = arith.addf %950, %976 : vector<1x8xf32>
    %c140 = arith.constant 140 : index
    %c0_163 = arith.constant 0 : index
    %978 = vector.load %arg6[%c140, %c0_163] : memref<256x8xf32, #tpu.memory_space<vmem>>, vector<4x8xf32>
    %979 = vector.shape_cast %973 : vector<1x8xf32> to vector<1x8xf32>
    %980 = vector.broadcast %979 : vector<1x8xf32> to vector<4x8xf32>
    %981 = arith.mulf %980, %29 : vector<4x8xf32>
    %982 = arith.addf %978, %981 : vector<4x8xf32>
    %983 = arith.negf %982 : vector<4x8xf32>
    %984 = math.exp %983 : vector<4x8xf32>
    %cst_164 = arith.constant 1.000000e+00 : f32
    %985 = vector.broadcast %cst_164 : f32 to vector<4x8xf32>
    %986 = arith.addf %985, %984 : vector<4x8xf32>
    %987 = arith.divf %985, %986 : vector<4x8xf32>
    %988 = vector.extract_strided_slice %987 {offsets = [0, 0], sizes = [1, 8], strides = [1, 1]} : vector<4x8xf32> to vector<1x8xf32>
    %989 = vector.extract_strided_slice %987 {offsets = [1, 0], sizes = [1, 8], strides = [1, 1]} : vector<4x8xf32> to vector<1x8xf32>
    %990 = vector.extract_strided_slice %987 {offsets = [2, 0], sizes = [1, 8], strides = [1, 1]} : vector<4x8xf32> to vector<1x8xf32>
    %cst_165 = arith.constant 2.000000e+00 : f32
    %991 = vector.broadcast %cst_165 : f32 to vector<1x8xf32>
    %992 = arith.mulf %990, %991 : vector<1x8xf32>
    %cst_166 = arith.constant 1.000000e+00 : f32
    %993 = vector.broadcast %cst_166 : f32 to vector<1x8xf32>
    %994 = arith.subf %992, %993 : vector<1x8xf32>
    %995 = vector.extract_strided_slice %987 {offsets = [3, 0], sizes = [1, 8], strides = [1, 1]} : vector<4x8xf32> to vector<1x8xf32>
    %996 = arith.mulf %989, %971 : vector<1x8xf32>
    %997 = arith.mulf %988, %994 : vector<1x8xf32>
    %998 = arith.addf %996, %997 : vector<1x8xf32>
    %999 = math.tanh %998 : vector<1x8xf32>
    %1000 = arith.mulf %995, %999 : vector<1x8xf32>
    %c40_167 = arith.constant 40 : index
    %1001 = memref.load %arg1[%c40_167] : memref<65xf32, #tpu.memory_space<smem>>
    %1002 = vector.broadcast %1001 : f32 to vector<1x8xf32>
    %1003 = arith.mulf %1000, %1002 : vector<1x8xf32>
    %1004 = arith.addf %977, %1003 : vector<1x8xf32>
    %c144 = arith.constant 144 : index
    %c0_168 = arith.constant 0 : index
    %1005 = vector.load %arg6[%c144, %c0_168] : memref<256x8xf32, #tpu.memory_space<vmem>>, vector<4x8xf32>
    %1006 = vector.shape_cast %1000 : vector<1x8xf32> to vector<1x8xf32>
    %1007 = vector.broadcast %1006 : vector<1x8xf32> to vector<4x8xf32>
    %1008 = arith.mulf %1007, %29 : vector<4x8xf32>
    %1009 = arith.addf %1005, %1008 : vector<4x8xf32>
    %1010 = arith.negf %1009 : vector<4x8xf32>
    %1011 = math.exp %1010 : vector<4x8xf32>
    %cst_169 = arith.constant 1.000000e+00 : f32
    %1012 = vector.broadcast %cst_169 : f32 to vector<4x8xf32>
    %1013 = arith.addf %1012, %1011 : vector<4x8xf32>
    %1014 = arith.divf %1012, %1013 : vector<4x8xf32>
    %1015 = vector.extract_strided_slice %1014 {offsets = [0, 0], sizes = [1, 8], strides = [1, 1]} : vector<4x8xf32> to vector<1x8xf32>
    %1016 = vector.extract_strided_slice %1014 {offsets = [1, 0], sizes = [1, 8], strides = [1, 1]} : vector<4x8xf32> to vector<1x8xf32>
    %1017 = vector.extract_strided_slice %1014 {offsets = [2, 0], sizes = [1, 8], strides = [1, 1]} : vector<4x8xf32> to vector<1x8xf32>
    %cst_170 = arith.constant 2.000000e+00 : f32
    %1018 = vector.broadcast %cst_170 : f32 to vector<1x8xf32>
    %1019 = arith.mulf %1017, %1018 : vector<1x8xf32>
    %cst_171 = arith.constant 1.000000e+00 : f32
    %1020 = vector.broadcast %cst_171 : f32 to vector<1x8xf32>
    %1021 = arith.subf %1019, %1020 : vector<1x8xf32>
    %1022 = vector.extract_strided_slice %1014 {offsets = [3, 0], sizes = [1, 8], strides = [1, 1]} : vector<4x8xf32> to vector<1x8xf32>
    %1023 = arith.mulf %1016, %998 : vector<1x8xf32>
    %1024 = arith.mulf %1015, %1021 : vector<1x8xf32>
    %1025 = arith.addf %1023, %1024 : vector<1x8xf32>
    %1026 = math.tanh %1025 : vector<1x8xf32>
    %1027 = arith.mulf %1022, %1026 : vector<1x8xf32>
    %c41 = arith.constant 41 : index
    %1028 = memref.load %arg1[%c41] : memref<65xf32, #tpu.memory_space<smem>>
    %1029 = vector.broadcast %1028 : f32 to vector<1x8xf32>
    %1030 = arith.mulf %1027, %1029 : vector<1x8xf32>
    %1031 = arith.addf %1004, %1030 : vector<1x8xf32>
    %c148 = arith.constant 148 : index
    %c0_172 = arith.constant 0 : index
    %1032 = vector.load %arg6[%c148, %c0_172] : memref<256x8xf32, #tpu.memory_space<vmem>>, vector<4x8xf32>
    %1033 = vector.shape_cast %1027 : vector<1x8xf32> to vector<1x8xf32>
    %1034 = vector.broadcast %1033 : vector<1x8xf32> to vector<4x8xf32>
    %1035 = arith.mulf %1034, %29 : vector<4x8xf32>
    %1036 = arith.addf %1032, %1035 : vector<4x8xf32>
    %1037 = arith.negf %1036 : vector<4x8xf32>
    %1038 = math.exp %1037 : vector<4x8xf32>
    %cst_173 = arith.constant 1.000000e+00 : f32
    %1039 = vector.broadcast %cst_173 : f32 to vector<4x8xf32>
    %1040 = arith.addf %1039, %1038 : vector<4x8xf32>
    %1041 = arith.divf %1039, %1040 : vector<4x8xf32>
    %1042 = vector.extract_strided_slice %1041 {offsets = [0, 0], sizes = [1, 8], strides = [1, 1]} : vector<4x8xf32> to vector<1x8xf32>
    %1043 = vector.extract_strided_slice %1041 {offsets = [1, 0], sizes = [1, 8], strides = [1, 1]} : vector<4x8xf32> to vector<1x8xf32>
    %1044 = vector.extract_strided_slice %1041 {offsets = [2, 0], sizes = [1, 8], strides = [1, 1]} : vector<4x8xf32> to vector<1x8xf32>
    %cst_174 = arith.constant 2.000000e+00 : f32
    %1045 = vector.broadcast %cst_174 : f32 to vector<1x8xf32>
    %1046 = arith.mulf %1044, %1045 : vector<1x8xf32>
    %cst_175 = arith.constant 1.000000e+00 : f32
    %1047 = vector.broadcast %cst_175 : f32 to vector<1x8xf32>
    %1048 = arith.subf %1046, %1047 : vector<1x8xf32>
    %1049 = vector.extract_strided_slice %1041 {offsets = [3, 0], sizes = [1, 8], strides = [1, 1]} : vector<4x8xf32> to vector<1x8xf32>
    %1050 = arith.mulf %1043, %1025 : vector<1x8xf32>
    %1051 = arith.mulf %1042, %1048 : vector<1x8xf32>
    %1052 = arith.addf %1050, %1051 : vector<1x8xf32>
    %1053 = math.tanh %1052 : vector<1x8xf32>
    %1054 = arith.mulf %1049, %1053 : vector<1x8xf32>
    %c42 = arith.constant 42 : index
    %1055 = memref.load %arg1[%c42] : memref<65xf32, #tpu.memory_space<smem>>
    %1056 = vector.broadcast %1055 : f32 to vector<1x8xf32>
    %1057 = arith.mulf %1054, %1056 : vector<1x8xf32>
    %1058 = arith.addf %1031, %1057 : vector<1x8xf32>
    %c152 = arith.constant 152 : index
    %c0_176 = arith.constant 0 : index
    %1059 = vector.load %arg6[%c152, %c0_176] : memref<256x8xf32, #tpu.memory_space<vmem>>, vector<4x8xf32>
    %1060 = vector.shape_cast %1054 : vector<1x8xf32> to vector<1x8xf32>
    %1061 = vector.broadcast %1060 : vector<1x8xf32> to vector<4x8xf32>
    %1062 = arith.mulf %1061, %29 : vector<4x8xf32>
    %1063 = arith.addf %1059, %1062 : vector<4x8xf32>
    %1064 = arith.negf %1063 : vector<4x8xf32>
    %1065 = math.exp %1064 : vector<4x8xf32>
    %cst_177 = arith.constant 1.000000e+00 : f32
    %1066 = vector.broadcast %cst_177 : f32 to vector<4x8xf32>
    %1067 = arith.addf %1066, %1065 : vector<4x8xf32>
    %1068 = arith.divf %1066, %1067 : vector<4x8xf32>
    %1069 = vector.extract_strided_slice %1068 {offsets = [0, 0], sizes = [1, 8], strides = [1, 1]} : vector<4x8xf32> to vector<1x8xf32>
    %1070 = vector.extract_strided_slice %1068 {offsets = [1, 0], sizes = [1, 8], strides = [1, 1]} : vector<4x8xf32> to vector<1x8xf32>
    %1071 = vector.extract_strided_slice %1068 {offsets = [2, 0], sizes = [1, 8], strides = [1, 1]} : vector<4x8xf32> to vector<1x8xf32>
    %cst_178 = arith.constant 2.000000e+00 : f32
    %1072 = vector.broadcast %cst_178 : f32 to vector<1x8xf32>
    %1073 = arith.mulf %1071, %1072 : vector<1x8xf32>
    %cst_179 = arith.constant 1.000000e+00 : f32
    %1074 = vector.broadcast %cst_179 : f32 to vector<1x8xf32>
    %1075 = arith.subf %1073, %1074 : vector<1x8xf32>
    %1076 = vector.extract_strided_slice %1068 {offsets = [3, 0], sizes = [1, 8], strides = [1, 1]} : vector<4x8xf32> to vector<1x8xf32>
    %1077 = arith.mulf %1070, %1052 : vector<1x8xf32>
    %1078 = arith.mulf %1069, %1075 : vector<1x8xf32>
    %1079 = arith.addf %1077, %1078 : vector<1x8xf32>
    %1080 = math.tanh %1079 : vector<1x8xf32>
    %1081 = arith.mulf %1076, %1080 : vector<1x8xf32>
    %c43 = arith.constant 43 : index
    %1082 = memref.load %arg1[%c43] : memref<65xf32, #tpu.memory_space<smem>>
    %1083 = vector.broadcast %1082 : f32 to vector<1x8xf32>
    %1084 = arith.mulf %1081, %1083 : vector<1x8xf32>
    %1085 = arith.addf %1058, %1084 : vector<1x8xf32>
    %c156 = arith.constant 156 : index
    %c0_180 = arith.constant 0 : index
    %1086 = vector.load %arg6[%c156, %c0_180] : memref<256x8xf32, #tpu.memory_space<vmem>>, vector<4x8xf32>
    %1087 = vector.shape_cast %1081 : vector<1x8xf32> to vector<1x8xf32>
    %1088 = vector.broadcast %1087 : vector<1x8xf32> to vector<4x8xf32>
    %1089 = arith.mulf %1088, %29 : vector<4x8xf32>
    %1090 = arith.addf %1086, %1089 : vector<4x8xf32>
    %1091 = arith.negf %1090 : vector<4x8xf32>
    %1092 = math.exp %1091 : vector<4x8xf32>
    %cst_181 = arith.constant 1.000000e+00 : f32
    %1093 = vector.broadcast %cst_181 : f32 to vector<4x8xf32>
    %1094 = arith.addf %1093, %1092 : vector<4x8xf32>
    %1095 = arith.divf %1093, %1094 : vector<4x8xf32>
    %1096 = vector.extract_strided_slice %1095 {offsets = [0, 0], sizes = [1, 8], strides = [1, 1]} : vector<4x8xf32> to vector<1x8xf32>
    %1097 = vector.extract_strided_slice %1095 {offsets = [1, 0], sizes = [1, 8], strides = [1, 1]} : vector<4x8xf32> to vector<1x8xf32>
    %1098 = vector.extract_strided_slice %1095 {offsets = [2, 0], sizes = [1, 8], strides = [1, 1]} : vector<4x8xf32> to vector<1x8xf32>
    %cst_182 = arith.constant 2.000000e+00 : f32
    %1099 = vector.broadcast %cst_182 : f32 to vector<1x8xf32>
    %1100 = arith.mulf %1098, %1099 : vector<1x8xf32>
    %cst_183 = arith.constant 1.000000e+00 : f32
    %1101 = vector.broadcast %cst_183 : f32 to vector<1x8xf32>
    %1102 = arith.subf %1100, %1101 : vector<1x8xf32>
    %1103 = vector.extract_strided_slice %1095 {offsets = [3, 0], sizes = [1, 8], strides = [1, 1]} : vector<4x8xf32> to vector<1x8xf32>
    %1104 = arith.mulf %1097, %1079 : vector<1x8xf32>
    %1105 = arith.mulf %1096, %1102 : vector<1x8xf32>
    %1106 = arith.addf %1104, %1105 : vector<1x8xf32>
    %1107 = math.tanh %1106 : vector<1x8xf32>
    %1108 = arith.mulf %1103, %1107 : vector<1x8xf32>
    %c44_184 = arith.constant 44 : index
    %1109 = memref.load %arg1[%c44_184] : memref<65xf32, #tpu.memory_space<smem>>
    %1110 = vector.broadcast %1109 : f32 to vector<1x8xf32>
    %1111 = arith.mulf %1108, %1110 : vector<1x8xf32>
    %1112 = arith.addf %1085, %1111 : vector<1x8xf32>
    %c160 = arith.constant 160 : index
    %c0_185 = arith.constant 0 : index
    %1113 = vector.load %arg6[%c160, %c0_185] : memref<256x8xf32, #tpu.memory_space<vmem>>, vector<4x8xf32>
    %1114 = vector.shape_cast %1108 : vector<1x8xf32> to vector<1x8xf32>
    %1115 = vector.broadcast %1114 : vector<1x8xf32> to vector<4x8xf32>
    %1116 = arith.mulf %1115, %29 : vector<4x8xf32>
    %1117 = arith.addf %1113, %1116 : vector<4x8xf32>
    %1118 = arith.negf %1117 : vector<4x8xf32>
    %1119 = math.exp %1118 : vector<4x8xf32>
    %cst_186 = arith.constant 1.000000e+00 : f32
    %1120 = vector.broadcast %cst_186 : f32 to vector<4x8xf32>
    %1121 = arith.addf %1120, %1119 : vector<4x8xf32>
    %1122 = arith.divf %1120, %1121 : vector<4x8xf32>
    %1123 = vector.extract_strided_slice %1122 {offsets = [0, 0], sizes = [1, 8], strides = [1, 1]} : vector<4x8xf32> to vector<1x8xf32>
    %1124 = vector.extract_strided_slice %1122 {offsets = [1, 0], sizes = [1, 8], strides = [1, 1]} : vector<4x8xf32> to vector<1x8xf32>
    %1125 = vector.extract_strided_slice %1122 {offsets = [2, 0], sizes = [1, 8], strides = [1, 1]} : vector<4x8xf32> to vector<1x8xf32>
    %cst_187 = arith.constant 2.000000e+00 : f32
    %1126 = vector.broadcast %cst_187 : f32 to vector<1x8xf32>
    %1127 = arith.mulf %1125, %1126 : vector<1x8xf32>
    %cst_188 = arith.constant 1.000000e+00 : f32
    %1128 = vector.broadcast %cst_188 : f32 to vector<1x8xf32>
    %1129 = arith.subf %1127, %1128 : vector<1x8xf32>
    %1130 = vector.extract_strided_slice %1122 {offsets = [3, 0], sizes = [1, 8], strides = [1, 1]} : vector<4x8xf32> to vector<1x8xf32>
    %1131 = arith.mulf %1124, %1106 : vector<1x8xf32>
    %1132 = arith.mulf %1123, %1129 : vector<1x8xf32>
    %1133 = arith.addf %1131, %1132 : vector<1x8xf32>
    %1134 = math.tanh %1133 : vector<1x8xf32>
    %1135 = arith.mulf %1130, %1134 : vector<1x8xf32>
    %c45 = arith.constant 45 : index
    %1136 = memref.load %arg1[%c45] : memref<65xf32, #tpu.memory_space<smem>>
    %1137 = vector.broadcast %1136 : f32 to vector<1x8xf32>
    %1138 = arith.mulf %1135, %1137 : vector<1x8xf32>
    %1139 = arith.addf %1112, %1138 : vector<1x8xf32>
    %c164 = arith.constant 164 : index
    %c0_189 = arith.constant 0 : index
    %1140 = vector.load %arg6[%c164, %c0_189] : memref<256x8xf32, #tpu.memory_space<vmem>>, vector<4x8xf32>
    %1141 = vector.shape_cast %1135 : vector<1x8xf32> to vector<1x8xf32>
    %1142 = vector.broadcast %1141 : vector<1x8xf32> to vector<4x8xf32>
    %1143 = arith.mulf %1142, %29 : vector<4x8xf32>
    %1144 = arith.addf %1140, %1143 : vector<4x8xf32>
    %1145 = arith.negf %1144 : vector<4x8xf32>
    %1146 = math.exp %1145 : vector<4x8xf32>
    %cst_190 = arith.constant 1.000000e+00 : f32
    %1147 = vector.broadcast %cst_190 : f32 to vector<4x8xf32>
    %1148 = arith.addf %1147, %1146 : vector<4x8xf32>
    %1149 = arith.divf %1147, %1148 : vector<4x8xf32>
    %1150 = vector.extract_strided_slice %1149 {offsets = [0, 0], sizes = [1, 8], strides = [1, 1]} : vector<4x8xf32> to vector<1x8xf32>
    %1151 = vector.extract_strided_slice %1149 {offsets = [1, 0], sizes = [1, 8], strides = [1, 1]} : vector<4x8xf32> to vector<1x8xf32>
    %1152 = vector.extract_strided_slice %1149 {offsets = [2, 0], sizes = [1, 8], strides = [1, 1]} : vector<4x8xf32> to vector<1x8xf32>
    %cst_191 = arith.constant 2.000000e+00 : f32
    %1153 = vector.broadcast %cst_191 : f32 to vector<1x8xf32>
    %1154 = arith.mulf %1152, %1153 : vector<1x8xf32>
    %cst_192 = arith.constant 1.000000e+00 : f32
    %1155 = vector.broadcast %cst_192 : f32 to vector<1x8xf32>
    %1156 = arith.subf %1154, %1155 : vector<1x8xf32>
    %1157 = vector.extract_strided_slice %1149 {offsets = [3, 0], sizes = [1, 8], strides = [1, 1]} : vector<4x8xf32> to vector<1x8xf32>
    %1158 = arith.mulf %1151, %1133 : vector<1x8xf32>
    %1159 = arith.mulf %1150, %1156 : vector<1x8xf32>
    %1160 = arith.addf %1158, %1159 : vector<1x8xf32>
    %1161 = math.tanh %1160 : vector<1x8xf32>
    %1162 = arith.mulf %1157, %1161 : vector<1x8xf32>
    %c46 = arith.constant 46 : index
    %1163 = memref.load %arg1[%c46] : memref<65xf32, #tpu.memory_space<smem>>
    %1164 = vector.broadcast %1163 : f32 to vector<1x8xf32>
    %1165 = arith.mulf %1162, %1164 : vector<1x8xf32>
    %1166 = arith.addf %1139, %1165 : vector<1x8xf32>
    %c168 = arith.constant 168 : index
    %c0_193 = arith.constant 0 : index
    %1167 = vector.load %arg6[%c168, %c0_193] : memref<256x8xf32, #tpu.memory_space<vmem>>, vector<4x8xf32>
    %1168 = vector.shape_cast %1162 : vector<1x8xf32> to vector<1x8xf32>
    %1169 = vector.broadcast %1168 : vector<1x8xf32> to vector<4x8xf32>
    %1170 = arith.mulf %1169, %29 : vector<4x8xf32>
    %1171 = arith.addf %1167, %1170 : vector<4x8xf32>
    %1172 = arith.negf %1171 : vector<4x8xf32>
    %1173 = math.exp %1172 : vector<4x8xf32>
    %cst_194 = arith.constant 1.000000e+00 : f32
    %1174 = vector.broadcast %cst_194 : f32 to vector<4x8xf32>
    %1175 = arith.addf %1174, %1173 : vector<4x8xf32>
    %1176 = arith.divf %1174, %1175 : vector<4x8xf32>
    %1177 = vector.extract_strided_slice %1176 {offsets = [0, 0], sizes = [1, 8], strides = [1, 1]} : vector<4x8xf32> to vector<1x8xf32>
    %1178 = vector.extract_strided_slice %1176 {offsets = [1, 0], sizes = [1, 8], strides = [1, 1]} : vector<4x8xf32> to vector<1x8xf32>
    %1179 = vector.extract_strided_slice %1176 {offsets = [2, 0], sizes = [1, 8], strides = [1, 1]} : vector<4x8xf32> to vector<1x8xf32>
    %cst_195 = arith.constant 2.000000e+00 : f32
    %1180 = vector.broadcast %cst_195 : f32 to vector<1x8xf32>
    %1181 = arith.mulf %1179, %1180 : vector<1x8xf32>
    %cst_196 = arith.constant 1.000000e+00 : f32
    %1182 = vector.broadcast %cst_196 : f32 to vector<1x8xf32>
    %1183 = arith.subf %1181, %1182 : vector<1x8xf32>
    %1184 = vector.extract_strided_slice %1176 {offsets = [3, 0], sizes = [1, 8], strides = [1, 1]} : vector<4x8xf32> to vector<1x8xf32>
    %1185 = arith.mulf %1178, %1160 : vector<1x8xf32>
    %1186 = arith.mulf %1177, %1183 : vector<1x8xf32>
    %1187 = arith.addf %1185, %1186 : vector<1x8xf32>
    %1188 = math.tanh %1187 : vector<1x8xf32>
    %1189 = arith.mulf %1184, %1188 : vector<1x8xf32>
    %c47 = arith.constant 47 : index
    %1190 = memref.load %arg1[%c47] : memref<65xf32, #tpu.memory_space<smem>>
    %1191 = vector.broadcast %1190 : f32 to vector<1x8xf32>
    %1192 = arith.mulf %1189, %1191 : vector<1x8xf32>
    %1193 = arith.addf %1166, %1192 : vector<1x8xf32>
    %c172 = arith.constant 172 : index
    %c0_197 = arith.constant 0 : index
    %1194 = vector.load %arg6[%c172, %c0_197] : memref<256x8xf32, #tpu.memory_space<vmem>>, vector<4x8xf32>
    %1195 = vector.shape_cast %1189 : vector<1x8xf32> to vector<1x8xf32>
    %1196 = vector.broadcast %1195 : vector<1x8xf32> to vector<4x8xf32>
    %1197 = arith.mulf %1196, %29 : vector<4x8xf32>
    %1198 = arith.addf %1194, %1197 : vector<4x8xf32>
    %1199 = arith.negf %1198 : vector<4x8xf32>
    %1200 = math.exp %1199 : vector<4x8xf32>
    %cst_198 = arith.constant 1.000000e+00 : f32
    %1201 = vector.broadcast %cst_198 : f32 to vector<4x8xf32>
    %1202 = arith.addf %1201, %1200 : vector<4x8xf32>
    %1203 = arith.divf %1201, %1202 : vector<4x8xf32>
    %1204 = vector.extract_strided_slice %1203 {offsets = [0, 0], sizes = [1, 8], strides = [1, 1]} : vector<4x8xf32> to vector<1x8xf32>
    %1205 = vector.extract_strided_slice %1203 {offsets = [1, 0], sizes = [1, 8], strides = [1, 1]} : vector<4x8xf32> to vector<1x8xf32>
    %1206 = vector.extract_strided_slice %1203 {offsets = [2, 0], sizes = [1, 8], strides = [1, 1]} : vector<4x8xf32> to vector<1x8xf32>
    %cst_199 = arith.constant 2.000000e+00 : f32
    %1207 = vector.broadcast %cst_199 : f32 to vector<1x8xf32>
    %1208 = arith.mulf %1206, %1207 : vector<1x8xf32>
    %cst_200 = arith.constant 1.000000e+00 : f32
    %1209 = vector.broadcast %cst_200 : f32 to vector<1x8xf32>
    %1210 = arith.subf %1208, %1209 : vector<1x8xf32>
    %1211 = vector.extract_strided_slice %1203 {offsets = [3, 0], sizes = [1, 8], strides = [1, 1]} : vector<4x8xf32> to vector<1x8xf32>
    %1212 = arith.mulf %1205, %1187 : vector<1x8xf32>
    %1213 = arith.mulf %1204, %1210 : vector<1x8xf32>
    %1214 = arith.addf %1212, %1213 : vector<1x8xf32>
    %1215 = math.tanh %1214 : vector<1x8xf32>
    %1216 = arith.mulf %1211, %1215 : vector<1x8xf32>
    %c48_201 = arith.constant 48 : index
    %1217 = memref.load %arg1[%c48_201] : memref<65xf32, #tpu.memory_space<smem>>
    %1218 = vector.broadcast %1217 : f32 to vector<1x8xf32>
    %1219 = arith.mulf %1216, %1218 : vector<1x8xf32>
    %1220 = arith.addf %1193, %1219 : vector<1x8xf32>
    %c176 = arith.constant 176 : index
    %c0_202 = arith.constant 0 : index
    %1221 = vector.load %arg6[%c176, %c0_202] : memref<256x8xf32, #tpu.memory_space<vmem>>, vector<4x8xf32>
    %1222 = vector.shape_cast %1216 : vector<1x8xf32> to vector<1x8xf32>
    %1223 = vector.broadcast %1222 : vector<1x8xf32> to vector<4x8xf32>
    %1224 = arith.mulf %1223, %29 : vector<4x8xf32>
    %1225 = arith.addf %1221, %1224 : vector<4x8xf32>
    %1226 = arith.negf %1225 : vector<4x8xf32>
    %1227 = math.exp %1226 : vector<4x8xf32>
    %cst_203 = arith.constant 1.000000e+00 : f32
    %1228 = vector.broadcast %cst_203 : f32 to vector<4x8xf32>
    %1229 = arith.addf %1228, %1227 : vector<4x8xf32>
    %1230 = arith.divf %1228, %1229 : vector<4x8xf32>
    %1231 = vector.extract_strided_slice %1230 {offsets = [0, 0], sizes = [1, 8], strides = [1, 1]} : vector<4x8xf32> to vector<1x8xf32>
    %1232 = vector.extract_strided_slice %1230 {offsets = [1, 0], sizes = [1, 8], strides = [1, 1]} : vector<4x8xf32> to vector<1x8xf32>
    %1233 = vector.extract_strided_slice %1230 {offsets = [2, 0], sizes = [1, 8], strides = [1, 1]} : vector<4x8xf32> to vector<1x8xf32>
    %cst_204 = arith.constant 2.000000e+00 : f32
    %1234 = vector.broadcast %cst_204 : f32 to vector<1x8xf32>
    %1235 = arith.mulf %1233, %1234 : vector<1x8xf32>
    %cst_205 = arith.constant 1.000000e+00 : f32
    %1236 = vector.broadcast %cst_205 : f32 to vector<1x8xf32>
    %1237 = arith.subf %1235, %1236 : vector<1x8xf32>
    %1238 = vector.extract_strided_slice %1230 {offsets = [3, 0], sizes = [1, 8], strides = [1, 1]} : vector<4x8xf32> to vector<1x8xf32>
    %1239 = arith.mulf %1232, %1214 : vector<1x8xf32>
    %1240 = arith.mulf %1231, %1237 : vector<1x8xf32>
    %1241 = arith.addf %1239, %1240 : vector<1x8xf32>
    %1242 = math.tanh %1241 : vector<1x8xf32>
    %1243 = arith.mulf %1238, %1242 : vector<1x8xf32>
    %c49 = arith.constant 49 : index
    %1244 = memref.load %arg1[%c49] : memref<65xf32, #tpu.memory_space<smem>>
    %1245 = vector.broadcast %1244 : f32 to vector<1x8xf32>
    %1246 = arith.mulf %1243, %1245 : vector<1x8xf32>
    %1247 = arith.addf %1220, %1246 : vector<1x8xf32>
    %c180 = arith.constant 180 : index
    %c0_206 = arith.constant 0 : index
    %1248 = vector.load %arg6[%c180, %c0_206] : memref<256x8xf32, #tpu.memory_space<vmem>>, vector<4x8xf32>
    %1249 = vector.shape_cast %1243 : vector<1x8xf32> to vector<1x8xf32>
    %1250 = vector.broadcast %1249 : vector<1x8xf32> to vector<4x8xf32>
    %1251 = arith.mulf %1250, %29 : vector<4x8xf32>
    %1252 = arith.addf %1248, %1251 : vector<4x8xf32>
    %1253 = arith.negf %1252 : vector<4x8xf32>
    %1254 = math.exp %1253 : vector<4x8xf32>
    %cst_207 = arith.constant 1.000000e+00 : f32
    %1255 = vector.broadcast %cst_207 : f32 to vector<4x8xf32>
    %1256 = arith.addf %1255, %1254 : vector<4x8xf32>
    %1257 = arith.divf %1255, %1256 : vector<4x8xf32>
    %1258 = vector.extract_strided_slice %1257 {offsets = [0, 0], sizes = [1, 8], strides = [1, 1]} : vector<4x8xf32> to vector<1x8xf32>
    %1259 = vector.extract_strided_slice %1257 {offsets = [1, 0], sizes = [1, 8], strides = [1, 1]} : vector<4x8xf32> to vector<1x8xf32>
    %1260 = vector.extract_strided_slice %1257 {offsets = [2, 0], sizes = [1, 8], strides = [1, 1]} : vector<4x8xf32> to vector<1x8xf32>
    %cst_208 = arith.constant 2.000000e+00 : f32
    %1261 = vector.broadcast %cst_208 : f32 to vector<1x8xf32>
    %1262 = arith.mulf %1260, %1261 : vector<1x8xf32>
    %cst_209 = arith.constant 1.000000e+00 : f32
    %1263 = vector.broadcast %cst_209 : f32 to vector<1x8xf32>
    %1264 = arith.subf %1262, %1263 : vector<1x8xf32>
    %1265 = vector.extract_strided_slice %1257 {offsets = [3, 0], sizes = [1, 8], strides = [1, 1]} : vector<4x8xf32> to vector<1x8xf32>
    %1266 = arith.mulf %1259, %1241 : vector<1x8xf32>
    %1267 = arith.mulf %1258, %1264 : vector<1x8xf32>
    %1268 = arith.addf %1266, %1267 : vector<1x8xf32>
    %1269 = math.tanh %1268 : vector<1x8xf32>
    %1270 = arith.mulf %1265, %1269 : vector<1x8xf32>
    %c50 = arith.constant 50 : index
    %1271 = memref.load %arg1[%c50] : memref<65xf32, #tpu.memory_space<smem>>
    %1272 = vector.broadcast %1271 : f32 to vector<1x8xf32>
    %1273 = arith.mulf %1270, %1272 : vector<1x8xf32>
    %1274 = arith.addf %1247, %1273 : vector<1x8xf32>
    %c184 = arith.constant 184 : index
    %c0_210 = arith.constant 0 : index
    %1275 = vector.load %arg6[%c184, %c0_210] : memref<256x8xf32, #tpu.memory_space<vmem>>, vector<4x8xf32>
    %1276 = vector.shape_cast %1270 : vector<1x8xf32> to vector<1x8xf32>
    %1277 = vector.broadcast %1276 : vector<1x8xf32> to vector<4x8xf32>
    %1278 = arith.mulf %1277, %29 : vector<4x8xf32>
    %1279 = arith.addf %1275, %1278 : vector<4x8xf32>
    %1280 = arith.negf %1279 : vector<4x8xf32>
    %1281 = math.exp %1280 : vector<4x8xf32>
    %cst_211 = arith.constant 1.000000e+00 : f32
    %1282 = vector.broadcast %cst_211 : f32 to vector<4x8xf32>
    %1283 = arith.addf %1282, %1281 : vector<4x8xf32>
    %1284 = arith.divf %1282, %1283 : vector<4x8xf32>
    %1285 = vector.extract_strided_slice %1284 {offsets = [0, 0], sizes = [1, 8], strides = [1, 1]} : vector<4x8xf32> to vector<1x8xf32>
    %1286 = vector.extract_strided_slice %1284 {offsets = [1, 0], sizes = [1, 8], strides = [1, 1]} : vector<4x8xf32> to vector<1x8xf32>
    %1287 = vector.extract_strided_slice %1284 {offsets = [2, 0], sizes = [1, 8], strides = [1, 1]} : vector<4x8xf32> to vector<1x8xf32>
    %cst_212 = arith.constant 2.000000e+00 : f32
    %1288 = vector.broadcast %cst_212 : f32 to vector<1x8xf32>
    %1289 = arith.mulf %1287, %1288 : vector<1x8xf32>
    %cst_213 = arith.constant 1.000000e+00 : f32
    %1290 = vector.broadcast %cst_213 : f32 to vector<1x8xf32>
    %1291 = arith.subf %1289, %1290 : vector<1x8xf32>
    %1292 = vector.extract_strided_slice %1284 {offsets = [3, 0], sizes = [1, 8], strides = [1, 1]} : vector<4x8xf32> to vector<1x8xf32>
    %1293 = arith.mulf %1286, %1268 : vector<1x8xf32>
    %1294 = arith.mulf %1285, %1291 : vector<1x8xf32>
    %1295 = arith.addf %1293, %1294 : vector<1x8xf32>
    %1296 = math.tanh %1295 : vector<1x8xf32>
    %1297 = arith.mulf %1292, %1296 : vector<1x8xf32>
    %c51 = arith.constant 51 : index
    %1298 = memref.load %arg1[%c51] : memref<65xf32, #tpu.memory_space<smem>>
    %1299 = vector.broadcast %1298 : f32 to vector<1x8xf32>
    %1300 = arith.mulf %1297, %1299 : vector<1x8xf32>
    %1301 = arith.addf %1274, %1300 : vector<1x8xf32>
    %c188 = arith.constant 188 : index
    %c0_214 = arith.constant 0 : index
    %1302 = vector.load %arg6[%c188, %c0_214] : memref<256x8xf32, #tpu.memory_space<vmem>>, vector<4x8xf32>
    %1303 = vector.shape_cast %1297 : vector<1x8xf32> to vector<1x8xf32>
    %1304 = vector.broadcast %1303 : vector<1x8xf32> to vector<4x8xf32>
    %1305 = arith.mulf %1304, %29 : vector<4x8xf32>
    %1306 = arith.addf %1302, %1305 : vector<4x8xf32>
    %1307 = arith.negf %1306 : vector<4x8xf32>
    %1308 = math.exp %1307 : vector<4x8xf32>
    %cst_215 = arith.constant 1.000000e+00 : f32
    %1309 = vector.broadcast %cst_215 : f32 to vector<4x8xf32>
    %1310 = arith.addf %1309, %1308 : vector<4x8xf32>
    %1311 = arith.divf %1309, %1310 : vector<4x8xf32>
    %1312 = vector.extract_strided_slice %1311 {offsets = [0, 0], sizes = [1, 8], strides = [1, 1]} : vector<4x8xf32> to vector<1x8xf32>
    %1313 = vector.extract_strided_slice %1311 {offsets = [1, 0], sizes = [1, 8], strides = [1, 1]} : vector<4x8xf32> to vector<1x8xf32>
    %1314 = vector.extract_strided_slice %1311 {offsets = [2, 0], sizes = [1, 8], strides = [1, 1]} : vector<4x8xf32> to vector<1x8xf32>
    %cst_216 = arith.constant 2.000000e+00 : f32
    %1315 = vector.broadcast %cst_216 : f32 to vector<1x8xf32>
    %1316 = arith.mulf %1314, %1315 : vector<1x8xf32>
    %cst_217 = arith.constant 1.000000e+00 : f32
    %1317 = vector.broadcast %cst_217 : f32 to vector<1x8xf32>
    %1318 = arith.subf %1316, %1317 : vector<1x8xf32>
    %1319 = vector.extract_strided_slice %1311 {offsets = [3, 0], sizes = [1, 8], strides = [1, 1]} : vector<4x8xf32> to vector<1x8xf32>
    %1320 = arith.mulf %1313, %1295 : vector<1x8xf32>
    %1321 = arith.mulf %1312, %1318 : vector<1x8xf32>
    %1322 = arith.addf %1320, %1321 : vector<1x8xf32>
    %1323 = math.tanh %1322 : vector<1x8xf32>
    %1324 = arith.mulf %1319, %1323 : vector<1x8xf32>
    %c52_218 = arith.constant 52 : index
    %1325 = memref.load %arg1[%c52_218] : memref<65xf32, #tpu.memory_space<smem>>
    %1326 = vector.broadcast %1325 : f32 to vector<1x8xf32>
    %1327 = arith.mulf %1324, %1326 : vector<1x8xf32>
    %1328 = arith.addf %1301, %1327 : vector<1x8xf32>
    %c192 = arith.constant 192 : index
    %c0_219 = arith.constant 0 : index
    %1329 = vector.load %arg6[%c192, %c0_219] : memref<256x8xf32, #tpu.memory_space<vmem>>, vector<4x8xf32>
    %1330 = vector.shape_cast %1324 : vector<1x8xf32> to vector<1x8xf32>
    %1331 = vector.broadcast %1330 : vector<1x8xf32> to vector<4x8xf32>
    %1332 = arith.mulf %1331, %29 : vector<4x8xf32>
    %1333 = arith.addf %1329, %1332 : vector<4x8xf32>
    %1334 = arith.negf %1333 : vector<4x8xf32>
    %1335 = math.exp %1334 : vector<4x8xf32>
    %cst_220 = arith.constant 1.000000e+00 : f32
    %1336 = vector.broadcast %cst_220 : f32 to vector<4x8xf32>
    %1337 = arith.addf %1336, %1335 : vector<4x8xf32>
    %1338 = arith.divf %1336, %1337 : vector<4x8xf32>
    %1339 = vector.extract_strided_slice %1338 {offsets = [0, 0], sizes = [1, 8], strides = [1, 1]} : vector<4x8xf32> to vector<1x8xf32>
    %1340 = vector.extract_strided_slice %1338 {offsets = [1, 0], sizes = [1, 8], strides = [1, 1]} : vector<4x8xf32> to vector<1x8xf32>
    %1341 = vector.extract_strided_slice %1338 {offsets = [2, 0], sizes = [1, 8], strides = [1, 1]} : vector<4x8xf32> to vector<1x8xf32>
    %cst_221 = arith.constant 2.000000e+00 : f32
    %1342 = vector.broadcast %cst_221 : f32 to vector<1x8xf32>
    %1343 = arith.mulf %1341, %1342 : vector<1x8xf32>
    %cst_222 = arith.constant 1.000000e+00 : f32
    %1344 = vector.broadcast %cst_222 : f32 to vector<1x8xf32>
    %1345 = arith.subf %1343, %1344 : vector<1x8xf32>
    %1346 = vector.extract_strided_slice %1338 {offsets = [3, 0], sizes = [1, 8], strides = [1, 1]} : vector<4x8xf32> to vector<1x8xf32>
    %1347 = arith.mulf %1340, %1322 : vector<1x8xf32>
    %1348 = arith.mulf %1339, %1345 : vector<1x8xf32>
    %1349 = arith.addf %1347, %1348 : vector<1x8xf32>
    %1350 = math.tanh %1349 : vector<1x8xf32>
    %1351 = arith.mulf %1346, %1350 : vector<1x8xf32>
    %c53 = arith.constant 53 : index
    %1352 = memref.load %arg1[%c53] : memref<65xf32, #tpu.memory_space<smem>>
    %1353 = vector.broadcast %1352 : f32 to vector<1x8xf32>
    %1354 = arith.mulf %1351, %1353 : vector<1x8xf32>
    %1355 = arith.addf %1328, %1354 : vector<1x8xf32>
    %c196 = arith.constant 196 : index
    %c0_223 = arith.constant 0 : index
    %1356 = vector.load %arg6[%c196, %c0_223] : memref<256x8xf32, #tpu.memory_space<vmem>>, vector<4x8xf32>
    %1357 = vector.shape_cast %1351 : vector<1x8xf32> to vector<1x8xf32>
    %1358 = vector.broadcast %1357 : vector<1x8xf32> to vector<4x8xf32>
    %1359 = arith.mulf %1358, %29 : vector<4x8xf32>
    %1360 = arith.addf %1356, %1359 : vector<4x8xf32>
    %1361 = arith.negf %1360 : vector<4x8xf32>
    %1362 = math.exp %1361 : vector<4x8xf32>
    %cst_224 = arith.constant 1.000000e+00 : f32
    %1363 = vector.broadcast %cst_224 : f32 to vector<4x8xf32>
    %1364 = arith.addf %1363, %1362 : vector<4x8xf32>
    %1365 = arith.divf %1363, %1364 : vector<4x8xf32>
    %1366 = vector.extract_strided_slice %1365 {offsets = [0, 0], sizes = [1, 8], strides = [1, 1]} : vector<4x8xf32> to vector<1x8xf32>
    %1367 = vector.extract_strided_slice %1365 {offsets = [1, 0], sizes = [1, 8], strides = [1, 1]} : vector<4x8xf32> to vector<1x8xf32>
    %1368 = vector.extract_strided_slice %1365 {offsets = [2, 0], sizes = [1, 8], strides = [1, 1]} : vector<4x8xf32> to vector<1x8xf32>
    %cst_225 = arith.constant 2.000000e+00 : f32
    %1369 = vector.broadcast %cst_225 : f32 to vector<1x8xf32>
    %1370 = arith.mulf %1368, %1369 : vector<1x8xf32>
    %cst_226 = arith.constant 1.000000e+00 : f32
    %1371 = vector.broadcast %cst_226 : f32 to vector<1x8xf32>
    %1372 = arith.subf %1370, %1371 : vector<1x8xf32>
    %1373 = vector.extract_strided_slice %1365 {offsets = [3, 0], sizes = [1, 8], strides = [1, 1]} : vector<4x8xf32> to vector<1x8xf32>
    %1374 = arith.mulf %1367, %1349 : vector<1x8xf32>
    %1375 = arith.mulf %1366, %1372 : vector<1x8xf32>
    %1376 = arith.addf %1374, %1375 : vector<1x8xf32>
    %1377 = math.tanh %1376 : vector<1x8xf32>
    %1378 = arith.mulf %1373, %1377 : vector<1x8xf32>
    %c54 = arith.constant 54 : index
    %1379 = memref.load %arg1[%c54] : memref<65xf32, #tpu.memory_space<smem>>
    %1380 = vector.broadcast %1379 : f32 to vector<1x8xf32>
    %1381 = arith.mulf %1378, %1380 : vector<1x8xf32>
    %1382 = arith.addf %1355, %1381 : vector<1x8xf32>
    %c200 = arith.constant 200 : index
    %c0_227 = arith.constant 0 : index
    %1383 = vector.load %arg6[%c200, %c0_227] : memref<256x8xf32, #tpu.memory_space<vmem>>, vector<4x8xf32>
    %1384 = vector.shape_cast %1378 : vector<1x8xf32> to vector<1x8xf32>
    %1385 = vector.broadcast %1384 : vector<1x8xf32> to vector<4x8xf32>
    %1386 = arith.mulf %1385, %29 : vector<4x8xf32>
    %1387 = arith.addf %1383, %1386 : vector<4x8xf32>
    %1388 = arith.negf %1387 : vector<4x8xf32>
    %1389 = math.exp %1388 : vector<4x8xf32>
    %cst_228 = arith.constant 1.000000e+00 : f32
    %1390 = vector.broadcast %cst_228 : f32 to vector<4x8xf32>
    %1391 = arith.addf %1390, %1389 : vector<4x8xf32>
    %1392 = arith.divf %1390, %1391 : vector<4x8xf32>
    %1393 = vector.extract_strided_slice %1392 {offsets = [0, 0], sizes = [1, 8], strides = [1, 1]} : vector<4x8xf32> to vector<1x8xf32>
    %1394 = vector.extract_strided_slice %1392 {offsets = [1, 0], sizes = [1, 8], strides = [1, 1]} : vector<4x8xf32> to vector<1x8xf32>
    %1395 = vector.extract_strided_slice %1392 {offsets = [2, 0], sizes = [1, 8], strides = [1, 1]} : vector<4x8xf32> to vector<1x8xf32>
    %cst_229 = arith.constant 2.000000e+00 : f32
    %1396 = vector.broadcast %cst_229 : f32 to vector<1x8xf32>
    %1397 = arith.mulf %1395, %1396 : vector<1x8xf32>
    %cst_230 = arith.constant 1.000000e+00 : f32
    %1398 = vector.broadcast %cst_230 : f32 to vector<1x8xf32>
    %1399 = arith.subf %1397, %1398 : vector<1x8xf32>
    %1400 = vector.extract_strided_slice %1392 {offsets = [3, 0], sizes = [1, 8], strides = [1, 1]} : vector<4x8xf32> to vector<1x8xf32>
    %1401 = arith.mulf %1394, %1376 : vector<1x8xf32>
    %1402 = arith.mulf %1393, %1399 : vector<1x8xf32>
    %1403 = arith.addf %1401, %1402 : vector<1x8xf32>
    %1404 = math.tanh %1403 : vector<1x8xf32>
    %1405 = arith.mulf %1400, %1404 : vector<1x8xf32>
    %c55 = arith.constant 55 : index
    %1406 = memref.load %arg1[%c55] : memref<65xf32, #tpu.memory_space<smem>>
    %1407 = vector.broadcast %1406 : f32 to vector<1x8xf32>
    %1408 = arith.mulf %1405, %1407 : vector<1x8xf32>
    %1409 = arith.addf %1382, %1408 : vector<1x8xf32>
    %c204 = arith.constant 204 : index
    %c0_231 = arith.constant 0 : index
    %1410 = vector.load %arg6[%c204, %c0_231] : memref<256x8xf32, #tpu.memory_space<vmem>>, vector<4x8xf32>
    %1411 = vector.shape_cast %1405 : vector<1x8xf32> to vector<1x8xf32>
    %1412 = vector.broadcast %1411 : vector<1x8xf32> to vector<4x8xf32>
    %1413 = arith.mulf %1412, %29 : vector<4x8xf32>
    %1414 = arith.addf %1410, %1413 : vector<4x8xf32>
    %1415 = arith.negf %1414 : vector<4x8xf32>
    %1416 = math.exp %1415 : vector<4x8xf32>
    %cst_232 = arith.constant 1.000000e+00 : f32
    %1417 = vector.broadcast %cst_232 : f32 to vector<4x8xf32>
    %1418 = arith.addf %1417, %1416 : vector<4x8xf32>
    %1419 = arith.divf %1417, %1418 : vector<4x8xf32>
    %1420 = vector.extract_strided_slice %1419 {offsets = [0, 0], sizes = [1, 8], strides = [1, 1]} : vector<4x8xf32> to vector<1x8xf32>
    %1421 = vector.extract_strided_slice %1419 {offsets = [1, 0], sizes = [1, 8], strides = [1, 1]} : vector<4x8xf32> to vector<1x8xf32>
    %1422 = vector.extract_strided_slice %1419 {offsets = [2, 0], sizes = [1, 8], strides = [1, 1]} : vector<4x8xf32> to vector<1x8xf32>
    %cst_233 = arith.constant 2.000000e+00 : f32
    %1423 = vector.broadcast %cst_233 : f32 to vector<1x8xf32>
    %1424 = arith.mulf %1422, %1423 : vector<1x8xf32>
    %cst_234 = arith.constant 1.000000e+00 : f32
    %1425 = vector.broadcast %cst_234 : f32 to vector<1x8xf32>
    %1426 = arith.subf %1424, %1425 : vector<1x8xf32>
    %1427 = vector.extract_strided_slice %1419 {offsets = [3, 0], sizes = [1, 8], strides = [1, 1]} : vector<4x8xf32> to vector<1x8xf32>
    %1428 = arith.mulf %1421, %1403 : vector<1x8xf32>
    %1429 = arith.mulf %1420, %1426 : vector<1x8xf32>
    %1430 = arith.addf %1428, %1429 : vector<1x8xf32>
    %1431 = math.tanh %1430 : vector<1x8xf32>
    %1432 = arith.mulf %1427, %1431 : vector<1x8xf32>
    %c56_235 = arith.constant 56 : index
    %1433 = memref.load %arg1[%c56_235] : memref<65xf32, #tpu.memory_space<smem>>
    %1434 = vector.broadcast %1433 : f32 to vector<1x8xf32>
    %1435 = arith.mulf %1432, %1434 : vector<1x8xf32>
    %1436 = arith.addf %1409, %1435 : vector<1x8xf32>
    %c208 = arith.constant 208 : index
    %c0_236 = arith.constant 0 : index
    %1437 = vector.load %arg6[%c208, %c0_236] : memref<256x8xf32, #tpu.memory_space<vmem>>, vector<4x8xf32>
    %1438 = vector.shape_cast %1432 : vector<1x8xf32> to vector<1x8xf32>
    %1439 = vector.broadcast %1438 : vector<1x8xf32> to vector<4x8xf32>
    %1440 = arith.mulf %1439, %29 : vector<4x8xf32>
    %1441 = arith.addf %1437, %1440 : vector<4x8xf32>
    %1442 = arith.negf %1441 : vector<4x8xf32>
    %1443 = math.exp %1442 : vector<4x8xf32>
    %cst_237 = arith.constant 1.000000e+00 : f32
    %1444 = vector.broadcast %cst_237 : f32 to vector<4x8xf32>
    %1445 = arith.addf %1444, %1443 : vector<4x8xf32>
    %1446 = arith.divf %1444, %1445 : vector<4x8xf32>
    %1447 = vector.extract_strided_slice %1446 {offsets = [0, 0], sizes = [1, 8], strides = [1, 1]} : vector<4x8xf32> to vector<1x8xf32>
    %1448 = vector.extract_strided_slice %1446 {offsets = [1, 0], sizes = [1, 8], strides = [1, 1]} : vector<4x8xf32> to vector<1x8xf32>
    %1449 = vector.extract_strided_slice %1446 {offsets = [2, 0], sizes = [1, 8], strides = [1, 1]} : vector<4x8xf32> to vector<1x8xf32>
    %cst_238 = arith.constant 2.000000e+00 : f32
    %1450 = vector.broadcast %cst_238 : f32 to vector<1x8xf32>
    %1451 = arith.mulf %1449, %1450 : vector<1x8xf32>
    %cst_239 = arith.constant 1.000000e+00 : f32
    %1452 = vector.broadcast %cst_239 : f32 to vector<1x8xf32>
    %1453 = arith.subf %1451, %1452 : vector<1x8xf32>
    %1454 = vector.extract_strided_slice %1446 {offsets = [3, 0], sizes = [1, 8], strides = [1, 1]} : vector<4x8xf32> to vector<1x8xf32>
    %1455 = arith.mulf %1448, %1430 : vector<1x8xf32>
    %1456 = arith.mulf %1447, %1453 : vector<1x8xf32>
    %1457 = arith.addf %1455, %1456 : vector<1x8xf32>
    %1458 = math.tanh %1457 : vector<1x8xf32>
    %1459 = arith.mulf %1454, %1458 : vector<1x8xf32>
    %c57 = arith.constant 57 : index
    %1460 = memref.load %arg1[%c57] : memref<65xf32, #tpu.memory_space<smem>>
    %1461 = vector.broadcast %1460 : f32 to vector<1x8xf32>
    %1462 = arith.mulf %1459, %1461 : vector<1x8xf32>
    %1463 = arith.addf %1436, %1462 : vector<1x8xf32>
    %c212 = arith.constant 212 : index
    %c0_240 = arith.constant 0 : index
    %1464 = vector.load %arg6[%c212, %c0_240] : memref<256x8xf32, #tpu.memory_space<vmem>>, vector<4x8xf32>
    %1465 = vector.shape_cast %1459 : vector<1x8xf32> to vector<1x8xf32>
    %1466 = vector.broadcast %1465 : vector<1x8xf32> to vector<4x8xf32>
    %1467 = arith.mulf %1466, %29 : vector<4x8xf32>
    %1468 = arith.addf %1464, %1467 : vector<4x8xf32>
    %1469 = arith.negf %1468 : vector<4x8xf32>
    %1470 = math.exp %1469 : vector<4x8xf32>
    %cst_241 = arith.constant 1.000000e+00 : f32
    %1471 = vector.broadcast %cst_241 : f32 to vector<4x8xf32>
    %1472 = arith.addf %1471, %1470 : vector<4x8xf32>
    %1473 = arith.divf %1471, %1472 : vector<4x8xf32>
    %1474 = vector.extract_strided_slice %1473 {offsets = [0, 0], sizes = [1, 8], strides = [1, 1]} : vector<4x8xf32> to vector<1x8xf32>
    %1475 = vector.extract_strided_slice %1473 {offsets = [1, 0], sizes = [1, 8], strides = [1, 1]} : vector<4x8xf32> to vector<1x8xf32>
    %1476 = vector.extract_strided_slice %1473 {offsets = [2, 0], sizes = [1, 8], strides = [1, 1]} : vector<4x8xf32> to vector<1x8xf32>
    %cst_242 = arith.constant 2.000000e+00 : f32
    %1477 = vector.broadcast %cst_242 : f32 to vector<1x8xf32>
    %1478 = arith.mulf %1476, %1477 : vector<1x8xf32>
    %cst_243 = arith.constant 1.000000e+00 : f32
    %1479 = vector.broadcast %cst_243 : f32 to vector<1x8xf32>
    %1480 = arith.subf %1478, %1479 : vector<1x8xf32>
    %1481 = vector.extract_strided_slice %1473 {offsets = [3, 0], sizes = [1, 8], strides = [1, 1]} : vector<4x8xf32> to vector<1x8xf32>
    %1482 = arith.mulf %1475, %1457 : vector<1x8xf32>
    %1483 = arith.mulf %1474, %1480 : vector<1x8xf32>
    %1484 = arith.addf %1482, %1483 : vector<1x8xf32>
    %1485 = math.tanh %1484 : vector<1x8xf32>
    %1486 = arith.mulf %1481, %1485 : vector<1x8xf32>
    %c58 = arith.constant 58 : index
    %1487 = memref.load %arg1[%c58] : memref<65xf32, #tpu.memory_space<smem>>
    %1488 = vector.broadcast %1487 : f32 to vector<1x8xf32>
    %1489 = arith.mulf %1486, %1488 : vector<1x8xf32>
    %1490 = arith.addf %1463, %1489 : vector<1x8xf32>
    %c216 = arith.constant 216 : index
    %c0_244 = arith.constant 0 : index
    %1491 = vector.load %arg6[%c216, %c0_244] : memref<256x8xf32, #tpu.memory_space<vmem>>, vector<4x8xf32>
    %1492 = vector.shape_cast %1486 : vector<1x8xf32> to vector<1x8xf32>
    %1493 = vector.broadcast %1492 : vector<1x8xf32> to vector<4x8xf32>
    %1494 = arith.mulf %1493, %29 : vector<4x8xf32>
    %1495 = arith.addf %1491, %1494 : vector<4x8xf32>
    %1496 = arith.negf %1495 : vector<4x8xf32>
    %1497 = math.exp %1496 : vector<4x8xf32>
    %cst_245 = arith.constant 1.000000e+00 : f32
    %1498 = vector.broadcast %cst_245 : f32 to vector<4x8xf32>
    %1499 = arith.addf %1498, %1497 : vector<4x8xf32>
    %1500 = arith.divf %1498, %1499 : vector<4x8xf32>
    %1501 = vector.extract_strided_slice %1500 {offsets = [0, 0], sizes = [1, 8], strides = [1, 1]} : vector<4x8xf32> to vector<1x8xf32>
    %1502 = vector.extract_strided_slice %1500 {offsets = [1, 0], sizes = [1, 8], strides = [1, 1]} : vector<4x8xf32> to vector<1x8xf32>
    %1503 = vector.extract_strided_slice %1500 {offsets = [2, 0], sizes = [1, 8], strides = [1, 1]} : vector<4x8xf32> to vector<1x8xf32>
    %cst_246 = arith.constant 2.000000e+00 : f32
    %1504 = vector.broadcast %cst_246 : f32 to vector<1x8xf32>
    %1505 = arith.mulf %1503, %1504 : vector<1x8xf32>
    %cst_247 = arith.constant 1.000000e+00 : f32
    %1506 = vector.broadcast %cst_247 : f32 to vector<1x8xf32>
    %1507 = arith.subf %1505, %1506 : vector<1x8xf32>
    %1508 = vector.extract_strided_slice %1500 {offsets = [3, 0], sizes = [1, 8], strides = [1, 1]} : vector<4x8xf32> to vector<1x8xf32>
    %1509 = arith.mulf %1502, %1484 : vector<1x8xf32>
    %1510 = arith.mulf %1501, %1507 : vector<1x8xf32>
    %1511 = arith.addf %1509, %1510 : vector<1x8xf32>
    %1512 = math.tanh %1511 : vector<1x8xf32>
    %1513 = arith.mulf %1508, %1512 : vector<1x8xf32>
    %c59 = arith.constant 59 : index
    %1514 = memref.load %arg1[%c59] : memref<65xf32, #tpu.memory_space<smem>>
    %1515 = vector.broadcast %1514 : f32 to vector<1x8xf32>
    %1516 = arith.mulf %1513, %1515 : vector<1x8xf32>
    %1517 = arith.addf %1490, %1516 : vector<1x8xf32>
    %c220 = arith.constant 220 : index
    %c0_248 = arith.constant 0 : index
    %1518 = vector.load %arg6[%c220, %c0_248] : memref<256x8xf32, #tpu.memory_space<vmem>>, vector<4x8xf32>
    %1519 = vector.shape_cast %1513 : vector<1x8xf32> to vector<1x8xf32>
    %1520 = vector.broadcast %1519 : vector<1x8xf32> to vector<4x8xf32>
    %1521 = arith.mulf %1520, %29 : vector<4x8xf32>
    %1522 = arith.addf %1518, %1521 : vector<4x8xf32>
    %1523 = arith.negf %1522 : vector<4x8xf32>
    %1524 = math.exp %1523 : vector<4x8xf32>
    %cst_249 = arith.constant 1.000000e+00 : f32
    %1525 = vector.broadcast %cst_249 : f32 to vector<4x8xf32>
    %1526 = arith.addf %1525, %1524 : vector<4x8xf32>
    %1527 = arith.divf %1525, %1526 : vector<4x8xf32>
    %1528 = vector.extract_strided_slice %1527 {offsets = [0, 0], sizes = [1, 8], strides = [1, 1]} : vector<4x8xf32> to vector<1x8xf32>
    %1529 = vector.extract_strided_slice %1527 {offsets = [1, 0], sizes = [1, 8], strides = [1, 1]} : vector<4x8xf32> to vector<1x8xf32>
    %1530 = vector.extract_strided_slice %1527 {offsets = [2, 0], sizes = [1, 8], strides = [1, 1]} : vector<4x8xf32> to vector<1x8xf32>
    %cst_250 = arith.constant 2.000000e+00 : f32
    %1531 = vector.broadcast %cst_250 : f32 to vector<1x8xf32>
    %1532 = arith.mulf %1530, %1531 : vector<1x8xf32>
    %cst_251 = arith.constant 1.000000e+00 : f32
    %1533 = vector.broadcast %cst_251 : f32 to vector<1x8xf32>
    %1534 = arith.subf %1532, %1533 : vector<1x8xf32>
    %1535 = vector.extract_strided_slice %1527 {offsets = [3, 0], sizes = [1, 8], strides = [1, 1]} : vector<4x8xf32> to vector<1x8xf32>
    %1536 = arith.mulf %1529, %1511 : vector<1x8xf32>
    %1537 = arith.mulf %1528, %1534 : vector<1x8xf32>
    %1538 = arith.addf %1536, %1537 : vector<1x8xf32>
    %1539 = math.tanh %1538 : vector<1x8xf32>
    %1540 = arith.mulf %1535, %1539 : vector<1x8xf32>
    %c60_252 = arith.constant 60 : index
    %1541 = memref.load %arg1[%c60_252] : memref<65xf32, #tpu.memory_space<smem>>
    %1542 = vector.broadcast %1541 : f32 to vector<1x8xf32>
    %1543 = arith.mulf %1540, %1542 : vector<1x8xf32>
    %1544 = arith.addf %1517, %1543 : vector<1x8xf32>
    %c224 = arith.constant 224 : index
    %c0_253 = arith.constant 0 : index
    %1545 = vector.load %arg6[%c224, %c0_253] : memref<256x8xf32, #tpu.memory_space<vmem>>, vector<4x8xf32>
    %1546 = vector.shape_cast %1540 : vector<1x8xf32> to vector<1x8xf32>
    %1547 = vector.broadcast %1546 : vector<1x8xf32> to vector<4x8xf32>
    %1548 = arith.mulf %1547, %29 : vector<4x8xf32>
    %1549 = arith.addf %1545, %1548 : vector<4x8xf32>
    %1550 = arith.negf %1549 : vector<4x8xf32>
    %1551 = math.exp %1550 : vector<4x8xf32>
    %cst_254 = arith.constant 1.000000e+00 : f32
    %1552 = vector.broadcast %cst_254 : f32 to vector<4x8xf32>
    %1553 = arith.addf %1552, %1551 : vector<4x8xf32>
    %1554 = arith.divf %1552, %1553 : vector<4x8xf32>
    %1555 = vector.extract_strided_slice %1554 {offsets = [0, 0], sizes = [1, 8], strides = [1, 1]} : vector<4x8xf32> to vector<1x8xf32>
    %1556 = vector.extract_strided_slice %1554 {offsets = [1, 0], sizes = [1, 8], strides = [1, 1]} : vector<4x8xf32> to vector<1x8xf32>
    %1557 = vector.extract_strided_slice %1554 {offsets = [2, 0], sizes = [1, 8], strides = [1, 1]} : vector<4x8xf32> to vector<1x8xf32>
    %cst_255 = arith.constant 2.000000e+00 : f32
    %1558 = vector.broadcast %cst_255 : f32 to vector<1x8xf32>
    %1559 = arith.mulf %1557, %1558 : vector<1x8xf32>
    %cst_256 = arith.constant 1.000000e+00 : f32
    %1560 = vector.broadcast %cst_256 : f32 to vector<1x8xf32>
    %1561 = arith.subf %1559, %1560 : vector<1x8xf32>
    %1562 = vector.extract_strided_slice %1554 {offsets = [3, 0], sizes = [1, 8], strides = [1, 1]} : vector<4x8xf32> to vector<1x8xf32>
    %1563 = arith.mulf %1556, %1538 : vector<1x8xf32>
    %1564 = arith.mulf %1555, %1561 : vector<1x8xf32>
    %1565 = arith.addf %1563, %1564 : vector<1x8xf32>
    %1566 = math.tanh %1565 : vector<1x8xf32>
    %1567 = arith.mulf %1562, %1566 : vector<1x8xf32>
    %c61 = arith.constant 61 : index
    %1568 = memref.load %arg1[%c61] : memref<65xf32, #tpu.memory_space<smem>>
    %1569 = vector.broadcast %1568 : f32 to vector<1x8xf32>
    %1570 = arith.mulf %1567, %1569 : vector<1x8xf32>
    %1571 = arith.addf %1544, %1570 : vector<1x8xf32>
    %c228 = arith.constant 228 : index
    %c0_257 = arith.constant 0 : index
    %1572 = vector.load %arg6[%c228, %c0_257] : memref<256x8xf32, #tpu.memory_space<vmem>>, vector<4x8xf32>
    %1573 = vector.shape_cast %1567 : vector<1x8xf32> to vector<1x8xf32>
    %1574 = vector.broadcast %1573 : vector<1x8xf32> to vector<4x8xf32>
    %1575 = arith.mulf %1574, %29 : vector<4x8xf32>
    %1576 = arith.addf %1572, %1575 : vector<4x8xf32>
    %1577 = arith.negf %1576 : vector<4x8xf32>
    %1578 = math.exp %1577 : vector<4x8xf32>
    %cst_258 = arith.constant 1.000000e+00 : f32
    %1579 = vector.broadcast %cst_258 : f32 to vector<4x8xf32>
    %1580 = arith.addf %1579, %1578 : vector<4x8xf32>
    %1581 = arith.divf %1579, %1580 : vector<4x8xf32>
    %1582 = vector.extract_strided_slice %1581 {offsets = [0, 0], sizes = [1, 8], strides = [1, 1]} : vector<4x8xf32> to vector<1x8xf32>
    %1583 = vector.extract_strided_slice %1581 {offsets = [1, 0], sizes = [1, 8], strides = [1, 1]} : vector<4x8xf32> to vector<1x8xf32>
    %1584 = vector.extract_strided_slice %1581 {offsets = [2, 0], sizes = [1, 8], strides = [1, 1]} : vector<4x8xf32> to vector<1x8xf32>
    %cst_259 = arith.constant 2.000000e+00 : f32
    %1585 = vector.broadcast %cst_259 : f32 to vector<1x8xf32>
    %1586 = arith.mulf %1584, %1585 : vector<1x8xf32>
    %cst_260 = arith.constant 1.000000e+00 : f32
    %1587 = vector.broadcast %cst_260 : f32 to vector<1x8xf32>
    %1588 = arith.subf %1586, %1587 : vector<1x8xf32>
    %1589 = vector.extract_strided_slice %1581 {offsets = [3, 0], sizes = [1, 8], strides = [1, 1]} : vector<4x8xf32> to vector<1x8xf32>
    %1590 = arith.mulf %1583, %1565 : vector<1x8xf32>
    %1591 = arith.mulf %1582, %1588 : vector<1x8xf32>
    %1592 = arith.addf %1590, %1591 : vector<1x8xf32>
    %1593 = math.tanh %1592 : vector<1x8xf32>
    %1594 = arith.mulf %1589, %1593 : vector<1x8xf32>
    %c62 = arith.constant 62 : index
    %1595 = memref.load %arg1[%c62] : memref<65xf32, #tpu.memory_space<smem>>
    %1596 = vector.broadcast %1595 : f32 to vector<1x8xf32>
    %1597 = arith.mulf %1594, %1596 : vector<1x8xf32>
    %1598 = arith.addf %1571, %1597 : vector<1x8xf32>
    %c232 = arith.constant 232 : index
    %c0_261 = arith.constant 0 : index
    %1599 = vector.load %arg6[%c232, %c0_261] : memref<256x8xf32, #tpu.memory_space<vmem>>, vector<4x8xf32>
    %1600 = vector.shape_cast %1594 : vector<1x8xf32> to vector<1x8xf32>
    %1601 = vector.broadcast %1600 : vector<1x8xf32> to vector<4x8xf32>
    %1602 = arith.mulf %1601, %29 : vector<4x8xf32>
    %1603 = arith.addf %1599, %1602 : vector<4x8xf32>
    %1604 = arith.negf %1603 : vector<4x8xf32>
    %1605 = math.exp %1604 : vector<4x8xf32>
    %cst_262 = arith.constant 1.000000e+00 : f32
    %1606 = vector.broadcast %cst_262 : f32 to vector<4x8xf32>
    %1607 = arith.addf %1606, %1605 : vector<4x8xf32>
    %1608 = arith.divf %1606, %1607 : vector<4x8xf32>
    %1609 = vector.extract_strided_slice %1608 {offsets = [0, 0], sizes = [1, 8], strides = [1, 1]} : vector<4x8xf32> to vector<1x8xf32>
    %1610 = vector.extract_strided_slice %1608 {offsets = [1, 0], sizes = [1, 8], strides = [1, 1]} : vector<4x8xf32> to vector<1x8xf32>
    %1611 = vector.extract_strided_slice %1608 {offsets = [2, 0], sizes = [1, 8], strides = [1, 1]} : vector<4x8xf32> to vector<1x8xf32>
    %cst_263 = arith.constant 2.000000e+00 : f32
    %1612 = vector.broadcast %cst_263 : f32 to vector<1x8xf32>
    %1613 = arith.mulf %1611, %1612 : vector<1x8xf32>
    %cst_264 = arith.constant 1.000000e+00 : f32
    %1614 = vector.broadcast %cst_264 : f32 to vector<1x8xf32>
    %1615 = arith.subf %1613, %1614 : vector<1x8xf32>
    %1616 = vector.extract_strided_slice %1608 {offsets = [3, 0], sizes = [1, 8], strides = [1, 1]} : vector<4x8xf32> to vector<1x8xf32>
    %1617 = arith.mulf %1610, %1592 : vector<1x8xf32>
    %1618 = arith.mulf %1609, %1615 : vector<1x8xf32>
    %1619 = arith.addf %1617, %1618 : vector<1x8xf32>
    %1620 = math.tanh %1619 : vector<1x8xf32>
    %1621 = arith.mulf %1616, %1620 : vector<1x8xf32>
    %c63 = arith.constant 63 : index
    %1622 = memref.load %arg1[%c63] : memref<65xf32, #tpu.memory_space<smem>>
    %1623 = vector.broadcast %1622 : f32 to vector<1x8xf32>
    %1624 = arith.mulf %1621, %1623 : vector<1x8xf32>
    %1625 = arith.addf %1598, %1624 : vector<1x8xf32>
    %c236 = arith.constant 236 : index
    %c0_265 = arith.constant 0 : index
    %1626 = vector.load %arg6[%c236, %c0_265] : memref<256x8xf32, #tpu.memory_space<vmem>>, vector<4x8xf32>
    %1627 = vector.shape_cast %1621 : vector<1x8xf32> to vector<1x8xf32>
    %1628 = vector.broadcast %1627 : vector<1x8xf32> to vector<4x8xf32>
    %1629 = arith.mulf %1628, %29 : vector<4x8xf32>
    %1630 = arith.addf %1626, %1629 : vector<4x8xf32>
    %1631 = arith.negf %1630 : vector<4x8xf32>
    %1632 = math.exp %1631 : vector<4x8xf32>
    %cst_266 = arith.constant 1.000000e+00 : f32
    %1633 = vector.broadcast %cst_266 : f32 to vector<4x8xf32>
    %1634 = arith.addf %1633, %1632 : vector<4x8xf32>
    %1635 = arith.divf %1633, %1634 : vector<4x8xf32>
    %1636 = vector.extract_strided_slice %1635 {offsets = [0, 0], sizes = [1, 8], strides = [1, 1]} : vector<4x8xf32> to vector<1x8xf32>
    %1637 = vector.extract_strided_slice %1635 {offsets = [1, 0], sizes = [1, 8], strides = [1, 1]} : vector<4x8xf32> to vector<1x8xf32>
    %1638 = vector.extract_strided_slice %1635 {offsets = [2, 0], sizes = [1, 8], strides = [1, 1]} : vector<4x8xf32> to vector<1x8xf32>
    %cst_267 = arith.constant 2.000000e+00 : f32
    %1639 = vector.broadcast %cst_267 : f32 to vector<1x8xf32>
    %1640 = arith.mulf %1638, %1639 : vector<1x8xf32>
    %cst_268 = arith.constant 1.000000e+00 : f32
    %1641 = vector.broadcast %cst_268 : f32 to vector<1x8xf32>
    %1642 = arith.subf %1640, %1641 : vector<1x8xf32>
    %1643 = vector.extract_strided_slice %1635 {offsets = [3, 0], sizes = [1, 8], strides = [1, 1]} : vector<4x8xf32> to vector<1x8xf32>
    %1644 = arith.mulf %1637, %1619 : vector<1x8xf32>
    %1645 = arith.mulf %1636, %1642 : vector<1x8xf32>
    %1646 = arith.addf %1644, %1645 : vector<1x8xf32>
    %1647 = math.tanh %1646 : vector<1x8xf32>
    %1648 = arith.mulf %1643, %1647 : vector<1x8xf32>
    %c64_269 = arith.constant 64 : index
    %1649 = memref.load %arg1[%c64_269] : memref<65xf32, #tpu.memory_space<smem>>
    %1650 = vector.broadcast %1649 : f32 to vector<1x8xf32>
    %1651 = arith.mulf %1648, %1650 : vector<1x8xf32>
    %1652 = arith.addf %1625, %1651 : vector<1x8xf32>
    %c4_270 = arith.constant 4 : index
    %1653 = memref.load %arg1[%c4_270] : memref<65xf32, #tpu.memory_space<smem>>
    %1654 = vector.broadcast %1653 : f32 to vector<1x8xf32>
    %1655 = arith.addf %1652, %1654 : vector<1x8xf32>
    %1656 = vector.shape_cast %1655 : vector<1x8xf32> to vector<1x1x8xf32>
    %c0_271 = arith.constant 0 : index
    %c0_272 = arith.constant 0 : index
    %c0_273 = arith.constant 0 : index
    %1657 = vector.load %arg5[%c0_271, %c0_272, %c0_273] : memref<1x1x8xf32, #tpu.memory_space<vmem>>, vector<1x1x8xf32>
    tpu.vector_store %arg5[%c0_271, %c0_272, %c0_273], %1656 {strides = array<i32>} : memref<1x1x8xf32, #tpu.memory_space<vmem>>, vector<1x1x8xf32>,
    return
  }
  func.func @transform_0(%arg0: i32, %arg1: memref<65xf32, #tpu.memory_space<smem>>) -> (i32, i32, i32) {
    %c0_i32 = arith.constant 0 : i32
    %c0_i32_0 = arith.constant 0 : i32
    %c0_i32_1 = arith.constant 0 : i32
    return %arg0, %c0_i32, %c0_i32_0 : i32, i32, i32
  }
  func.func @transform_1(%arg0: i32, %arg1: memref<65xf32, #tpu.memory_space<smem>>) -> (i32, i32) {
    %c0_i32 = arith.constant 0 : i32
    %c0_i32_0 = arith.constant 0 : i32
    %c0_i32_1 = arith.constant 0 : i32
    return %c0_i32, %c0_i32_0 : i32, i32
  }
  func.func @transform_2(%arg0: i32, %arg1: memref<65xf32, #tpu.memory_space<smem>>) -> (i32, i32) {
    %c0_i32 = arith.constant 0 : i32
    %c0_i32_0 = arith.constant 0 : i32
    %c0_i32_1 = arith.constant 0 : i32
    return %c0_i32, %c0_i32_0 : i32, i32
  }
  func.func @transform_3(%arg0: i32, %arg1: memref<65xf32, #tpu.memory_space<smem>>) -> (i32, i32, i32) {
    %c0_i32 = arith.constant 0 : i32
    %c0_i32_0 = arith.constant 0 : i32
    %c0_i32_1 = arith.constant 0 : i32
    return %arg0, %c0_i32, %c0_i32_0 : i32, i32, i32
  }
}

</mosaic_0001>

<bundles_post_ra>
// kernel: t2v_lstm_forward.1
= control target key start
LH: loop header
LB: loop body
LE: loop exit
PB: predicated region body
PF: predicated region fallthrough
CT: control target
= control target key end

     0   :  { %s5926_s0 = inlined_call_operand.vmem [shape: f32[65], index: 0, kind: input, shape index: {}]   ;;  %s5927_s1 = inlined_call_operand.vmem [shape: f32[4,60,8], index: 1, kind: input, shape index: {}]   ;;  %s5928_s2 = inlined_call_operand.vmem [shape: f32[128,60], index: 2, kind: input, shape index: {}]   ;;  %s5929_s3 = inlined_call_operand.vmem [shape: f32[256,136], index: 3, kind: input, shape index: {}]   ;;  %s5930_s4 = inlined_call_operand.hbm [shape: f32[4,1,8], index: 4, kind: output, shape index: {}]  }
   0x1   :  { %s9_s17 = sshll.u32 %s5926_s0, 4  ;;  %s10_s17 = int_to_ptr.vmem [resolvable:$true] %s9_s17 }
   0x2   :  { %s4585_s18 = scalar_lea.vmem %s10_s17, 16  ;;  %p4590_p1 = scmp.lt.s32.totalorder %s10_s17, %s10_s17 }
   0x3   :  { %p4586_p0 = scmp.ne.s32.totalorder %s10_s17, %s4585_s18  ;;  %p4591_p2 = scmp.lt.s32.totalorder %s4585_s18, %s4585_s18 }
   0x5   :  { %p4592_p3 = por %p4591_p2, %p4590_p1 }
   0x7   :  { %p4593_p4 = pnand %p4592_p3, %p4586_p0 }
   0x9   :  { %4596 = shalt.err (!%p4593_p4)  }
   0xa   :  { %s4663_s19 = smov [#allocation4]  }
   0xb   :  { %12 = dma.vmem_to_smem %s10_s17, 16, %s4663_s19, [#allocation3] }
   0xc   :  { %4641 = dma.done.wait [#allocation3], 16 }
   0xd   :  { %4642 = vsyncadd [#allocation3], 4294967280 }
   0xe   :  { %14 = sfence }
   0xf   :  { %15 = vsyncpa [#allocation6], 0 }
  0x10   :  { %17 = vsyncpa [#allocation6 + $0x1], 0  ;;  %s4703_s20 = smov 0   ;;  %s4705_s21 = smov 0  }
  0x11   :  { %s4707_s0 = smov 0   ;;  %s4709_s22 = smov 0  }
  0x12 LB: > { %s4724_s23 = sadd.s32 4294967295, %s4661_s22   ;;  %s3712_s24 = sadd.s32 4294967294, %s4661_s22   ;;  %s4661_s22 = sphi %s4709_s22, %s5950_s22   ;;  %s4657_s0 = sphi %s4707_s0, %s5949_s0   ;;  %s4653_s21 = sphi %s4705_s21, %s5948_s21   ;;  %s4649_s20 = sphi %s4703_s20, %s5947_s20  }
  0x13   : > { %s4728_s25 = sadd.s32 1, %s4661_s22   ;;  %s98_s26 = sadd.s32 1, %s4657_s0 }
  0x14   : > { %s95_s27 = ssub.s32 %s4661_s22, %s4728_s25  ;;  %p108_p5 = scmp.ne.s32.totalorder %s4657_s0, %s4653_s21 }
  0x15   : > { %p96_p6 = scmp.eq.s32.totalorder %s95_s27, 0  ;;  %p109_p7 = scmp.eq.s32.totalorder %s4724_s23, 3 }
  0x16   : > { %p114_p8 = scmp.ne.s32.totalorder %s4653_s21, %s4649_s20  ;;  %p115_p9 = scmp.eq.s32.totalorder %s3712_s24, 3 }
  0x17   : > { %s4739_s28 = scalar_select %p96_p6, %s4657_s0, %s98_s26  }
  0x18   : > { %p4741_p10 = por %p109_p7, %p108_p5  ;;  %p4745_p11 = por %p115_p9, %p114_p8 }
  0x19   : > { %p3715_p12 = scmp.ge.s32.totalorder %s4661_s22, 1  ;;  %p147_p13 = scmp.lt.s32.totalorder %s4661_s22, 5 }
  0x1b   : > { %p148_p0 = pnand %p3715_p12, %p147_p13 }
  0x1c   : > { %p170_p1 = scmp.lt.s32.totalorder (!%p148_p0), %s4724_s23, 3  ;;  %v183_v0 = vld [vmem:[%s5928_s2] sm:$0xff] (!%p148_p0)  ;;  %vm199_vm0 = vcmask (!%p148_p0), 490496   ;;  %vm248_vm1 = vcmask (!%p148_p0), 1043456   ;;  %vm4664_vm2 = vmmov (!%p148_p0), 1   ;;  %v184_v13 = vld [vmem:[%s5928_s2 + $0x8] sm:$0xff] (!%p148_p0) }
  0x1d   : > { %151 = sbr.rel (%p148_p0) target bundleno = 4295 (0x10c7), region = 32  ;;  %4027 = vmatprep.mubr.msk.f32.mxu0 (!%p148_p0), %vm199_vm0, %v183_v0  ;;  %vm4064_vm3 = vmpackc.low (!%p148_p0), %vm248_vm1, %vm4664_vm2  ;;  %v185_v14 = vld [vmem:[%s5928_s2 + $0x10] sm:$0xff] (!%p148_p0)  ;;  %v186_v15 = vld [vmem:[%s5928_s2 + $0x18] sm:$0xff] (!%p148_p0)  ;;  %v4665_v28 = vmov (!%p148_p0), 0.0|0.0   ;;  %s3800_s18 = sld [smem:[#allocation4 + $0x2]] (!%p148_p0) }
  0x1e   : > { %v187_v16 = vld [vmem:[%s5928_s2 + $0x20] sm:$0xff] (!%p148_p0)  ;;  %v188_v17 = vld [vmem:[%s5928_s2 + $0x28] sm:$0xff] (!%p148_p0)  ;;  %v189_v18 = vld [vmem:[%s5928_s2 + $0x30] sm:$0xff] (!%p148_p0)  ;;  %4093 = vmatprep.subr.bf16.mxu1 (!%p148_p0), %v4665_v28  ;;  %s3801_s19 = sld [smem:[#allocation4 + $0x3]] (!%p148_p0)  ;;  %s3799_s24 = sld [smem:[#allocation4 + $0x1]] (!%p148_p0) }
  0x1f   : > { %v190_v19 = vld [vmem:[%s5928_s2 + $0x38] sm:$0xff] (!%p148_p0)  ;;  %v191_v20 = vld [vmem:[%s5928_s2 + $0x40] sm:$0xff] (!%p148_p0)  ;;  %v192_v21 = vld [vmem:[%s5928_s2 + $0x48] sm:$0xff] (!%p148_p0)  ;;  %s1649_s26 = sld [smem:[#allocation4]] (!%p148_p0)  ;;  %s3807_s9 = sld [smem:[#allocation4 + $0x6]] (!%p148_p0) }
  0x20   : > { %v193_v22 = vld [vmem:[%s5928_s2 + $0x50] sm:$0xff] (!%p148_p0)  ;;  %v194_v23 = vld [vmem:[%s5928_s2 + $0x58] sm:$0xff] (!%p148_p0)  ;;  %v195_v24 = vld [vmem:[%s5928_s2 + $0x60] sm:$0xff] (!%p148_p0)  ;;  %s3810_s14 = sld [smem:[#allocation4 + $0x7]] (!%p148_p0)  ;;  %s3813_s15 = sld [smem:[#allocation4 + $0x8]] (!%p148_p0) }
  0x21   : > { %v196_v25 = vld [vmem:[%s5928_s2 + $0x68] sm:$0xff] (!%p148_p0)  ;;  %v197_v26 = vld [vmem:[%s5928_s2 + $0x70] sm:$0xff] (!%p148_p0)  ;;  %v198_v27 = vld [vmem:[%s5928_s2 + $0x78] sm:$0xff] (!%p148_p0)  ;;  %s3948_s12 = sld [smem:[#allocation4 + $0x35]] (!%p148_p0)  ;;  %s3951_s5 = sld [smem:[#allocation4 + $0x36]] (!%p148_p0) }
  0x22   : > { %s3960_s10 = sld [smem:[#allocation4 + $0x39]] (!%p148_p0)  ;;  %s3969_s13 = sld [smem:[#allocation4 + $0x3c]] (!%p148_p0) }
  0x23   : > { %s3978_s16 = sld [smem:[#allocation4 + $0x3f]] (!%p148_p0)  ;;  %s3981_s17 = sld [smem:[#allocation4 + $0x40]] (!%p148_p0) }
  0x24   : > { %s171_s7 = scalar_select %p170_p1, %s4724_s23, 3 }
  0x26   : > { %s3986_s8 = sshll.u32 %s171_s7, 6 }
  0x27   : > { %s174_s11 = scalar_lea.vmem %s5927_s1, %s3986_s8  ;;  %s3804_s8 = sld [smem:[#allocation4 + $0x5]] }
  0x28   : > { %v175_v1 = vld [vmem:[%s174_s11] sm:$0xff]  ;;  %v176_v2 = vld [vmem:[%s174_s11 + $0x8] sm:$0xff]  ;;  %v177_v3 = vld [vmem:[%s174_s11 + $0x10] sm:$0xff] }
  0x29   : > { %v4051_v4 = vpack.c.bf16 %v176_v2, %v175_v1  ;;  %v178_v5 = vld [vmem:[%s174_s11 + $0x18] sm:$0xff]  ;;  %v179_v7 = vld [vmem:[%s174_s11 + $0x20] sm:$0xff]  ;;  %v180_v8 = vld [vmem:[%s174_s11 + $0x28] sm:$0xff] }
  0x2a   : > { %v4055_v6 = vpack.c.bf16 %v178_v5, %v177_v3  ;;  %v4059_v9 = vpack.c.bf16 %v180_v8, %v179_v7  ;;  %v181_v10 = vld [vmem:[%s174_s11 + $0x30] sm:$0xff]  ;;  %v182_v11 = vld [vmem:[%s174_s11 + $0x38] sm:$0xf]  ;;  %s3963_s11 = sld [smem:[#allocation4 + $0x3a]] }
  0x2b   : > { %4052 = vmatprep.subr.bf16.mxu0 %v4051_v4  ;;  %v4063_v12 = vpack.c.bf16 %v182_v11, %v181_v10 }
  0x2c   : > { %4054 = vmatpush3.bf16.msra.mxu0 %v4051_v4 }
  0x2d   : > { %4056 = vmatprep.subr.bf16.mxu0 %v4055_v6 }
  0x30   : > { %4058 = vmatpush3.bf16.msra.mxu0 %v4055_v6 }
  0x31   : > { %4060 = vmatprep.subr.bf16.mxu0 %v4059_v9 }
  0x34   : > { %4062 = vmatpush3.bf16.msra.mxu0 %v4059_v9  ;;  %v4666_v9 = vmov 683565275  }
  0x35   : > { %4065 = vmatprep.subr.msk.bf16.mxu0 %vm4064_vm3, %v4063_v12 }
  0x38   : > { %4068 = vmatpush3.bf16.msk.msra.mxu0 %vm4064_vm3, %v4063_v12 }
  0x39   : > { %4069 = vmatprep.subr.bf16.mxu0 %v4665_v28 }
  0x3b   : > { %4028 = vmatmul.mubr.msk.f32.vlgmr.msra.gmra.mrb[0].mxu0 %vm199_vm0, %v184_v13 }
  0x3c   : > { %4030 = vmatprep.mubr.msk.f32.mxu0 %vm199_vm0, %v185_v14  ;;  %v4667_v14 = vmov 2475754826  }
  0x3f   : > { %4031 = vmatmul.mubr.msk.f32.gmra.mrb[2].mxu0 %vm199_vm0, %v186_v15 }
  0x40   : > { %4033 = vmatprep.mubr.msk.f32.mxu0 %vm199_vm0, %v187_v16  ;;  %v4668_v16 = vmov 2131351028  }
  0x43   : > { %4034 = vmatmul.mubr.msk.f32.gmra.mrb[4].mxu0 %vm199_vm0, %v188_v17 }
  0x44   : > { %4036 = vmatprep.mubr.msk.f32.mxu0 %vm199_vm0, %v189_v18  ;;  %v4669_v18 = vmov 2102212464  }
  0x47   : > { %4037 = vmatmul.mubr.msk.f32.gmra.mrb[6].mxu0 %vm199_vm0, %v190_v19 }
  0x48   : > { %4039 = vmatprep.mubr.msk.f32.mxu0 %vm199_vm0, %v191_v20  ;;  %v4670_v20 = vmov 920167782  }
  0x4b   : > { %4040 = vmatmul.mubr.msk.f32.gmra.mrb[8].mxu0 %vm199_vm0, %v192_v21 }
  0x4c   : > { %4042 = vmatprep.mubr.msk.f32.mxu0 %vm199_vm0, %v193_v22 }
  0x4f   : > { %4043 = vmatmul.mubr.msk.f32.gmra.mrb[10].mxu0 %vm199_vm0, %v194_v23 }
  0x50   : > { %4045 = vmatprep.mubr.msk.f32.mxu0 %vm199_vm0, %v195_v24 }
  0x53   : > { %4046 = vmatmul.mubr.msk.f32.gmra.mrb[12].mxu0 %vm199_vm0, %v196_v25 }
  0x54   : > { %4048 = vmatprep.mubr.msk.f32.mxu0 %vm199_vm0, %v197_v26 }
  0x57   : > { %4049 = vmatmul.mubr.msk.f32.gmra.mrb[14].mxu0 %vm199_vm0, %v198_v27  ;;  %v4671_v27 = vmov 1326507024  }
 0x10e   : > { %v4029_v29 = vpop.f32.mrb[0].mxu0 }
 0x10f   : > { %v318_v30 = vpop.f32.mrb[1].mxu0 }
 0x110   : > { %v4070_v31 = vpack.c.bf16 %v4029_v29, %v318_v30 }
 0x112   : > { %v4032_v32 = vpop.f32.mrb[2].mxu0  ;;  %4071 = vmatpush1.bf16.msra.mxu0 %v4070_v31  ;;  %4102 = vmatpush1.bf16.msra.mxu1 %v4070_v31 }
 0x113   : > { %v328_v33 = vpop.f32.mrb[3].mxu0  ;;  %4072 = vmatprep.subr.bf16.mxu0 %v4665_v28  ;;  %4094 = vmatprep.subr.bf16.mxu1 %v4665_v28 }
 0x114   : > { %v4073_v34 = vpack.c.bf16 %v4032_v32, %v328_v33 }
 0x116   : > { %v4035_v35 = vpop.f32.mrb[4].mxu0  ;;  %4074 = vmatpush1.bf16.msra.mxu0 %v4073_v34  ;;  %4103 = vmatpush1.bf16.msra.mxu1 %v4073_v34 }
 0x117   : > { %v338_v36 = vpop.f32.mrb[5].mxu0  ;;  %4075 = vmatprep.subr.bf16.mxu0 %v4665_v28  ;;  %4095 = vmatprep.subr.bf16.mxu1 %v4665_v28 }
 0x118   : > { %v4076_v37 = vpack.c.bf16 %v4035_v35, %v338_v36 }
 0x11a   : > { %v4038_v38 = vpop.f32.mrb[6].mxu0  ;;  %4077 = vmatpush1.bf16.msra.mxu0 %v4076_v37  ;;  %4104 = vmatpush1.bf16.msra.mxu1 %v4076_v37 }
 0x11b   : > { %v348_v39 = vpop.f32.mrb[7].mxu0  ;;  %4078 = vmatprep.subr.bf16.mxu0 %v4665_v28  ;;  %4096 = vmatprep.subr.bf16.mxu1 %v4665_v28 }
 0x11c   : > { %v4079_v40 = vpack.c.bf16 %v4038_v38, %v348_v39 }
 0x11e   : > { %v4828_v41 = vpop.f32.mrb[8].mxu0  ;;  %4080 = vmatpush1.bf16.msra.mxu0 %v4079_v40  ;;  %4105 = vmatpush1.bf16.msra.mxu1 %v4079_v40 }
 0x11f   : > { %v501_v42 = vand.u32 2147483647, %v4828_v41  ;;  %v504_v43 = vand.u32 2139095040, %v4828_v41  ;;  %v4832_v44 = vpop.f32.mrb[9].mxu0  ;;  %4081 = vmatprep.subr.bf16.mxu0 %v4665_v28  ;;  %4097 = vmatprep.subr.bf16.mxu1 %v4665_v28  ;;  %vm503_vm1 = vcmp.lt.s32.totalorder %v4828_v41, 0 }
 0x120   : > { %v397_v45 = vand.u32 2147483647, %v4832_v44  ;;  %v400_v46 = vand.u32 2139095040, %v4832_v44 }
 0x121   : > { %v505_v47 = vshrl.u32 %v504_v43, 23  ;;  %v508_v48 = vand.u32 8388607, %v501_v42 }
 0x122   : > { %v401_v49 = vshrl.u32 %v400_v46, 23  ;;  %v404_v50 = vand.u32 8388607, %v397_v45  ;;  %v4842_v51 = vpop.f32.mrb[10].mxu0 }
 0x123   : > { %v3739_v52 = vadd.s32 4294967169, %v505_v47  ;;  %v4844_v53 = vpop.f32.mrb[11].mxu0  ;;  %v712_v55 = vand.u32 2139095040, %v4842_v51  ;;  %v509_v57 = vor.u32 8388608, %v508_v48 }
 0x124   : > { %v3735_v54 = vadd.s32 4294967169, %v401_v49  ;;  %v405_v58 = vor.u32 8388608, %v404_v50 }
 0x125   : > { %v511_v56 = vadd.s32 1, %v3739_v52  ;;  %v713_v60 = vshrl.u32 %v712_v55, 23  ;;  %v4851_v4 = vshll.u32 %v509_v57, 8 }
 0x126   : > { %v407_v59 = vadd.s32 1, %v3735_v54  ;;  %v4847_v61 = vpop.f32.mrb[12].mxu0  ;;  %v4855_v6 = vshll.u32 %v405_v58, 8 }
 0x127   : > { %vm512_vm4 = vcmp.gt.s32.totalorder %v511_v56, 0  ;;  %v4849_v62 = vpop.f32.mrb[13].mxu0  ;;  %v3747_v0 = vadd.s32 4294967169, %v713_v60 }
 0x128   : > { %v513_v63 = vsel %vm512_vm4, %v511_v56, 0  ;;  %vm408_vm5 = vcmp.gt.s32.totalorder %v407_v59, 0 }
 0x129   : > { %v514_v1 = vshrl.u32 %v513_v63, 5  ;;  %v515_v2 = vand.u32 31, %v513_v63  ;;  %v409_v3 = vsel %vm408_vm5, %v407_v59, 0  ;;  %v4860_v12 = vadd.s32 1, %v3747_v0 }
 0x12a   : > { %v4853_v5 = vshrl.u32 %v409_v3, 5  ;;  %v4857_v7 = vpop.f32.mrb[14].mxu0  ;;  %v411_v11 = vand.u32 31, %v409_v3  ;;  %vm4956_vm5 = vcmp.le.f32.partialorder %v501_v42, 0.7853982 }
 0x12b   : > { %v516_v8 = vsub.s32 32, %v515_v2  ;;  %v518_v10 = vshll.u32 %v4666_v9, %v515_v2  ;;  %v4862_v13 = vpop.f32.mrb[15].mxu0  ;;  %v521_v15 = vshll.u32 %v4667_v14, %v515_v2  ;;  %v524_v17 = vshll.u32 %v4668_v16, %v515_v2 }
 0x12c   : > { %v527_v19 = vshll.u32 %v4669_v18, %v515_v2  ;;  %v530_v21 = vshll.u32 %v4670_v20, %v515_v2  ;;  %vm533_vm6 = vcmp.lt.s32.totalorder %v514_v1, 1  ;;  %vm534_vm7 = vcmp.lt.s32.totalorder %v514_v1, 2 }
 0x12d   : > { %v519_v22 = vshrl.u32 %v4667_v14, %v516_v8  ;;  %v522_v23 = vshrl.u32 %v4668_v16, %v516_v8  ;;  %v525_v24 = vshrl.u32 %v4669_v18, %v516_v8  ;;  %v517_v25 = vshrl.u32 %v4666_v9, %v516_v8 }
 0x12e   : > { %v528_v26 = vshrl.u32 %v4670_v20, %v516_v8  ;;  %v531_v29 = vshrl.u32 %v4671_v27, %v516_v8  ;;  %v412_v33 = vsub.s32 32, %v411_v11  ;;  %vm535_vm8 = vcmp.lt.s32.totalorder %v514_v1, 3 }
 0x12f   : > { %v520_v30 = vor.u32 %v519_v22, %v518_v10  ;;  %v523_v31 = vor.u32 %v522_v23, %v521_v15  ;;  %v526_v32 = vor.u32 %v525_v24, %v524_v17  ;;  %vm536_vm9 = vcmp.lt.s32.totalorder %v514_v1, 4 }
 0x130   : > { %v529_v34 = vor.u32 %v528_v26, %v527_v19  ;;  %v532_v35 = vor.u32 %v531_v29, %v530_v21  ;;  %v414_v47 = vshll.u32 %v4666_v9, %v411_v11  ;;  %v415_v50 = vshrl.u32 %v4667_v14, %v412_v33 }
 0x131   : > { %v537_v36 = vsel %vm533_vm6, %v517_v25, %v520_v30  ;;  %v538_v37 = vsel %vm536_vm9, %v526_v32, 2102212464  ;;  %v541_v38 = vsel %vm533_vm6, %v520_v30, %v523_v31  ;;  %v545_v39 = vsel %vm533_vm6, %v523_v31, %v526_v32 }
 0x132   : > { %v539_v40 = vsel %vm535_vm8, %v523_v31, %v538_v37  ;;  %v542_v43 = vsel %vm536_vm9, %v529_v34, 920167782  ;;  %v546_v46 = vsel %vm536_vm9, %v532_v35, 1326507024  ;;  %v417_v52 = vshll.u32 %v4667_v14, %v411_v11 }
 0x133   : > { %v543_v48 = vsel %vm535_vm8, %v526_v32, %v542_v43  ;;  %v547_v49 = vsel %vm535_vm8, %v529_v34, %v546_v46  ;;  %v540_v54 = vsel %vm534_vm7, %v537_v36, %v539_v40  ;;  %v418_v57 = vshrl.u32 %v4668_v16, %v412_v33 }
 0x134   : > { %v544_v55 = vsel %vm534_vm7, %v541_v38, %v543_v48  ;;  %v548_v56 = vsel %vm534_vm7, %v545_v39, %v547_v49  ;;  %v416_v0 = vor.u32 %v415_v50, %v414_v47  ;;  %v420_v3 = vshll.u32 %v4668_v16, %v411_v11 }
 0x135   : > { %v4885_v58 = vmul.u32.u64.low %v4851_v4, %v548_v56  ;;  %v4886_v59 = vmul.u32.u64.high %v4851_v4, %v548_v56, %v4885_v58  ;;  %v4889_v60 = vmul.u32.u64.low %v4851_v4, %v544_v55  ;;  %v4890_v63 = vmul.u32.u64.high %v4851_v4, %v544_v55, %v4889_v60 }
 0x136   : > { %v419_v2 = vor.u32 %v418_v57, %v417_v52  ;;  %v421_v8 = vshrl.u32 %v4669_v18, %v412_v33  ;;  %v413_v1 = vshrl.u32 %v4666_v9, %v412_v33  ;;  %v423_v10 = vshll.u32 %v4669_v18, %v411_v11 }
 0x137   : > { %v424_v15 = vshrl.u32 %v4670_v20, %v412_v33  ;;  %v427_v17 = vshrl.u32 %v4671_v27, %v412_v33  ;;  %v556_v19 = vmul.u32 %v4851_v4, %v540_v54  ;;  %v426_v22 = vshll.u32 %v4670_v20, %v411_v11 }
 0x138   : > { %v422_v21 = vor.u32 %v421_v8, %v420_v3  ;;  %vm429_vm10 = vcmp.lt.s32.totalorder %v4853_v5, 1  ;;  %vm558_vm11 = vc.u32 %v4886_v59, %v4889_v60  ;;  %v559_v23 = vadd.s32 1, %v4890_v63 }
 0x139   : > { %v425_v24 = vor.u32 %v424_v15, %v423_v10  ;;  %vm430_vm12 = vcmp.lt.s32.totalorder %v4853_v5, 2  ;;  %v428_v25 = vor.u32 %v427_v17, %v426_v22  ;;  %vm431_vm13 = vcmp.lt.s32.totalorder %v4853_v5, 3 }
 0x13a   : > { %vm432_vm14 = vcmp.lt.s32.totalorder %v4853_v5, 4  ;;  %v437_v26 = vsel %vm429_vm10, %v416_v0, %v419_v2  ;;  %v560_v4 = vsel %vm558_vm11, %v559_v23, %v4890_v63  ;;  %v441_v30 = vsel %vm429_vm10, %v419_v2, %v422_v21 }
 0x13b   : > { %v434_v29 = vsel %vm432_vm14, %v422_v21, 2102212464  ;;  %v438_v11 = vsel %vm432_vm14, %v425_v24, 920167782  ;;  %v561_v31 = vadd.s32 %v560_v4, %v556_v19  ;;  %v433_v32 = vsel %vm429_vm10, %v413_v1, %v416_v0 }
 0x13c   : > { %v439_v33 = vsel %vm431_vm13, %v422_v21, %v438_v11  ;;  %v442_v34 = vsel %vm432_vm14, %v428_v25, 1326507024  ;;  %v435_v35 = vsel %vm431_vm13, %v419_v2, %v434_v29  ;;  %vm720_vm15 = vcmp.gt.s32.totalorder %v4860_v12, 0 }
 0x13d   : > { %v440_v36 = vsel %vm430_vm12, %v437_v26, %v439_v33  ;;  %v443_v37 = vsel %vm431_vm13, %v425_v24, %v442_v34  ;;  %v562_v38 = vadd.s32 536870912, %v561_v31  ;;  %v721_v48 = vsel %vm720_vm15, %v4860_v12, 0 }
 0x13e   : > { %v444_v39 = vsel %vm430_vm12, %v441_v30, %v443_v37  ;;  %v4915_v40 = vmul.u32.u64.low %v4855_v6, %v440_v36  ;;  %v4916_v43 = vmul.u32.u64.high %v4855_v6, %v440_v36, %v4915_v40  ;;  %v436_v50 = vsel %vm430_vm12, %v433_v32, %v435_v35 }
 0x13f   : > { %v4920_v46 = vmul.u32.u64.low %v4855_v6, %v444_v39  ;;  %v4921_v47 = vmul.u32.u64.high %v4855_v6, %v444_v39, %v4920_v46  ;;  %v4924_v49 = vshrl.u32 %v562_v38, 30  ;;  %v723_v52 = vand.u32 31, %v721_v48 }
 0x140   : > { %v455_v55 = vadd.s32 1, %v4916_v43  ;;  %v709_v56 = vand.u32 2147483647, %v4842_v51  ;;  %v452_v58 = vmul.u32 %v4855_v6, %v436_v50  ;;  %v608_v6 = vand.u32 2139095040, %v4844_v53 }
 0x141   : > { %v564_v54 = vshll.u32 %v4924_v49, 30  ;;  %v724_v57 = vsub.s32 32, %v723_v52  ;;  %vm454_vm0 = vc.u32 %v4921_v47, %v4915_v40  ;;  %v722_v15 = vshrl.u32 %v721_v48, 5 }
 0x142   : > { %v456_v12 = vsel %vm454_vm0, %v455_v55, %v4916_v43  ;;  %v716_v8 = vand.u32 8388607, %v709_v56  ;;  %v726_v17 = vshll.u32 %v4666_v9, %v723_v52  ;;  %v729_v19 = vshll.u32 %v4667_v14, %v723_v52 }
 0x143   : > { %v4934_v63 = vsub.s32 %v561_v31, %v564_v54  ;;  %v457_v0 = vadd.s32 %v456_v12, %v452_v58  ;;  %v727_v5 = vshrl.u32 %v4667_v14, %v724_v57  ;;  %v730_v2 = vshrl.u32 %v4668_v16, %v724_v57 }
 0x144   : > { %v733_v1 = vshrl.u32 %v4669_v18, %v724_v57  ;;  %v732_v22 = vshll.u32 %v4668_v16, %v723_v52  ;;  %v735_v23 = vshll.u32 %v4669_v18, %v723_v52  ;;  %v736_v24 = vshrl.u32 %v4670_v20, %v724_v57 }
 0x145   : > { %v567_v3 = vsub.s32 0, %v4934_v63  ;;  %v458_v10 = vadd.s32 536870912, %v457_v0  ;;  %v728_v26 = vor.u32 %v727_v5, %v726_v17  ;;  %v731_v4 = vor.u32 %v730_v2, %v729_v19 }
 0x146   : > { %v739_v29 = vshrl.u32 %v4671_v27, %v724_v57  ;;  %v717_v30 = vor.u32 8388608, %v716_v8  ;;  %v734_v31 = vor.u32 %v733_v1, %v732_v22  ;;  %v737_v32 = vor.u32 %v736_v24, %v735_v23 }
 0x147   : > { %v3740_v21 = vmin.u32 %v567_v3, %v4934_v63  ;;  %v459_v25 = vshrl.u32 %v458_v10, 30  ;;  %v587_v33 = vsub.s32 4, %v4924_v49  ;;  %v738_v35 = vshll.u32 %v4670_v20, %v723_v52 }
 0x148   : > { %v609_v36 = vshrl.u32 %v608_v6, 23  ;;  %vm741_vm2 = vcmp.lt.s32.totalorder %v722_v15, 1  ;;  %vm743_vm3 = vcmp.lt.s32.totalorder %v722_v15, 3  ;;  %vm744_vm4 = vcmp.lt.s32.totalorder %v722_v15, 4 }
 0x149   : > { %v569_v11 = vclz %v3740_v21  ;;  %v460_v34 = vshll.u32 %v459_v25, 30  ;;  %v740_v43 = vor.u32 %v739_v29, %v738_v35  ;;  %v749_v46 = vsel %vm741_vm2, %v728_v26, %v731_v4 }
 0x14a   : > { %v750_v48 = vsel %vm744_vm4, %v737_v32, 920167782  ;;  %v757_v52 = vshll.u32 %v717_v30, 8  ;;  %v605_v54 = vand.u32 2147483647, %v4844_v53  ;;  %vm742_vm7 = vcmp.lt.s32.totalorder %v722_v15, 2 }
 0x14b   : > { %v3741_v37 = vadd.s32 4294967294, %v569_v11  ;;  %v4960_v39 = vsub.s32 %v457_v0, %v460_v34  ;;  %v751_v50 = vsel %vm743_vm3, %v734_v31, %v750_v48  ;;  %v746_v42 = vsel %vm744_vm4, %v734_v31, 2102212464 }
 0x14c   : > { %v725_v0 = vshrl.u32 %v4666_v9, %v724_v57  ;;  %v752_v5 = vsel %vm742_vm7, %v749_v46, %v751_v50  ;;  %v753_v2 = vsel %vm741_vm2, %v731_v4, %v734_v31  ;;  %v588_v3 = vsel %vm503_vm1, %v587_v33, %v4924_v49 }
 0x14d   : > { %vm3742_vm6 = vcmp.lt.s32.totalorder %v3741_v37, 0  ;;  %v463_v58 = vsub.s32 0, %v4960_v39  ;;  %v754_v1 = vsel %vm744_vm4, %v740_v43, 1326507024  ;;  %v3743_v6 = vadd.s32 4294967169, %v609_v36 }
 0x14e   : > { %v572_v55 = vsel %vm3742_vm6, 0, %v3741_v37  ;;  %v745_v17 = vsel %vm741_vm2, %v725_v0, %v728_v26  ;;  %v747_v19 = vsel %vm743_vm3, %v731_v4, %v746_v42  ;;  %v755_v57 = vsel %vm743_vm3, %v737_v32, %v754_v1 }
 0x14f   : > { %v577_v12 = vsub.s32 4294967266, %v572_v55  ;;  %v3736_v8 = vmin.u32 %v463_v58, %v4960_v39  ;;  %v573_v10 = vsub.s32 32, %v572_v55  ;;  %v756_v22 = vsel %vm742_vm7, %v753_v2, %v755_v57 }
 0x150   : > { %v4980_v23 = vmul.u32.u64.low %v757_v52, %v752_v5  ;;  %v4981_v24 = vmul.u32.u64.high %v757_v52, %v752_v5, %v4980_v23  ;;  %v483_v49 = vsub.s32 4, %v459_v25  ;;  %v557_v31 = vadd.s32 %v4889_v60, %v4886_v59 }
 0x151   : > { %v465_v21 = vclz %v3736_v8  ;;  %v578_v29 = vadd.s32 127, %v577_v12  ;;  %v4983_v11 = vmul.u32.u64.low %v757_v52, %v756_v22  ;;  %v4984_v30 = vmul.u32.u64.high %v757_v52, %v756_v22, %v4983_v11 }
 0x152   : > { %v748_v26 = vsel %vm742_vm7, %v745_v17, %v747_v19  ;;  %v615_v4 = vadd.s32 1, %v3743_v6  ;;  %v590_v32 = vsel %vm4956_vm5, 0, %v588_v3  ;;  %vm399_vm8 = vcmp.lt.s32.totalorder %v4832_v44, 0 }
 0x153   : > { %v3737_v33 = vadd.s32 4294967294, %v465_v21  ;;  %v612_v34 = vand.u32 8388607, %v605_v54  ;;  %v575_v35 = vshrl.u32 %v557_v31, %v573_v10  ;;  %v767_v36 = vadd.s32 1, %v4981_v24 }
 0x154   : > { %vm616_vm10 = vcmp.gt.s32.totalorder %v615_v4, 0  ;;  %v579_v37 = vshll.u32 %v578_v29, 23  ;;  %v484_v59 = vsel %vm399_vm8, %v483_v49, %v459_v25  ;;  %v764_v60 = vmul.u32 %v757_v52, %v748_v26 }
 0x155   : > { %vm3738_vm9 = vcmp.lt.s32.totalorder %v3737_v33, 0  ;;  %vm766_vm11 = vc.u32 %v4984_v30, %v4980_v23  ;;  %v574_v15 = vshll.u32 %v4934_v63, %v572_v55  ;;  %vm5001_vm12 = vcmp.le.f32.partialorder %v397_v45, 0.7853982 }
 0x156   : > { %v768_v46 = vsel %vm766_vm11, %v767_v36, %v4981_v24  ;;  %v917_v48 = vand.u32 2147483647, %v4847_v61  ;;  %v594_v50 = vadd.s32 3, %v590_v32  ;;  %v468_v58 = vsel %vm3738_vm9, 0, %v3737_v33 }
 0x157   : > { %v769_v42 = vadd.s32 %v768_v46, %v764_v60  ;;  %v617_v12 = vsel %vm616_vm10, %v615_v4, 0  ;;  %v576_v25 = vor.u32 %v575_v35, %v574_v15  ;;  %v486_v52 = vsel %vm5001_vm12, 0, %v484_v59 }
 0x158   : > { %v613_v0 = vor.u32 8388608, %v612_v34  ;;  %v619_v63 = vand.u32 31, %v617_v12  ;;  %v580_v55 = vor.u32 4788187, %v579_v37  ;;  %v453_v45 = vadd.s32 %v4915_v40, %v4921_v47 }
 0x159   : > { %v770_v5 = vadd.s32 536870912, %v769_v42  ;;  %v473_v2 = vsub.s32 4294967266, %v468_v58  ;;  %v5011_v8 = vand.u32 3, %v594_v50  ;;  %v5013_v1 = vadd.s32 3, %v486_v52 }
 0x15a   : > { %v620_v3 = vsub.s32 32, %v619_v63  ;;  %v920_v10 = vand.u32 2139095040, %v4847_v61  ;;  %v583_v17 = vcvt.s32.f32 %v576_v25  ;;  %v469_v19 = vsub.s32 32, %v468_v58 }
 0x15b   : > { %v5015_v6 = vshrl.u32 %v770_v5, 30  ;;  %v5018_v57 = vshll.u32 %v613_v0, 8  ;;  %v5022_v21 = vand.u32 8388607, %v917_v48  ;;  %v581_v22 = vand.u32 2147483647, %v580_v55 }
 0x15c   : > { %v5025_v40 = vadd.s32 %v4980_v23, %v4984_v30  ;;  %v623_v24 = vshrl.u32 %v4667_v14, %v620_v3  ;;  %v474_v29 = vadd.s32 127, %v473_v2  ;;  %v622_v49 = vshll.u32 %v4666_v9, %v619_v63 }
 0x15d   : > { %v772_v47 = vshll.u32 %v5015_v6, 30  ;;  %v626_v11 = vshrl.u32 %v4668_v16, %v620_v3  ;;  %v629_v31 = vshrl.u32 %v4669_v18, %v620_v3  ;;  %v625_v26 = vshll.u32 %v4667_v14, %v619_v63 }
 0x15e   : > { %v628_v4 = vshll.u32 %v4668_v16, %v619_v63  ;;  %v921_v32 = vshrl.u32 %v920_v10, 23  ;;  %v471_v23 = vshrl.u32 %v453_v45, %v469_v19  ;;  %v618_v30 = vshrl.u32 %v617_v12, 5 }
 0x15f   : > { %v5032_v33 = vsub.s32 %v769_v42, %v772_v47  ;;  %v624_v34 = vor.u32 %v623_v24, %v622_v49  ;;  %v631_v35 = vshll.u32 %v4669_v18, %v619_v63  ;;  %v627_v37 = vor.u32 %v626_v11, %v625_v26 }
 0x160   : > { %v630_v59 = vor.u32 %v629_v31, %v628_v4  ;;  %v632_v60 = vshrl.u32 %v4670_v20, %v620_v3  ;;  %v470_v15 = vshll.u32 %v4960_v39, %v468_v58  ;;  %v475_v46 = vshll.u32 %v474_v29, 23 }
 0x161   : > { %v775_v36 = vsub.s32 0, %v5032_v33  ;;  %v634_v50 = vshll.u32 %v4670_v20, %v619_v63  ;;  %v635_v42 = vshrl.u32 %v4671_v27, %v620_v3  ;;  %v5042_v25 = vmul.f32 %v583_v17, %v581_v22 }
 0x162   : > { %v633_v52 = vor.u32 %v632_v60, %v631_v35  ;;  %v3755_v0 = vadd.s32 4294967169, %v921_v32  ;;  %v472_v55 = vor.u32 %v471_v23, %v470_v15  ;;  %vm637_vm13 = vcmp.lt.s32.totalorder %v618_v30, 1 }
 0x163   : > { %v3748_v12 = vmin.u32 %v775_v36, %v5032_v33  ;;  %v636_v5 = vor.u32 %v635_v42, %v634_v50  ;;  %vm640_vm14 = vcmp.lt.s32.totalorder %v618_v30, 4  ;;  %v621_v2 = vshrl.u32 %v4666_v9, %v620_v3 }
 0x164   : > { %v642_v10 = vsel %vm640_vm14, %v630_v59, 2102212464  ;;  %v645_v39 = vsel %vm637_vm13, %v624_v34, %v627_v37  ;;  %v476_v58 = vor.u32 4788187, %v475_v46  ;;  %vm638_vm15 = vcmp.lt.s32.totalorder %v618_v30, 2 }
 0x165   : > { %v777_v45 = vclz %v3748_v12  ;;  %vm639_vm0 = vcmp.lt.s32.totalorder %v618_v30, 3  ;;  %v646_v63 = vsel %vm640_vm14, %v633_v52, 920167782  ;;  %v641_v17 = vsel %vm637_vm13, %v621_v2, %v624_v34 }
 0x166   : > { %v647_v22 = vsel %vm639_vm0, %v630_v59, %v646_v63  ;;  %v649_v47 = vsel %vm637_vm13, %v627_v37, %v630_v59  ;;  %v643_v24 = vsel %vm639_vm0, %v627_v37, %v642_v10  ;;  %v650_v49 = vsel %vm640_vm14, %v636_v5, 1326507024 }
 0x167   : > { %v3749_v19 = vadd.s32 4294967294, %v777_v45  ;;  %v648_v29 = vsel %vm638_vm15, %v645_v39, %v647_v22  ;;  %v927_v11 = vadd.s32 1, %v3755_v0  ;;  %v651_v31 = vsel %vm639_vm0, %v633_v52, %v650_v49 }
 0x168   : > { %v5048_v26 = vmul.u32.u64.low %v5018_v57, %v648_v29  ;;  %v5049_v3 = vmul.u32.u64.high %v5018_v57, %v648_v29, %v5048_v26  ;;  %v477_v4 = vand.u32 2147483647, %v476_v58  ;;  %v652_v23 = vsel %vm638_vm15, %v649_v47, %v651_v31 }
 0x169   : > { %vm3750_vm2 = vcmp.lt.s32.totalorder %v3749_v19, 0  ;;  %vm928_vm3 = vcmp.gt.s32.totalorder %v927_v11, 0  ;;  %v644_v36 = vsel %vm638_vm15, %v641_v17, %v643_v24  ;;  %v479_v59 = vcvt.s32.f32 %v472_v55 }
 0x16a   : > { %v780_v32 = vsel %vm3750_vm2, 0, %v3749_v19  ;;  %v929_v37 = vsel %vm928_vm3, %v927_v11, 0  ;;  %vm711_vm4 = vcmp.lt.s32.totalorder %v4842_v51, 0  ;;  %v585_v50 = vxor.u32 2147483648, %v5042_v25 }
 0x16b   : > { %v781_v34 = vsub.s32 32, %v780_v32  ;;  %v785_v35 = vsub.s32 4294967266, %v780_v32  ;;  %v5056_v60 = vmul.u32.u64.low %v5018_v57, %v652_v23  ;;  %v5057_v15 = vmul.u32.u64.high %v5018_v57, %v652_v23, %v5056_v60 }
 0x16c   : > { %v931_v46 = vand.u32 31, %v929_v37  ;;  %v663_v52 = vadd.s32 1, %v5049_v3  ;;  %v480_v0 = vmul.f32 %v479_v59, %v477_v4  ;;  %v795_v30 = vsub.s32 4, %v5015_v6 }
 0x16d   : > { %v783_v42 = vshrl.u32 %v5025_v40, %v781_v34  ;;  %v786_v12 = vadd.s32 127, %v785_v35  ;;  %v660_v5 = vmul.u32 %v5018_v57, %v644_v36  ;;  %v782_v45 = vshll.u32 %v5032_v33, %v780_v32 }
 0x16e   : > { %v932_v55 = vsub.s32 32, %v931_v46  ;;  %v5065_v10 = vshrl.u32 %v929_v37, 5  ;;  %v934_v39 = vshll.u32 %v4666_v9, %v931_v46  ;;  %vm662_vm6 = vc.u32 %v5057_v15, %v5048_v26 }
 0x16f   : > { %v787_v2 = vshll.u32 %v786_v12, 23  ;;  %v937_v58 = vshll.u32 %v4667_v14, %v931_v46  ;;  %v940_v63 = vshll.u32 %v4668_v16, %v931_v46  ;;  %v784_v19 = vor.u32 %v783_v42, %v782_v45 }
 0x170   : > { %v935_v40 = vshrl.u32 %v4667_v14, %v932_v55  ;;  %v664_v57 = vsel %vm662_vm6, %v663_v52, %v5049_v3  ;;  %v938_v33 = vshrl.u32 %v4668_v16, %v932_v55  ;;  %vm5077_vm7 = vcmp.le.f32.partialorder %v709_v56, 0.7853982 }
 0x171   : > { %v788_v17 = vor.u32 4788187, %v787_v2  ;;  %v665_v47 = vadd.s32 %v664_v57, %v660_v5  ;;  %v941_v24 = vshrl.u32 %v4669_v18, %v932_v55  ;;  %v943_v29 = vshll.u32 %v4669_v18, %v931_v46 }
 0x172   : > { %v944_v49 = vshrl.u32 %v4670_v20, %v932_v55  ;;  %v936_v11 = vor.u32 %v935_v40, %v934_v39  ;;  %v939_v31 = vor.u32 %v938_v33, %v937_v58  ;;  %v946_v4 = vshll.u32 %v4670_v20, %v931_v46 }
 0x173   : > { %v947_v3 = vshrl.u32 %v4671_v27, %v932_v55  ;;  %v789_v32 = vand.u32 2147483647, %v788_v17  ;;  %v666_v23 = vadd.s32 536870912, %v665_v47  ;;  %v942_v34 = vor.u32 %v941_v24, %v940_v63 }
 0x174   : > { %v945_v56 = vor.u32 %v944_v49, %v943_v29  ;;  %v586_v35 = vsel %vm503_vm1, %v585_v50, %v5042_v25  ;;  %v796_v36 = vsel %vm711_vm4, %v795_v30, %v5015_v6  ;;  %v925_v37 = vor.u32 8388608, %v5022_v21 }
 0x175   : > { %v948_v59 = vor.u32 %v947_v3, %v946_v4  ;;  %v791_v60 = vcvt.s32.f32 %v784_v19  ;;  %v667_v42 = vshrl.u32 %v666_v23, 30  ;;  %vm949_vm9 = vcmp.lt.s32.totalorder %v5065_v10, 1 }
 0x176   : > { %vm952_vm10 = vcmp.lt.s32.totalorder %v5065_v10, 4  ;;  %v481_v46 = vxor.u32 2147483648, %v480_v0  ;;  %vm951_vm11 = vcmp.lt.s32.totalorder %v5065_v10, 3  ;;  %v957_v12 = vsel %vm949_vm9, %v936_v11, %v939_v31 }
 0x177   : > { %v958_v25 = vsel %vm952_vm10, %v945_v56, 920167782  ;;  %v792_v50 = vmul.f32 %v791_v60, %v789_v32  ;;  %v668_v52 = vshll.u32 %v667_v42, 30  ;;  %v961_v21 = vsel %vm949_vm9, %v939_v31, %v942_v34 }
 0x178   : > { %v959_v6 = vsel %vm951_vm11, %v942_v34, %v958_v25  ;;  %v589_v30 = vsel %vm4956_vm5, %v4828_v41, %v586_v35  ;;  %vm950_vm1 = vcmp.lt.s32.totalorder %v5065_v10, 2  ;;  %v954_v5 = vsel %vm952_vm10, %v942_v34, 2102212464 }
 0x179   : > { %v962_v45 = vsel %vm952_vm10, %v948_v59, 1326507024  ;;  %vm607_vm13 = vcmp.lt.s32.totalorder %v4844_v53, 0  ;;  %v5107_v2 = vsub.s32 %v665_v47, %v668_v52  ;;  %v933_v39 = vshrl.u32 %v4666_v9, %v932_v55 }
 0x17a   : > { %v960_v40 = vsel %vm950_vm1, %v957_v12, %v959_v6  ;;  %v963_v58 = vsel %vm951_vm11, %v945_v56, %v962_v45  ;;  %v482_v38 = vsel %vm399_vm8, %v481_v46, %v480_v0  ;;  %v798_v63 = vsel %vm5077_vm7, 0, %v796_v36 }
 0x17b   : > { %v964_v19 = vsel %vm950_vm1, %v961_v21, %v963_v58  ;;  %v965_v17 = vshll.u32 %v925_v37, 8  ;;  %v793_v57 = vxor.u32 2147483648, %v792_v50  ;;  %v671_v33 = vsub.s32 0, %v5107_v2 }
 0x17c   : > { %v953_v55 = vsel %vm949_vm9, %v933_v39, %v936_v11  ;;  %v955_v47 = vsel %vm951_vm11, %v939_v31, %v954_v5  ;;  %vm5127_vm5 = vcmp.le.f32.partialorder %v605_v54, 0.7853982  ;;  %v5138_v3 = vand.u32 3, %v5013_v1 }
 0x17d   : > { %v5131_v24 = vmul.u32.u64.low %v965_v17, %v964_v19  ;;  %v5132_v29 = vmul.u32.u64.high %v965_v17, %v964_v19, %v5131_v24  ;;  %v5134_v49 = vmul.u32.u64.low %v965_v17, %v960_v40  ;;  %v5135_v4 = vmul.u32.u64.high %v965_v17, %v960_v40, %v5134_v49 }
 0x17e   : > { %v802_v32 = vadd.s32 3, %v798_v63  ;;  %v3744_v11 = vmin.u32 %v671_v33, %v5107_v2  ;;  %v816_v31 = vand.u32 2139095040, %v4849_v62  ;;  %4193 = vcosq.f32 %v589_v30 }
 0x17f   : > { %v691_v23 = vsub.s32 4, %v667_v42  ;;  %v956_v54 = vsel %vm950_vm1, %v953_v55, %v955_v47  ;;  %v1128_v34 = vand.u32 2139095040, %v4857_v7  ;;  %4195 = vsinq.f32 %v589_v30 }
 0x180   : > { %v485_v56 = vsel %vm5001_vm12, %v4832_v44, %v482_v38  ;;  %v673_v35 = vclz %v3744_v11  ;;  %v817_v1 = vshrl.u32 %v816_v31, 23  ;;  %v794_v36 = vsel %vm711_vm4, %v793_v57, %v792_v50 }
 0x181   : > { %vm974_vm8 = vc.u32 %v5132_v29, %v5134_v49  ;;  %v975_v37 = vadd.s32 1, %v5135_v4  ;;  %v813_v59 = vand.u32 2147483647, %v4849_v62  ;;  %v5153_v10 = vand.u32 3, %v802_v32 }
 0x182   : > { %v3745_v60 = vadd.s32 4294967294, %v673_v35  ;;  %v972_v46 = vmul.u32 %v965_v17, %v956_v54  ;;  %v3751_v12 = vadd.s32 4294967169, %v817_v1  ;;  %4197 = vcosq.f32 %v485_v56 }
 0x183   : > { %v692_v43 = vsel %vm607_vm13, %v691_v23, %v667_v42  ;;  %v976_v25 = vsel %vm974_vm8, %v975_v37, %v5135_v4  ;;  %v1129_v52 = vshrl.u32 %v1128_v34, 23  ;;  %v797_v50 = vsel %vm5077_vm7, %v4842_v51, %v794_v36 }
 0x184   : > { %vm3746_vm12 = vcmp.lt.s32.totalorder %v3745_v60, 0  ;;  %v977_v6 = vadd.s32 %v976_v25, %v972_v46  ;;  %v823_v21 = vadd.s32 1, %v3751_v12  ;;  %4199 = vsinq.f32 %v485_v56 }
 0x185   : > { %v661_v30 = vadd.s32 %v5048_v26, %v5057_v15  ;;  %v676_v5 = vsel %vm3746_vm12, 0, %v3745_v60  ;;  %v820_v45 = vand.u32 8388607, %v813_v59  ;;  %v694_v40 = vsel %vm5127_vm5, 0, %v692_v43 }
 0x186   : > { %v677_v39 = vsub.s32 32, %v676_v5  ;;  %v681_v42 = vsub.s32 4294967266, %v676_v5  ;;  %v978_v58 = vadd.s32 536870912, %v977_v6  ;;  %4201 = vcosq.f32 %v797_v50 }
 0x187   : > { %vm824_vm14 = vcmp.gt.s32.totalorder %v823_v21, 0  ;;  %v1125_v22 = vand.u32 2147483647, %v4857_v7  ;;  %v3763_v38 = vadd.s32 4294967169, %v1129_v52  ;;  %4203 = vsinq.f32 %v797_v50 }
 0x188   : > { %v679_v63 = vshrl.u32 %v661_v30, %v677_v39  ;;  %v682_v19 = vadd.s32 127, %v681_v42  ;;  %v5168_v17 = vshrl.u32 %v978_v58, 30  ;;  %v825_v26 = vsel %vm824_vm14, %v823_v21, 0  ;;  %v5170_v15 = vpop.eup %4193 }
 0x189   : > { %v5172_v57 = vadd.s32 3, %v694_v40  ;;  %v821_v33 = vor.u32 8388608, %v820_v45  ;;  %v827_v55 = vand.u32 31, %v825_v26  ;;  %v5174_v47 = vpop.eup %4195  ;;  %v678_v24 = vshll.u32 %v5107_v2, %v676_v5 }
 0x18a   : > { %v683_v4 = vshll.u32 %v682_v19, 23  ;;  %v5178_v32 = vadd.s32 %v5134_v49, %v5132_v29  ;;  %v980_v11 = vshll.u32 %v5168_v17, 30  ;;  %v5183_v23 = vand.u32 8388607, %v1125_v22 }
 0x18b   : > { %v828_v31 = vsub.s32 32, %v827_v55  ;;  %v1135_v54 = vadd.s32 1, %v3763_v38  ;;  %v1024_v34 = vand.u32 2139095040, %v4862_v13  ;;  %v680_v56 = vor.u32 %v679_v63, %v678_v24 }
 0x18c   : > { %v684_v35 = vor.u32 4788187, %v683_v4  ;;  %v5186_v1 = vsub.s32 %v977_v6, %v980_v11  ;;  %v5188_v36 = vshrl.u32 %v825_v26, 5  ;;  %v5190_v2 = vpop.eup %4197  ;;  %v830_v29 = vshll.u32 %v4666_v9, %v827_v55 }
 0x18d   : > { %v831_v49 = vshrl.u32 %v4667_v14, %v828_v31  ;;  %v833_v37 = vshll.u32 %v4667_v14, %v827_v55  ;;  %v834_v60 = vshrl.u32 %v4668_v16, %v828_v31  ;;  %v836_v43 = vshll.u32 %v4668_v16, %v827_v55 }
 0x18e   : > { %v685_v46 = vand.u32 2147483647, %v684_v35  ;;  %v983_v12 = vsub.s32 0, %v5186_v1  ;;  %v837_v25 = vshrl.u32 %v4669_v18, %v828_v31  ;;  %v5199_v52 = vpop.eup %4199  ;;  %v839_v21 = vshll.u32 %v4669_v18, %v827_v55 }
 0x18f   : > { %v832_v50 = vor.u32 %v831_v49, %v830_v29  ;;  %v835_v6 = vor.u32 %v834_v60, %v833_v37  ;;  %v840_v30 = vshrl.u32 %v4670_v20, %v828_v31  ;;  %v687_v5 = vcvt.s32.f32 %v680_v56 }
 0x190   : > { %v3756_v45 = vmin.u32 %v983_v12, %v5186_v1  ;;  %v838_v39 = vor.u32 %v837_v25, %v836_v43  ;;  %v5204_v42 = vshll.u32 %v821_v33, 8  ;;  %v5206_v40 = vpop.eup %4201  ;;  %v842_v38 = vshll.u32 %v4670_v20, %v827_v55 }
 0x191   : > { %v841_v58 = vor.u32 %v840_v30, %v839_v21  ;;  %v843_v63 = vshrl.u32 %v4671_v27, %v828_v31  ;;  %v1133_v19 = vor.u32 8388608, %v5183_v23  ;;  %v688_v26 = vmul.f32 %v687_v5, %v685_v46  ;;  %v5212_v11 = vpop.eup %4203 }
 0x192   : > { %v985_v24 = vclz %v3756_v45  ;;  %vm845_vm15 = vcmp.lt.s32.totalorder %v5188_v36, 1  ;;  %v1025_v4 = vshrl.u32 %v1024_v34, 23  ;;  %vm848_vm0 = vcmp.lt.s32.totalorder %v5188_v36, 4 }
 0x193   : > { %v844_v56 = vor.u32 %v843_v63, %v842_v38  ;;  %v853_v33 = vsel %vm845_vm15, %v832_v50, %v835_v6  ;;  %vm1136_vm2 = vcmp.gt.s32.totalorder %v1135_v54, 0  ;;  %vm919_vm3 = vcmp.lt.s32.totalorder %v4847_v61, 0 }
 0x194   : > { %v3757_v55 = vadd.s32 4294967294, %v985_v24  ;;  %vm847_vm4 = vcmp.lt.s32.totalorder %v5188_v36, 3  ;;  %v850_v23 = vsel %vm848_vm0, %v838_v39, 2102212464  ;;  %v854_v34 = vsel %vm848_vm0, %v841_v58, 920167782 }
 0x195   : > { %v1003_v35 = vsub.s32 4, %v5168_v17  ;;  %v829_v29 = vshrl.u32 %v4666_v9, %v828_v31  ;;  %vm846_vm6 = vcmp.lt.s32.totalorder %v5188_v36, 2  ;;  %v855_v49 = vsel %vm847_vm4, %v838_v39, %v854_v34 }
 0x196   : > { %v689_v37 = vxor.u32 2147483648, %v688_v26  ;;  %vm3758_vm7 = vcmp.lt.s32.totalorder %v3757_v55, 0  ;;  %v856_v60 = vsel %vm846_vm6, %v853_v33, %v855_v49  ;;  %v857_v46 = vsel %vm845_vm15, %v835_v6, %v838_v39 }
 0x197   : > { %v988_v12 = vsel %vm3758_vm7, 0, %v3757_v55  ;;  %v849_v43 = vsel %vm845_vm15, %v829_v29, %v832_v50  ;;  %v851_v31 = vsel %vm847_vm4, %v835_v6, %v850_v23  ;;  %v858_v25 = vsel %vm848_vm0, %v844_v56, 1326507024 }
 0x198   : > { %v989_v21 = vsub.s32 32, %v988_v12  ;;  %v990_v30 = vshll.u32 %v5186_v1, %v988_v12  ;;  %v993_v5 = vsub.s32 4294967266, %v988_v12  ;;  %v859_v45 = vsel %vm847_vm4, %v841_v58, %v858_v25 }
 0x199   : > { %v860_v39 = vsel %vm846_vm6, %v857_v46, %v859_v45  ;;  %v5244_v38 = vmul.u32.u64.low %v5204_v42, %v856_v60  ;;  %v5245_v63 = vmul.u32.u64.high %v5204_v42, %v856_v60, %v5244_v38  ;;  %v1137_v50 = vsel %vm1136_vm2, %v1135_v54, 0 }
 0x19a   : > { %v991_v6 = vshrl.u32 %v5178_v32, %v989_v21  ;;  %v994_v24 = vadd.s32 127, %v993_v5  ;;  %v5251_v56 = vmul.u32.u64.low %v5204_v42, %v860_v39  ;;  %v5252_v1 = vmul.u32.u64.high %v5204_v42, %v860_v39, %v5251_v56 }
 0x19b   : > { %v5255_v33 = vand.u32 3, %v5172_v57  ;;  %vm5259_vm9 = vcmp.le.f32.partialorder %v917_v48, 0.7853982  ;;  %v852_v55 = vsel %vm846_vm6, %v849_v43, %v851_v31  ;;  %v1139_v54 = vand.u32 31, %v1137_v50 }
 0x19c   : > { %v1021_v32 = vand.u32 2147483647, %v4862_v13  ;;  %v992_v23 = vor.u32 %v991_v6, %v990_v30  ;;  %v995_v34 = vshll.u32 %v994_v24, 23  ;;  %v5266_v29 = vshll.u32 %v1133_v19, 8 }
 0x19d   : > { %v3759_v49 = vadd.s32 4294967169, %v1025_v4  ;;  %v690_v57 = vsel %vm607_vm13, %v689_v37, %v688_v26  ;;  %v5273_v48 = vsel %vm919_vm3, %v1003_v35, %v5168_v17  ;;  %v871_v60 = vadd.s32 1, %v5245_v63 }
 0x19e   : > { %v1140_v36 = vsub.s32 32, %v1139_v54  ;;  %v996_v46 = vor.u32 4788187, %v995_v34  ;;  %v868_v12 = vmul.u32 %v5204_v42, %v852_v55  ;;  %vm870_vm10 = vc.u32 %v5252_v1, %v5244_v38 }
 0x19f   : > { %v1142_v19 = vshll.u32 %v4666_v9, %v1139_v54  ;;  %v872_v4 = vsel %vm870_vm10, %v871_v60, %v5245_v63  ;;  %v1145_v37 = vshll.u32 %v4667_v14, %v1139_v54  ;;  %v999_v43 = vcvt.s32.f32 %v992_v23 }
 0x1a0   : > { %v1143_v26 = vshrl.u32 %v4667_v14, %v1140_v36  ;;  %v1146_v17 = vshrl.u32 %v4668_v16, %v1140_v36  ;;  %v997_v35 = vand.u32 2147483647, %v996_v46  ;;  %vm815_vm11 = vcmp.lt.s32.totalorder %v4849_v62, 0 }
 0x1a1   : > { %v873_v31 = vadd.s32 %v872_v4, %v868_v12  ;;  %v1149_v42 = vshrl.u32 %v4669_v18, %v1140_v36  ;;  %v1138_v25 = vshrl.u32 %v1137_v50, 5  ;;  %v1148_v21 = vshll.u32 %v4668_v16, %v1139_v54 }
 0x1a2   : > { %v1151_v30 = vshll.u32 %v4669_v18, %v1139_v54  ;;  %v1152_v5 = vshrl.u32 %v4670_v20, %v1140_v36  ;;  %v1000_v45 = vmul.f32 %v999_v43, %v997_v35  ;;  %v1144_v63 = vor.u32 %v1143_v26, %v1142_v19 }
 0x1a3   : > { %v874_v39 = vadd.s32 536870912, %v873_v31  ;;  %v1147_v6 = vor.u32 %v1146_v17, %v1145_v37  ;;  %vm5291_vm1 = vcmp.le.f32.partialorder %v813_v59, 0.7853982  ;;  %v1150_v56 = vor.u32 %v1149_v42, %v1148_v21 }
 0x1a4   : > { %v1153_v55 = vor.u32 %v1152_v5, %v1151_v30  ;;  %v1154_v50 = vshll.u32 %v4670_v20, %v1139_v54  ;;  %v1155_v23 = vshrl.u32 %v4671_v27, %v1140_v36  ;;  %v693_v34 = vsel %vm5127_vm5, %v4844_v53, %v690_v57 }
 0x1a5   : > { %v1001_v60 = vxor.u32 2147483648, %v1000_v45  ;;  %v1006_v46 = vsel %vm5259_vm9, 0, %v5273_v48  ;;  %v875_v12 = vshrl.u32 %v874_v39, 30  ;;  %v1141_v59 = vshrl.u32 %v4666_v9, %v1140_v36 }
 0x1a6   : > { %v1156_v19 = vor.u32 %v1155_v23, %v1154_v50  ;;  %vm1157_vm13 = vcmp.lt.s32.totalorder %v1138_v25, 1  ;;  %v5306_v4 = vand.u32 8388607, %v1021_v32  ;;  %vm1160_vm8 = vcmp.lt.s32.totalorder %v1138_v25, 4 }
 0x1a7   : > { %v876_v54 = vshll.u32 %v875_v12, 30  ;;  %v899_v26 = vsub.s32 4, %v875_v12  ;;  %v1165_v0 = vsel %vm1157_vm13, %v1144_v63, %v1147_v6  ;;  %vm1158_vm5 = vcmp.lt.s32.totalorder %v1138_v25, 2 }
 0x1a8   : > { %vm1159_vm12 = vcmp.lt.s32.totalorder %v1138_v25, 3  ;;  %v1162_v57 = vsel %vm1160_vm8, %v1150_v56, 2102212464  ;;  %v1166_v37 = vsel %vm1160_vm8, %v1153_v55, 920167782  ;;  %v1002_v48 = vsel %vm919_vm3, %v1001_v60, %v1000_v45 }
 0x1a9   : > { %v5311_v17 = vsub.s32 %v873_v31, %v876_v54  ;;  %v1167_v36 = vsel %vm1159_vm12, %v1150_v56, %v1166_v37  ;;  %v1169_v35 = vsel %vm1157_vm13, %v1147_v6, %v1150_v56  ;;  %v900_v43 = vsel %vm815_vm11, %v899_v26, %v875_v12 }
 0x1aa   : > { %v1168_v42 = vsel %vm1158_vm5, %v1165_v0, %v1167_v36  ;;  %v1170_v21 = vsel %vm1160_vm8, %v1156_v19, 1326507024  ;;  %v1031_v30 = vadd.s32 1, %v3759_v49  ;;  %v1161_v39 = vsel %vm1157_vm13, %v1141_v59, %v1144_v63 }
 0x1ab   : > { %v879_v5 = vsub.s32 0, %v5311_v17  ;;  %v1163_v50 = vsel %vm1159_vm12, %v1147_v6, %v1162_v57  ;;  %v1171_v23 = vsel %vm1159_vm12, %v1153_v55, %v1170_v21  ;;  %v5322_v31 = vsel %vm5259_vm9, %v4847_v61, %v1002_v48 }
 0x1ac   : > { %v1172_v45 = vsel %vm1158_vm5, %v1169_v35, %v1171_v23  ;;  %v5326_v56 = vmul.u32.u64.low %v5266_v29, %v1168_v42  ;;  %v5327_v60 = vmul.u32.u64.high %v5266_v29, %v1168_v42, %v5326_v56  ;;  %v902_v12 = vsel %vm5291_vm1, 0, %v900_v43 }
 0x1ad   : > { %v3752_v49 = vmin.u32 %v879_v5, %v5311_v17  ;;  %v5334_v63 = vmul.u32.u64.low %v5266_v29, %v1172_v45  ;;  %v5335_v6 = vmul.u32.u64.high %v5266_v29, %v1172_v45, %v5334_v63  ;;  %4205 = vcosq.f32 %v693_v34 }
 0x1ae   : > { %v5337_v58 = vadd.s32 3, %v1006_v46  ;;  %v1164_v55 = vsel %vm1158_vm5, %v1161_v39, %v1163_v50  ;;  %vm1032_vm14 = vcmp.gt.s32.totalorder %v1031_v30, 0  ;;  %4207 = vsinq.f32 %v693_v34 }
 0x1af   : > { %v869_v59 = vadd.s32 %v5244_v38, %v5252_v1  ;;  %v881_v19 = vclz %v3752_v49  ;;  %v1033_v54 = vsel %vm1032_vm14, %v1031_v30, 0  ;;  %4209 = vcosq.f32 %v5322_v31 }
 0x1b0   : > { %v5343_v26 = vadd.s32 3, %v902_v12  ;;  %v1183_v0 = vadd.s32 1, %v5327_v60  ;;  %v1035_v57 = vand.u32 31, %v1033_v54  ;;  %v1180_v46 = vmul.u32 %v5266_v29, %v1164_v55 }
 0x1b1   : > { %v3753_v37 = vadd.s32 4294967294, %v881_v19  ;;  %vm1182_vm15 = vc.u32 %v5335_v6, %v5326_v56  ;;  %v1029_v25 = vor.u32 8388608, %v5306_v4  ;;  %vm493_vm0 = vcmp.eq.s32.totalorder %v5138_v3, 0 }
 0x1b2   : > { %v1184_v34 = vsel %vm1182_vm15, %v1183_v0, %v5327_v60  ;;  %v1036_v38 = vsub.s32 32, %v1035_v57  ;;  %v494_v1 = vxor.u32 2147483648, %v5199_v52  ;;  %v5353_v36 = vshrl.u32 %v1033_v54, 5 }
 0x1b3   : > { %vm3754_vm2 = vcmp.lt.s32.totalorder %v3753_v37, 0  ;;  %v1185_v48 = vadd.s32 %v1184_v34, %v1180_v46  ;;  %v497_v35 = vxor.u32 2147483648, %v5190_v2  ;;  %v1038_v29 = vshll.u32 %v4666_v9, %v1035_v57 }
 0x1b4   : > { %v884_v43 = vsel %vm3754_vm2, 0, %v3753_v37  ;;  %v1039_v42 = vshrl.u32 %v4667_v14, %v1036_v38  ;;  %v1041_v21 = vshll.u32 %v4667_v14, %v1035_v57  ;;  %v1042_v50 = vshrl.u32 %v4668_v16, %v1036_v38 }
 0x1b5   : > { %v885_v30 = vsub.s32 32, %v884_v43  ;;  %v889_v5 = vsub.s32 4294967266, %v884_v43  ;;  %v1186_v39 = vadd.s32 536870912, %v1185_v48  ;;  %vm496_vm3 = vcmp.eq.s32.totalorder %v5138_v3, 2 }
 0x1b6   : > { %v1044_v23 = vshll.u32 %v4668_v16, %v1035_v57  ;;  %v1045_v45 = vshrl.u32 %v4669_v18, %v1036_v38  ;;  %v1047_v60 = vshll.u32 %v4669_v18, %v1035_v57  ;;  %v1048_v49 = vshrl.u32 %v4670_v20, %v1036_v38 }
 0x1b7   : > { %v886_v12 = vshll.u32 %v5311_v17, %v884_v43  ;;  %v887_v63 = vshrl.u32 %v869_v59, %v885_v30  ;;  %v890_v55 = vadd.s32 127, %v889_v5  ;;  %v5366_v14 = vshrl.u32 %v1186_v39, 30  ;;  %v5368_v19 = vpop.eup %4205 }
 0x1b8   : > { %v1040_v54 = vor.u32 %v1039_v42, %v1038_v29  ;;  %v1046_v0 = vor.u32 %v1045_v45, %v1044_v23  ;;  %v1050_v37 = vshll.u32 %v4670_v20, %v1035_v57  ;;  %v1051_v16 = vshrl.u32 %v4671_v27, %v1036_v38  ;;  %v5373_v46 = vpop.eup %4207 }
 0x1b9   : > { %vm492_vm4 = vcmp.lt.s32.totalorder %v5138_v3, 2  ;;  %v888_v18 = vor.u32 %v887_v63, %v886_v12  ;;  %v891_v34 = vshll.u32 %v890_v55, 23  ;;  %v1188_v17 = vshll.u32 %v5366_v14, 30  ;;  %v5376_v43 = vpop.eup %4209 }
 0x1ba   : > { %v1043_v59 = vor.u32 %v1042_v50, %v1041_v21  ;;  %v1037_v30 = vshrl.u32 %v4666_v9, %v1036_v38  ;;  %v1049_v5 = vor.u32 %v1048_v49, %v1047_v60  ;;  %v1052_v29 = vor.u32 %v1051_v16, %v1050_v37 }
 0x1bb   : > { %v495_v20 = vsel %vm493_vm0, %v5190_v2, %v494_v1  ;;  %v892_v27 = vor.u32 4788187, %v891_v34  ;;  %v5382_v57 = vsub.s32 %v1185_v48, %v1188_v17  ;;  %vm1053_vm6 = vcmp.lt.s32.totalorder %v5353_v36, 1 }
 0x1bc   : > { %vm1056_vm7 = vcmp.lt.s32.totalorder %v5353_v36, 4  ;;  %vm489_vm9 = vweird.f32 %v4832_v44  ;;  %v895_v42 = vcvt.s32.f32 %v888_v18  ;;  %vm1055_vm10 = vcmp.lt.s32.totalorder %v5353_v36, 3 }
 0x1bd   : > { %v1057_v21 = vsel %vm1053_vm6, %v1037_v30, %v1040_v54  ;;  %v1058_v9 = vsel %vm1056_vm7, %v1046_v0, 2102212464  ;;  %v893_v38 = vand.u32 2147483647, %v892_v27  ;;  %v1191_v39 = vsub.s32 0, %v5382_v57 }
 0x1be   : > { %v1059_v2 = vsel %vm1055_vm10, %v1043_v59, %v1058_v9  ;;  %v1061_v1 = vsel %vm1053_vm6, %v1040_v54, %v1043_v59  ;;  %v1062_v48 = vsel %vm1056_vm7, %v1049_v5, 920167782  ;;  %v1065_v50 = vsel %vm1053_vm6, %v1043_v59, %v1046_v0 }
 0x1bf   : > { %v1066_v23 = vsel %vm1056_vm7, %v1052_v29, 1326507024  ;;  %v498_v45 = vsel %vm496_vm3, %v497_v35, %v5199_v52  ;;  %v896_v60 = vmul.f32 %v895_v42, %v893_v38  ;;  %v3764_v49 = vmin.u32 %v1191_v39, %v5382_v57 }
 0x1c0   : > { %vm1054_vm13 = vcmp.lt.s32.totalorder %v5353_v36, 2  ;;  %v1063_v12 = vsel %vm1055_vm10, %v1046_v0, %v1062_v48  ;;  %v1067_v54 = vsel %vm1055_vm10, %v1049_v5, %v1066_v23  ;;  %v1069_v37 = vshll.u32 %v1029_v25, 8 }
 0x1c1   : > { %v1060_v63 = vsel %vm1054_vm13, %v1057_v21, %v1059_v2  ;;  %v1064_v55 = vsel %vm1054_vm13, %v1061_v1, %v1063_v12  ;;  %vm593_vm8 = vweird.f32 %v4828_v41  ;;  %v897_v16 = vxor.u32 2147483648, %v896_v60 }
 0x1c2   : > { %v1193_v52 = vclz %v3764_v49  ;;  %v1068_v35 = vsel %vm1054_vm13, %v1065_v50, %v1067_v54  ;;  %v499_v18 = vsel %vm492_vm4, %v495_v20, %v498_v45  ;;  %4211 = vsinq.f32 %v5322_v31 }
 0x1c3   : > { %v5405_v34 = vmul.u32.u64.low %v1069_v37, %v1068_v35  ;;  %v5406_v17 = vmul.u32.u64.high %v1069_v37, %v1068_v35, %v5405_v34  ;;  %v5408_v0 = vmul.u32.u64.low %v1069_v37, %v1064_v55  ;;  %v5409_v59 = vmul.u32.u64.high %v1069_v37, %v1064_v55, %v5408_v0 }
 0x1c4   : > { %v898_v4 = vsel %vm815_vm11, %v897_v16, %v896_v60  ;;  %v5416_v25 = vand.u32 3, %v5343_v26  ;;  %v3765_v36 = vadd.s32 4294967294, %v1193_v52  ;;  %v1181_v30 = vadd.s32 %v5326_v56, %v5335_v6 }
 0x1c5   : > { %v901_v3 = vsel %vm5291_vm1, %v4849_v62, %v898_v4  ;;  %v598_v5 = vxor.u32 2147483648, %v5174_v47  ;;  %v601_v29 = vxor.u32 2147483648, %v5170_v15  ;;  %v1076_v31 = vmul.u32 %v1069_v37, %v1060_v63 }
 0x1c6   : > { %4213 = vcosq.f32 %v901_v3  ;;  %vm3766_vm5 = vcmp.lt.s32.totalorder %v3765_v36, 0  ;;  %v500_v20 = vsel %vm489_vm9, nan, %v499_v18  ;;  %vm1078_vm11 = vc.u32 %v5406_v17, %v5408_v0 }
 0x1c7   : > { %4215 = vsinq.f32 %v901_v3  ;;  %v1196_v26 = vsel %vm3766_vm5, 0, %v3765_v36  ;;  %vm597_vm1 = vcmp.eq.s32.totalorder %v5011_v8, 0  ;;  %v1079_v56 = vadd.s32 1, %v5409_v59 }
 0x1c8   : > { %v1197_v24 = vsub.s32 32, %v1196_v26  ;;  %v1201_v27 = vsub.s32 4294967266, %v1196_v26  ;;  %vm600_vm12 = vcmp.eq.s32.totalorder %v5011_v8, 2  ;;  %vm596_vm14 = vcmp.lt.s32.totalorder %v5011_v8, 2 }
 0x1c9   : > { %v599_v6 = vsel %vm597_vm1, %v5170_v15, %v598_v5  ;;  %v602_v44 = vsel %vm600_vm12, %v601_v29, %v5174_v47  ;;  %v702_v42 = vxor.u32 2147483648, %v5373_v46  ;;  %vm801_vm15 = vweird.f32 %v4842_v51 }
 0x1ca   : > { %v1202_v21 = vadd.s32 127, %v1201_v27  ;;  %v1080_v9 = vsel %vm1078_vm11, %v1079_v56, %v5409_v59  ;;  %v603_v38 = vsel %vm596_vm14, %v599_v6, %v602_v44  ;;  %vm701_vm0 = vcmp.eq.s32.totalorder %v5255_v33, 0  ;;  %v1230_v27 = vld [vmem:[%s5929_s3 + $0x8] sm:$0xff] }
 0x1cb   : > { %v1081_v39 = vadd.s32 %v1080_v9, %v1076_v31  ;;  %v604_v2 = vsel %vm593_vm8, nan, %v603_v38  ;;  %v703_v8 = vsel %vm701_vm0, %v5368_v19, %v702_v42  ;;  %v705_v15 = vxor.u32 2147483648, %v5368_v19 }
 0x1cc   : > { %v1199_v1 = vshrl.u32 %v1181_v30, %v1197_v24  ;;  %v1203_v47 = vshll.u32 %v1202_v21, 23  ;;  %v4082_v48 = vpack.c.bf16 %v604_v2, %v500_v20  ;;  %vm704_vm2 = vcmp.eq.s32.totalorder %v5255_v33, 2  ;;  %v4212_v60 = vpop.eup %4211 }
 0x1cd   : > { %v1082_v50 = vadd.s32 536870912, %v1081_v39  ;;  %vm700_vm3 = vcmp.lt.s32.totalorder %v5255_v33, 2  ;;  %v706_v23 = vsel %vm704_vm2, %v705_v15, %v5373_v46  ;;  %v806_v45 = vxor.u32 2147483648, %v5212_v11 }
 0x1ce   : > { %v1198_v41 = vshll.u32 %v5382_v57, %v1196_v26  ;;  %v1204_v49 = vor.u32 4788187, %v1203_v47  ;;  %4083 = vmatpush1.bf16.msra.mxu0 %v4082_v48  ;;  %4106 = vmatpush1.bf16.msra.mxu1 %v4082_v48  ;;  %v707_v12 = vsel %vm700_vm3, %v703_v8, %v706_v23  ;;  %vm805_vm4 = vcmp.eq.s32.totalorder %v5153_v10, 0 }
 0x1cf   : > { %vm697_vm6 = vweird.f32 %v4844_v53  ;;  %v5450_v19 = vshrl.u32 %v1082_v50, 30  ;;  %4084 = vmatprep.subr.bf16.mxu0 %v4665_v28  ;;  %4098 = vmatprep.subr.bf16.mxu1 %v4665_v28  ;;  %v807_v33 = vsel %vm805_vm4, %v5206_v40, %v806_v45  ;;  %v809_v46 = vxor.u32 2147483648, %v5206_v40 }
 0x1d0   : > { %v4214_v63 = vpop.eup %4213  ;;  %v1011_v57 = vand.u32 3, %v5337_v58  ;;  %v1200_v55 = vor.u32 %v1199_v1, %v1198_v41  ;;  %vm804_vm7 = vcmp.lt.s32.totalorder %v5153_v10, 2  ;;  %vm808_vm9 = vcmp.eq.s32.totalorder %v5153_v10, 2 }
 0x1d1   : > { %v4216_v54 = vpop.eup %4215  ;;  %v1084_v53 = vshll.u32 %v5450_v19, 30  ;;  %v708_v37 = vsel %vm697_vm6, nan, %v707_v12  ;;  %v810_v16 = vsel %vm808_vm9, %v809_v46, %v5212_v11  ;;  %v913_v52 = vxor.u32 2147483648, %v4214_v63 }
 0x1d2   : > { %v1205_v35 = vand.u32 2147483647, %v1204_v49  ;;  %v811_v18 = vsel %vm804_vm7, %v807_v33, %v810_v16  ;;  %v910_v34 = vxor.u32 2147483648, %v4216_v54  ;;  %vm912_vm10 = vcmp.eq.s32.totalorder %v5416_v25, 2 }
 0x1d3   : > { %v1085_v40 = vsub.s32 %v1081_v39, %v1084_v53  ;;  %v812_v58 = vsel %vm801_vm15, nan, %v811_v18  ;;  %vm909_vm13 = vcmp.eq.s32.totalorder %v5416_v25, 0  ;;  %v914_v59 = vsel %vm912_vm10, %v913_v52, %v4216_v54 }
 0x1d4   : > { %v4085_v10 = vpack.c.bf16 %v812_v58, %v708_v37  ;;  %v911_v4 = vsel %vm909_vm13, %v4214_v63, %v910_v34  ;;  %v1207_v36 = vcvt.s32.f32 %v1200_v55  ;;  %vm908_vm8 = vcmp.lt.s32.totalorder %v5416_v25, 2 }
 0x1d5   : > { %v1087_v3 = vsub.s32 0, %v1085_v40  ;;  %v915_v11 = vsel %vm908_vm8, %v911_v4, %v914_v59  ;;  %v1014_v30 = vxor.u32 2147483648, %v4212_v60  ;;  %vm1013_vm5 = vcmp.eq.s32.totalorder %v1011_v57, 0 }
 0x1d6   : > { %4086 = vmatpush1.bf16.msra.mxu0 %v4085_v10  ;;  %4107 = vmatpush1.bf16.msra.mxu1 %v4085_v10  ;;  %v1208_v5 = vmul.f32 %v1207_v36, %v1205_v35  ;;  %v1017_v51 = vxor.u32 2147483648, %v5376_v43  ;;  %vm905_vm11 = vweird.f32 %v4849_v62  ;;  %vm1016_vm1 = vcmp.eq.s32.totalorder %v1011_v57, 2 }
 0x1d7   : > { %v3760_v29 = vmin.u32 %v1087_v3, %v1085_v40  ;;  %4087 = vmatprep.subr.bf16.mxu0 %v4665_v28  ;;  %4099 = vmatprep.subr.bf16.mxu1 %v4665_v28  ;;  %v1015_v31 = vsel %vm1013_vm5, %v5376_v43, %v1014_v30  ;;  %v916_v25 = vsel %vm905_vm11, nan, %v915_v11  ;;  %vm1012_vm12 = vcmp.lt.s32.totalorder %v1011_v57, 2  ;;  %v1229_v11 = vld [vmem:[%s5929_s3] sm:$0xff] }
 0x1d8   : > { %v1018_v26 = vsel %vm1016_vm1, %v1017_v51, %v4212_v60  ;;  %vm1009_vm14 = vweird.f32 %v4847_v61  ;;  %v1209_v56 = vxor.u32 2147483648, %v1208_v5  ;;  %vm1293_vm15 = vcmask 64512  }
 0x1d9   : > { %v1089_v20 = vclz %v3760_v29  ;;  %v1019_v24 = vsel %vm1012_vm12, %v1015_v31, %v1018_v26  ;;  %3767 = vmatprep.mubr.msk.f32.mxu0 %vm1293_vm15, %v1230_v27  ;;  %vm1127_vm2 = vcmp.lt.s32.totalorder %v4857_v7, 0  ;;  %v1077_v43 = vadd.s32 %v5408_v0, %v5406_v17  ;;  %v1233_v29 = vld [vmem:[%s5929_s3 + $0x20] sm:$0xff] }
 0x1da   : > { %v1020_v44 = vsel %vm1009_vm14, nan, %v1019_v24  ;;  %v1210_v61 = vsel %vm1127_vm2, %v1209_v56, %v1208_v5  ;;  %vm5485_vm3 = vcmp.le.f32.partialorder %v1125_v22, 0.7853982  ;;  %v1211_v1 = vsub.s32 4, %v5366_v14  ;;  %v1234_v5 = vld [vmem:[%s5929_s3 + $0x28] sm:$0xff] }
 0x1db   : > { %v3761_v6 = vadd.s32 4294967294, %v1089_v20  ;;  %v4088_v42 = vpack.c.bf16 %v1020_v44, %v916_v25  ;;  %v1213_v15 = vsel %vm5485_vm3, %v4857_v7, %v1210_v61  ;;  %v1107_v23 = vsub.s32 4, %v5450_v19 }
 0x1dc   : > { %4217 = vcosq.f32 %v1213_v15  ;;  %v1212_v22 = vsel %vm1127_vm2, %v1211_v1, %v5366_v14  ;;  %vm1023_vm4 = vcmp.lt.s32.totalorder %v4862_v13, 0  ;;  %vm1022_vm6 = vcmp.le.f32.partialorder %v1021_v32, 0.7853982 }
 0x1dd   : > { %vm3762_vm0 = vcmp.lt.s32.totalorder %v3761_v6, 0  ;;  %4089 = vmatpush1.bf16.msra.mxu0 %v4088_v42  ;;  %4108 = vmatpush1.bf16.msra.mxu1 %v4088_v42  ;;  %4219 = vsinq.f32 %v1213_v15  ;;  %v1214_v45 = vsel %vm5485_vm3, 0, %v1212_v22  ;;  %v1108_v49 = vsel %vm1023_vm4, %v1107_v23, %v5450_v19 }
 0x1de   : > { %v1092_v62 = vsel %vm3762_vm0, 0, %v3761_v6  ;;  %4090 = vmatprep.subr.bf16.mxu0 %v4665_v28  ;;  %4100 = vmatprep.subr.bf16.mxu1 %v4665_v28  ;;  %v1218_v12 = vadd.s32 3, %v1214_v45  ;;  %v1110_v63 = vsel %vm1022_vm6, 0, %v1108_v49  ;;  %vm1217_vm8 = vweird.f32 %v4857_v7  ;;  %v1232_v7 = vld [vmem:[%s5929_s3 + $0x18] sm:$0xff] }
 0x1df   : > { %v1093_v21 = vsub.s32 32, %v1092_v62  ;;  %v1097_v9 = vsub.s32 4294967266, %v1092_v62  ;;  %v1094_v39 = vshll.u32 %v1085_v40, %v1092_v62  ;;  %v1114_v55 = vadd.s32 3, %v1110_v63 }
 0x1e0   : > { %v1219_v57 = vand.u32 3, %v1218_v12  ;;  %vm1113_vm1 = vweird.f32 %v4862_v13  ;;  %v4672_v3 = vmov 0.0   ;;  %v4673_v30 = vmov 1.0  }
 0x1e1   : > { %v1095_v2 = vshrl.u32 %v1077_v43, %v1093_v21  ;;  %v1098_v8 = vadd.s32 127, %v1097_v9  ;;  %v1115_v37 = vand.u32 3, %v1114_v55  ;;  %v1647_v51 = vlaneseq }
 0x1e2   : > { %vm1221_vm7 = vcmp.eq.s32.totalorder %v1219_v57, 0  ;;  %vm1224_vm9 = vcmp.eq.s32.totalorder %v1219_v57, 2  ;;  %vm1220_vm10 = vcmp.lt.s32.totalorder %v1219_v57, 2  ;;  %v1656_v20 = vstv %s3800_s18  ;;  %s3982_s18 = sld [smem:[#allocation4 + $0x4]] }
 0x1e3   : > { %v1096_v17 = vor.u32 %v1095_v2, %v1094_v39  ;;  %v1099_v0 = vshll.u32 %v1098_v8, 23  ;;  %vm1120_vm13 = vcmp.eq.s32.totalorder %v1115_v37, 2  ;;  %vm1117_vm5 = vcmp.eq.s32.totalorder %v1115_v37, 0  ;;  %v1236_v39 = vld [vmem:[%s5929_s3 + $0x38] sm:$0xff]  ;;  %v1235_v2 = vld [vmem:[%s5929_s3 + $0x30] sm:$0xff] }
 0x1e4   : > { %vm1116_vm11 = vcmp.lt.s32.totalorder %v1115_v37, 2  ;;  %v1648_v31 = vshrl.u32 %v1647_v51, 7  ;;  %v1657_v25 = vstv %s3801_s19  ;;  %v1659_v24 = vstv %s3799_s24  ;;  %v1237_v51 = vld [vmem:[%s5929_s3 + $0x40] sm:$0xff]  ;;  %s3816_s24 = sld [smem:[#allocation4 + $0x9]]  ;;  %s168_s19 = sand.u32 1, %s4653_s21  }
 0x1e5   : > { %v1100_v47 = vor.u32 4788187, %v1099_v0  ;;  %v1103_v48 = vcvt.s32.f32 %v1096_v17  ;;  %v1661_v56 = vstv %s1649_s26  ;;  %s3819_s26 = sld [smem:[#allocation4 + $0xa]] }
 0x1e6   : > { %v4218_v46 = vpop.eup %4217  ;;  %vm1655_vm12 = vcmp.eq.s32.totalorder %v1648_v31, 2  ;;  %vm1654_vm14 = vcmp.eq.s32.totalorder %v1648_v31, 1  ;;  %vm1653_vm0 = vcmp.eq.s32.totalorder %v1648_v31, 0 }
 0x1e7   : > { %v1101_v28 = vand.u32 2147483647, %v1100_v47  ;;  %v4220_v14 = vpop.eup %4219  ;;  %v1225_v53 = vxor.u32 2147483648, %v4218_v46  ;;  %v1658_v26 = vsel %vm1655_vm12, %v1656_v20, %v1657_v25 }
 0x1e8   : > { %v1222_v54 = vxor.u32 2147483648, %v4220_v14  ;;  %v1660_v27 = vsel %vm1654_vm14, %v1659_v24, %v1658_v26 }
 0x1e9   : > { %v1104_v50 = vmul.f32 %v1103_v48, %v1101_v28  ;;  %v1226_v32 = vsel %vm1224_vm9, %v1225_v53, %v4220_v14  ;;  %v5524_v42 = vsel %vm1653_vm0, %v1661_v56, %v1660_v27 }
 0x1ea   : > { %v1223_v16 = vsel %vm1221_vm7, %v4218_v46, %v1222_v54  ;;  %v1664_v61 = vmul.f32 0.0, %v5524_v42 }
 0x1eb   : > { %v1105_v60 = vxor.u32 2147483648, %v1104_v50  ;;  %v1227_v18 = vsel %vm1220_vm10, %v1223_v16, %v1226_v32 }
 0x1ec   : > { %v1228_v59 = vsel %vm1217_vm8, nan, %v1227_v18 }
 0x1ed   : > { %v1106_v41 = vsel %vm1023_vm4, %v1105_v60, %v1104_v50  ;;  %v5535_v60 = vsub.s32 3, %v1648_v31 }
 0x1ee   : > { %v1109_v33 = vsel %vm1022_vm6, %v4862_v13, %v1106_v41  ;;  %v1231_v13 = vld [vmem:[%s5929_s3 + $0x10] sm:$0xff] }
 0x1ef   : > { %4221 = vcosq.f32 %v1109_v33 }
 0x1f0   : > { %4223 = vsinq.f32 %v1109_v33 }
 0x1f9   : > { %v4222_v52 = vpop.eup %4221 }
 0x1fa   : > { %v4224_v19 = vpop.eup %4223  ;;  %v1121_v35 = vxor.u32 2147483648, %v4222_v52 }
 0x1fb   : > { %v1118_v34 = vxor.u32 2147483648, %v4224_v19 }
 0x1fc   : > { %v1122_v40 = vsel %vm1120_vm13, %v1121_v35, %v4224_v19 }
 0x1fd   : > { %v1119_v58 = vsel %vm1117_vm5, %v4222_v52, %v1118_v34 }
 0x1fe   : > { %v1123_v10 = vsel %vm1116_vm11, %v1119_v58, %v1122_v40  ;;  %v1689_v58 = vstv %s3804_s8  ;;  %s3822_s8 = sld [smem:[#allocation4 + $0xb]] }
 0x1ff   : > { %v1124_v4 = vsel %vm1113_vm1, nan, %v1123_v10 }
 0x200   : > { %v4091_v36 = vpack.c.bf16 %v1228_v59, %v1124_v4  ;;  %v1722_v59 = vstv %s3807_s9  ;;  %s3825_s9 = sld [smem:[#allocation4 + $0xc]] }
 0x202   : > { %4092 = vmatpush1.bf16.msra.mxu0 %v4091_v36  ;;  %4109 = vmatpush1.bf16.msra.mxu1 %v4091_v36 }
 0x203   : > { %1422 = vmatprep.subr.mxu0 %v4672_v3  ;;  %4101 = vmatprep.subr.mxu1 %v4672_v3 }
 0x206   : > { %1423 = vmatpush1.msra.mxu0 %v4673_v30  ;;  %4110 = vmatpush1.msra.mxu1 %v4673_v30 }
 0x207   : > { %1455 = vmatmul.mubr.f32.vlgmr.msra.gmra.mrb[16].mxu0 %v1229_v11 }
 0x208   : > { %3768 = vmatprep.mubr.msk.f32.mxu0 %vm1293_vm15, %v1232_v7 }
 0x20b   : > { %1460 = vmatmul.mubr.f32.gmra.mrb[18].mxu0 %v1231_v13 }
 0x20c   : > { %3769 = vmatprep.mubr.msk.f32.mxu0 %vm1293_vm15, %v1234_v5 }
 0x20f   : > { %1465 = vmatmul.mubr.f32.gmra.mrb[20].mxu0 %v1233_v29  ;;  %v1238_v29 = vld [vmem:[%s5929_s3 + $0x48] sm:$0xff] }
 0x210   : > { %3770 = vmatprep.mubr.msk.f32.mxu0 %vm1293_vm15, %v1236_v39 }
 0x213   : > { %1470 = vmatmul.mubr.f32.gmra.mrb[22].mxu0 %v1235_v2 }
 0x214   : > { %3771 = vmatprep.mubr.msk.f32.mxu0 %vm1293_vm15, %v1238_v29 }
 0x217   : > { %1475 = vmatmul.mubr.f32.gmra.mrb[24].mxu0 %v1237_v51 }
 0x2da   : > { %v1456_v6 = vpop.f32.mrb[16].mxu0 }
 0x2db   : > { %1615 = vst.msk [vmem:[#allocation2] sm:$0xff] %vm1293_vm15, %v1456_v6  ;;  %v1458_v44 = vpop.f32.mrb[17].mxu0 }
 0x2de   : > { %v1461_v62 = vpop.f32.mrb[18].mxu0 }
 0x2df   : > { %1616 = vst.msk [vmem:[#allocation2 + $0x8] sm:$0xff] %vm1293_vm15, %v1461_v62  ;;  %v1463_v43 = vpop.f32.mrb[19].mxu0 }
 0x2e2   : > { %v1663_v21 = vld [vmem:[#allocation2] sm:$0xf]  ;;  %v1692_v33 = vld [vmem:[#allocation2 + $0x4] sm:$0xf]  ;;  %v1466_v35 = vpop.f32.mrb[20].mxu0 }
 0x2e3   : > { %v1665_v9 = vadd.f32 %v1664_v61, %v1663_v21  ;;  %1617 = vst.msk [vmem:[#allocation2 + $0x10] sm:$0xff] %vm1293_vm15, %v1466_v35  ;;  %v1468_v18 = vpop.f32.mrb[21].mxu0  ;;  %v1755_v21 = vstv %s3810_s14  ;;  %v1239_v35 = vld [vmem:[%s5929_s3 + $0x50] sm:$0xff]  ;;  %s3828_s14 = sld [smem:[#allocation4 + $0xd]] }
 0x2e5   : > { %v3802_v38 = vmul.f32 -1.442695, %v1665_v9 }
 0x2e6   : > { %v1725_v11 = vld [vmem:[#allocation2 + $0x8] sm:$0xf] }
 0x2e7   : > { %4225 = vpow2.f32 %v3802_v38 }
 0x2f1   : > { %v4226_v8 = vpop.eup %4225 }
 0x2f2   : > { %v1669_v15 = vadd.f32 1.0, %v4226_v8 }
 0x2f4   : > { %4227 = vrcp.f32 %v1669_v15  ;;  %v1758_v15 = vld [vmem:[#allocation2 + $0xc] sm:$0xf] }
 0x2fe   : > { %v4228_v17 = vpop.eup %4227 }
 0x2ff   : > { %v1672_v0 = vmul.f32 2.0, %v4228_v17  ;;  %v1674_v48 = vmul.f32 0.0, %v4228_v17 }
 0x301   : > { %v3803_v1 = vadd.f32 -1.0, %v1672_v0 }
 0x303   : > { %v1676_v47 = vrot.slane %v3803_v1, 2 }
 0x305   : > { %v1678_v28 = vmul.f32 %v4228_v17, %v1676_v47 }
 0x307   : > { %v1680_v22 = vrot.slane %v1678_v28, 7 }
 0x309   : > { %v1682_v50 = vadd.f32 %v1680_v22, %v1674_v48 }
 0x30b   : > { %4229 = vtanh.f32 %v1682_v50 }
 0x315   : > { %v4230_v23 = vpop.eup %4229 }
 0x316   : > { %v1685_v45 = vrot.slane %v4230_v23, 6 }
 0x318   : > { %v1687_v41 = vmul.f32 %v4228_v17, %v1685_v45 }
 0x31a   : > { %v1696_v49 = vrot.slane %v1687_v41, %v5535_v60  ;;  %v1690_v4 = vmul.f32 %v1689_v58, %v1687_v41 }
 0x31c   : > { %v1697_v12 = vmul.f32 %v1696_v49, %v5524_v42 }
 0x31e   : > { %v1698_v46 = vadd.f32 %v1697_v12, %v1692_v33  ;;  %v1471_v12 = vpop.f32.mrb[22].mxu0 }
 0x31f   : > { %1618 = vst.msk [vmem:[#allocation2 + $0x18] sm:$0xff] %vm1293_vm15, %v1471_v12  ;;  %v1473_v33 = vpop.f32.mrb[23].mxu0 }
 0x320   : > { %v3805_v14 = vmul.f32 -1.442695, %v1698_v46 }
 0x322   : > { %4231 = vpow2.f32 %v3805_v14 }
 0x32c   : > { %v4232_v63 = vpop.eup %4231 }
 0x32d   : > { %v1702_v57 = vadd.f32 1.0, %v4232_v63  ;;  %v1788_v63 = vstv %s3813_s15  ;;  %s3831_s15 = sld [smem:[#allocation4 + $0xe]] }
 0x32f   : > { %4233 = vrcp.f32 %v1702_v57 }
 0x339   : > { %v4234_v55 = vpop.eup %4233 }
 0x33a   : > { %v1705_v54 = vmul.f32 2.0, %v4234_v55  ;;  %v1707_v32 = vmul.f32 %v4234_v55, %v1682_v50 }
 0x33c   : > { %v3806_v53 = vadd.f32 -1.0, %v1705_v54 }
 0x33e   : > { %v1709_v37 = vrot.slane %v3806_v53, 2  ;;  %v1791_v53 = vld [vmem:[#allocation2 + $0x10] sm:$0xf] }
 0x340   : > { %v1711_v16 = vmul.f32 %v4234_v55, %v1709_v37 }
 0x342   : > { %v1713_v52 = vrot.slane %v1711_v16, 7 }
 0x344   : > { %v1715_v19 = vadd.f32 %v1713_v52, %v1707_v32 }
 0x346   : > { %4235 = vtanh.f32 %v1715_v19 }
 0x350   : > { %v4236_v34 = vpop.eup %4235 }
 0x351   : > { %v1718_v40 = vrot.slane %v4236_v34, 6 }
 0x353   : > { %v1720_v10 = vmul.f32 %v4234_v55, %v1718_v40 }
 0x355   : > { %v1723_v36 = vmul.f32 %v1722_v59, %v1720_v10  ;;  %v1729_v3 = vrot.slane %v1720_v10, %v5535_v60 }
 0x357   : > { %v1724_v7 = vadd.f32 %v1723_v36, %v1690_v4  ;;  %v1730_v30 = vmul.f32 %v1729_v3, %v5524_v42 }
 0x359   : > { %v1731_v13 = vadd.f32 %v1730_v30, %v1725_v11 }
 0x35b   : > { %v3808_v5 = vmul.f32 -1.442695, %v1731_v13  ;;  %v1821_v13 = vstv %s3816_s24  ;;  %s3834_s24 = sld [smem:[#allocation4 + $0xf]] }
 0x35d   : > { %4237 = vpow2.f32 %v3808_v5 }
 0x367   : > { %v4238_v31 = vpop.eup %4237 }
 0x368   : > { %v1735_v20 = vadd.f32 1.0, %v4238_v31 }
 0x36a   : > { %4239 = vrcp.f32 %v1735_v20 }
 0x374   : > { %v4240_v25 = vpop.eup %4239 }
 0x375   : > { %v1738_v26 = vmul.f32 2.0, %v4240_v25  ;;  %v1740_v6 = vmul.f32 %v4240_v25, %v1715_v19  ;;  %v1240_v19 = vld [vmem:[%s5929_s3 + $0x58] sm:$0xff] }
 0x376   : > { %3772 = vmatprep.mubr.msk.f32.mxu0 %vm1293_vm15, %v1240_v19 }
 0x377   : > { %v3809_v24 = vadd.f32 -1.0, %v1738_v26  ;;  %1480 = vmatmul.mubr.f32.gmra.mrb[26].mxu0 %v1239_v35 }
 0x379   : > { %v1742_v27 = vrot.slane %v3809_v24, 2 }
 0x37b   : > { %v1744_v56 = vmul.f32 %v4240_v25, %v1742_v27 }
 0x37d   : > { %v1746_v44 = vrot.slane %v1744_v56, 7 }
 0x37f   : > { %v1748_v62 = vadd.f32 %v1746_v44, %v1740_v6 }
 0x381   : > { %4241 = vtanh.f32 %v1748_v62 }
 0x38b   : > { %v4242_v61 = vpop.eup %4241 }
 0x38c   : > { %v1751_v43 = vrot.slane %v4242_v61, 6 }
 0x38e   : > { %v1753_v9 = vmul.f32 %v4240_v25, %v1751_v43  ;;  %v1824_v25 = vld [vmem:[#allocation2 + $0x14] sm:$0xf] }
 0x390   : > { %v1756_v38 = vmul.f32 %v1755_v21, %v1753_v9  ;;  %v1762_v39 = vrot.slane %v1753_v9, %v5535_v60 }
 0x392   : > { %v1757_v2 = vadd.f32 %v1756_v38, %v1724_v7  ;;  %v1763_v8 = vmul.f32 %v1762_v39, %v5524_v42  ;;  %v1476_v39 = vpop.f32.mrb[24].mxu0 }
 0x393   : > { %1619 = vst.msk [vmem:[#allocation2 + $0x20] sm:$0xff] %vm1293_vm15, %v1476_v39 }
 0x394   : > { %v1764_v17 = vadd.f32 %v1763_v8, %v1758_v15 }
 0x396   : > { %v3811_v0 = vmul.f32 -1.442695, %v1764_v17  ;;  %v1854_v17 = vstv %s3819_s26  ;;  %s3837_s26 = sld [smem:[#allocation4 + $0x10]] }
 0x398   : > { %4243 = vpow2.f32 %v3811_v0 }
 0x3a2   : > { %v4244_v1 = vpop.eup %4243 }
 0x3a3   : > { %v1768_v47 = vadd.f32 1.0, %v4244_v1 }
 0x3a5   : > { %4245 = vrcp.f32 %v1768_v47 }
 0x3af   : > { %v4246_v28 = vpop.eup %4245 }
 0x3b0   : > { %v1771_v48 = vmul.f32 2.0, %v4246_v28  ;;  %v1773_v45 = vmul.f32 %v4246_v28, %v1748_v62 }
 0x3b2   : > { %v3812_v22 = vadd.f32 -1.0, %v1771_v48 }
 0x3b4   : > { %v1775_v50 = vrot.slane %v3812_v22, 2 }
 0x3b6   : > { %v1777_v23 = vmul.f32 %v4246_v28, %v1775_v50 }
 0x3b8   : > { %v1779_v41 = vrot.slane %v1777_v23, 7 }
 0x3ba   : > { %v1781_v49 = vadd.f32 %v1779_v41, %v1773_v45  ;;  %v1242_v45 = vld [vmem:[%s5929_s3 + $0x68] sm:$0xff]  ;;  %v1241_v41 = vld [vmem:[%s5929_s3 + $0x60] sm:$0xff] }
 0x3bb   : > { %3773 = vmatprep.mubr.msk.f32.mxu0 %vm1293_vm15, %v1242_v45 }
 0x3bc   : > { %4247 = vtanh.f32 %v1781_v49  ;;  %1485 = vmatmul.mubr.f32.gmra.mrb[28].mxu0 %v1241_v41 }
 0x3c6   : > { %v4248_v46 = vpop.eup %4247 }
 0x3c7   : > { %v1784_v14 = vrot.slane %v4248_v46, 6 }
 0x3c9   : > { %v1786_v57 = vmul.f32 %v4246_v28, %v1784_v14  ;;  %v1857_v28 = vld [vmem:[#allocation2 + $0x18] sm:$0xf] }
 0x3cb   : > { %v1789_v55 = vmul.f32 %v1788_v63, %v1786_v57  ;;  %v1795_v54 = vrot.slane %v1786_v57, %v5535_v60 }
 0x3cd   : > { %v1790_v37 = vadd.f32 %v1789_v55, %v1757_v2  ;;  %v1796_v16 = vmul.f32 %v1795_v54, %v5524_v42  ;;  %v1478_v2 = vpop.f32.mrb[25].mxu0 }
 0x3cf   : > { %v1797_v32 = vadd.f32 %v1796_v16, %v1791_v53 }
 0x3d1   : > { %v3814_v52 = vmul.f32 -1.442695, %v1797_v32  ;;  %v1887_v32 = vstv %s3822_s8  ;;  %s3840_s8 = sld [smem:[#allocation4 + $0x11]] }
 0x3d3   : > { %4249 = vpow2.f32 %v3814_v52 }
 0x3dd   : > { %v4250_v18 = vpop.eup %4249 }
 0x3de   : > { %v1801_v34 = vadd.f32 1.0, %v4250_v18 }
 0x3e0   : > { %4251 = vrcp.f32 %v1801_v34 }
 0x3ea   : > { %v4252_v40 = vpop.eup %4251 }
 0x3eb   : > { %v1804_v58 = vmul.f32 2.0, %v4252_v40  ;;  %v1806_v36 = vmul.f32 %v4252_v40, %v1781_v49 }
 0x3ed   : > { %v3815_v59 = vadd.f32 -1.0, %v1804_v58 }
 0x3ef   : > { %v1808_v10 = vrot.slane %v3815_v59, 2 }
 0x3f1   : > { %v1810_v4 = vmul.f32 %v4252_v40, %v1808_v10 }
 0x3f3   : > { %v1812_v3 = vrot.slane %v1810_v4, 7 }
 0x3f5   : > { %v1814_v11 = vadd.f32 %v1812_v3, %v1806_v36 }
 0x3f7   : > { %4253 = vtanh.f32 %v1814_v11 }
 0x401   : > { %v4254_v7 = vpop.eup %4253 }
 0x402   : > { %v1817_v30 = vrot.slane %v4254_v7, 6 }
 0x404   : > { %v1819_v5 = vmul.f32 %v4252_v40, %v1817_v30  ;;  %v1890_v40 = vld [vmem:[#allocation2 + $0x1c] sm:$0xf] }
 0x406   : > { %v1822_v29 = vmul.f32 %v1821_v13, %v1819_v5  ;;  %v1828_v51 = vrot.slane %v1819_v5, %v5535_v60 }
 0x408   : > { %v1823_v31 = vadd.f32 %v1822_v29, %v1790_v37  ;;  %v1829_v20 = vmul.f32 %v1828_v51, %v5524_v42 }
 0x40a   : > { %v1830_v26 = vadd.f32 %v1829_v20, %v1824_v25 }
 0x40c   : > { %v3817_v24 = vmul.f32 -1.442695, %v1830_v26  ;;  %v1920_v26 = vstv %s3825_s9  ;;  %s3843_s9 = sld [smem:[#allocation4 + $0x12]] }
 0x40e   : > { %4255 = vpow2.f32 %v3817_v24 }
 0x418   : > { %v4256_v27 = vpop.eup %4255 }
 0x419   : > { %v1834_v56 = vadd.f32 1.0, %v4256_v27 }
 0x41b   : > { %4257 = vrcp.f32 %v1834_v56 }
 0x425   : > { %v4258_v6 = vpop.eup %4257 }
 0x426   : > { %v1837_v44 = vmul.f32 2.0, %v4258_v6  ;;  %v1839_v21 = vmul.f32 %v4258_v6, %v1814_v11 }
 0x428   : > { %v3818_v62 = vadd.f32 -1.0, %v1837_v44 }
 0x42a   : > { %v1841_v61 = vrot.slane %v3818_v62, 2 }
 0x42c   : > { %v1843_v43 = vmul.f32 %v4258_v6, %v1841_v61 }
 0x42e   : > { %v1845_v9 = vrot.slane %v1843_v43, 7 }
 0x430   : > { %v1847_v38 = vadd.f32 %v1845_v9, %v1839_v21  ;;  %v1244_v21 = vld [vmem:[%s5929_s3 + $0x78] sm:$0xff]  ;;  %v1243_v9 = vld [vmem:[%s5929_s3 + $0x70] sm:$0xff] }
 0x431   : > { %3774 = vmatprep.mubr.msk.f32.mxu0 %vm1293_vm15, %v1244_v21 }
 0x432   : > { %4259 = vtanh.f32 %v1847_v38  ;;  %1490 = vmatmul.mubr.f32.gmra.mrb[30].mxu0 %v1243_v9 }
 0x43c   : > { %v4260_v8 = vpop.eup %4259 }
 0x43d   : > { %v1850_v15 = vrot.slane %v4260_v8, 6 }
 0x43f   : > { %v1852_v0 = vmul.f32 %v4258_v6, %v1850_v15  ;;  %v1923_v6 = vld [vmem:[#allocation2 + $0x20] sm:$0xf] }
 0x441   : > { %v1855_v1 = vmul.f32 %v1854_v17, %v1852_v0  ;;  %v1861_v47 = vrot.slane %v1852_v0, %v5535_v60 }
 0x443   : > { %v1856_v48 = vadd.f32 %v1855_v1, %v1823_v31  ;;  %v1862_v22 = vmul.f32 %v1861_v47, %v5524_v42 }
 0x445   : > { %v1863_v50 = vadd.f32 %v1862_v22, %v1857_v28 }
 0x447   : > { %v3820_v23 = vmul.f32 -1.442695, %v1863_v50  ;;  %v1953_v50 = vstv %s3828_s14  ;;  %s3846_s14 = sld [smem:[#allocation4 + $0x13]] }
 0x449   : > { %4261 = vpow2.f32 %v3820_v23 }
 0x44a   : > { %v1481_v51 = vpop.f32.mrb[26].mxu0 }
 0x44b   : > { %1620 = vst.msk [vmem:[#allocation2 + $0x28] sm:$0xff] %vm1293_vm15, %v1481_v51  ;;  %v1483_v31 = vpop.f32.mrb[27].mxu0 }
 0x453   : > { %v4262_v49 = vpop.eup %4261 }
 0x454   : > { %v1867_v12 = vadd.f32 1.0, %v4262_v49 }
 0x456   : > { %4263 = vrcp.f32 %v1867_v12 }
 0x460   : > { %v4264_v33 = vpop.eup %4263 }
 0x461   : > { %v1870_v46 = vmul.f32 2.0, %v4264_v33  ;;  %v1872_v55 = vmul.f32 %v4264_v33, %v1847_v38 }
 0x463   : > { %v3821_v14 = vadd.f32 -1.0, %v1870_v46 }
 0x465   : > { %v1874_v63 = vrot.slane %v3821_v14, 2 }
 0x467   : > { %v1876_v57 = vmul.f32 %v4264_v33, %v1874_v63 }
 0x469   : > { %v1878_v54 = vrot.slane %v1876_v57, 7 }
 0x46b   : > { %v1880_v53 = vadd.f32 %v1878_v54, %v1872_v55 }
 0x46d   : > { %4265 = vtanh.f32 %v1880_v53 }
 0x477   : > { %v4266_v37 = vpop.eup %4265 }
 0x478   : > { %v1883_v16 = vrot.slane %v4266_v37, 6 }
 0x47a   : > { %v1885_v52 = vmul.f32 %v4264_v33, %v1883_v16  ;;  %v1956_v33 = vld [vmem:[#allocation2 + $0x24] sm:$0xf] }
 0x47c   : > { %v1888_v19 = vmul.f32 %v1887_v32, %v1885_v52  ;;  %v1894_v35 = vrot.slane %v1885_v52, %v5535_v60 }
 0x47e   : > { %v1889_v18 = vadd.f32 %v1888_v19, %v1856_v48  ;;  %v1895_v34 = vmul.f32 %v1894_v35, %v5524_v42 }
 0x480   : > { %v1896_v58 = vadd.f32 %v1895_v34, %v1890_v40 }
 0x482   : > { %v3823_v59 = vmul.f32 -1.442695, %v1896_v58  ;;  %v1986_v58 = vstv %s3831_s15  ;;  %s3849_s15 = sld [smem:[#allocation4 + $0x14]] }
 0x484   : > { %4267 = vpow2.f32 %v3823_v59 }
 0x48e   : > { %v4268_v10 = vpop.eup %4267 }
 0x48f   : > { %v1900_v4 = vadd.f32 1.0, %v4268_v10  ;;  %v1486_v35 = vpop.f32.mrb[28].mxu0 }
 0x490   : > { %1621 = vst.msk [vmem:[#allocation2 + $0x30] sm:$0xff] %vm1293_vm15, %v1486_v35 }
 0x491   : > { %4269 = vrcp.f32 %v1900_v4 }
 0x49b   : > { %v4270_v36 = vpop.eup %4269 }
 0x49c   : > { %v1903_v3 = vmul.f32 2.0, %v4270_v36  ;;  %v1905_v13 = vmul.f32 %v4270_v36, %v1880_v53 }
 0x49e   : > { %v3824_v11 = vadd.f32 -1.0, %v1903_v3 }
 0x4a0   : > { %v1907_v7 = vrot.slane %v3824_v11, 2 }
 0x4a2   : > { %v1909_v30 = vmul.f32 %v4270_v36, %v1907_v7 }
 0x4a4   : > { %v1911_v5 = vrot.slane %v1909_v30, 7 }
 0x4a6   : > { %v1913_v29 = vadd.f32 %v1911_v5, %v1905_v13  ;;  %v1246_v13 = vld [vmem:[%s5929_s3 + $0x88] sm:$0xff]  ;;  %v1245_v5 = vld [vmem:[%s5929_s3 + $0x80] sm:$0xff] }
 0x4a7   : > { %3775 = vmatprep.mubr.msk.f32.mxu0 %vm1293_vm15, %v1246_v13 }
 0x4a8   : > { %4271 = vtanh.f32 %v1913_v29  ;;  %1495 = vmatmul.mubr.f32.gmra.mrb[32].mxu0 %v1245_v5 }
 0x4b2   : > { %v4272_v20 = vpop.eup %4271 }
 0x4b3   : > { %v1916_v25 = vrot.slane %v4272_v20, 6 }
 0x4b5   : > { %v1918_v24 = vmul.f32 %v4270_v36, %v1916_v25  ;;  %v1989_v36 = vld [vmem:[#allocation2 + $0x28] sm:$0xf] }
 0x4b7   : > { %v1921_v27 = vmul.f32 %v1920_v26, %v1918_v24  ;;  %v1927_v56 = vrot.slane %v1918_v24, %v5535_v60 }
 0x4b9   : > { %v1922_v44 = vadd.f32 %v1921_v27, %v1889_v18  ;;  %v1928_v62 = vmul.f32 %v1927_v56, %v5524_v42  ;;  %v1488_v18 = vpop.f32.mrb[29].mxu0 }
 0x4bb   : > { %v1929_v61 = vadd.f32 %v1928_v62, %v1923_v6 }
 0x4bd   : > { %v3826_v43 = vmul.f32 -1.442695, %v1929_v61  ;;  %v2019_v61 = vstv %s3834_s24  ;;  %s3852_s24 = sld [smem:[#allocation4 + $0x15]] }
 0x4bf   : > { %4273 = vpow2.f32 %v3826_v43 }
 0x4c9   : > { %v4274_v38 = vpop.eup %4273 }
 0x4ca   : > { %v1933_v39 = vadd.f32 1.0, %v4274_v38 }
 0x4cc   : > { %4275 = vrcp.f32 %v1933_v39 }
 0x4d6   : > { %v4276_v2 = vpop.eup %4275 }
 0x4d7   : > { %v1936_v8 = vmul.f32 2.0, %v4276_v2  ;;  %v1938_v1 = vmul.f32 %v4276_v2, %v1913_v29 }
 0x4d9   : > { %v3827_v15 = vadd.f32 -1.0, %v1936_v8 }
 0x4db   : > { %v1940_v17 = vrot.slane %v3827_v15, 2 }
 0x4dd   : > { %v1942_v0 = vmul.f32 %v4276_v2, %v1940_v17 }
 0x4df   : > { %v1944_v47 = vrot.slane %v1942_v0, 7 }
 0x4e1   : > { %v1946_v28 = vadd.f32 %v1944_v47, %v1938_v1 }
 0x4e3   : > { %4277 = vtanh.f32 %v1946_v28 }
 0x4ed   : > { %v4278_v48 = vpop.eup %4277 }
 0x4ee   : > { %v1949_v22 = vrot.slane %v4278_v48, 6 }
 0x4f0   : > { %v1951_v23 = vmul.f32 %v4276_v2, %v1949_v22  ;;  %v2022_v2 = vld [vmem:[#allocation2 + $0x2c] sm:$0xf] }
 0x4f2   : > { %v1954_v45 = vmul.f32 %v1953_v50, %v1951_v23  ;;  %v1960_v41 = vrot.slane %v1951_v23, %v5535_v60 }
 0x4f4   : > { %v1955_v49 = vadd.f32 %v1954_v45, %v1922_v44  ;;  %v1961_v12 = vmul.f32 %v1960_v41, %v5524_v42 }
 0x4f6   : > { %v1962_v46 = vadd.f32 %v1961_v12, %v1956_v33 }
 0x4f8   : > { %v3829_v14 = vmul.f32 -1.442695, %v1962_v46  ;;  %v2052_v46 = vstv %s3837_s26  ;;  %s3855_s26 = sld [smem:[#allocation4 + $0x16]] }
 0x4fa   : > { %4279 = vpow2.f32 %v3829_v14 }
 0x504   : > { %v4280_v63 = vpop.eup %4279 }
 0x505   : > { %v1966_v57 = vadd.f32 1.0, %v4280_v63  ;;  %v1491_v41 = vpop.f32.mrb[30].mxu0 }
 0x506   : > { %1622 = vst.msk [vmem:[#allocation2 + $0x38] sm:$0xff] %vm1293_vm15, %v1491_v41 }
 0x507   : > { %4281 = vrcp.f32 %v1966_v57 }
 0x511   : > { %v4282_v55 = vpop.eup %4281 }
 0x512   : > { %v1969_v54 = vmul.f32 2.0, %v4282_v55  ;;  %v1971_v32 = vmul.f32 %v4282_v55, %v1946_v28 }
 0x514   : > { %v3830_v53 = vadd.f32 -1.0, %v1969_v54 }
 0x516   : > { %v1973_v37 = vrot.slane %v3830_v53, 2 }
 0x518   : > { %v1975_v16 = vmul.f32 %v4282_v55, %v1973_v37 }
 0x51a   : > { %v1977_v52 = vrot.slane %v1975_v16, 7 }
 0x51c   : > { %v1979_v19 = vadd.f32 %v1977_v52, %v1971_v32  ;;  %v1248_v32 = vld [vmem:[%s5929_s3 + $0x98] sm:$0xff]  ;;  %v1247_v52 = vld [vmem:[%s5929_s3 + $0x90] sm:$0xff] }
 0x51d   : > { %3776 = vmatprep.mubr.msk.f32.mxu0 %vm1293_vm15, %v1248_v32 }
 0x51e   : > { %4283 = vtanh.f32 %v1979_v19  ;;  %1500 = vmatmul.mubr.f32.gmra.mrb[34].mxu0 %v1247_v52 }
 0x528   : > { %v4284_v34 = vpop.eup %4283 }
 0x529   : > { %v1982_v40 = vrot.slane %v4284_v34, 6 }
 0x52b   : > { %v1984_v59 = vmul.f32 %v4282_v55, %v1982_v40  ;;  %v2055_v55 = vld [vmem:[#allocation2 + $0x30] sm:$0xf] }
 0x52d   : > { %v1987_v10 = vmul.f32 %v1986_v58, %v1984_v59  ;;  %v1993_v4 = vrot.slane %v1984_v59, %v5535_v60 }
 0x52f   : > { %v1988_v3 = vadd.f32 %v1987_v10, %v1955_v49  ;;  %v1994_v11 = vmul.f32 %v1993_v4, %v5524_v42  ;;  %v1493_v49 = vpop.f32.mrb[31].mxu0 }
 0x531   : > { %v1995_v7 = vadd.f32 %v1994_v11, %v1989_v36 }
 0x533   : > { %v3832_v30 = vmul.f32 -1.442695, %v1995_v7  ;;  %v2085_v7 = vstv %s3840_s8  ;;  %s3858_s8 = sld [smem:[#allocation4 + $0x17]] }
 0x535   : > { %4285 = vpow2.f32 %v3832_v30 }
 0x53f   : > { %v4286_v29 = vpop.eup %4285 }
 0x540   : > { %v1999_v51 = vadd.f32 1.0, %v4286_v29 }
 0x542   : > { %4287 = vrcp.f32 %v1999_v51 }
 0x54c   : > { %v4288_v31 = vpop.eup %4287 }
 0x54d   : > { %v2002_v20 = vmul.f32 2.0, %v4288_v31  ;;  %v2004_v27 = vmul.f32 %v4288_v31, %v1979_v19 }
 0x54f   : > { %v3833_v25 = vadd.f32 -1.0, %v2002_v20 }
 0x551   : > { %v2006_v26 = vrot.slane %v3833_v25, 2 }
 0x553   : > { %v2008_v24 = vmul.f32 %v4288_v31, %v2006_v26 }
 0x555   : > { %v2010_v56 = vrot.slane %v2008_v24, 7 }
 0x557   : > { %v2012_v6 = vadd.f32 %v2010_v56, %v2004_v27 }
 0x559   : > { %4289 = vtanh.f32 %v2012_v6 }
 0x563   : > { %v4290_v44 = vpop.eup %4289 }
 0x564   : > { %v2015_v62 = vrot.slane %v4290_v44, 6 }
 0x566   : > { %v2017_v43 = vmul.f32 %v4288_v31, %v2015_v62  ;;  %v2088_v31 = vld [vmem:[#allocation2 + $0x34] sm:$0xf] }
 0x568   : > { %v2020_v21 = vmul.f32 %v2019_v61, %v2017_v43  ;;  %v2026_v9 = vrot.slane %v2017_v43, %v5535_v60 }
 0x56a   : > { %v2021_v38 = vadd.f32 %v2020_v21, %v1988_v3  ;;  %v2027_v39 = vmul.f32 %v2026_v9, %v5524_v42 }
 0x56c   : > { %v2028_v8 = vadd.f32 %v2027_v39, %v2022_v2 }
 0x56e   : > { %v3835_v15 = vmul.f32 -1.442695, %v2028_v8  ;;  %v2118_v8 = vstv %s3843_s9  ;;  %s3861_s9 = sld [smem:[#allocation4 + $0x18]] }
 0x570   : > { %4291 = vpow2.f32 %v3835_v15 }
 0x57a   : > { %v4292_v17 = vpop.eup %4291 }
 0x57b   : > { %v2032_v0 = vadd.f32 1.0, %v4292_v17  ;;  %v1496_v9 = vpop.f32.mrb[32].mxu0 }
 0x57c   : > { %1623 = vst.msk [vmem:[#allocation2 + $0x40] sm:$0xff] %vm1293_vm15, %v1496_v9 }
 0x57d   : > { %4293 = vrcp.f32 %v2032_v0 }
 0x587   : > { %v4294_v1 = vpop.eup %4293 }
 0x588   : > { %v2035_v47 = vmul.f32 2.0, %v4294_v1  ;;  %v2037_v50 = vmul.f32 %v4294_v1, %v2012_v6 }
 0x58a   : > { %v3836_v28 = vadd.f32 -1.0, %v2035_v47 }
 0x58c   : > { %v2039_v48 = vrot.slane %v3836_v28, 2 }
 0x58e   : > { %v2041_v22 = vmul.f32 %v4294_v1, %v2039_v48 }
 0x590   : > { %v2043_v23 = vrot.slane %v2041_v22, 7 }
 0x592   : > { %v2045_v45 = vadd.f32 %v2043_v23, %v2037_v50  ;;  %v1250_v50 = vld [vmem:[%s5929_s3 + $0xa8] sm:$0xff]  ;;  %v1249_v23 = vld [vmem:[%s5929_s3 + $0xa0] sm:$0xff] }
 0x593   : > { %3777 = vmatprep.mubr.msk.f32.mxu0 %vm1293_vm15, %v1250_v50 }
 0x594   : > { %4295 = vtanh.f32 %v2045_v45  ;;  %1505 = vmatmul.mubr.f32.gmra.mrb[36].mxu0 %v1249_v23 }
 0x59e   : > { %v4296_v12 = vpop.eup %4295 }
 0x59f   : > { %v2048_v33 = vrot.slane %v4296_v12, 6 }
 0x5a1   : > { %v2050_v14 = vmul.f32 %v4294_v1, %v2048_v33  ;;  %v2121_v1 = vld [vmem:[#allocation2 + $0x38] sm:$0xf] }
 0x5a3   : > { %v2053_v63 = vmul.f32 %v2052_v46, %v2050_v14  ;;  %v2059_v57 = vrot.slane %v2050_v14, %v5535_v60 }
 0x5a5   : > { %v2054_v54 = vadd.f32 %v2053_v63, %v2021_v38  ;;  %v2060_v53 = vmul.f32 %v2059_v57, %v5524_v42  ;;  %v1498_v38 = vpop.f32.mrb[33].mxu0 }
 0x5a7   : > { %v2061_v37 = vadd.f32 %v2060_v53, %v2055_v55 }
 0x5a9   : > { %v3838_v16 = vmul.f32 -1.442695, %v2061_v37  ;;  %v2151_v37 = vstv %s3846_s14  ;;  %s3864_s14 = sld [smem:[#allocation4 + $0x19]] }
 0x5ab   : > { %4297 = vpow2.f32 %v3838_v16 }
 0x5b5   : > { %v4298_v19 = vpop.eup %4297 }
 0x5b6   : > { %v2065_v35 = vadd.f32 1.0, %v4298_v19 }
 0x5b8   : > { %4299 = vrcp.f32 %v2065_v35 }
 0x5c2   : > { %v4300_v18 = vpop.eup %4299 }
 0x5c3   : > { %v2068_v34 = vmul.f32 2.0, %v4300_v18  ;;  %v2070_v10 = vmul.f32 %v4300_v18, %v2045_v45 }
 0x5c5   : > { %v3839_v40 = vadd.f32 -1.0, %v2068_v34 }
 0x5c7   : > { %v2072_v58 = vrot.slane %v3839_v40, 2 }
 0x5c9   : > { %v2074_v59 = vmul.f32 %v4300_v18, %v2072_v58 }
 0x5cb   : > { %v2076_v4 = vrot.slane %v2074_v59, 7 }
 0x5cd   : > { %v2078_v36 = vadd.f32 %v2076_v4, %v2070_v10 }
 0x5cf   : > { %4301 = vtanh.f32 %v2078_v36 }
 0x5d9   : > { %v4302_v3 = vpop.eup %4301 }
 0x5da   : > { %v2081_v11 = vrot.slane %v4302_v3, 6 }
 0x5dc   : > { %v2083_v30 = vmul.f32 %v4300_v18, %v2081_v11  ;;  %v2154_v18 = vld [vmem:[#allocation2 + $0x3c] sm:$0xf] }
 0x5de   : > { %v2086_v13 = vmul.f32 %v2085_v7, %v2083_v30  ;;  %v2092_v5 = vrot.slane %v2083_v30, %v5535_v60 }
 0x5e0   : > { %v2087_v29 = vadd.f32 %v2086_v13, %v2054_v54  ;;  %v2093_v51 = vmul.f32 %v2092_v5, %v5524_v42 }
 0x5e2   : > { %v2094_v20 = vadd.f32 %v2093_v51, %v2088_v31 }
 0x5e4   : > { %v3841_v25 = vmul.f32 -1.442695, %v2094_v20  ;;  %v2184_v20 = vstv %s3849_s15  ;;  %s3867_s15 = sld [smem:[#allocation4 + $0x1a]] }
 0x5e6   : > { %4303 = vpow2.f32 %v3841_v25 }
 0x5f0   : > { %v4304_v26 = vpop.eup %4303 }
 0x5f1   : > { %v2098_v24 = vadd.f32 1.0, %v4304_v26  ;;  %v1501_v5 = vpop.f32.mrb[34].mxu0 }
 0x5f2   : > { %1624 = vst.msk [vmem:[#allocation2 + $0x48] sm:$0xff] %vm1293_vm15, %v1501_v5 }
 0x5f3   : > { %4305 = vrcp.f32 %v2098_v24 }
 0x5fd   : > { %v4306_v27 = vpop.eup %4305 }
 0x5fe   : > { %v2101_v56 = vmul.f32 2.0, %v4306_v27  ;;  %v2103_v61 = vmul.f32 %v4306_v27, %v2078_v36 }
 0x600   : > { %v3842_v6 = vadd.f32 -1.0, %v2101_v56 }
 0x602   : > { %v2105_v44 = vrot.slane %v3842_v6, 2 }
 0x604   : > { %v2107_v62 = vmul.f32 %v4306_v27, %v2105_v44 }
 0x606   : > { %v2109_v43 = vrot.slane %v2107_v62, 7 }
 0x608   : > { %v2111_v21 = vadd.f32 %v2109_v43, %v2103_v61  ;;  %v1252_v61 = vld [vmem:[%s5929_s3 + $0xb8] sm:$0xff]  ;;  %v1251_v43 = vld [vmem:[%s5929_s3 + $0xb0] sm:$0xff] }
 0x609   : > { %3778 = vmatprep.mubr.msk.f32.mxu0 %vm1293_vm15, %v1252_v61 }
 0x60a   : > { %4307 = vtanh.f32 %v2111_v21  ;;  %1510 = vmatmul.mubr.f32.gmra.mrb[38].mxu0 %v1251_v43 }
 0x614   : > { %v4308_v39 = vpop.eup %4307 }
 0x615   : > { %v2114_v2 = vrot.slane %v4308_v39, 6 }
 0x617   : > { %v2116_v15 = vmul.f32 %v4306_v27, %v2114_v2  ;;  %v2187_v27 = vld [vmem:[#allocation2 + $0x40] sm:$0xf] }
 0x619   : > { %v2119_v17 = vmul.f32 %v2118_v8, %v2116_v15  ;;  %v2125_v0 = vrot.slane %v2116_v15, %v5535_v60 }
 0x61b   : > { %v2120_v47 = vadd.f32 %v2119_v17, %v2087_v29  ;;  %v2126_v28 = vmul.f32 %v2125_v0, %v5524_v42  ;;  %v1503_v29 = vpop.f32.mrb[35].mxu0 }
 0x61d   : > { %v2127_v48 = vadd.f32 %v2126_v28, %v2121_v1 }
 0x61f   : > { %v3844_v22 = vmul.f32 -1.442695, %v2127_v48  ;;  %v2217_v48 = vstv %s3852_s24  ;;  %s3870_s24 = sld [smem:[#allocation4 + $0x1b]] }
 0x621   : > { %4309 = vpow2.f32 %v3844_v22 }
 0x62b   : > { %v4310_v45 = vpop.eup %4309 }
 0x62c   : > { %v2131_v41 = vadd.f32 1.0, %v4310_v45 }
 0x62e   : > { %4311 = vrcp.f32 %v2131_v41 }
 0x638   : > { %v4312_v49 = vpop.eup %4311 }
 0x639   : > { %v2134_v12 = vmul.f32 2.0, %v4312_v49  ;;  %v2136_v63 = vmul.f32 %v4312_v49, %v2111_v21 }
 0x63b   : > { %v3845_v33 = vadd.f32 -1.0, %v2134_v12 }
 0x63d   : > { %v2138_v46 = vrot.slane %v3845_v33, 2 }
 0x63f   : > { %v2140_v14 = vmul.f32 %v4312_v49, %v2138_v46 }
 0x641   : > { %v2142_v57 = vrot.slane %v2140_v14, 7 }
 0x643   : > { %v2144_v55 = vadd.f32 %v2142_v57, %v2136_v63 }
 0x645   : > { %4313 = vtanh.f32 %v2144_v55 }
 0x64f   : > { %v4314_v54 = vpop.eup %4313 }
 0x650   : > { %v2147_v53 = vrot.slane %v4314_v54, 6 }
 0x652   : > { %v2149_v16 = vmul.f32 %v4312_v49, %v2147_v53  ;;  %v2220_v49 = vld [vmem:[#allocation2 + $0x44] sm:$0xf] }
 0x654   : > { %v2152_v32 = vmul.f32 %v2151_v37, %v2149_v16  ;;  %v2158_v52 = vrot.slane %v2149_v16, %v5535_v60 }
 0x656   : > { %v2153_v19 = vadd.f32 %v2152_v32, %v2120_v47  ;;  %v2159_v35 = vmul.f32 %v2158_v52, %v5524_v42 }
 0x658   : > { %v2160_v34 = vadd.f32 %v2159_v35, %v2154_v18 }
 0x65a   : > { %v3847_v40 = vmul.f32 -1.442695, %v2160_v34  ;;  %v2250_v34 = vstv %s3855_s26  ;;  %s3873_s26 = sld [smem:[#allocation4 + $0x1c]] }
 0x65c   : > { %4315 = vpow2.f32 %v3847_v40 }
 0x666   : > { %v4316_v58 = vpop.eup %4315 }
 0x667   : > { %v2164_v59 = vadd.f32 1.0, %v4316_v58  ;;  %v1506_v52 = vpop.f32.mrb[36].mxu0 }
 0x668   : > { %1625 = vst.msk [vmem:[#allocation2 + $0x50] sm:$0xff] %vm1293_vm15, %v1506_v52 }
 0x669   : > { %4317 = vrcp.f32 %v2164_v59 }
 0x673   : > { %v4318_v10 = vpop.eup %4317 }
 0x674   : > { %v2167_v4 = vmul.f32 2.0, %v4318_v10  ;;  %v2169_v7 = vmul.f32 %v4318_v10, %v2144_v55 }
 0x676   : > { %v3848_v36 = vadd.f32 -1.0, %v2167_v4 }
 0x678   : > { %v2171_v3 = vrot.slane %v3848_v36, 2 }
 0x67a   : > { %v2173_v11 = vmul.f32 %v4318_v10, %v2171_v3 }
 0x67c   : > { %v2175_v30 = vrot.slane %v2173_v11, 7 }
 0x67e   : > { %v2177_v13 = vadd.f32 %v2175_v30, %v2169_v7  ;;  %v1254_v7 = vld [vmem:[%s5929_s3 + $0xc8] sm:$0xff]  ;;  %v1253_v30 = vld [vmem:[%s5929_s3 + $0xc0] sm:$0xff] }
 0x67f   : > { %3779 = vmatprep.mubr.msk.f32.mxu0 %vm1293_vm15, %v1254_v7 }
 0x680   : > { %4319 = vtanh.f32 %v2177_v13  ;;  %1515 = vmatmul.mubr.f32.gmra.mrb[40].mxu0 %v1253_v30 }
 0x68a   : > { %v4320_v51 = vpop.eup %4319 }
 0x68b   : > { %v2180_v31 = vrot.slane %v4320_v51, 6 }
 0x68d   : > { %v2182_v25 = vmul.f32 %v4318_v10, %v2180_v31  ;;  %v2253_v10 = vld [vmem:[#allocation2 + $0x48] sm:$0xf] }
 0x68f   : > { %v2185_v26 = vmul.f32 %v2184_v20, %v2182_v25  ;;  %v2191_v24 = vrot.slane %v2182_v25, %v5535_v60 }
 0x691   : > { %v2186_v56 = vadd.f32 %v2185_v26, %v2153_v19  ;;  %v2192_v6 = vmul.f32 %v2191_v24, %v5524_v42  ;;  %v1508_v19 = vpop.f32.mrb[37].mxu0 }
 0x693   : > { %v2193_v44 = vadd.f32 %v2192_v6, %v2187_v27 }
 0x695   : > { %v3850_v62 = vmul.f32 -1.442695, %v2193_v44  ;;  %v2283_v44 = vstv %s3858_s8  ;;  %s3876_s8 = sld [smem:[#allocation4 + $0x1d]] }
 0x697   : > { %4321 = vpow2.f32 %v3850_v62 }
 0x6a1   : > { %v4322_v21 = vpop.eup %4321 }
 0x6a2   : > { %v2197_v9 = vadd.f32 1.0, %v4322_v21 }
 0x6a4   : > { %4323 = vrcp.f32 %v2197_v9 }
 0x6ae   : > { %v4324_v38 = vpop.eup %4323 }
 0x6af   : > { %v2200_v39 = vmul.f32 2.0, %v4324_v38  ;;  %v2202_v17 = vmul.f32 %v4324_v38, %v2177_v13 }
 0x6b1   : > { %v3851_v2 = vadd.f32 -1.0, %v2200_v39 }
 0x6b3   : > { %v2204_v8 = vrot.slane %v3851_v2, 2 }
 0x6b5   : > { %v2206_v15 = vmul.f32 %v4324_v38, %v2204_v8 }
 0x6b7   : > { %v2208_v0 = vrot.slane %v2206_v15, 7 }
 0x6b9   : > { %v2210_v1 = vadd.f32 %v2208_v0, %v2202_v17 }
 0x6bb   : > { %4325 = vtanh.f32 %v2210_v1 }
 0x6c5   : > { %v4326_v47 = vpop.eup %4325 }
 0x6c6   : > { %v2213_v28 = vrot.slane %v4326_v47, 6 }
 0x6c8   : > { %v2215_v22 = vmul.f32 %v4324_v38, %v2213_v28  ;;  %v2286_v38 = vld [vmem:[#allocation2 + $0x4c] sm:$0xf] }
 0x6ca   : > { %v2218_v50 = vmul.f32 %v2217_v48, %v2215_v22  ;;  %v2224_v23 = vrot.slane %v2215_v22, %v5535_v60 }
 0x6cc   : > { %v2219_v45 = vadd.f32 %v2218_v50, %v2186_v56  ;;  %v2225_v41 = vmul.f32 %v2224_v23, %v5524_v42 }
 0x6ce   : > { %v2226_v12 = vadd.f32 %v2225_v41, %v2220_v49 }
 0x6d0   : > { %v3853_v33 = vmul.f32 -1.442695, %v2226_v12  ;;  %v2316_v12 = vstv %s3861_s9  ;;  %s3879_s9 = sld [smem:[#allocation4 + $0x1e]] }
 0x6d2   : > { %4327 = vpow2.f32 %v3853_v33 }
 0x6dc   : > { %v4328_v46 = vpop.eup %4327 }
 0x6dd   : > { %v2230_v14 = vadd.f32 1.0, %v4328_v46  ;;  %v1511_v23 = vpop.f32.mrb[38].mxu0 }
 0x6de   : > { %1626 = vst.msk [vmem:[#allocation2 + $0x58] sm:$0xff] %vm1293_vm15, %v1511_v23 }
 0x6df   : > { %4329 = vrcp.f32 %v2230_v14 }
 0x6e9   : > { %v4330_v63 = vpop.eup %4329 }
 0x6ea   : > { %v2233_v57 = vmul.f32 2.0, %v4330_v63  ;;  %v2235_v37 = vmul.f32 %v4330_v63, %v2210_v1 }
 0x6ec   : > { %v3854_v55 = vadd.f32 -1.0, %v2233_v57 }
 0x6ee   : > { %v2237_v54 = vrot.slane %v3854_v55, 2 }
 0x6f0   : > { %v2239_v53 = vmul.f32 %v4330_v63, %v2237_v54 }
 0x6f2   : > { %v2241_v16 = vrot.slane %v2239_v53, 7 }
 0x6f4   : > { %v2243_v32 = vadd.f32 %v2241_v16, %v2235_v37  ;;  %v1256_v37 = vld [vmem:[%s5929_s3 + $0xd8] sm:$0xff]  ;;  %v1255_v16 = vld [vmem:[%s5929_s3 + $0xd0] sm:$0xff] }
 0x6f5   : > { %3780 = vmatprep.mubr.msk.f32.mxu0 %vm1293_vm15, %v1256_v37 }
 0x6f6   : > { %4331 = vtanh.f32 %v2243_v32  ;;  %1520 = vmatmul.mubr.f32.gmra.mrb[42].mxu0 %v1255_v16 }
 0x700   : > { %v4332_v35 = vpop.eup %4331 }
 0x701   : > { %v2246_v18 = vrot.slane %v4332_v35, 6 }
 0x703   : > { %v2248_v40 = vmul.f32 %v4330_v63, %v2246_v18  ;;  %v2319_v63 = vld [vmem:[#allocation2 + $0x50] sm:$0xf] }
 0x705   : > { %v2251_v58 = vmul.f32 %v2250_v34, %v2248_v40  ;;  %v2257_v59 = vrot.slane %v2248_v40, %v5535_v60 }
 0x707   : > { %v2252_v4 = vadd.f32 %v2251_v58, %v2219_v45  ;;  %v2258_v36 = vmul.f32 %v2257_v59, %v5524_v42  ;;  %v1513_v45 = vpop.f32.mrb[39].mxu0 }
 0x709   : > { %v2259_v3 = vadd.f32 %v2258_v36, %v2253_v10 }
 0x70b   : > { %v3856_v11 = vmul.f32 -1.442695, %v2259_v3  ;;  %v2349_v3 = vstv %s3864_s14  ;;  %s3882_s14 = sld [smem:[#allocation4 + $0x1f]] }
 0x70d   : > { %4333 = vpow2.f32 %v3856_v11 }
 0x717   : > { %v4334_v13 = vpop.eup %4333 }
 0x718   : > { %v2263_v5 = vadd.f32 1.0, %v4334_v13 }
 0x71a   : > { %4335 = vrcp.f32 %v2263_v5 }
 0x724   : > { %v4336_v29 = vpop.eup %4335 }
 0x725   : > { %v2266_v51 = vmul.f32 2.0, %v4336_v29  ;;  %v2268_v26 = vmul.f32 %v4336_v29, %v2243_v32 }
 0x727   : > { %v3857_v31 = vadd.f32 -1.0, %v2266_v51 }
 0x729   : > { %v2270_v20 = vrot.slane %v3857_v31, 2 }
 0x72b   : > { %v2272_v25 = vmul.f32 %v4336_v29, %v2270_v20 }
 0x72d   : > { %v2274_v24 = vrot.slane %v2272_v25, 7 }
 0x72f   : > { %v2276_v27 = vadd.f32 %v2274_v24, %v2268_v26 }
 0x731   : > { %4337 = vtanh.f32 %v2276_v27 }
 0x73b   : > { %v4338_v56 = vpop.eup %4337 }
 0x73c   : > { %v2279_v6 = vrot.slane %v4338_v56, 6 }
 0x73e   : > { %v2281_v62 = vmul.f32 %v4336_v29, %v2279_v6  ;;  %v2352_v29 = vld [vmem:[#allocation2 + $0x54] sm:$0xf] }
 0x740   : > { %v2284_v61 = vmul.f32 %v2283_v44, %v2281_v62  ;;  %v2290_v43 = vrot.slane %v2281_v62, %v5535_v60 }
 0x742   : > { %v2285_v21 = vadd.f32 %v2284_v61, %v2252_v4  ;;  %v2291_v9 = vmul.f32 %v2290_v43, %v5524_v42 }
 0x744   : > { %v2292_v39 = vadd.f32 %v2291_v9, %v2286_v38 }
 0x746   : > { %v3859_v2 = vmul.f32 -1.442695, %v2292_v39  ;;  %v2382_v39 = vstv %s3867_s15  ;;  %s3885_s15 = sld [smem:[#allocation4 + $0x20]] }
 0x748   : > { %4339 = vpow2.f32 %v3859_v2 }
 0x752   : > { %v4340_v8 = vpop.eup %4339 }
 0x753   : > { %v2296_v15 = vadd.f32 1.0, %v4340_v8  ;;  %v1516_v43 = vpop.f32.mrb[40].mxu0 }
 0x754   : > { %1627 = vst.msk [vmem:[#allocation2 + $0x60] sm:$0xff] %vm1293_vm15, %v1516_v43 }
 0x755   : > { %4341 = vrcp.f32 %v2296_v15 }
 0x75f   : > { %v4342_v17 = vpop.eup %4341 }
 0x760   : > { %v2299_v0 = vmul.f32 2.0, %v4342_v17  ;;  %v2301_v48 = vmul.f32 %v4342_v17, %v2276_v27 }
 0x762   : > { %v3860_v1 = vadd.f32 -1.0, %v2299_v0 }
 0x764   : > { %v2303_v47 = vrot.slane %v3860_v1, 2 }
 0x766   : > { %v2305_v28 = vmul.f32 %v4342_v17, %v2303_v47 }
 0x768   : > { %v2307_v22 = vrot.slane %v2305_v28, 7 }
 0x76a   : > { %v2309_v50 = vadd.f32 %v2307_v22, %v2301_v48  ;;  %v1258_v48 = vld [vmem:[%s5929_s3 + $0xe8] sm:$0xff]  ;;  %v1257_v22 = vld [vmem:[%s5929_s3 + $0xe0] sm:$0xff] }
 0x76b   : > { %3781 = vmatprep.mubr.msk.f32.mxu1 %vm1293_vm15, %v1258_v48 }
 0x76c   : > { %4343 = vtanh.f32 %v2309_v50  ;;  %1525 = vmatmul.mubr.f32.vlgmr.msra.gmra.mrb[0].mxu1 %v1257_v22 }
 0x776   : > { %v4344_v41 = vpop.eup %4343 }
 0x777   : > { %v2312_v49 = vrot.slane %v4344_v41, 6 }
 0x779   : > { %v2314_v33 = vmul.f32 %v4342_v17, %v2312_v49  ;;  %v2385_v17 = vld [vmem:[#allocation2 + $0x58] sm:$0xf] }
 0x77b   : > { %v2317_v46 = vmul.f32 %v2316_v12, %v2314_v33  ;;  %v2323_v14 = vrot.slane %v2314_v33, %v5535_v60 }
 0x77d   : > { %v2318_v57 = vadd.f32 %v2317_v46, %v2285_v21  ;;  %v2324_v55 = vmul.f32 %v2323_v14, %v5524_v42  ;;  %v1518_v21 = vpop.f32.mrb[41].mxu0 }
 0x77f   : > { %v2325_v54 = vadd.f32 %v2324_v55, %v2319_v63 }
 0x781   : > { %v3862_v53 = vmul.f32 -1.442695, %v2325_v54  ;;  %v2415_v54 = vstv %s3870_s24  ;;  %s3888_s24 = sld [smem:[#allocation4 + $0x21]] }
 0x783   : > { %4345 = vpow2.f32 %v3862_v53 }
 0x78d   : > { %v4346_v32 = vpop.eup %4345 }
 0x78e   : > { %v2329_v52 = vadd.f32 1.0, %v4346_v32 }
 0x790   : > { %4347 = vrcp.f32 %v2329_v52 }
 0x79a   : > { %v4348_v19 = vpop.eup %4347 }
 0x79b   : > { %v2332_v35 = vmul.f32 2.0, %v4348_v19  ;;  %v2334_v58 = vmul.f32 %v4348_v19, %v2309_v50 }
 0x79d   : > { %v3863_v18 = vadd.f32 -1.0, %v2332_v35 }
 0x79f   : > { %v2336_v34 = vrot.slane %v3863_v18, 2 }
 0x7a1   : > { %v2338_v40 = vmul.f32 %v4348_v19, %v2336_v34 }
 0x7a3   : > { %v2340_v59 = vrot.slane %v2338_v40, 7 }
 0x7a5   : > { %v2342_v10 = vadd.f32 %v2340_v59, %v2334_v58 }
 0x7a7   : > { %4349 = vtanh.f32 %v2342_v10 }
 0x7b1   : > { %v4350_v4 = vpop.eup %4349 }
 0x7b2   : > { %v2345_v36 = vrot.slane %v4350_v4, 6 }
 0x7b4   : > { %v2347_v11 = vmul.f32 %v4348_v19, %v2345_v36  ;;  %v2418_v19 = vld [vmem:[#allocation2 + $0x5c] sm:$0xf] }
 0x7b6   : > { %v2350_v7 = vmul.f32 %v2349_v3, %v2347_v11  ;;  %v2356_v30 = vrot.slane %v2347_v11, %v5535_v60 }
 0x7b8   : > { %v2351_v13 = vadd.f32 %v2350_v7, %v2318_v57  ;;  %v2357_v5 = vmul.f32 %v2356_v30, %v5524_v42 }
 0x7ba   : > { %v2358_v51 = vadd.f32 %v2357_v5, %v2352_v29 }
 0x7bc   : > { %v3865_v31 = vmul.f32 -1.442695, %v2358_v51  ;;  %v2448_v51 = vstv %s3873_s26  ;;  %s3891_s26 = sld [smem:[#allocation4 + $0x22]] }
 0x7be   : > { %4351 = vpow2.f32 %v3865_v31 }
 0x7c8   : > { %v4352_v20 = vpop.eup %4351 }
 0x7c9   : > { %v2362_v25 = vadd.f32 1.0, %v4352_v20  ;;  %v1521_v30 = vpop.f32.mrb[42].mxu0 }
 0x7ca   : > { %1628 = vst.msk [vmem:[#allocation2 + $0x68] sm:$0xff] %vm1293_vm15, %v1521_v30 }
 0x7cb   : > { %4353 = vrcp.f32 %v2362_v25 }
 0x7d5   : > { %v4354_v26 = vpop.eup %4353 }
 0x7d6   : > { %v2365_v24 = vmul.f32 2.0, %v4354_v26  ;;  %v2367_v44 = vmul.f32 %v4354_v26, %v2342_v10 }
 0x7d8   : > { %v3866_v27 = vadd.f32 -1.0, %v2365_v24 }
 0x7da   : > { %v2369_v56 = vrot.slane %v3866_v27, 2 }
 0x7dc   : > { %v2371_v6 = vmul.f32 %v4354_v26, %v2369_v56 }
 0x7de   : > { %v2373_v62 = vrot.slane %v2371_v6, 7 }
 0x7e0   : > { %v2375_v61 = vadd.f32 %v2373_v62, %v2367_v44  ;;  %v1260_v44 = vld [vmem:[%s5929_s3 + $0xf8] sm:$0xff]  ;;  %v1259_v62 = vld [vmem:[%s5929_s3 + $0xf0] sm:$0xff] }
 0x7e1   : > { %3782 = vmatprep.mubr.msk.f32.mxu1 %vm1293_vm15, %v1260_v44 }
 0x7e2   : > { %4355 = vtanh.f32 %v2375_v61  ;;  %1530 = vmatmul.mubr.f32.gmra.mrb[2].mxu1 %v1259_v62 }
 0x7ec   : > { %v4356_v9 = vpop.eup %4355 }
 0x7ed   : > { %v2378_v38 = vrot.slane %v4356_v9, 6 }
 0x7ef   : > { %v2380_v2 = vmul.f32 %v4354_v26, %v2378_v38  ;;  %v2451_v26 = vld [vmem:[#allocation2 + $0x60] sm:$0xf] }
 0x7f1   : > { %v2383_v8 = vmul.f32 %v2382_v39, %v2380_v2  ;;  %v2389_v15 = vrot.slane %v2380_v2, %v5535_v60 }
 0x7f3   : > { %v2384_v0 = vadd.f32 %v2383_v8, %v2351_v13  ;;  %v2390_v1 = vmul.f32 %v2389_v15, %v5524_v42  ;;  %v1523_v13 = vpop.f32.mrb[43].mxu0 }
 0x7f5   : > { %v2391_v47 = vadd.f32 %v2390_v1, %v2385_v17 }
 0x7f7   : > { %v3868_v28 = vmul.f32 -1.442695, %v2391_v47  ;;  %v2481_v47 = vstv %s3876_s8  ;;  %s3894_s8 = sld [smem:[#allocation4 + $0x23]] }
 0x7f9   : > { %4357 = vpow2.f32 %v3868_v28 }
 0x803   : > { %v4358_v50 = vpop.eup %4357 }
 0x804   : > { %v2395_v23 = vadd.f32 1.0, %v4358_v50 }
 0x806   : > { %4359 = vrcp.f32 %v2395_v23 }
 0x810   : > { %v4360_v45 = vpop.eup %4359 }
 0x811   : > { %v2398_v41 = vmul.f32 2.0, %v4360_v45  ;;  %v2400_v46 = vmul.f32 %v4360_v45, %v2375_v61 }
 0x813   : > { %v3869_v49 = vadd.f32 -1.0, %v2398_v41 }
 0x815   : > { %v2402_v12 = vrot.slane %v3869_v49, 2 }
 0x817   : > { %v2404_v33 = vmul.f32 %v4360_v45, %v2402_v12 }
 0x819   : > { %v2406_v14 = vrot.slane %v2404_v33, 7 }
 0x81b   : > { %v2408_v63 = vadd.f32 %v2406_v14, %v2400_v46 }
 0x81d   : > { %4361 = vtanh.f32 %v2408_v63 }
 0x827   : > { %v4362_v57 = vpop.eup %4361 }
 0x828   : > { %v2411_v55 = vrot.slane %v4362_v57, 6 }
 0x82a   : > { %v2413_v53 = vmul.f32 %v4360_v45, %v2411_v55  ;;  %v2484_v45 = vld [vmem:[#allocation2 + $0x64] sm:$0xf] }
 0x82c   : > { %v2416_v37 = vmul.f32 %v2415_v54, %v2413_v53  ;;  %v2422_v16 = vrot.slane %v2413_v53, %v5535_v60 }
 0x82e   : > { %v2417_v32 = vadd.f32 %v2416_v37, %v2384_v0  ;;  %v2423_v52 = vmul.f32 %v2422_v16, %v5524_v42 }
 0x830   : > { %v2424_v35 = vadd.f32 %v2423_v52, %v2418_v19 }
 0x832   : > { %v3871_v18 = vmul.f32 -1.442695, %v2424_v35  ;;  %v2514_v35 = vstv %s3879_s9  ;;  %s3897_s9 = sld [smem:[#allocation4 + $0x24]] }
 0x834   : > { %4363 = vpow2.f32 %v3871_v18 }
 0x83e   : > { %v4364_v34 = vpop.eup %4363 }
 0x83f   : > { %v2428_v40 = vadd.f32 1.0, %v4364_v34  ;;  %v1526_v16 = vpop.f32.mrb[0].mxu1 }
 0x840   : > { %1629 = vst.msk [vmem:[#allocation2 + $0x70] sm:$0xff] %vm1293_vm15, %v1526_v16 }
 0x841   : > { %4365 = vrcp.f32 %v2428_v40 }
 0x84b   : > { %v4366_v58 = vpop.eup %4365 }
 0x84c   : > { %v2431_v59 = vmul.f32 2.0, %v4366_v58  ;;  %v2433_v3 = vmul.f32 %v4366_v58, %v2408_v63 }
 0x84e   : > { %v3872_v10 = vadd.f32 -1.0, %v2431_v59 }
 0x850   : > { %v2435_v4 = vrot.slane %v3872_v10, 2 }
 0x852   : > { %v2437_v36 = vmul.f32 %v4366_v58, %v2435_v4 }
 0x854   : > { %v2439_v11 = vrot.slane %v2437_v36, 7 }
 0x856   : > { %v2441_v7 = vadd.f32 %v2439_v11, %v2433_v3  ;;  %v1262_v3 = vld [vmem:[%s5929_s3 + $0x108] sm:$0xff]  ;;  %v1261_v11 = vld [vmem:[%s5929_s3 + $0x100] sm:$0xff] }
 0x857   : > { %3783 = vmatprep.mubr.msk.f32.mxu1 %vm1293_vm15, %v1262_v3 }
 0x858   : > { %4367 = vtanh.f32 %v2441_v7  ;;  %1535 = vmatmul.mubr.f32.gmra.mrb[4].mxu1 %v1261_v11 }
 0x862   : > { %v4368_v5 = vpop.eup %4367 }
 0x863   : > { %v2444_v29 = vrot.slane %v4368_v5, 6 }
 0x865   : > { %v2446_v31 = vmul.f32 %v4366_v58, %v2444_v29  ;;  %v2517_v58 = vld [vmem:[#allocation2 + $0x68] sm:$0xf] }
 0x867   : > { %v2449_v20 = vmul.f32 %v2448_v51, %v2446_v31  ;;  %v2455_v25 = vrot.slane %v2446_v31, %v5535_v60 }
 0x869   : > { %v2450_v24 = vadd.f32 %v2449_v20, %v2417_v32  ;;  %v2456_v27 = vmul.f32 %v2455_v25, %v5524_v42  ;;  %v1528_v32 = vpop.f32.mrb[1].mxu1 }
 0x86b   : > { %v2457_v56 = vadd.f32 %v2456_v27, %v2451_v26 }
 0x86d   : > { %v3874_v6 = vmul.f32 -1.442695, %v2457_v56  ;;  %v2547_v56 = vstv %s3882_s14  ;;  %s3900_s14 = sld [smem:[#allocation4 + $0x25]] }
 0x86f   : > { %4369 = vpow2.f32 %v3874_v6 }
 0x879   : > { %v4370_v61 = vpop.eup %4369 }
 0x87a   : > { %v2461_v43 = vadd.f32 1.0, %v4370_v61 }
 0x87c   : > { %4371 = vrcp.f32 %v2461_v43 }
 0x886   : > { %v4372_v21 = vpop.eup %4371 }
 0x887   : > { %v2464_v9 = vmul.f32 2.0, %v4372_v21  ;;  %v2466_v8 = vmul.f32 %v4372_v21, %v2441_v7 }
 0x889   : > { %v3875_v38 = vadd.f32 -1.0, %v2464_v9 }
 0x88b   : > { %v2468_v39 = vrot.slane %v3875_v38, 2 }
 0x88d   : > { %v2470_v2 = vmul.f32 %v4372_v21, %v2468_v39 }
 0x88f   : > { %v2472_v15 = vrot.slane %v2470_v2, 7 }
 0x891   : > { %v2474_v17 = vadd.f32 %v2472_v15, %v2466_v8 }
 0x893   : > { %4373 = vtanh.f32 %v2474_v17 }
 0x89d   : > { %v4374_v0 = vpop.eup %4373 }
 0x89e   : > { %v2477_v1 = vrot.slane %v4374_v0, 6 }
 0x8a0   : > { %v2479_v28 = vmul.f32 %v4372_v21, %v2477_v1  ;;  %v2550_v21 = vld [vmem:[#allocation2 + $0x6c] sm:$0xf] }
 0x8a2   : > { %v2482_v48 = vmul.f32 %v2481_v47, %v2479_v28  ;;  %v2488_v22 = vrot.slane %v2479_v28, %v5535_v60 }
 0x8a4   : > { %v2483_v50 = vadd.f32 %v2482_v48, %v2450_v24  ;;  %v2489_v23 = vmul.f32 %v2488_v22, %v5524_v42 }
 0x8a6   : > { %v2490_v41 = vadd.f32 %v2489_v23, %v2484_v45 }
 0x8a8   : > { %v3877_v49 = vmul.f32 -1.442695, %v2490_v41  ;;  %v2580_v41 = vstv %s3885_s15  ;;  %s3903_s15 = sld [smem:[#allocation4 + $0x26]] }
 0x8aa   : > { %4375 = vpow2.f32 %v3877_v49 }
 0x8b4   : > { %v4376_v12 = vpop.eup %4375 }
 0x8b5   : > { %v2494_v33 = vadd.f32 1.0, %v4376_v12  ;;  %v1531_v22 = vpop.f32.mrb[2].mxu1 }
 0x8b6   : > { %1630 = vst.msk [vmem:[#allocation2 + $0x78] sm:$0xff] %vm1293_vm15, %v1531_v22 }
 0x8b7   : > { %4377 = vrcp.f32 %v2494_v33 }
 0x8c1   : > { %v4378_v46 = vpop.eup %4377 }
 0x8c2   : > { %v2497_v14 = vmul.f32 2.0, %v4378_v46  ;;  %v2499_v54 = vmul.f32 %v4378_v46, %v2474_v17 }
 0x8c4   : > { %v3878_v63 = vadd.f32 -1.0, %v2497_v14 }
 0x8c6   : > { %v2501_v57 = vrot.slane %v3878_v63, 2 }
 0x8c8   : > { %v2503_v55 = vmul.f32 %v4378_v46, %v2501_v57 }
 0x8ca   : > { %v2505_v53 = vrot.slane %v2503_v55, 7 }
 0x8cc   : > { %v2507_v37 = vadd.f32 %v2505_v53, %v2499_v54  ;;  %v1264_v54 = vld [vmem:[%s5929_s3 + $0x118] sm:$0xff]  ;;  %v1263_v53 = vld [vmem:[%s5929_s3 + $0x110] sm:$0xff] }
 0x8cd   : > { %3784 = vmatprep.mubr.msk.f32.mxu1 %vm1293_vm15, %v1264_v54 }
 0x8ce   : > { %4379 = vtanh.f32 %v2507_v37  ;;  %1540 = vmatmul.mubr.f32.gmra.mrb[6].mxu1 %v1263_v53 }
 0x8d8   : > { %v4380_v52 = vpop.eup %4379 }
 0x8d9   : > { %v2510_v19 = vrot.slane %v4380_v52, 6 }
 0x8db   : > { %v2512_v18 = vmul.f32 %v4378_v46, %v2510_v19  ;;  %v2583_v46 = vld [vmem:[#allocation2 + $0x70] sm:$0xf] }
 0x8dd   : > { %v2515_v34 = vmul.f32 %v2514_v35, %v2512_v18  ;;  %v2521_v40 = vrot.slane %v2512_v18, %v5535_v60 }
 0x8df   : > { %v2516_v59 = vadd.f32 %v2515_v34, %v2483_v50  ;;  %v2522_v10 = vmul.f32 %v2521_v40, %v5524_v42  ;;  %v1533_v50 = vpop.f32.mrb[3].mxu1 }
 0x8e1   : > { %v2523_v4 = vadd.f32 %v2522_v10, %v2517_v58 }
 0x8e3   : > { %v3880_v36 = vmul.f32 -1.442695, %v2523_v4  ;;  %v2613_v4 = vstv %s3888_s24  ;;  %s3906_s24 = sld [smem:[#allocation4 + $0x27]] }
 0x8e5   : > { %4381 = vpow2.f32 %v3880_v36 }
 0x8ef   : > { %v4382_v7 = vpop.eup %4381 }
 0x8f0   : > { %v2527_v30 = vadd.f32 1.0, %v4382_v7 }
 0x8f2   : > { %4383 = vrcp.f32 %v2527_v30 }
 0x8fc   : > { %v4384_v13 = vpop.eup %4383 }
 0x8fd   : > { %v2530_v5 = vmul.f32 2.0, %v4384_v13  ;;  %v2532_v20 = vmul.f32 %v4384_v13, %v2507_v37 }
 0x8ff   : > { %v3881_v29 = vadd.f32 -1.0, %v2530_v5 }
 0x901   : > { %v2534_v51 = vrot.slane %v3881_v29, 2 }
 0x903   : > { %v2536_v31 = vmul.f32 %v4384_v13, %v2534_v51 }
 0x905   : > { %v2538_v25 = vrot.slane %v2536_v31, 7 }
 0x907   : > { %v2540_v26 = vadd.f32 %v2538_v25, %v2532_v20 }
 0x909   : > { %4385 = vtanh.f32 %v2540_v26 }
 0x913   : > { %v4386_v24 = vpop.eup %4385 }
 0x914   : > { %v2543_v27 = vrot.slane %v4386_v24, 6 }
 0x916   : > { %v2545_v6 = vmul.f32 %v4384_v13, %v2543_v27  ;;  %v2616_v13 = vld [vmem:[#allocation2 + $0x74] sm:$0xf] }
 0x918   : > { %v2548_v44 = vmul.f32 %v2547_v56, %v2545_v6  ;;  %v2554_v62 = vrot.slane %v2545_v6, %v5535_v60 }
 0x91a   : > { %v2549_v61 = vadd.f32 %v2548_v44, %v2516_v59  ;;  %v2555_v43 = vmul.f32 %v2554_v62, %v5524_v42 }
 0x91c   : > { %v2556_v9 = vadd.f32 %v2555_v43, %v2550_v21 }
 0x91e   : > { %v3883_v38 = vmul.f32 -1.442695, %v2556_v9  ;;  %v2646_v9 = vstv %s3891_s26  ;;  %s3909_s26 = sld [smem:[#allocation4 + $0x28]] }
 0x920   : > { %4387 = vpow2.f32 %v3883_v38 }
 0x92a   : > { %v4388_v39 = vpop.eup %4387 }
 0x92b   : > { %v2560_v2 = vadd.f32 1.0, %v4388_v39  ;;  %v1536_v62 = vpop.f32.mrb[4].mxu1 }
 0x92c   : > { %1631 = vst.msk [vmem:[#allocation2 + $0x80] sm:$0xff] %vm1293_vm15, %v1536_v62 }
 0x92d   : > { %4389 = vrcp.f32 %v2560_v2 }
 0x937   : > { %v4390_v8 = vpop.eup %4389 }
 0x938   : > { %v2563_v15 = vmul.f32 2.0, %v4390_v8  ;;  %v2565_v47 = vmul.f32 %v4390_v8, %v2540_v26 }
 0x93a   : > { %v3884_v17 = vadd.f32 -1.0, %v2563_v15 }
 0x93c   : > { %v2567_v0 = vrot.slane %v3884_v17, 2 }
 0x93e   : > { %v2569_v1 = vmul.f32 %v4390_v8, %v2567_v0 }
 0x940   : > { %v2571_v28 = vrot.slane %v2569_v1, 7 }
 0x942   : > { %v2573_v48 = vadd.f32 %v2571_v28, %v2565_v47  ;;  %v1266_v47 = vld [vmem:[%s5929_s3 + $0x128] sm:$0xff]  ;;  %v1265_v28 = vld [vmem:[%s5929_s3 + $0x120] sm:$0xff] }
 0x943   : > { %3785 = vmatprep.mubr.msk.f32.mxu1 %vm1293_vm15, %v1266_v47 }
 0x944   : > { %4391 = vtanh.f32 %v2573_v48  ;;  %1545 = vmatmul.mubr.f32.gmra.mrb[8].mxu1 %v1265_v28 }
 0x94e   : > { %v4392_v23 = vpop.eup %4391 }
 0x94f   : > { %v2576_v45 = vrot.slane %v4392_v23, 6 }
 0x951   : > { %v2578_v49 = vmul.f32 %v4390_v8, %v2576_v45  ;;  %v2649_v8 = vld [vmem:[#allocation2 + $0x78] sm:$0xf] }
 0x953   : > { %v2581_v12 = vmul.f32 %v2580_v41, %v2578_v49  ;;  %v2587_v33 = vrot.slane %v2578_v49, %v5535_v60 }
 0x955   : > { %v2582_v14 = vadd.f32 %v2581_v12, %v2549_v61  ;;  %v2588_v63 = vmul.f32 %v2587_v33, %v5524_v42  ;;  %v1538_v61 = vpop.f32.mrb[5].mxu1 }
 0x957   : > { %v2589_v57 = vadd.f32 %v2588_v63, %v2583_v46 }
 0x959   : > { %v3886_v55 = vmul.f32 -1.442695, %v2589_v57  ;;  %v2679_v57 = vstv %s3894_s8  ;;  %s3912_s8 = sld [smem:[#allocation4 + $0x29]] }
 0x95b   : > { %4393 = vpow2.f32 %v3886_v55 }
 0x965   : > { %v4394_v37 = vpop.eup %4393 }
 0x966   : > { %v2593_v16 = vadd.f32 1.0, %v4394_v37 }
 0x968   : > { %4395 = vrcp.f32 %v2593_v16 }
 0x972   : > { %v4396_v32 = vpop.eup %4395 }
 0x973   : > { %v2596_v52 = vmul.f32 2.0, %v4396_v32  ;;  %v2598_v34 = vmul.f32 %v4396_v32, %v2573_v48 }
 0x975   : > { %v3887_v19 = vadd.f32 -1.0, %v2596_v52 }
 0x977   : > { %v2600_v35 = vrot.slane %v3887_v19, 2 }
 0x979   : > { %v2602_v18 = vmul.f32 %v4396_v32, %v2600_v35 }
 0x97b   : > { %v2604_v40 = vrot.slane %v2602_v18, 7 }
 0x97d   : > { %v2606_v58 = vadd.f32 %v2604_v40, %v2598_v34 }
 0x97f   : > { %4397 = vtanh.f32 %v2606_v58 }
 0x989   : > { %v4398_v59 = vpop.eup %4397 }
 0x98a   : > { %v2609_v10 = vrot.slane %v4398_v59, 6 }
 0x98c   : > { %v2611_v36 = vmul.f32 %v4396_v32, %v2609_v10  ;;  %v2682_v32 = vld [vmem:[#allocation2 + $0x7c] sm:$0xf] }
 0x98e   : > { %v2614_v3 = vmul.f32 %v2613_v4, %v2611_v36  ;;  %v2620_v11 = vrot.slane %v2611_v36, %v5535_v60 }
 0x990   : > { %v2615_v7 = vadd.f32 %v2614_v3, %v2582_v14  ;;  %v2621_v30 = vmul.f32 %v2620_v11, %v5524_v42 }
 0x992   : > { %v2622_v5 = vadd.f32 %v2621_v30, %v2616_v13 }
 0x994   : > { %v3889_v29 = vmul.f32 -1.442695, %v2622_v5  ;;  %v2712_v5 = vstv %s3897_s9  ;;  %s3915_s9 = sld [smem:[#allocation4 + $0x2a]] }
 0x996   : > { %4399 = vpow2.f32 %v3889_v29 }
 0x9a0   : > { %v4400_v51 = vpop.eup %4399 }
 0x9a1   : > { %v2626_v31 = vadd.f32 1.0, %v4400_v51  ;;  %v1541_v11 = vpop.f32.mrb[6].mxu1 }
 0x9a2   : > { %1632 = vst.msk [vmem:[#allocation2 + $0x88] sm:$0xff] %vm1293_vm15, %v1541_v11 }
 0x9a3   : > { %4401 = vrcp.f32 %v2626_v31 }
 0x9ad   : > { %v4402_v20 = vpop.eup %4401 }
 0x9ae   : > { %v2629_v25 = vmul.f32 2.0, %v4402_v20  ;;  %v2631_v56 = vmul.f32 %v4402_v20, %v2606_v58 }
 0x9b0   : > { %v3890_v26 = vadd.f32 -1.0, %v2629_v25 }
 0x9b2   : > { %v2633_v24 = vrot.slane %v3890_v26, 2 }
 0x9b4   : > { %v2635_v27 = vmul.f32 %v4402_v20, %v2633_v24 }
 0x9b6   : > { %v2637_v6 = vrot.slane %v2635_v27, 7 }
 0x9b8   : > { %v2639_v44 = vadd.f32 %v2637_v6, %v2631_v56  ;;  %v1268_v56 = vld [vmem:[%s5929_s3 + $0x138] sm:$0xff]  ;;  %v1267_v6 = vld [vmem:[%s5929_s3 + $0x130] sm:$0xff] }
 0x9b9   : > { %3786 = vmatprep.mubr.msk.f32.mxu1 %vm1293_vm15, %v1268_v56 }
 0x9ba   : > { %4403 = vtanh.f32 %v2639_v44  ;;  %1550 = vmatmul.mubr.f32.gmra.mrb[10].mxu1 %v1267_v6 }
 0x9c4   : > { %v4404_v43 = vpop.eup %4403 }
 0x9c5   : > { %v2642_v21 = vrot.slane %v4404_v43, 6 }
 0x9c7   : > { %v2644_v38 = vmul.f32 %v4402_v20, %v2642_v21  ;;  %v2715_v20 = vld [vmem:[#allocation2 + $0x80] sm:$0xf] }
 0x9c9   : > { %v2647_v39 = vmul.f32 %v2646_v9, %v2644_v38  ;;  %v2653_v2 = vrot.slane %v2644_v38, %v5535_v60 }
 0x9cb   : > { %v2648_v15 = vadd.f32 %v2647_v39, %v2615_v7  ;;  %v2654_v17 = vmul.f32 %v2653_v2, %v5524_v42  ;;  %v1543_v7 = vpop.f32.mrb[7].mxu1 }
 0x9cd   : > { %v2655_v0 = vadd.f32 %v2654_v17, %v2649_v8 }
 0x9cf   : > { %v3892_v1 = vmul.f32 -1.442695, %v2655_v0  ;;  %v2745_v0 = vstv %s3900_s14  ;;  %s3918_s14 = sld [smem:[#allocation4 + $0x2b]] }
 0x9d1   : > { %4405 = vpow2.f32 %v3892_v1 }
 0x9db   : > { %v4406_v48 = vpop.eup %4405 }
 0x9dc   : > { %v2659_v22 = vadd.f32 1.0, %v4406_v48 }
 0x9de   : > { %4407 = vrcp.f32 %v2659_v22 }
 0x9e8   : > { %v4408_v50 = vpop.eup %4407 }
 0x9e9   : > { %v2662_v23 = vmul.f32 2.0, %v4408_v50  ;;  %v2664_v12 = vmul.f32 %v4408_v50, %v2639_v44 }
 0x9eb   : > { %v3893_v45 = vadd.f32 -1.0, %v2662_v23 }
 0x9ed   : > { %v2666_v41 = vrot.slane %v3893_v45, 2 }
 0x9ef   : > { %v2668_v49 = vmul.f32 %v4408_v50, %v2666_v41 }
 0x9f1   : > { %v2670_v33 = vrot.slane %v2668_v49, 7 }
 0x9f3   : > { %v2672_v46 = vadd.f32 %v2670_v33, %v2664_v12 }
 0x9f5   : > { %4409 = vtanh.f32 %v2672_v46 }
 0x9ff   : > { %v4410_v14 = vpop.eup %4409 }
 0xa00   : > { %v2675_v63 = vrot.slane %v4410_v14, 6 }
 0xa02   : > { %v2677_v55 = vmul.f32 %v4408_v50, %v2675_v63  ;;  %v2748_v50 = vld [vmem:[#allocation2 + $0x84] sm:$0xf] }
 0xa04   : > { %v2680_v54 = vmul.f32 %v2679_v57, %v2677_v55  ;;  %v2686_v53 = vrot.slane %v2677_v55, %v5535_v60 }
 0xa06   : > { %v2681_v37 = vadd.f32 %v2680_v54, %v2648_v15  ;;  %v2687_v16 = vmul.f32 %v2686_v53, %v5524_v42 }
 0xa08   : > { %v2688_v52 = vadd.f32 %v2687_v16, %v2682_v32 }
 0xa0a   : > { %v3895_v19 = vmul.f32 -1.442695, %v2688_v52  ;;  %v2778_v52 = vstv %s3903_s15  ;;  %s3921_s15 = sld [smem:[#allocation4 + $0x2c]] }
 0xa0c   : > { %4411 = vpow2.f32 %v3895_v19 }
 0xa16   : > { %v4412_v35 = vpop.eup %4411 }
 0xa17   : > { %v2692_v18 = vadd.f32 1.0, %v4412_v35  ;;  %v1546_v53 = vpop.f32.mrb[8].mxu1 }
 0xa18   : > { %1633 = vst.msk [vmem:[#allocation2 + $0x90] sm:$0xff] %vm1293_vm15, %v1546_v53 }
 0xa19   : > { %4413 = vrcp.f32 %v2692_v18 }
 0xa23   : > { %v4414_v34 = vpop.eup %4413 }
 0xa24   : > { %v2695_v40 = vmul.f32 2.0, %v4414_v34  ;;  %v2697_v4 = vmul.f32 %v4414_v34, %v2672_v46 }
 0xa26   : > { %v3896_v58 = vadd.f32 -1.0, %v2695_v40 }
 0xa28   : > { %v2699_v59 = vrot.slane %v3896_v58, 2 }
 0xa2a   : > { %v2701_v10 = vmul.f32 %v4414_v34, %v2699_v59 }
 0xa2c   : > { %v2703_v36 = vrot.slane %v2701_v10, 7 }
 0xa2e   : > { %v2705_v3 = vadd.f32 %v2703_v36, %v2697_v4  ;;  %v1270_v4 = vld [vmem:[%s5929_s3 + $0x148] sm:$0xff]  ;;  %v1269_v36 = vld [vmem:[%s5929_s3 + $0x140] sm:$0xff] }
 0xa2f   : > { %3787 = vmatprep.mubr.msk.f32.mxu1 %vm1293_vm15, %v1270_v4 }
 0xa30   : > { %4415 = vtanh.f32 %v2705_v3  ;;  %1555 = vmatmul.mubr.f32.gmra.mrb[12].mxu1 %v1269_v36 }
 0xa3a   : > { %v4416_v30 = vpop.eup %4415 }
 0xa3b   : > { %v2708_v13 = vrot.slane %v4416_v30, 6 }
 0xa3d   : > { %v2710_v29 = vmul.f32 %v4414_v34, %v2708_v13  ;;  %v2781_v34 = vld [vmem:[#allocation2 + $0x88] sm:$0xf] }
 0xa3f   : > { %v2713_v51 = vmul.f32 %v2712_v5, %v2710_v29  ;;  %v2719_v31 = vrot.slane %v2710_v29, %v5535_v60 }
 0xa41   : > { %v2714_v25 = vadd.f32 %v2713_v51, %v2681_v37  ;;  %v2720_v26 = vmul.f32 %v2719_v31, %v5524_v42  ;;  %v1548_v37 = vpop.f32.mrb[9].mxu1 }
 0xa43   : > { %v2721_v24 = vadd.f32 %v2720_v26, %v2715_v20 }
 0xa45   : > { %v3898_v27 = vmul.f32 -1.442695, %v2721_v24  ;;  %v2811_v24 = vstv %s3906_s24  ;;  %s3924_s24 = sld [smem:[#allocation4 + $0x2d]] }
 0xa47   : > { %4417 = vpow2.f32 %v3898_v27 }
 0xa51   : > { %v4418_v44 = vpop.eup %4417 }
 0xa52   : > { %v2725_v62 = vadd.f32 1.0, %v4418_v44 }
 0xa54   : > { %4419 = vrcp.f32 %v2725_v62 }
 0xa5e   : > { %v4420_v61 = vpop.eup %4419 }
 0xa5f   : > { %v2728_v43 = vmul.f32 2.0, %v4420_v61  ;;  %v2730_v39 = vmul.f32 %v4420_v61, %v2705_v3 }
 0xa61   : > { %v3899_v21 = vadd.f32 -1.0, %v2728_v43 }
 0xa63   : > { %v2732_v9 = vrot.slane %v3899_v21, 2 }
 0xa65   : > { %v2734_v38 = vmul.f32 %v4420_v61, %v2732_v9 }
 0xa67   : > { %v2736_v2 = vrot.slane %v2734_v38, 7 }
 0xa69   : > { %v2738_v8 = vadd.f32 %v2736_v2, %v2730_v39 }
 0xa6b   : > { %4421 = vtanh.f32 %v2738_v8 }
 0xa75   : > { %v4422_v15 = vpop.eup %4421 }
 0xa76   : > { %v2741_v17 = vrot.slane %v4422_v15, 6 }
 0xa78   : > { %v2743_v1 = vmul.f32 %v4420_v61, %v2741_v17  ;;  %v2814_v61 = vld [vmem:[#allocation2 + $0x8c] sm:$0xf] }
 0xa7a   : > { %v2746_v47 = vmul.f32 %v2745_v0, %v2743_v1  ;;  %v2752_v28 = vrot.slane %v2743_v1, %v5535_v60 }
 0xa7c   : > { %v2747_v48 = vadd.f32 %v2746_v47, %v2714_v25  ;;  %v2753_v22 = vmul.f32 %v2752_v28, %v5524_v42 }
 0xa7e   : > { %v2754_v23 = vadd.f32 %v2753_v22, %v2748_v50 }
 0xa80   : > { %v3901_v45 = vmul.f32 -1.442695, %v2754_v23  ;;  %v2844_v23 = vstv %s3909_s26  ;;  %s3927_s26 = sld [smem:[#allocation4 + $0x2e]] }
 0xa82   : > { %4423 = vpow2.f32 %v3901_v45 }
 0xa8c   : > { %v4424_v41 = vpop.eup %4423 }
 0xa8d   : > { %v2758_v49 = vadd.f32 1.0, %v4424_v41  ;;  %v1551_v28 = vpop.f32.mrb[10].mxu1 }
 0xa8e   : > { %1634 = vst.msk [vmem:[#allocation2 + $0x98] sm:$0xff] %vm1293_vm15, %v1551_v28 }
 0xa8f   : > { %4425 = vrcp.f32 %v2758_v49 }
 0xa99   : > { %v4426_v12 = vpop.eup %4425 }
 0xa9a   : > { %v2761_v33 = vmul.f32 2.0, %v4426_v12  ;;  %v2763_v57 = vmul.f32 %v4426_v12, %v2738_v8 }
 0xa9c   : > { %v3902_v46 = vadd.f32 -1.0, %v2761_v33 }
 0xa9e   : > { %v2765_v14 = vrot.slane %v3902_v46, 2 }
 0xaa0   : > { %v2767_v63 = vmul.f32 %v4426_v12, %v2765_v14 }
 0xaa2   : > { %v2769_v55 = vrot.slane %v2767_v63, 7 }
 0xaa4   : > { %v2771_v54 = vadd.f32 %v2769_v55, %v2763_v57  ;;  %v1272_v57 = vld [vmem:[%s5929_s3 + $0x158] sm:$0xff]  ;;  %v1271_v55 = vld [vmem:[%s5929_s3 + $0x150] sm:$0xff] }
 0xaa5   : > { %3788 = vmatprep.mubr.msk.f32.mxu1 %vm1293_vm15, %v1272_v57 }
 0xaa6   : > { %4427 = vtanh.f32 %v2771_v54  ;;  %1560 = vmatmul.mubr.f32.gmra.mrb[14].mxu1 %v1271_v55 }
 0xab0   : > { %v4428_v16 = vpop.eup %4427 }
 0xab1   : > { %v2774_v32 = vrot.slane %v4428_v16, 6 }
 0xab3   : > { %v2776_v19 = vmul.f32 %v4426_v12, %v2774_v32  ;;  %v2847_v12 = vld [vmem:[#allocation2 + $0x90] sm:$0xf] }
 0xab5   : > { %v2779_v35 = vmul.f32 %v2778_v52, %v2776_v19  ;;  %v2785_v18 = vrot.slane %v2776_v19, %v5535_v60 }
 0xab7   : > { %v2780_v40 = vadd.f32 %v2779_v35, %v2747_v48  ;;  %v2786_v58 = vmul.f32 %v2785_v18, %v5524_v42  ;;  %v1553_v48 = vpop.f32.mrb[11].mxu1 }
 0xab9   : > { %v2787_v59 = vadd.f32 %v2786_v58, %v2781_v34 }
 0xabb   : > { %v3904_v10 = vmul.f32 -1.442695, %v2787_v59  ;;  %v2877_v59 = vstv %s3912_s8  ;;  %s3930_s8 = sld [smem:[#allocation4 + $0x2f]] }
 0xabd   : > { %4429 = vpow2.f32 %v3904_v10 }
 0xac7   : > { %v4430_v3 = vpop.eup %4429 }
 0xac8   : > { %v2791_v11 = vadd.f32 1.0, %v4430_v3 }
 0xaca   : > { %4431 = vrcp.f32 %v2791_v11 }
 0xad4   : > { %v4432_v7 = vpop.eup %4431 }
 0xad5   : > { %v2794_v30 = vmul.f32 2.0, %v4432_v7  ;;  %v2796_v51 = vmul.f32 %v4432_v7, %v2771_v54 }
 0xad7   : > { %v3905_v13 = vadd.f32 -1.0, %v2794_v30 }
 0xad9   : > { %v2798_v5 = vrot.slane %v3905_v13, 2 }
 0xadb   : > { %v2800_v29 = vmul.f32 %v4432_v7, %v2798_v5 }
 0xadd   : > { %v2802_v31 = vrot.slane %v2800_v29, 7 }
 0xadf   : > { %v2804_v20 = vadd.f32 %v2802_v31, %v2796_v51 }
 0xae1   : > { %4433 = vtanh.f32 %v2804_v20 }
 0xaeb   : > { %v4434_v25 = vpop.eup %4433 }
 0xaec   : > { %v2807_v26 = vrot.slane %v4434_v25, 6 }
 0xaee   : > { %v2809_v27 = vmul.f32 %v4432_v7, %v2807_v26  ;;  %v2880_v7 = vld [vmem:[#allocation2 + $0x94] sm:$0xf] }
 0xaf0   : > { %v2812_v56 = vmul.f32 %v2811_v24, %v2809_v27  ;;  %v2818_v6 = vrot.slane %v2809_v27, %v5535_v60 }
 0xaf2   : > { %v2813_v44 = vadd.f32 %v2812_v56, %v2780_v40  ;;  %v2819_v62 = vmul.f32 %v2818_v6, %v5524_v42 }
 0xaf4   : > { %v2820_v43 = vadd.f32 %v2819_v62, %v2814_v61 }
 0xaf6   : > { %v3907_v21 = vmul.f32 -1.442695, %v2820_v43  ;;  %v2910_v43 = vstv %s3915_s9  ;;  %s3933_s9 = sld [smem:[#allocation4 + $0x30]] }
 0xaf8   : > { %4435 = vpow2.f32 %v3907_v21 }
 0xb02   : > { %v4436_v9 = vpop.eup %4435 }
 0xb03   : > { %v2824_v38 = vadd.f32 1.0, %v4436_v9  ;;  %v1556_v6 = vpop.f32.mrb[12].mxu1 }
 0xb04   : > { %1635 = vst.msk [vmem:[#allocation2 + $0xa0] sm:$0xff] %vm1293_vm15, %v1556_v6 }
 0xb05   : > { %4437 = vrcp.f32 %v2824_v38 }
 0xb0f   : > { %v4438_v39 = vpop.eup %4437 }
 0xb10   : > { %v2827_v2 = vmul.f32 2.0, %v4438_v39  ;;  %v2829_v0 = vmul.f32 %v4438_v39, %v2804_v20 }
 0xb12   : > { %v3908_v8 = vadd.f32 -1.0, %v2827_v2 }
 0xb14   : > { %v2831_v15 = vrot.slane %v3908_v8, 2 }
 0xb16   : > { %v2833_v17 = vmul.f32 %v4438_v39, %v2831_v15 }
 0xb18   : > { %v2835_v1 = vrot.slane %v2833_v17, 7 }
 0xb1a   : > { %v2837_v47 = vadd.f32 %v2835_v1, %v2829_v0  ;;  %v1274_v0 = vld [vmem:[%s5929_s3 + $0x168] sm:$0xff]  ;;  %v1273_v1 = vld [vmem:[%s5929_s3 + $0x160] sm:$0xff] }
 0xb1b   : > { %3789 = vmatprep.mubr.msk.f32.mxu1 %vm1293_vm15, %v1274_v0 }
 0xb1c   : > { %4439 = vtanh.f32 %v2837_v47  ;;  %1565 = vmatmul.mubr.f32.gmra.mrb[16].mxu1 %v1273_v1 }
 0xb26   : > { %v4440_v22 = vpop.eup %4439 }
 0xb27   : > { %v2840_v50 = vrot.slane %v4440_v22, 6 }
 0xb29   : > { %v2842_v45 = vmul.f32 %v4438_v39, %v2840_v50  ;;  %v2913_v39 = vld [vmem:[#allocation2 + $0x98] sm:$0xf] }
 0xb2b   : > { %v2845_v41 = vmul.f32 %v2844_v23, %v2842_v45  ;;  %v2851_v49 = vrot.slane %v2842_v45, %v5535_v60 }
 0xb2d   : > { %v2846_v33 = vadd.f32 %v2845_v41, %v2813_v44  ;;  %v2852_v46 = vmul.f32 %v2851_v49, %v5524_v42  ;;  %v1558_v44 = vpop.f32.mrb[13].mxu1 }
 0xb2f   : > { %v2853_v14 = vadd.f32 %v2852_v46, %v2847_v12 }
 0xb31   : > { %v3910_v63 = vmul.f32 -1.442695, %v2853_v14  ;;  %v2943_v14 = vstv %s3918_s14  ;;  %s3936_s14 = sld [smem:[#allocation4 + $0x31]] }
 0xb33   : > { %4441 = vpow2.f32 %v3910_v63 }
 0xb3d   : > { %v4442_v54 = vpop.eup %4441 }
 0xb3e   : > { %v2857_v53 = vadd.f32 1.0, %v4442_v54 }
 0xb40   : > { %4443 = vrcp.f32 %v2857_v53 }
 0xb4a   : > { %v4444_v37 = vpop.eup %4443 }
 0xb4b   : > { %v2860_v16 = vmul.f32 2.0, %v4444_v37  ;;  %v2862_v35 = vmul.f32 %v4444_v37, %v2837_v47 }
 0xb4d   : > { %v3911_v32 = vadd.f32 -1.0, %v2860_v16 }
 0xb4f   : > { %v2864_v52 = vrot.slane %v3911_v32, 2 }
 0xb51   : > { %v2866_v19 = vmul.f32 %v4444_v37, %v2864_v52 }
 0xb53   : > { %v2868_v18 = vrot.slane %v2866_v19, 7 }
 0xb55   : > { %v2870_v34 = vadd.f32 %v2868_v18, %v2862_v35 }
 0xb57   : > { %4445 = vtanh.f32 %v2870_v34 }
 0xb61   : > { %v4446_v40 = vpop.eup %4445 }
 0xb62   : > { %v2873_v58 = vrot.slane %v4446_v40, 6 }
 0xb64   : > { %v2875_v10 = vmul.f32 %v4444_v37, %v2873_v58  ;;  %v2946_v37 = vld [vmem:[#allocation2 + $0x9c] sm:$0xf] }
 0xb66   : > { %v2878_v4 = vmul.f32 %v2877_v59, %v2875_v10  ;;  %v2884_v36 = vrot.slane %v2875_v10, %v5535_v60 }
 0xb68   : > { %v2879_v3 = vadd.f32 %v2878_v4, %v2846_v33  ;;  %v2885_v11 = vmul.f32 %v2884_v36, %v5524_v42 }
 0xb6a   : > { %v2886_v30 = vadd.f32 %v2885_v11, %v2880_v7 }
 0xb6c   : > { %v3913_v13 = vmul.f32 -1.442695, %v2886_v30  ;;  %v2976_v30 = vstv %s3921_s15  ;;  %s3939_s15 = sld [smem:[#allocation4 + $0x32]] }
 0xb6e   : > { %4447 = vpow2.f32 %v3913_v13 }
 0xb78   : > { %v4448_v5 = vpop.eup %4447 }
 0xb79   : > { %v2890_v29 = vadd.f32 1.0, %v4448_v5  ;;  %v1561_v36 = vpop.f32.mrb[14].mxu1 }
 0xb7a   : > { %1636 = vst.msk [vmem:[#allocation2 + $0xa8] sm:$0xff] %vm1293_vm15, %v1561_v36 }
 0xb7b   : > { %4449 = vrcp.f32 %v2890_v29 }
 0xb85   : > { %v4450_v51 = vpop.eup %4449 }
 0xb86   : > { %v2893_v31 = vmul.f32 2.0, %v4450_v51  ;;  %v2895_v24 = vmul.f32 %v4450_v51, %v2870_v34 }
 0xb88   : > { %v3914_v20 = vadd.f32 -1.0, %v2893_v31 }
 0xb8a   : > { %v2897_v25 = vrot.slane %v3914_v20, 2 }
 0xb8c   : > { %v2899_v26 = vmul.f32 %v4450_v51, %v2897_v25 }
 0xb8e   : > { %v2901_v27 = vrot.slane %v2899_v26, 7 }
 0xb90   : > { %v2903_v56 = vadd.f32 %v2901_v27, %v2895_v24  ;;  %v1276_v24 = vld [vmem:[%s5929_s3 + $0x178] sm:$0xff]  ;;  %v1275_v27 = vld [vmem:[%s5929_s3 + $0x170] sm:$0xff] }
 0xb91   : > { %3790 = vmatprep.mubr.msk.f32.mxu1 %vm1293_vm15, %v1276_v24 }
 0xb92   : > { %4451 = vtanh.f32 %v2903_v56  ;;  %1570 = vmatmul.mubr.f32.gmra.mrb[18].mxu1 %v1275_v27 }
 0xb9c   : > { %v4452_v62 = vpop.eup %4451 }
 0xb9d   : > { %v2906_v61 = vrot.slane %v4452_v62, 6 }
 0xb9f   : > { %v2908_v21 = vmul.f32 %v4450_v51, %v2906_v61  ;;  %v2979_v51 = vld [vmem:[#allocation2 + $0xa0] sm:$0xf] }
 0xba1   : > { %v2911_v9 = vmul.f32 %v2910_v43, %v2908_v21  ;;  %v2917_v38 = vrot.slane %v2908_v21, %v5535_v60 }
 0xba3   : > { %v2912_v2 = vadd.f32 %v2911_v9, %v2879_v3  ;;  %v2918_v8 = vmul.f32 %v2917_v38, %v5524_v42  ;;  %v1563_v3 = vpop.f32.mrb[15].mxu1 }
 0xba5   : > { %v2919_v15 = vadd.f32 %v2918_v8, %v2913_v39 }
 0xba7   : > { %v3916_v17 = vmul.f32 -1.442695, %v2919_v15  ;;  %v3009_v15 = vstv %s3924_s24  ;;  %s3942_s24 = sld [smem:[#allocation4 + $0x33]] }
 0xba9   : > { %4453 = vpow2.f32 %v3916_v17 }
 0xbb3   : > { %v4454_v47 = vpop.eup %4453 }
 0xbb4   : > { %v2923_v28 = vadd.f32 1.0, %v4454_v47 }
 0xbb6   : > { %4455 = vrcp.f32 %v2923_v28 }
 0xbc0   : > { %v4456_v48 = vpop.eup %4455 }
 0xbc1   : > { %v2926_v22 = vmul.f32 2.0, %v4456_v48  ;;  %v2928_v41 = vmul.f32 %v4456_v48, %v2903_v56 }
 0xbc3   : > { %v3917_v50 = vadd.f32 -1.0, %v2926_v22 }
 0xbc5   : > { %v2930_v23 = vrot.slane %v3917_v50, 2 }
 0xbc7   : > { %v2932_v45 = vmul.f32 %v4456_v48, %v2930_v23 }
 0xbc9   : > { %v2934_v49 = vrot.slane %v2932_v45, 7 }
 0xbcb   : > { %v2936_v12 = vadd.f32 %v2934_v49, %v2928_v41 }
 0xbcd   : > { %4457 = vtanh.f32 %v2936_v12 }
 0xbd7   : > { %v4458_v33 = vpop.eup %4457 }
 0xbd8   : > { %v2939_v46 = vrot.slane %v4458_v33, 6 }
 0xbda   : > { %v2941_v63 = vmul.f32 %v4456_v48, %v2939_v46  ;;  %v3012_v48 = vld [vmem:[#allocation2 + $0xa4] sm:$0xf] }
 0xbdc   : > { %v2944_v57 = vmul.f32 %v2943_v14, %v2941_v63  ;;  %v2950_v55 = vrot.slane %v2941_v63, %v5535_v60 }
 0xbde   : > { %v2945_v54 = vadd.f32 %v2944_v57, %v2912_v2  ;;  %v2951_v53 = vmul.f32 %v2950_v55, %v5524_v42 }
 0xbe0   : > { %v2952_v16 = vadd.f32 %v2951_v53, %v2946_v37 }
 0xbe2   : > { %v3919_v32 = vmul.f32 -1.442695, %v2952_v16  ;;  %v3042_v16 = vstv %s3927_s26  ;;  %s3945_s26 = sld [smem:[#allocation4 + $0x34]] }
 0xbe4   : > { %4459 = vpow2.f32 %v3919_v32 }
 0xbee   : > { %v4460_v52 = vpop.eup %4459 }
 0xbef   : > { %v2956_v19 = vadd.f32 1.0, %v4460_v52  ;;  %v1566_v55 = vpop.f32.mrb[16].mxu1 }
 0xbf0   : > { %1637 = vst.msk [vmem:[#allocation2 + $0xb0] sm:$0xff] %vm1293_vm15, %v1566_v55 }
 0xbf1   : > { %4461 = vrcp.f32 %v2956_v19 }
 0xbfb   : > { %v4462_v35 = vpop.eup %4461 }
 0xbfc   : > { %v2959_v18 = vmul.f32 2.0, %v4462_v35  ;;  %v2961_v59 = vmul.f32 %v4462_v35, %v2936_v12 }
 0xbfe   : > { %v3920_v34 = vadd.f32 -1.0, %v2959_v18 }
 0xc00   : > { %v2963_v40 = vrot.slane %v3920_v34, 2 }
 0xc02   : > { %v2965_v58 = vmul.f32 %v4462_v35, %v2963_v40 }
 0xc04   : > { %v2967_v10 = vrot.slane %v2965_v58, 7 }
 0xc06   : > { %v2969_v4 = vadd.f32 %v2967_v10, %v2961_v59  ;;  %v1278_v59 = vld [vmem:[%s5929_s3 + $0x188] sm:$0xff]  ;;  %v1277_v10 = vld [vmem:[%s5929_s3 + $0x180] sm:$0xff] }
 0xc07   : > { %3791 = vmatprep.mubr.msk.f32.mxu1 %vm1293_vm15, %v1278_v59 }
 0xc08   : > { %4463 = vtanh.f32 %v2969_v4  ;;  %1575 = vmatmul.mubr.f32.gmra.mrb[20].mxu1 %v1277_v10 }
 0xc12   : > { %v4464_v11 = vpop.eup %4463 }
 0xc13   : > { %v2972_v7 = vrot.slane %v4464_v11, 6 }
 0xc15   : > { %v2974_v13 = vmul.f32 %v4462_v35, %v2972_v7  ;;  %v3045_v35 = vld [vmem:[#allocation2 + $0xa8] sm:$0xf] }
 0xc17   : > { %v2977_v5 = vmul.f32 %v2976_v30, %v2974_v13  ;;  %v2983_v29 = vrot.slane %v2974_v13, %v5535_v60 }
 0xc19   : > { %v2978_v31 = vadd.f32 %v2977_v5, %v2945_v54  ;;  %v2984_v20 = vmul.f32 %v2983_v29, %v5524_v42  ;;  %v1568_v54 = vpop.f32.mrb[17].mxu1 }
 0xc1b   : > { %v2985_v25 = vadd.f32 %v2984_v20, %v2979_v51 }
 0xc1d   : > { %v3922_v26 = vmul.f32 -1.442695, %v2985_v25  ;;  %v3075_v25 = vstv %s3930_s8  ;;  %s3954_s8 = sld [smem:[#allocation4 + $0x37]] }
 0xc1f   : > { %4465 = vpow2.f32 %v3922_v26 }
 0xc29   : > { %v4466_v56 = vpop.eup %4465 }
 0xc2a   : > { %v2989_v6 = vadd.f32 1.0, %v4466_v56 }
 0xc2c   : > { %4467 = vrcp.f32 %v2989_v6 }
 0xc36   : > { %v4468_v44 = vpop.eup %4467 }
 0xc37   : > { %v2992_v62 = vmul.f32 2.0, %v4468_v44  ;;  %v2994_v9 = vmul.f32 %v4468_v44, %v2969_v4 }
 0xc39   : > { %v3923_v61 = vadd.f32 -1.0, %v2992_v62 }
 0xc3b   : > { %v2996_v43 = vrot.slane %v3923_v61, 2 }
 0xc3d   : > { %v2998_v21 = vmul.f32 %v4468_v44, %v2996_v43 }
 0xc3f   : > { %v3000_v38 = vrot.slane %v2998_v21, 7 }
 0xc41   : > { %v3002_v39 = vadd.f32 %v3000_v38, %v2994_v9 }
 0xc43   : > { %4469 = vtanh.f32 %v3002_v39 }
 0xc4d   : > { %v4470_v2 = vpop.eup %4469 }
 0xc4e   : > { %v3005_v8 = vrot.slane %v4470_v2, 6 }
 0xc50   : > { %v3007_v17 = vmul.f32 %v4468_v44, %v3005_v8  ;;  %v3078_v44 = vld [vmem:[#allocation2 + $0xac] sm:$0xf] }
 0xc52   : > { %v3010_v0 = vmul.f32 %v3009_v15, %v3007_v17  ;;  %v3016_v1 = vrot.slane %v3007_v17, %v5535_v60 }
 0xc54   : > { %v3011_v47 = vadd.f32 %v3010_v0, %v2978_v31  ;;  %v3017_v28 = vmul.f32 %v3016_v1, %v5524_v42 }
 0xc56   : > { %v3018_v22 = vadd.f32 %v3017_v28, %v3012_v48 }
 0xc58   : > { %v3925_v50 = vmul.f32 -1.442695, %v3018_v22  ;;  %v3108_v22 = vstv %s3933_s9  ;;  %s3957_s9 = sld [smem:[#allocation4 + $0x38]] }
 0xc5a   : > { %4471 = vpow2.f32 %v3925_v50 }
 0xc64   : > { %v4472_v23 = vpop.eup %4471 }
 0xc65   : > { %v3022_v45 = vadd.f32 1.0, %v4472_v23  ;;  %v1571_v1 = vpop.f32.mrb[18].mxu1 }
 0xc66   : > { %1638 = vst.msk [vmem:[#allocation2 + $0xb8] sm:$0xff] %vm1293_vm15, %v1571_v1 }
 0xc67   : > { %4473 = vrcp.f32 %v3022_v45 }
 0xc71   : > { %v4474_v41 = vpop.eup %4473 }
 0xc72   : > { %v3025_v49 = vmul.f32 2.0, %v4474_v41  ;;  %v3027_v14 = vmul.f32 %v4474_v41, %v3002_v39 }
 0xc74   : > { %v3926_v12 = vadd.f32 -1.0, %v3025_v49 }
 0xc76   : > { %v3029_v33 = vrot.slane %v3926_v12, 2 }
 0xc78   : > { %v3031_v46 = vmul.f32 %v4474_v41, %v3029_v33 }
 0xc7a   : > { %v3033_v63 = vrot.slane %v3031_v46, 7 }
 0xc7c   : > { %v3035_v57 = vadd.f32 %v3033_v63, %v3027_v14  ;;  %v1280_v14 = vld [vmem:[%s5929_s3 + $0x198] sm:$0xff]  ;;  %v1279_v63 = vld [vmem:[%s5929_s3 + $0x190] sm:$0xff] }
 0xc7d   : > { %3792 = vmatprep.mubr.msk.f32.mxu1 %vm1293_vm15, %v1280_v14 }
 0xc7e   : > { %4475 = vtanh.f32 %v3035_v57  ;;  %1580 = vmatmul.mubr.f32.gmra.mrb[22].mxu1 %v1279_v63 }
 0xc88   : > { %v4476_v53 = vpop.eup %4475 }
 0xc89   : > { %v3038_v37 = vrot.slane %v4476_v53, 6 }
 0xc8b   : > { %v3040_v32 = vmul.f32 %v4474_v41, %v3038_v37  ;;  %v3111_v41 = vld [vmem:[#allocation2 + $0xb0] sm:$0xf] }
 0xc8d   : > { %v3043_v52 = vmul.f32 %v3042_v16, %v3040_v32  ;;  %v3049_v19 = vrot.slane %v3040_v32, %v5535_v60 }
 0xc8f   : > { %v3044_v18 = vadd.f32 %v3043_v52, %v3011_v47  ;;  %v3050_v34 = vmul.f32 %v3049_v19, %v5524_v42  ;;  %v1573_v47 = vpop.f32.mrb[19].mxu1 }
 0xc91   : > { %v3051_v40 = vadd.f32 %v3050_v34, %v3045_v35 }
 0xc93   : > { %v3928_v58 = vmul.f32 -1.442695, %v3051_v40  ;;  %v3141_v40 = vstv %s3936_s14  ;;  %s3972_s14 = sld [smem:[#allocation4 + $0x3d]] }
 0xc95   : > { %4477 = vpow2.f32 %v3928_v58 }
 0xc9f   : > { %v4478_v4 = vpop.eup %4477 }
 0xca0   : > { %v3055_v36 = vadd.f32 1.0, %v4478_v4 }
 0xca2   : > { %4479 = vrcp.f32 %v3055_v36 }
 0xcac   : > { %v4480_v3 = vpop.eup %4479 }
 0xcad   : > { %v3058_v11 = vmul.f32 2.0, %v4480_v3  ;;  %v3060_v5 = vmul.f32 %v4480_v3, %v3035_v57 }
 0xcaf   : > { %v3929_v7 = vadd.f32 -1.0, %v3058_v11 }
 0xcb1   : > { %v3062_v30 = vrot.slane %v3929_v7, 2 }
 0xcb3   : > { %v3064_v13 = vmul.f32 %v4480_v3, %v3062_v30 }
 0xcb5   : > { %v3066_v29 = vrot.slane %v3064_v13, 7 }
 0xcb7   : > { %v3068_v51 = vadd.f32 %v3066_v29, %v3060_v5 }
 0xcb9   : > { %4481 = vtanh.f32 %v3068_v51 }
 0xcc3   : > { %v4482_v31 = vpop.eup %4481 }
 0xcc4   : > { %v3071_v20 = vrot.slane %v4482_v31, 6 }
 0xcc6   : > { %v3073_v26 = vmul.f32 %v4480_v3, %v3071_v20  ;;  %v3144_v3 = vld [vmem:[#allocation2 + $0xb4] sm:$0xf] }
 0xcc8   : > { %v3076_v24 = vmul.f32 %v3075_v25, %v3073_v26  ;;  %v3082_v27 = vrot.slane %v3073_v26, %v5535_v60 }
 0xcca   : > { %v3077_v56 = vadd.f32 %v3076_v24, %v3044_v18  ;;  %v3083_v6 = vmul.f32 %v3082_v27, %v5524_v42 }
 0xccc   : > { %v3084_v62 = vadd.f32 %v3083_v6, %v3078_v44 }
 0xcce   : > { %v3931_v61 = vmul.f32 -1.442695, %v3084_v62  ;;  %v3174_v62 = vstv %s3939_s15  ;;  %s3975_s15 = sld [smem:[#allocation4 + $0x3e]] }
 0xcd0   : > { %4483 = vpow2.f32 %v3931_v61 }
 0xcda   : > { %v4484_v43 = vpop.eup %4483 }
 0xcdb   : > { %v3088_v21 = vadd.f32 1.0, %v4484_v43  ;;  %v1576_v27 = vpop.f32.mrb[20].mxu1 }
 0xcdc   : > { %1639 = vst.msk [vmem:[#allocation2 + $0xc0] sm:$0xff] %vm1293_vm15, %v1576_v27  ;;  %v1285_v27 = vld [vmem:[%s5929_s3 + $0x1c0] sm:$0xff] }
 0xcdd   : > { %4485 = vrcp.f32 %v3088_v21 }
 0xce7   : > { %v4486_v9 = vpop.eup %4485 }
 0xce8   : > { %v3091_v38 = vmul.f32 2.0, %v4486_v9  ;;  %v3093_v15 = vmul.f32 %v4486_v9, %v3068_v51 }
 0xcea   : > { %v3932_v39 = vadd.f32 -1.0, %v3091_v38 }
 0xcec   : > { %v3095_v2 = vrot.slane %v3932_v39, 2 }
 0xcee   : > { %v3097_v8 = vmul.f32 %v4486_v9, %v3095_v2 }
 0xcf0   : > { %v3099_v17 = vrot.slane %v3097_v8, 7 }
 0xcf2   : > { %v3101_v0 = vadd.f32 %v3099_v17, %v3093_v15  ;;  %v1282_v15 = vld [vmem:[%s5929_s3 + $0x1a8] sm:$0xff]  ;;  %v1281_v17 = vld [vmem:[%s5929_s3 + $0x1a0] sm:$0xff] }
 0xcf3   : > { %3793 = vmatprep.mubr.msk.f32.mxu1 %vm1293_vm15, %v1282_v15  ;;  %v3273_v15 = vstv %s3948_s12  ;;  %s3966_s12 = sld [smem:[#allocation4 + $0x3b]] }
 0xcf4   : > { %4487 = vtanh.f32 %v3101_v0  ;;  %1585 = vmatmul.mubr.f32.gmra.mrb[24].mxu1 %v1281_v17 }
 0xcfe   : > { %v4488_v28 = vpop.eup %4487 }
 0xcff   : > { %v3104_v48 = vrot.slane %v4488_v28, 6 }
 0xd01   : > { %v3106_v50 = vmul.f32 %v4486_v9, %v3104_v48  ;;  %v3177_v9 = vld [vmem:[#allocation2 + $0xb8] sm:$0xf] }
 0xd03   : > { %v3109_v23 = vmul.f32 %v3108_v22, %v3106_v50  ;;  %v3115_v45 = vrot.slane %v3106_v50, %v5535_v60 }
 0xd05   : > { %v3116_v49 = vmul.f32 %v3115_v45, %v5524_v42  ;;  %v3110_v12 = vadd.f32 %v3109_v23, %v3077_v56  ;;  %v1578_v56 = vpop.f32.mrb[21].mxu1 }
 0xd07   : > { %v3117_v33 = vadd.f32 %v3116_v49, %v3111_v41 }
 0xd09   : > { %v3934_v46 = vmul.f32 -1.442695, %v3117_v33  ;;  %v3207_v33 = vstv %s3942_s24  ;;  %s3983_s24 = sshll.u32 %s4724_s23, 4  ;;  %s4674_s23 = smov [#allocation5]  }
 0xd0a   : > { %s5884_s7 = scalar_lea.hbm %s5930_s4, %s3983_s24 }
 0xd0b   : > { %4489 = vpow2.f32 %v3934_v46 }
 0xd15   : > { %v4490_v57 = vpop.eup %4489 }
 0xd16   : > { %v3121_v55 = vadd.f32 1.0, %v4490_v57 }
 0xd18   : > { %4491 = vrcp.f32 %v3121_v55 }
 0xd22   : > { %v4492_v54 = vpop.eup %4491 }
 0xd23   : > { %v3124_v53 = vmul.f32 2.0, %v4492_v54  ;;  %v3126_v52 = vmul.f32 %v4492_v54, %v3101_v0 }
 0xd25   : > { %v3935_v37 = vadd.f32 -1.0, %v3124_v53 }
 0xd27   : > { %v3128_v16 = vrot.slane %v3935_v37, 2 }
 0xd29   : > { %v3130_v32 = vmul.f32 %v4492_v54, %v3128_v16 }
 0xd2b   : > { %v3132_v19 = vrot.slane %v3130_v32, 7 }
 0xd2d   : > { %v3134_v35 = vadd.f32 %v3132_v19, %v3126_v52 }
 0xd2f   : > { %4493 = vtanh.f32 %v3134_v35 }
 0xd39   : > { %v4494_v18 = vpop.eup %4493 }
 0xd3a   : > { %v3137_v34 = vrot.slane %v4494_v18, 6 }
 0xd3c   : > { %v3139_v58 = vmul.f32 %v4492_v54, %v3137_v34  ;;  %v3210_v54 = vld [vmem:[#allocation2 + $0xbc] sm:$0xf] }
 0xd3e   : > { %v3142_v59 = vmul.f32 %v3141_v40, %v3139_v58  ;;  %v3148_v10 = vrot.slane %v3139_v58, %v5535_v60 }
 0xd40   : > { %v3149_v4 = vmul.f32 %v3148_v10, %v5524_v42  ;;  %v3143_v36 = vadd.f32 %v3142_v59, %v3110_v12 }
 0xd42   : > { %v3150_v11 = vadd.f32 %v3149_v4, %v3144_v3 }
 0xd44   : > { %v3937_v7 = vmul.f32 -1.442695, %v3150_v11  ;;  %v3240_v11 = vstv %s3945_s26  ;;  %s169_s26 = scalar_lea.vmem [#allocation5], %s168_s19 }
 0xd45   : > { %s3657_s27 = sshll.u32 %s169_s26, 4  ;;  %s5886_s27 = int_to_ptr.vmem [resolvable:$true] %s3657_s27 }
 0xd46   : > { %4495 = vpow2.f32 %v3937_v7 }
 0xd50   : > { %v4496_v30 = vpop.eup %4495 }
 0xd51   : > { %v3154_v13 = vadd.f32 1.0, %v4496_v30  ;;  %v1581_v10 = vpop.f32.mrb[22].mxu1 }
 0xd52   : > { %1640 = vst.msk [vmem:[#allocation2 + $0xc8] sm:$0xff] %vm1293_vm15, %v1581_v10  ;;  %v1583_v4 = vpop.f32.mrb[23].mxu1 }
 0xd53   : > { %4497 = vrcp.f32 %v3154_v13 }
 0xd59   : > { %v3309_v10 = vld [vmem:[#allocation2 + $0xc8] sm:$0xf] }
 0xd5d   : > { %v4498_v5 = vpop.eup %4497 }
 0xd5e   : > { %v3157_v29 = vmul.f32 2.0, %v4498_v5  ;;  %v3159_v25 = vmul.f32 %v4498_v5, %v3134_v35 }
 0xd60   : > { %v3938_v51 = vadd.f32 -1.0, %v3157_v29 }
 0xd62   : > { %v3161_v31 = vrot.slane %v3938_v51, 2 }
 0xd64   : > { %v3163_v20 = vmul.f32 %v4498_v5, %v3161_v31 }
 0xd66   : > { %v3165_v26 = vrot.slane %v3163_v20, 7 }
 0xd68   : > { %v3167_v24 = vadd.f32 %v3165_v26, %v3159_v25  ;;  %v1284_v25 = vld [vmem:[%s5929_s3 + $0x1b8] sm:$0xff]  ;;  %v1283_v26 = vld [vmem:[%s5929_s3 + $0x1b0] sm:$0xff] }
 0xd69   : > { %3794 = vmatprep.mubr.msk.f32.mxu1 %vm1293_vm15, %v1284_v25 }
 0xd6a   : > { %4499 = vtanh.f32 %v3167_v24  ;;  %1590 = vmatmul.mubr.f32.gmra.mrb[26].mxu1 %v1283_v26 }
 0xd74   : > { %v4500_v6 = vpop.eup %4499 }
 0xd75   : > { %v3170_v44 = vrot.slane %v4500_v6, 6 }
 0xd77   : > { %v3172_v61 = vmul.f32 %v4498_v5, %v3170_v44  ;;  %v3243_v5 = vld [vmem:[#allocation2 + $0xc0] sm:$0xf] }
 0xd79   : > { %v3181_v43 = vrot.slane %v3172_v61, %v5535_v60  ;;  %v3175_v21 = vmul.f32 %v3174_v62, %v3172_v61 }
 0xd7b   : > { %v3182_v38 = vmul.f32 %v3181_v43, %v5524_v42  ;;  %v3176_v39 = vadd.f32 %v3175_v21, %v3143_v36 }
 0xd7d   : > { %v3183_v2 = vadd.f32 %v3182_v38, %v3177_v9 }
 0xd7f   : > { %v3940_v8 = vmul.f32 -1.442695, %v3183_v2 }
 0xd81   : > { %4501 = vpow2.f32 %v3940_v8 }
 0xd8b   : > { %v4502_v0 = vpop.eup %4501 }
 0xd8c   : > { %v3187_v1 = vadd.f32 1.0, %v4502_v0 }
 0xd8e   : > { %4503 = vrcp.f32 %v3187_v1 }
 0xd98   : > { %v4504_v47 = vpop.eup %4503 }
 0xd99   : > { %v3190_v28 = vmul.f32 2.0, %v4504_v47  ;;  %v3192_v23 = vmul.f32 %v4504_v47, %v3167_v24  ;;  %v1286_v24 = vld [vmem:[%s5929_s3 + $0x1c8] sm:$0xff] }
 0xd9a   : > { %3795 = vmatprep.mubr.msk.f32.mxu1 %vm1293_vm15, %v1286_v24 }
 0xd9b   : > { %v3941_v48 = vadd.f32 -1.0, %v3190_v28  ;;  %1595 = vmatmul.mubr.f32.gmra.mrb[28].mxu1 %v1285_v27 }
 0xd9d   : > { %v3194_v22 = vrot.slane %v3941_v48, 2  ;;  %v3276_v48 = vld [vmem:[#allocation2 + $0xc4] sm:$0xf] }
 0xd9f   : > { %v3196_v50 = vmul.f32 %v4504_v47, %v3194_v22 }
 0xda1   : > { %v3198_v45 = vrot.slane %v3196_v50, 7 }
 0xda3   : > { %v3200_v41 = vadd.f32 %v3198_v45, %v3192_v23 }
 0xda5   : > { %4505 = vtanh.f32 %v3200_v41 }
 0xdaf   : > { %v4506_v49 = vpop.eup %4505 }
 0xdb0   : > { %v3203_v12 = vrot.slane %v4506_v49, 6 }
 0xdb2   : > { %v3205_v46 = vmul.f32 %v4504_v47, %v3203_v12 }
 0xdb4   : > { %v3214_v14 = vrot.slane %v3205_v46, %v5535_v60  ;;  %v3208_v63 = vmul.f32 %v3207_v33, %v3205_v46 }
 0xdb6   : > { %v3215_v57 = vmul.f32 %v3214_v14, %v5524_v42  ;;  %v3209_v55 = vadd.f32 %v3208_v63, %v3176_v39 }
 0xdb8   : > { %v3216_v53 = vadd.f32 %v3215_v57, %v3210_v54  ;;  %v1287_v54 = vld [vmem:[%s5929_s3 + $0x1d0] sm:$0xff] }
 0xdba   : > { %v3943_v37 = vmul.f32 -1.442695, %v3216_v53  ;;  %v1290_v53 = vld [vmem:[%s5929_s3 + $0x1e8] sm:$0xff] }
 0xdbc   : > { %4507 = vpow2.f32 %v3943_v37 }
 0xdc6   : > { %v4508_v16 = vpop.eup %4507 }
 0xdc7   : > { %v3220_v32 = vadd.f32 1.0, %v4508_v16  ;;  %v1586_v37 = vpop.f32.mrb[24].mxu1 }
 0xdc8   : > { %1641 = vst.msk [vmem:[#allocation2 + $0xd0] sm:$0xff] %vm1293_vm15, %v1586_v37  ;;  %v1588_v16 = vpop.f32.mrb[25].mxu1 }
 0xdc9   : > { %4509 = vrcp.f32 %v3220_v32  ;;  %v1289_v32 = vld [vmem:[%s5929_s3 + $0x1e0] sm:$0xff] }
 0xdd3   : > { %v4510_v52 = vpop.eup %4509 }
 0xdd4   : > { %v3223_v19 = vmul.f32 2.0, %v4510_v52  ;;  %v3225_v40 = vmul.f32 %v4510_v52, %v3200_v41 }
 0xdd6   : > { %v3944_v35 = vadd.f32 -1.0, %v3223_v19  ;;  %v1291_v19 = vld [vmem:[%s5929_s3 + $0x1f0] sm:$0xff] }
 0xdd8   : > { %v3227_v18 = vrot.slane %v3944_v35, 2 }
 0xdda   : > { %v3229_v34 = vmul.f32 %v4510_v52, %v3227_v18 }
 0xddc   : > { %v3231_v58 = vrot.slane %v3229_v34, 7  ;;  %v3306_v34 = vstv %s3951_s5 }
 0xdde   : > { %v3233_v59 = vadd.f32 %v3231_v58, %v3225_v40 }
 0xde0   : > { %4511 = vtanh.f32 %v3233_v59 }
 0xdea   : > { %v4512_v36 = vpop.eup %4511 }
 0xdeb   : > { %v3236_v3 = vrot.slane %v4512_v36, 6 }
 0xded   : > { %v3238_v7 = vmul.f32 %v4510_v52, %v3236_v3  ;;  %v1292_v52 = vld [vmem:[%s5929_s3 + $0x1f8] sm:$0xff] }
 0xdef   : > { %v3247_v30 = vrot.slane %v3238_v7, %v5535_v60  ;;  %v3241_v13 = vmul.f32 %v3240_v11, %v3238_v7 }
 0xdf1   : > { %v3248_v29 = vmul.f32 %v3247_v30, %v5524_v42  ;;  %v3242_v51 = vadd.f32 %v3241_v13, %v3209_v55  ;;  %v1288_v55 = vld [vmem:[%s5929_s3 + $0x1d8] sm:$0xff] }
 0xdf2   : > { %3796 = vmatprep.mubr.msk.f32.mxu1 %vm1293_vm15, %v1288_v55 }
 0xdf3   : > { %v3249_v31 = vadd.f32 %v3248_v29, %v3243_v5  ;;  %1600 = vmatmul.mubr.f32.gmra.mrb[30].mxu1 %v1287_v54 }
 0xdf4   : > { %3797 = vmatprep.mubr.msk.f32.mxu1 %vm1293_vm15, %v1290_v53 }
 0xdf5   : > { %v3946_v20 = vmul.f32 -1.442695, %v3249_v31 }
 0xdf7   : > { %4513 = vpow2.f32 %v3946_v20  ;;  %1605 = vmatmul.mubr.f32.gmra.mrb[32].mxu1 %v1289_v32 }
 0xdf8   : > { %3798 = vmatprep.mubr.msk.f32.mxu1 %vm1293_vm15, %v1292_v52 }
 0xdfb   : > { %1610 = vmatmul.mubr.f32.gmra.mrb[34].mxu1 %v1291_v19 }
 0xe01   : > { %v4514_v56 = vpop.eup %4513 }
 0xe02   : > { %v3253_v6 = vadd.f32 1.0, %v4514_v56  ;;  %v3339_v56 = vstv %s3954_s8  ;;  %s3645_s8 = scalar_lea.sflag [#allocation6], %s168_s19 }
 0xe04   : > { %4515 = vrcp.f32 %v3253_v6 }
 0xe0e   : > { %v4516_v44 = vpop.eup %4515 }
 0xe0f   : > { %v3256_v62 = vmul.f32 2.0, %v4516_v44  ;;  %v3258_v9 = vmul.f32 %v4516_v44, %v3233_v59 }
 0xe11   : > { %v3947_v61 = vadd.f32 -1.0, %v3256_v62 }
 0xe13   : > { %v3260_v43 = vrot.slane %v3947_v61, 2 }
 0xe15   : > { %v3262_v21 = vmul.f32 %v4516_v44, %v3260_v43 }
 0xe17   : > { %v3264_v38 = vrot.slane %v3262_v21, 7  ;;  %v3342_v21 = vld [vmem:[#allocation2 + $0xcc] sm:$0xf] }
 0xe19   : > { %v3266_v39 = vadd.f32 %v3264_v38, %v3258_v9 }
 0xe1b   : > { %4517 = vtanh.f32 %v3266_v39 }
 0xe25   : > { %v4518_v2 = vpop.eup %4517 }
 0xe26   : > { %v3269_v8 = vrot.slane %v4518_v2, 6 }
 0xe28   : > { %v3271_v17 = vmul.f32 %v4516_v44, %v3269_v8 }
 0xe2a   : > { %v3280_v0 = vrot.slane %v3271_v17, %v5535_v60  ;;  %v3274_v1 = vmul.f32 %v3273_v15, %v3271_v17 }
 0xe2c   : > { %v3281_v47 = vmul.f32 %v3280_v0, %v5524_v42  ;;  %v3275_v28 = vadd.f32 %v3274_v1, %v3242_v51 }
 0xe2e   : > { %v3282_v22 = vadd.f32 %v3281_v47, %v3276_v48 }
 0xe30   : > { %v3949_v50 = vmul.f32 -1.442695, %v3282_v22 }
 0xe32   : > { %4519 = vpow2.f32 %v3949_v50 }
 0xe3c   : > { %v4520_v23 = vpop.eup %4519 }
 0xe3d   : > { %v3286_v45 = vadd.f32 1.0, %v4520_v23  ;;  %v1591_v22 = vpop.f32.mrb[26].mxu1 }
 0xe3e   : > { %1642 = vst.msk [vmem:[#allocation2 + $0xd8] sm:$0xff] %vm1293_vm15, %v1591_v22  ;;  %v1593_v50 = vpop.f32.mrb[27].mxu1 }
 0xe3f   : > { %4521 = vrcp.f32 %v3286_v45 }
 0xe49   : > { %v4522_v41 = vpop.eup %4521 }
 0xe4a   : > { %v3289_v49 = vmul.f32 2.0, %v4522_v41  ;;  %v3291_v14 = vmul.f32 %v4522_v41, %v3266_v39 }
 0xe4c   : > { %v3950_v12 = vadd.f32 -1.0, %v3289_v49 }
 0xe4e   : > { %v3293_v33 = vrot.slane %v3950_v12, 2  ;;  %v3372_v12 = vstv %s3957_s9  ;;  %s4597_s9 = scalar_lea.vmem %s5886_s27, 16 }
 0xe4f   : > { %p4598_p2 = scmp.ne.s32.totalorder %s5886_s27, %s4597_s9 }
 0xe50   : > { %v3295_v46 = vmul.f32 %v4522_v41, %v3293_v33 }
 0xe51   : > { %p4599_p3 = pnand %p4598_p2, %p4741_p10 }
 0xe52   : > { %v3297_v63 = vrot.slane %v3295_v46, 7 }
 0xe53   : > { %p4600_p4 = pneg %p4599_p3 }
 0xe54   : > { %v3299_v57 = vadd.f32 %v3297_v63, %v3291_v14  ;;  %v3375_v63 = vld [vmem:[#allocation2 + $0xd0] sm:$0xf] }
 0xe56   : > { %4523 = vtanh.f32 %v3299_v57 }
 0xe60   : > { %v4524_v35 = vpop.eup %4523 }
 0xe61   : > { %v3302_v18 = vrot.slane %v4524_v35, 6 }
 0xe63   : > { %v3304_v40 = vmul.f32 %v4522_v41, %v3302_v18 }
 0xe65   : > { %v3313_v58 = vrot.slane %v3304_v40, %v5535_v60  ;;  %v3307_v59 = vmul.f32 %v3306_v34, %v3304_v40 }
 0xe67   : > { %v3314_v4 = vmul.f32 %v3313_v58, %v5524_v42  ;;  %v3308_v36 = vadd.f32 %v3307_v59, %v3275_v28 }
 0xe69   : > { %v3315_v3 = vadd.f32 %v3314_v4, %v3309_v10  ;;  %v3405_v4 = vstv %s3960_s10  ;;  %s4601_s10 = sshll.u32 %s4674_s23, 4  ;;  %s4602_s10 = int_to_ptr.vmem [resolvable:$false] %s4601_s10 }
 0xe6a   : > { %p4604_p5 = scmp.lt.s32.totalorder %s5886_s27, %s4602_s10 }
 0xe6b   : > { %v3952_v11 = vmul.f32 -1.442695, %v3315_v3 }
 0xe6d   : > { %4525 = vpow2.f32 %v3952_v11 }
 0xe6e   : > { %v1596_v23 = vpop.f32.mrb[28].mxu1 }
 0xe6f   : > { %1643 = vst.msk [vmem:[#allocation2 + $0xe0] sm:$0xff] %vm1293_vm15, %v1596_v23  ;;  %v1598_v45 = vpop.f32.mrb[29].mxu1 }
 0xe77   : > { %v4526_v7 = vpop.eup %4525 }
 0xe78   : > { %v3319_v30 = vadd.f32 1.0, %v4526_v7 }
 0xe7a   : > { %4527 = vrcp.f32 %v3319_v30 }
 0xe84   : > { %v4528_v13 = vpop.eup %4527 }
 0xe85   : > { %v3322_v5 = vmul.f32 2.0, %v4528_v13  ;;  %v3324_v20 = vmul.f32 %v4528_v13, %v3299_v57 }
 0xe87   : > { %v3953_v29 = vadd.f32 -1.0, %v3322_v5 }
 0xe89   : > { %v3326_v51 = vrot.slane %v3953_v29, 2 }
 0xe8b   : > { %v3328_v31 = vmul.f32 %v4528_v13, %v3326_v51 }
 0xe8d   : > { %v3330_v25 = vrot.slane %v3328_v31, 7 }
 0xe8f   : > { %v3332_v26 = vadd.f32 %v3330_v25, %v3324_v20 }
 0xe91   : > { %4529 = vtanh.f32 %v3332_v26 }
 0xe9b   : > { %v4530_v24 = vpop.eup %4529 }
 0xe9c   : > { %v3335_v27 = vrot.slane %v4530_v24, 6 }
 0xe9e   : > { %v3337_v6 = vmul.f32 %v4528_v13, %v3335_v27  ;;  %v3408_v13 = vld [vmem:[#allocation2 + $0xd4] sm:$0xf] }
 0xea0   : > { %v3340_v44 = vmul.f32 %v3339_v56, %v3337_v6  ;;  %v3346_v62 = vrot.slane %v3337_v6, %v5535_v60 }
 0xea2   : > { %v3341_v61 = vadd.f32 %v3340_v44, %v3308_v36  ;;  %v3347_v43 = vmul.f32 %v3346_v62, %v5524_v42 }
 0xea4   : > { %v3348_v9 = vadd.f32 %v3347_v43, %v3342_v21 }
 0xea6   : > { %v3955_v38 = vmul.f32 -1.442695, %v3348_v9 }
 0xea8   : > { %4531 = vpow2.f32 %v3955_v38 }
 0xeb2   : > { %v4532_v39 = vpop.eup %4531 }
 0xeb3   : > { %v3352_v2 = vadd.f32 1.0, %v4532_v39 }
 0xeb5   : > { %4533 = vrcp.f32 %v3352_v2 }
 0xebf   : > { %v4534_v8 = vpop.eup %4533 }
 0xec0   : > { %v3355_v15 = vmul.f32 2.0, %v4534_v8  ;;  %v3357_v47 = vmul.f32 %v4534_v8, %v3332_v26 }
 0xec2   : > { %v3956_v17 = vadd.f32 -1.0, %v3355_v15 }
 0xec4   : > { %v3359_v0 = vrot.slane %v3956_v17, 2 }
 0xec6   : > { %v3361_v1 = vmul.f32 %v4534_v8, %v3359_v0  ;;  %v1601_v31 = vpop.f32.mrb[30].mxu1 }
 0xec7   : > { %1644 = vst.msk [vmem:[#allocation2 + $0xe8] sm:$0xff] %vm1293_vm15, %v1601_v31  ;;  %v1603_v25 = vpop.f32.mrb[31].mxu1  ;;  %vm3642_vm15 = vcmask 60419  }
 0xec8   : > { %v3363_v28 = vrot.slane %v3361_v1, 7  ;;  %v3441_v1 = vld [vmem:[#allocation2 + $0xd8] sm:$0xf] }
 0xeca   : > { %v3365_v48 = vadd.f32 %v3363_v28, %v3357_v47  ;;  %v1606_v26 = vpop.f32.mrb[32].mxu1 }
 0xecb   : > { %v1608_v24 = vpop.f32.mrb[33].mxu1 }
 0xecc   : > { %4535 = vtanh.f32 %v3365_v48 }
 0xece   : > { %v1611_v27 = vpop.f32.mrb[34].mxu1 }
 0xecf   : > { %v1613_v56 = vpop.f32.mrb[35].mxu1 }
 0xed6   : > { %v4536_v41 = vpop.eup %4535 }
 0xed7   : > { %v3368_v49 = vrot.slane %v4536_v41, 6 }
 0xed9   : > { %v3370_v33 = vmul.f32 %v4534_v8, %v3368_v49  ;;  %v3438_v8 = vstv %s3963_s11  ;;  %s4603_s11 = scalar_lea.vmem %s4602_s10, 32 }
 0xeda   : > { %p4605_p6 = scmp.lt.s32.totalorder %s4603_s11, %s4597_s9 }
 0xedb   : > { %v3373_v46 = vmul.f32 %v3372_v12, %v3370_v33  ;;  %v3379_v14 = vrot.slane %v3370_v33, %v5535_v60 }
 0xedc   : > { %p4606_p7 = por %p4605_p6, %p4604_p5 }
 0xedd   : > { %v3374_v57 = vadd.f32 %v3373_v46, %v3341_v61  ;;  %v3380_v55 = vmul.f32 %v3379_v14, %v5524_v42 }
 0xede   : > { %p4607_p8 = pnand %p4606_p7, %p4600_p4 }
 0xedf   : > { %v3381_v54 = vadd.f32 %v3380_v55, %v3375_v63 }
 0xee1   : > { %v3958_v53 = vmul.f32 -1.442695, %v3381_v54  ;;  %v3471_v54 = vstv %s3966_s12 }
 0xee3   : > { %4537 = vpow2.f32 %v3958_v53 }
 0xeed   : > { %v4538_v37 = vpop.eup %4537 }
 0xeee   : > { %v3385_v16 = vadd.f32 1.0, %v4538_v37 }
 0xef0   : > { %4539 = vrcp.f32 %v3385_v16 }
 0xefa   : > { %v4540_v32 = vpop.eup %4539 }
 0xefb   : > { %v3388_v52 = vmul.f32 2.0, %v4540_v32  ;;  %v3390_v34 = vmul.f32 %v4540_v32, %v3365_v48 }
 0xefd   : > { %v3959_v19 = vadd.f32 -1.0, %v3388_v52 }
 0xeff   : > { %v3392_v35 = vrot.slane %v3959_v19, 2  ;;  %v3474_v19 = vld [vmem:[#allocation2 + $0xdc] sm:$0xf] }
 0xf01   : > { %v3394_v18 = vmul.f32 %v4540_v32, %v3392_v35 }
 0xf03   : > { %v3396_v40 = vrot.slane %v3394_v18, 7 }
 0xf05   : > { %v3398_v58 = vadd.f32 %v3396_v40, %v3390_v34 }
 0xf07   : > { %4541 = vtanh.f32 %v3398_v58 }
 0xf11   : > { %v4542_v59 = vpop.eup %4541 }
 0xf12   : > { %v3401_v10 = vrot.slane %v4542_v59, 6 }
 0xf14   : > { %v3403_v36 = vmul.f32 %v4540_v32, %v3401_v10 }
 0xf16   : > { %v3406_v3 = vmul.f32 %v3405_v4, %v3403_v36  ;;  %v3412_v11 = vrot.slane %v3403_v36, %v5535_v60 }
 0xf18   : > { %v3407_v7 = vadd.f32 %v3406_v3, %v3374_v57  ;;  %v3413_v30 = vmul.f32 %v3412_v11, %v5524_v42 }
 0xf1a   : > { %v3414_v5 = vadd.f32 %v3413_v30, %v3408_v13 }
 0xf1c   : > { %v3961_v29 = vmul.f32 -1.442695, %v3414_v5  ;;  %v3504_v5 = vstv %s3969_s13 }
 0xf1e   : > { %4543 = vpow2.f32 %v3961_v29 }
 0xf28   : > { %v4544_v51 = vpop.eup %4543 }
 0xf29   : > { %v3418_v20 = vadd.f32 1.0, %v4544_v51 }
 0xf2b   : > { %4545 = vrcp.f32 %v3418_v20  ;;  %v3507_v20 = vld [vmem:[#allocation2 + $0xe0] sm:$0xf] }
 0xf35   : > { %v4546_v6 = vpop.eup %4545 }
 0xf36   : > { %v3421_v44 = vmul.f32 2.0, %v4546_v6  ;;  %v3423_v21 = vmul.f32 %v4546_v6, %v3398_v58 }
 0xf38   : > { %v3962_v62 = vadd.f32 -1.0, %v3421_v44 }
 0xf3a   : > { %v3425_v61 = vrot.slane %v3962_v62, 2 }
 0xf3c   : > { %v3427_v43 = vmul.f32 %v4546_v6, %v3425_v61 }
 0xf3e   : > { %v3429_v9 = vrot.slane %v3427_v43, 7 }
 0xf40   : > { %v3431_v38 = vadd.f32 %v3429_v9, %v3423_v21 }
 0xf42   : > { %4547 = vtanh.f32 %v3431_v38 }
 0xf4c   : > { %v4548_v39 = vpop.eup %4547 }
 0xf4d   : > { %v3434_v2 = vrot.slane %v4548_v39, 6 }
 0xf4f   : > { %v3436_v15 = vmul.f32 %v4546_v6, %v3434_v2 }
 0xf51   : > { %v3439_v17 = vmul.f32 %v3438_v8, %v3436_v15  ;;  %v3445_v0 = vrot.slane %v3436_v15, %v5535_v60  ;;  %v3537_v15 = vstv %s3972_s14 }
 0xf53   : > { %v3440_v47 = vadd.f32 %v3439_v17, %v3407_v7  ;;  %v3446_v28 = vmul.f32 %v3445_v0, %v5524_v42 }
 0xf55   : > { %v3447_v48 = vadd.f32 %v3446_v28, %v3441_v1 }
 0xf57   : > { %v3964_v22 = vmul.f32 -1.442695, %v3447_v48  ;;  %v3540_v48 = vld [vmem:[#allocation2 + $0xe4] sm:$0xf] }
 0xf59   : > { %4549 = vpow2.f32 %v3964_v22 }
 0xf63   : > { %v4550_v50 = vpop.eup %4549 }
 0xf64   : > { %v3451_v23 = vadd.f32 1.0, %v4550_v50 }
 0xf66   : > { %4551 = vrcp.f32 %v3451_v23 }
 0xf70   : > { %v4552_v45 = vpop.eup %4551 }
 0xf71   : > { %v3454_v41 = vmul.f32 2.0, %v4552_v45  ;;  %v3456_v46 = vmul.f32 %v4552_v45, %v3431_v38 }
 0xf73   : > { %v3965_v49 = vadd.f32 -1.0, %v3454_v41 }
 0xf75   : > { %v3458_v12 = vrot.slane %v3965_v49, 2 }
 0xf77   : > { %v3460_v33 = vmul.f32 %v4552_v45, %v3458_v12 }
 0xf79   : > { %v3462_v14 = vrot.slane %v3460_v33, 7 }
 0xf7b   : > { %v3464_v63 = vadd.f32 %v3462_v14, %v3456_v46 }
 0xf7d   : > { %4553 = vtanh.f32 %v3464_v63 }
 0xf87   : > { %v4554_v57 = vpop.eup %4553 }
 0xf88   : > { %v3467_v55 = vrot.slane %v4554_v57, 6 }
 0xf8a   : > { %v3469_v53 = vmul.f32 %v4552_v45, %v3467_v55 }
 0xf8c   : > { %v3472_v37 = vmul.f32 %v3471_v54, %v3469_v53  ;;  %v3478_v16 = vrot.slane %v3469_v53, %v5535_v60  ;;  %v3570_v53 = vstv %s3975_s15 }
 0xf8e   : > { %v3473_v32 = vadd.f32 %v3472_v37, %v3440_v47  ;;  %v3479_v52 = vmul.f32 %v3478_v16, %v5524_v42 }
 0xf90   : > { %v3480_v35 = vadd.f32 %v3479_v52, %v3474_v19  ;;  %v3573_v52 = vld [vmem:[#allocation2 + $0xe8] sm:$0xf] }
 0xf92   : > { %v3967_v18 = vmul.f32 -1.442695, %v3480_v35 }
 0xf94   : > { %4555 = vpow2.f32 %v3967_v18 }
 0xf9e   : > { %v4556_v34 = vpop.eup %4555 }
 0xf9f   : > { %v3484_v40 = vadd.f32 1.0, %v4556_v34 }
 0xfa1   : > { %4557 = vrcp.f32 %v3484_v40 }
 0xfab   : > { %v4558_v58 = vpop.eup %4557 }
 0xfac   : > { %v3487_v59 = vmul.f32 2.0, %v4558_v58  ;;  %v3489_v3 = vmul.f32 %v4558_v58, %v3464_v63 }
 0xfae   : > { %v3968_v10 = vadd.f32 -1.0, %v3487_v59 }
 0xfb0   : > { %v3491_v4 = vrot.slane %v3968_v10, 2 }
 0xfb2   : > { %v3493_v36 = vmul.f32 %v4558_v58, %v3491_v4 }
 0xfb4   : > { %v3495_v11 = vrot.slane %v3493_v36, 7 }
 0xfb6   : > { %v3497_v7 = vadd.f32 %v3495_v11, %v3489_v3 }
 0xfb8   : > { %4559 = vtanh.f32 %v3497_v7 }
 0xfc2   : > { %v4560_v30 = vpop.eup %4559 }
 0xfc3   : > { %v3500_v13 = vrot.slane %v4560_v30, 6 }
 0xfc5   : > { %v3502_v29 = vmul.f32 %v4558_v58, %v3500_v13 }
 0xfc7   : > { %v3505_v51 = vmul.f32 %v3504_v5, %v3502_v29  ;;  %v3511_v31 = vrot.slane %v3502_v29, %v5535_v60 }
 0xfc9   : > { %v3506_v25 = vadd.f32 %v3505_v51, %v3473_v32  ;;  %v3512_v26 = vmul.f32 %v3511_v31, %v5524_v42 }
 0xfcb   : > { %v3513_v24 = vadd.f32 %v3512_v26, %v3507_v20  ;;  %v3606_v20 = vld [vmem:[#allocation2 + $0xec] sm:$0xf] }
 0xfcd   : > { %v3970_v27 = vmul.f32 -1.442695, %v3513_v24 }
 0xfcf   : > { %4561 = vpow2.f32 %v3970_v27 }
 0xfd9   : > { %v4562_v56 = vpop.eup %4561 }
 0xfda   : > { %v3517_v6 = vadd.f32 1.0, %v4562_v56 }
 0xfdc   : > { %4563 = vrcp.f32 %v3517_v6 }
 0xfe6   : > { %v4564_v44 = vpop.eup %4563 }
 0xfe7   : > { %v3520_v62 = vmul.f32 2.0, %v4564_v44  ;;  %v3522_v9 = vmul.f32 %v4564_v44, %v3497_v7 }
 0xfe9   : > { %v3971_v61 = vadd.f32 -1.0, %v3520_v62 }
 0xfeb   : > { %v3524_v43 = vrot.slane %v3971_v61, 2 }
 0xfed   : > { %v3526_v21 = vmul.f32 %v4564_v44, %v3524_v43 }
 0xfef   : > { %v3528_v38 = vrot.slane %v3526_v21, 7 }
 0xff1   : > { %v3530_v39 = vadd.f32 %v3528_v38, %v3522_v9 }
 0xff3   : > { %4565 = vtanh.f32 %v3530_v39 }
 0xffd   : > { %v4566_v2 = vpop.eup %4565 }
 0xffe   : > { %v3533_v8 = vrot.slane %v4566_v2, 6  ;;  %v3636_v2 = vstv %s3981_s17 }
0x1000   : > { %v3535_v17 = vmul.f32 %v4564_v44, %v3533_v8 }
0x1002   : > { %v3538_v0 = vmul.f32 %v3537_v15, %v3535_v17  ;;  %v3544_v1 = vrot.slane %v3535_v17, %v5535_v60 }
0x1004   : > { %v3539_v47 = vadd.f32 %v3538_v0, %v3506_v25  ;;  %v3545_v28 = vmul.f32 %v3544_v1, %v5524_v42  ;;  %v3640_v0 = vstv %s3982_s18 }
0x1006   : > { %v3546_v22 = vadd.f32 %v3545_v28, %v3540_v48 }
0x1008   : > { %v3973_v50 = vmul.f32 -1.442695, %v3546_v22 }
0x100a   : > { %4567 = vpow2.f32 %v3973_v50 }
0x1014   : > { %v4568_v23 = vpop.eup %4567 }
0x1015   : > { %v3550_v45 = vadd.f32 1.0, %v4568_v23 }
0x1017   : > { %4569 = vrcp.f32 %v3550_v45 }
0x1021   : > { %v4570_v41 = vpop.eup %4569 }
0x1022   : > { %v3553_v49 = vmul.f32 2.0, %v4570_v41  ;;  %v3555_v14 = vmul.f32 %v4570_v41, %v3530_v39 }
0x1024   : > { %v3974_v12 = vadd.f32 -1.0, %v3553_v49 }
0x1026   : > { %v3557_v33 = vrot.slane %v3974_v12, 2 }
0x1028   : > { %v3559_v46 = vmul.f32 %v4570_v41, %v3557_v33 }
0x102a   : > { %v3561_v63 = vrot.slane %v3559_v46, 7 }
0x102c   : > { %v3563_v57 = vadd.f32 %v3561_v63, %v3555_v14 }
0x102e   : > { %4571 = vtanh.f32 %v3563_v57 }
0x1038   : > { %v4572_v55 = vpop.eup %4571 }
0x1039   : > { %v3566_v54 = vrot.slane %v4572_v55, 6 }
0x103b   : > { %v3568_v37 = vmul.f32 %v4570_v41, %v3566_v54 }
0x103d   : > { %v3571_v16 = vmul.f32 %v3570_v53, %v3568_v37  ;;  %v3577_v32 = vrot.slane %v3568_v37, %v5535_v60 }
0x103f   : > { %v3572_v19 = vadd.f32 %v3571_v16, %v3539_v47  ;;  %v3578_v35 = vmul.f32 %v3577_v32, %v5524_v42 }
0x1041   : > { %v3579_v18 = vadd.f32 %v3578_v35, %v3573_v52 }
0x1043   : > { %v3976_v34 = vmul.f32 -1.442695, %v3579_v18 }
0x1045   : > { %4573 = vpow2.f32 %v3976_v34 }
0x104f   : > { %v4574_v40 = vpop.eup %4573 }
0x1050   : > { %v3583_v58 = vadd.f32 1.0, %v4574_v40 }
0x1052   : > { %4575 = vrcp.f32 %v3583_v58 }
0x105c   : > { %v4576_v59 = vpop.eup %4575 }
0x105d   : > { %v3586_v10 = vmul.f32 2.0, %v4576_v59  ;;  %v3588_v11 = vmul.f32 %v4576_v59, %v3563_v57 }
0x105f   : > { %v3977_v4 = vadd.f32 -1.0, %v3586_v10 }
0x1061   : > { %v3590_v36 = vrot.slane %v3977_v4, 2 }
0x1063   : > { %v3592_v3 = vmul.f32 %v4576_v59, %v3590_v36 }
0x1065   : > { %v3594_v7 = vrot.slane %v3592_v3, 7 }
0x1067   : > { %v3596_v30 = vadd.f32 %v3594_v7, %v3588_v11 }
0x1069   : > { %4577 = vtanh.f32 %v3596_v30 }
0x1073   : > { %v4578_v13 = vpop.eup %4577 }
0x1074   : > { %v3599_v5 = vrot.slane %v4578_v13, 6 }
0x1076   : > { %v3601_v29 = vmul.f32 %v4576_v59, %v3599_v5 }
0x1078   : > { %v3610_v51 = vrot.slane %v3601_v29, %v5535_v60 }
0x107a   : > { %v3611_v31 = vmul.f32 %v3610_v51, %v5524_v42  ;;  %v3603_v42 = vstv %s3978_s16 }
0x107b   : > { %v3604_v38 = vmul.f32 %v3603_v42, %v3601_v29 }
0x107c   : > { %v3612_v25 = vadd.f32 %v3611_v31, %v3606_v20 }
0x107d   : > { %v3605_v15 = vadd.f32 %v3604_v38, %v3572_v19 }
0x107e   : > { %v3979_v26 = vmul.f32 -1.442695, %v3612_v25 }
0x1080   : > { %4579 = vpow2.f32 %v3979_v26 }
0x108a   : > { %v4580_v24 = vpop.eup %4579 }
0x108b   : > { %v3616_v27 = vadd.f32 1.0, %v4580_v24 }
0x108d   : > { %4581 = vrcp.f32 %v3616_v27 }
0x1097   : > { %v4582_v56 = vpop.eup %4581 }
0x1098   : > { %v3619_v6 = vmul.f32 2.0, %v4582_v56  ;;  %v3621_v43 = vmul.f32 %v4582_v56, %v3596_v30 }
0x109a   : > { %v3980_v44 = vadd.f32 -1.0, %v3619_v6 }
0x109c   : > { %v3623_v62 = vrot.slane %v3980_v44, 2 }
0x109e   : > { %v3625_v61 = vmul.f32 %v4582_v56, %v3623_v62 }
0x10a0   : > { %v3627_v21 = vrot.slane %v3625_v61, 7 }
0x10a2   : > { %v3629_v9 = vadd.f32 %v3627_v21, %v3621_v43 }
0x10a4   : > { %4583 = vtanh.f32 %v3629_v9 }
0x10ae   : > { %v4584_v60 = vpop.eup %4583 }
0x10af   : > { %v3632_v39 = vrot.slane %v4584_v60, 6 }
0x10b1   : > { %v3634_v8 = vmul.f32 %v4582_v56, %v3632_v39 }
0x10b3   : > { %v3637_v17 = vmul.f32 %v3636_v2, %v3634_v8 }
0x10b5   : > { %v3638_v1 = vadd.f32 %v3637_v17, %v3605_v15 }
0x10b7   : > { %v3641_v47 = vadd.f32 %v3640_v0, %v3638_v1 }
0x10b9   : > { %3643 = vst.msk [vmem:[%s169_s26 - $0x3] sm:$0x8] %vm3642_vm15, %v3641_v47 }
0x10ba   : > { %4610 = shalt.err (!%p4607_p8)
}
0x10bb   : > { %s4611_s12 = scalar_lea.hbm %s5884_s7, 16  ;;  %s4615_s15 = scalar_lea.hbm %s5930_s4, 64 }
0x10bc   : > { %p4612_p9 = scmp.ne.s32.totalorder %s5884_s7, %s4611_s12  ;;  %p4616_p0 = scmp.lt.u32.totalorder %s5884_s7, %s5930_s4 }
0x10bd   : > { %p4617_p1 = scmp.lt.u32.totalorder %s4615_s15, %s4611_s12  ;;  %p4619_p3 = scmp.lt.u32.totalorder %s4611_s12, %s5884_s7 }
0x10be   : > { %p4613_p12 = pnand %p4612_p9, %p4741_p10 }
0x10bf   : > { %p4618_p2 = por %p4617_p1, %p4616_p0 }
0x10c0   : > { %p4614_p13 = pneg %p4613_p12 }
0x10c1   : > { %p4620_p4 = por %p4619_p3, %p4618_p2 }
0x10c3   : > { %p4621_p5 = pnand %p4620_p4, %p4614_p13 }
0x10c5   : > { %4624 = shalt.err (!%p4621_p5)
}
0x10c6   : > { %4143 = dma.vmem_to_hbm [thread:$0]  (%p4741_p10), %s5886_s27, 16, %s5884_s7, %s3645_s8  }
0x10c7 PF: > { %p4149_p6 = scmp.ge.s32.totalorder %s4661_s22, 2  ;;  %s3669_s18 = sand.u32 1, %s4649_s20  }
0x10c8   : > { %s3670_s19 = scalar_lea.sflag [#allocation6], %s3669_s18 }
0x10c9   : > { %p4146_p7 = pnand %p4149_p6, %p4745_p11 }
0x10cb   : > { %4644 = dma.done.wait (!%p4146_p7), %s3670_s19, 16  }
0x10cc   : > { %4646 = vsyncadd (!%p4146_p7), %s3670_s19, 4294967280  ;;  %p20_p8 = scmp.ge.s32.totalorder %s4728_s25, 6   ;;  %s5947_s20 = smov %s4653_s21 }
0x10cd   : > { %s5948_s21 = smov %s4657_s0  ;;  %s5949_s0 = smov %s4739_s28 }
0x10ce   : > { %s5950_s22 = smov %s4728_s25  ;;  %22 = sbr.rel (!%p20_p8) target bundleno = 18 (0x12), region = 67 }
0x10d5   :  { %3674 = vsyncpa [#allocation6], 1 }
0x10d6   :  { %3676 = vsyncpa [#allocation6 + $0x1], 1 }

</bundles_post_ra>
